<compile_context>
chip_gen: v7x
topology: tpu7x:2x2x1
jax: 0.10.0
libtpu: 0.0.40
codegen_flags: <defaults>
</compile_context>

<pallas_src>
import functools

import jax
import jax.numpy as jnp
from jax.experimental import pallas as pl
from jax.experimental.pallas import tpu as pltpu


def _linear_kernel(x_ref, w_ref, b_ref, o_ref, *, apply_relu):
    """One (tm, tn) output tile: single full-K matmul + bias (+ ReLU)."""
    acc = jnp.dot(x_ref[...], w_ref[...], preferred_element_type=jnp.float32)
    out = acc + b_ref[...]  # f32 bias broadcast over rows
    if apply_relu:
        out = jnp.maximum(out, 0.0)
    o_ref[...] = out.astype(o_ref.dtype)


def pallas_linear(x, w_t, b, *, apply_relu, out_dtype, tn=512):
    """y = relu?(x @ w_t + b);  x: (M, K) bf16, w_t: (K, N) bf16, b: (N,) f32.

    No dtype conversions happen here: callers must pass bf16 x / w_t so the
    kernel reads exactly the bytes it needs from HBM (bandwidth-bound path).
    Accumulation is f32 on the MXU; output dtype is `out_dtype`.
    """
    M, K = x.shape
    K2, N = w_t.shape
    assert K == K2
    assert x.dtype == jnp.bfloat16 and w_t.dtype == jnp.bfloat16

    tm = M                  # small batch: whole batch is one tile
    # tn=512 keeps >=2 blocks on the parallel N axis (v7x megacore for fc2,
    # N=1024) and ~8.2 MiB live VMEM (under v5e's 16 MiB scoped default).
    # Don't raise it without also raising vmem_limit_bytes (v5e) and keeping
    # fc2 at >=2 N blocks (v7x).
    tn = min(tn, N)

    b2d = b.reshape(1, N).astype(jnp.float32)

    grid = (pl.cdiv(M, tm), pl.cdiv(N, tn))
    kernel = functools.partial(_linear_kernel, apply_relu=apply_relu)

    return pl.pallas_call(
        kernel,
        out_shape=jax.ShapeDtypeStruct((M, N), out_dtype),
        grid_spec=pltpu.PrefetchScalarGridSpec(
            num_scalar_prefetch=0,
            grid=grid,
            in_specs=[
                pl.BlockSpec((tm, K), lambda i, j: (i, 0)),   # x, full K
                pl.BlockSpec((K, tn), lambda i, j: (0, j)),   # w_t, full K
                pl.BlockSpec((1, tn), lambda i, j: (0, j)),   # bias tile
            ],
            out_specs=pl.BlockSpec((tm, tn), lambda i, j: (i, j)),
        ),
        compiler_params=pltpu.CompilerParams(
            dimension_semantics=("parallel", "parallel"),
        ),
    )(x, w_t, b2d)


def simple_net_forward(x, params):
    """Reproduces SimpleNet.forward: fc1 -> ReLU -> fc2.

    `params` must already hold bf16 weights (see prepare_params); only the
    tiny activation cast (64 KiB) happens inside the jit.
    """
    w1_bf, b1, w2_bf, b2 = params
    x_bf = x.astype(jnp.bfloat16)
    # fc1 emits bf16 so fc2 consumes it directly (no convert kernel between).
    h = pallas_linear(x_bf, w1_bf, b1, apply_relu=True, out_dtype=jnp.bfloat16)
    y = pallas_linear(h, w2_bf, b2, apply_relu=False, out_dtype=jnp.float32)
    return y


def init_params(key):
    """Deterministic init matching PyTorch nn.Linear default (uniform +-1/sqrt(fan_in))."""
    k1, k2, k3, k4 = jax.random.split(key, 4)
    in1, out1 = 4096, 2048
    in2, out2 = 2048, 1024
    bnd1 = 1.0 / jnp.sqrt(in1)
    bnd2 = 1.0 / jnp.sqrt(in2)
    # PyTorch stores weight as (out, in); we keep the transposed (in, out) form.
    w1_t = jax.random.uniform(k1, (in1, out1), jnp.float32, -bnd1, bnd1)
    b1 = jax.random.uniform(k2, (out1,), jnp.float32, -bnd1, bnd1)
    w2_t = jax.random.uniform(k3, (in2, out2), jnp.float32, -bnd2, bnd2)
    b2 = jax.random.uniform(k4, (out2,), jnp.float32, -bnd2, bnd2)
    return (w1_t, b1, w2_t, b2)


def prepare_params(params):
    """One-time, outside-jit conversion of f32 master weights to bf16.

    Doing this once (instead of per forward) keeps steady-state HBM traffic at
    the ~20 MiB bf16-weight roofline rather than ~72 MiB with in-jit converts.
    """
    w1_t, b1, w2_t, b2 = params
    return (
        jax.device_put(w1_t.astype(jnp.bfloat16)),
        b1,
        jax.device_put(w2_t.astype(jnp.bfloat16)),
        b2,
    )


if __name__ == "__main__":
    key = jax.random.PRNGKey(0)
    kp, kx = jax.random.split(key)
    params_f32 = init_params(kp)
    params = prepare_params(params_f32)            # bf16 weights, done once
    jax.block_until_ready(params)

    batch = 8
    x = jax.random.normal(kx, (batch, 4096), jnp.float32)

    forward = jax.jit(simple_net_forward)
    y = forward(x, params)
    jax.block_until_ready(y)
    assert y.shape == (batch, 1024)
    assert y.dtype == jnp.float32

    w1_t, b1, w2_t, b2 = params_f32

    # Bit-faithful reference of what the kernel computes (bf16 weights/acts,
    # f32 accumulation, bf16 intermediate): should match tightly.
    h_ref = jnp.maximum(
        jnp.dot(x.astype(jnp.bfloat16), w1_t.astype(jnp.bfloat16),
                preferred_element_type=jnp.float32) + b1, 0.0)
    ref_bf = jnp.dot(h_ref.astype(jnp.bfloat16), w2_t.astype(jnp.bfloat16),
                     preferred_element_type=jnp.float32) + b2
    assert jnp.allclose(y, ref_bf, atol=1e-2, rtol=1e-2)

    # Pure f32 reference (original PyTorch module semantics): loose tolerance
    # since weights/activations are fed to the MXU in bf16.
    ref_f32 = jnp.maximum(x @ w1_t + b1, 0.0) @ w2_t + b2
    assert jnp.allclose(y, ref_f32, atol=5e-2, rtol=5e-2)

    print("KERNEL_OK")
</pallas_src>

<mosaic_0001>
module attributes {stable_mosaic.version = 11 : i64} {
  func.func @_linear_kernel(%arg0: i32, %arg1: i32, %arg2: memref<8x4096xbf16, #tpu.memory_space<vmem>>, %arg3: memref<4096x512xbf16, #tpu.memory_space<vmem>>, %arg4: memref<1x512xf32, #tpu.memory_space<vmem>>, %arg5: memref<8x512xbf16, #tpu.memory_space<vmem>>) attributes {dimension_semantics = [#tpu.dimension_semantics<parallel>, #tpu.dimension_semantics<parallel>], iteration_bounds = array<i64: 1, 4>, scalar_prefetch = 0 : i64, scratch_operands = 0 : i64, tpu.core_type = #tpu.core_type<tc>, window_params = [{transform_indices = @transform_0, window_bounds = array<i64: 8, 4096>}, {transform_indices = @transform_1, window_bounds = array<i64: 4096, 512>}, {transform_indices = @transform_2, window_bounds = array<i64: 1, 512>}, {transform_indices = @transform_3, window_bounds = array<i64: 8, 512>}]} {
    %c0 = arith.constant 0 : index
    %c0_0 = arith.constant 0 : index
    %0 = vector.load %arg2[%c0, %c0_0] : memref<8x4096xbf16, #tpu.memory_space<vmem>>, vector<8x4096xbf16>
    %c0_1 = arith.constant 0 : index
    %c0_2 = arith.constant 0 : index
    %1 = vector.load %arg3[%c0_1, %c0_2] : memref<4096x512xbf16, #tpu.memory_space<vmem>>, vector<4096x512xbf16>
    %cst = arith.constant dense<0.000000e+00> : vector<8x512xf32>
    %2 = tpu.matmul %0, %1, %cst {dimension_numbers = #tpu.dot_dimension_numbers<[1], [0], [0], [1], [0, 0, 1, 1], [], []>} : vector<8x4096xbf16>, vector<4096x512xbf16>, vector<8x512xf32> -> vector<8x512xf32>
    %c0_3 = arith.constant 0 : index
    %c0_4 = arith.constant 0 : index
    %3 = vector.load %arg4[%c0_3, %c0_4] : memref<1x512xf32, #tpu.memory_space<vmem>>, vector<1x512xf32>
    %4 = vector.broadcast %3 : vector<1x512xf32> to vector<8x512xf32>
    %5 = arith.addf %2, %4 : vector<8x512xf32>
    %cst_5 = arith.constant 0.000000e+00 : f32
    %6 = vector.broadcast %cst_5 : f32 to vector<8x512xf32>
    %7 = arith.maximumf %5, %6 : vector<8x512xf32>
    %8 = arith.truncf %7 : vector<8x512xf32> to vector<8x512xbf16>
    %c0_6 = arith.constant 0 : index
    %c0_7 = arith.constant 0 : index
    %9 = vector.load %arg5[%c0_6, %c0_7] : memref<8x512xbf16, #tpu.memory_space<vmem>>, vector<8x512xbf16>
    tpu.vector_store %arg5[%c0_6, %c0_7], %8 {strides = array<i32>} : memref<8x512xbf16, #tpu.memory_space<vmem>>, vector<8x512xbf16>,
    return
  }
  func.func @transform_0(%arg0: i32, %arg1: i32) -> (i32, i32) {
    %c0_i32 = arith.constant 0 : i32
    %c0_i32_0 = arith.constant 0 : i32
    return %arg0, %c0_i32 : i32, i32
  }
  func.func @transform_1(%arg0: i32, %arg1: i32) -> (i32, i32) {
    %c0_i32 = arith.constant 0 : i32
    %c0_i32_0 = arith.constant 0 : i32
    return %c0_i32, %arg1 : i32, i32
  }
  func.func @transform_2(%arg0: i32, %arg1: i32) -> (i32, i32) {
    %c0_i32 = arith.constant 0 : i32
    %c0_i32_0 = arith.constant 0 : i32
    return %c0_i32, %arg1 : i32, i32
  }
  func.func @transform_3(%arg0: i32, %arg1: i32) -> (i32, i32) {
    %c0_i32 = arith.constant 0 : i32
    return %arg0, %arg1 : i32, i32
  }
}

module attributes {stable_mosaic.version = 11 : i64} {
  func.func @_linear_kernel(%arg0: i32, %arg1: i32, %arg2: memref<8x2048xbf16, #tpu.memory_space<vmem>>, %arg3: memref<2048x512xbf16, #tpu.memory_space<vmem>>, %arg4: memref<1x512xf32, #tpu.memory_space<vmem>>, %arg5: memref<8x512xf32, #tpu.memory_space<vmem>>) attributes {dimension_semantics = [#tpu.dimension_semantics<parallel>, #tpu.dimension_semantics<parallel>], iteration_bounds = array<i64: 1, 2>, scalar_prefetch = 0 : i64, scratch_operands = 0 : i64, tpu.core_type = #tpu.core_type<tc>, window_params = [{transform_indices = @transform_0, window_bounds = array<i64: 8, 2048>}, {transform_indices = @transform_1, window_bounds = array<i64: 2048, 512>}, {transform_indices = @transform_2, window_bounds = array<i64: 1, 512>}, {transform_indices = @transform_3, window_bounds = array<i64: 8, 512>}]} {
    %c0 = arith.constant 0 : index
    %c0_0 = arith.constant 0 : index
    %0 = vector.load %arg2[%c0, %c0_0] : memref<8x2048xbf16, #tpu.memory_space<vmem>>, vector<8x2048xbf16>
    %c0_1 = arith.constant 0 : index
    %c0_2 = arith.constant 0 : index
    %1 = vector.load %arg3[%c0_1, %c0_2] : memref<2048x512xbf16, #tpu.memory_space<vmem>>, vector<2048x512xbf16>
    %cst = arith.constant dense<0.000000e+00> : vector<8x512xf32>
    %2 = tpu.matmul %0, %1, %cst {dimension_numbers = #tpu.dot_dimension_numbers<[1], [0], [0], [1], [0, 0, 1, 1], [], []>} : vector<8x2048xbf16>, vector<2048x512xbf16>, vector<8x512xf32> -> vector<8x512xf32>
    %c0_3 = arith.constant 0 : index
    %c0_4 = arith.constant 0 : index
    %3 = vector.load %arg4[%c0_3, %c0_4] : memref<1x512xf32, #tpu.memory_space<vmem>>, vector<1x512xf32>
    %4 = vector.broadcast %3 : vector<1x512xf32> to vector<8x512xf32>
    %5 = arith.addf %2, %4 : vector<8x512xf32>
    %c0_5 = arith.constant 0 : index
    %c0_6 = arith.constant 0 : index
    %6 = vector.load %arg5[%c0_5, %c0_6] : memref<8x512xf32, #tpu.memory_space<vmem>>, vector<8x512xf32>
    tpu.vector_store %arg5[%c0_5, %c0_6], %5 {strides = array<i32>} : memref<8x512xf32, #tpu.memory_space<vmem>>, vector<8x512xf32>,
    return
  }
  func.func @transform_0(%arg0: i32, %arg1: i32) -> (i32, i32) {
    %c0_i32 = arith.constant 0 : i32
    %c0_i32_0 = arith.constant 0 : i32
    return %arg0, %c0_i32 : i32, i32
  }
  func.func @transform_1(%arg0: i32, %arg1: i32) -> (i32, i32) {
    %c0_i32 = arith.constant 0 : i32
    %c0_i32_0 = arith.constant 0 : i32
    return %c0_i32, %arg1 : i32, i32
  }
  func.func @transform_2(%arg0: i32, %arg1: i32) -> (i32, i32) {
    %c0_i32 = arith.constant 0 : i32
    %c0_i32_0 = arith.constant 0 : i32
    return %c0_i32, %arg1 : i32, i32
  }
  func.func @transform_3(%arg0: i32, %arg1: i32) -> (i32, i32) {
    %c0_i32 = arith.constant 0 : i32
    return %arg0, %arg1 : i32, i32
  }
}

</mosaic_0001>

<bundles_post_ra>
// kernel: simple_net_forward.3
= control target key start
LH: loop header
LB: loop body
LE: loop exit
PB: predicated region body
PF: predicated region fallthrough
CT: control target
= control target key end

     0   :  { %8 = vsyncpa [#allocation4], 0  ;;  %s8488_s0 = inlined_call_operand.vmem [shape: bf16[8,2048], index: 0, kind: input, shape index: {}]   ;;  %s8489_s1 = inlined_call_operand.vmem [shape: bf16[2048,1024], index: 1, kind: input, shape index: {}]   ;;  %s8490_s2 = inlined_call_operand.vmem [shape: f32[1,1024], index: 2, kind: input, shape index: {}]   ;;  %s8491_s3 = inlined_call_operand.hbm [shape: f32[8,1024], index: 3, kind: output, shape index: {}]  }
   0x1   :  { %10 = vsyncpa [#allocation4 + $0x1], 0  ;;  %s6748_s12 = smov 0   ;;  %s6750_s13 = smov 0  }
   0x2   :  { %s6752_s14 = smov 0   ;;  %s6754_s15 = smov 0  }
   0x3   :  { %s6756_s16 = smov 0   ;;  %s6758_s17 = smov 0  }
   0x4 LB: > { %s5201_s18 = sadd.s32 4294967295, %s6725_s17   ;;  %s5202_s19 = sadd.s32 4294967294, %s6725_s17   ;;  %s6725_s17 = sphi %s6758_s17, %s16_s17   ;;  %s6721_s16 = sphi %s6756_s16, %s8498_s16   ;;  %s6717_s15 = sphi %s6754_s15, %s8497_s15   ;;  %s6713_s14 = sphi %s6752_s14, %s8496_s14   ;;  %s6709_s13 = sphi %s6750_s13, %s8495_s13   ;;  %s6705_s12 = sphi %s6748_s12, %s8494_s12  }
   0x5   : > { %s25_s20 = sadd.s32 1, %s6721_s16  ;;  %s61_s21 = sadd.s32 1, %s6713_s14 }
   0x6   : > { %p26_p0 = scmp.ge.s32.totalorder %s25_s20, 2  ;;  %p68_p1 = scmp.ne.s32.totalorder %s6713_s14, %s6709_s13 }
   0x7   : > { %p69_p2 = scmp.eq.s32.totalorder %s6725_s17, 0  ;;  %p126_p3 = scmp.eq.s32.totalorder %s5201_s18, 1 }
   0x8   : > { %s8500_s20 = smov (%p26_p0, %s25_s20), 0  ;;  %p131_p6 = scmp.ne.s32.totalorder %s6709_s13, %s6705_s12 }
   0x9   : > { %p70_p4 = por %p69_p2, %p68_p1  ;;  %p6787_p5 = por %p126_p3, %p68_p1 }
   0xa   : > { %s58_s23 = ssub.s32 %s6721_s16, %s8500_s20  ;;  %p132_p8 = scmp.eq.s32.totalorder %s5202_s19, 1 }
   0xb   : > { %p59_p7 = scmp.eq.s32.totalorder %s58_s23, 0  ;;  %p5205_p10 = scmp.ge.s32.totalorder %s6725_s17, 2 }
   0xc   : > { %p6798_p9 = por %p132_p8, %p131_p6 }
   0xd   : > { %s6796_s24 = scalar_select %p59_p7, %s6713_s14, %s61_s21  }
   0xe   : > { %156 = sbr.rel (%p5205_p10) target bundleno = 281 (0x119), region = 20 }
  0x15   : > { %159 = sbr.rel (!%p70_p4) target bundleno = 281 (0x119), region = 24  ;;  %s161_s26 = sand.u32 (%p70_p4), 1, %s6713_s14  }
  0x16   : > { %s5746_s27 = sshll.u32 (%p70_p4), %s6721_s16, 4  ;;  %s5206_s28 = sshll.u32 (%p70_p4), %s161_s26, 12 }
  0x17   : > { %s6810_s4 = scalar_lea.vmem (%p70_p4), %s8489_s1, %s5746_s27  ;;  %s6815_s5 = scalar_lea.vmem (%p70_p4), [#allocation2], %s5206_s28 }
  0x18   : > { %v179_v0 = vld [vmem:[%s6810_s4] sm:$0xff] (%p70_p4)  ;;  %v181_v1 = vld [vmem:[%s6810_s4 + $0x8] sm:$0xff] (%p70_p4) }
  0x19   : > { %v183_v2 = vld [vmem:[%s6810_s4 + $0x20] sm:$0xff] (%p70_p4)  ;;  %180 = vst [vmem:[%s6815_s5] sm:$0xff] (%p70_p4), %v179_v0  ;;  %182 = vst [vmem:[%s6815_s5 + $0x8] sm:$0xff] (%p70_p4), %v181_v1  ;;  %v185_v3 = vld [vmem:[%s6810_s4 + $0x28] sm:$0xff] (%p70_p4) }
  0x1a   : > { %184 = vst [vmem:[%s6815_s5 + $0x10] sm:$0xff] (%p70_p4), %v183_v2  ;;  %v187_v4 = vld [vmem:[%s6810_s4 + $0x40] sm:$0xff] (%p70_p4)  ;;  %v189_v5 = vld [vmem:[%s6810_s4 + $0x48] sm:$0xff] (%p70_p4)  ;;  %186 = vst [vmem:[%s6815_s5 + $0x18] sm:$0xff] (%p70_p4), %v185_v3 }
  0x1b   : > { %188 = vst [vmem:[%s6815_s5 + $0x20] sm:$0xff] (%p70_p4), %v187_v4  ;;  %190 = vst [vmem:[%s6815_s5 + $0x28] sm:$0xff] (%p70_p4), %v189_v5  ;;  %v191_v6 = vld [vmem:[%s6810_s4 + $0x60] sm:$0xff] (%p70_p4)  ;;  %v193_v7 = vld [vmem:[%s6810_s4 + $0x68] sm:$0xff] (%p70_p4) }
  0x1c   : > { %v195_v8 = vld [vmem:[%s6810_s4 + $0x80] sm:$0xff]  ;;  %192 = vst [vmem:[%s6815_s5 + $0x30] sm:$0xff] %v191_v6  ;;  %194 = vst [vmem:[%s6815_s5 + $0x38] sm:$0xff] %v193_v7  ;;  %v197_v9 = vld [vmem:[%s6810_s4 + $0x88] sm:$0xff] }
  0x1d   : > { %196 = vst [vmem:[%s6815_s5 + $0x40] sm:$0xff] %v195_v8  ;;  %v199_v10 = vld [vmem:[%s6810_s4 + $0xa0] sm:$0xff]  ;;  %v201_v11 = vld [vmem:[%s6810_s4 + $0xa8] sm:$0xff]  ;;  %198 = vst [vmem:[%s6815_s5 + $0x48] sm:$0xff] %v197_v9 }
  0x1e   : > { %200 = vst [vmem:[%s6815_s5 + $0x50] sm:$0xff] %v199_v10  ;;  %202 = vst [vmem:[%s6815_s5 + $0x58] sm:$0xff] %v201_v11  ;;  %v203_v12 = vld [vmem:[%s6810_s4 + $0xc0] sm:$0xff]  ;;  %v205_v13 = vld [vmem:[%s6810_s4 + $0xc8] sm:$0xff] }
  0x1f   : > { %v207_v14 = vld [vmem:[%s6810_s4 + $0xe0] sm:$0xff]  ;;  %204 = vst [vmem:[%s6815_s5 + $0x60] sm:$0xff] %v203_v12  ;;  %206 = vst [vmem:[%s6815_s5 + $0x68] sm:$0xff] %v205_v13  ;;  %v209_v15 = vld [vmem:[%s6810_s4 + $0xe8] sm:$0xff] }
  0x20   : > { %208 = vst [vmem:[%s6815_s5 + $0x70] sm:$0xff] %v207_v14  ;;  %v211_v16 = vld [vmem:[%s6810_s4 + $0x100] sm:$0xff]  ;;  %v213_v17 = vld [vmem:[%s6810_s4 + $0x108] sm:$0xff]  ;;  %210 = vst [vmem:[%s6815_s5 + $0x78] sm:$0xff] %v209_v15 }
  0x21   : > { %212 = vst [vmem:[%s6815_s5 + $0x80] sm:$0xff] %v211_v16  ;;  %214 = vst [vmem:[%s6815_s5 + $0x88] sm:$0xff] %v213_v17  ;;  %v215_v18 = vld [vmem:[%s6810_s4 + $0x120] sm:$0xff]  ;;  %v217_v19 = vld [vmem:[%s6810_s4 + $0x128] sm:$0xff] }
  0x22   : > { %v219_v20 = vld [vmem:[%s6810_s4 + $0x140] sm:$0xff]  ;;  %216 = vst [vmem:[%s6815_s5 + $0x90] sm:$0xff] %v215_v18  ;;  %218 = vst [vmem:[%s6815_s5 + $0x98] sm:$0xff] %v217_v19  ;;  %v221_v21 = vld [vmem:[%s6810_s4 + $0x148] sm:$0xff] }
  0x23   : > { %220 = vst [vmem:[%s6815_s5 + $0xa0] sm:$0xff] %v219_v20  ;;  %v223_v22 = vld [vmem:[%s6810_s4 + $0x160] sm:$0xff]  ;;  %v225_v23 = vld [vmem:[%s6810_s4 + $0x168] sm:$0xff]  ;;  %222 = vst [vmem:[%s6815_s5 + $0xa8] sm:$0xff] %v221_v21 }
  0x24   : > { %224 = vst [vmem:[%s6815_s5 + $0xb0] sm:$0xff] %v223_v22  ;;  %226 = vst [vmem:[%s6815_s5 + $0xb8] sm:$0xff] %v225_v23  ;;  %v227_v24 = vld [vmem:[%s6810_s4 + $0x180] sm:$0xff]  ;;  %v229_v25 = vld [vmem:[%s6810_s4 + $0x188] sm:$0xff] }
  0x25   : > { %v231_v26 = vld [vmem:[%s6810_s4 + $0x1a0] sm:$0xff]  ;;  %228 = vst [vmem:[%s6815_s5 + $0xc0] sm:$0xff] %v227_v24  ;;  %230 = vst [vmem:[%s6815_s5 + $0xc8] sm:$0xff] %v229_v25  ;;  %v233_v27 = vld [vmem:[%s6810_s4 + $0x1a8] sm:$0xff] }
  0x26   : > { %232 = vst [vmem:[%s6815_s5 + $0xd0] sm:$0xff] %v231_v26  ;;  %v235_v28 = vld [vmem:[%s6810_s4 + $0x1c0] sm:$0xff]  ;;  %v237_v29 = vld [vmem:[%s6810_s4 + $0x1c8] sm:$0xff]  ;;  %234 = vst [vmem:[%s6815_s5 + $0xd8] sm:$0xff] %v233_v27 }
  0x27   : > { %236 = vst [vmem:[%s6815_s5 + $0xe0] sm:$0xff] %v235_v28  ;;  %238 = vst [vmem:[%s6815_s5 + $0xe8] sm:$0xff] %v237_v29  ;;  %v239_v30 = vld [vmem:[%s6810_s4 + $0x1e0] sm:$0xff]  ;;  %v241_v31 = vld [vmem:[%s6810_s4 + $0x1e8] sm:$0xff] }
  0x28   : > { %v243_v32 = vld [vmem:[%s6810_s4 + $0x200] sm:$0xff]  ;;  %240 = vst [vmem:[%s6815_s5 + $0xf0] sm:$0xff] %v239_v30  ;;  %242 = vst [vmem:[%s6815_s5 + $0xf8] sm:$0xff] %v241_v31  ;;  %v245_v33 = vld [vmem:[%s6810_s4 + $0x208] sm:$0xff] }
  0x29   : > { %244 = vst [vmem:[%s6815_s5 + $0x100] sm:$0xff] %v243_v32  ;;  %v247_v34 = vld [vmem:[%s6810_s4 + $0x220] sm:$0xff]  ;;  %v249_v35 = vld [vmem:[%s6810_s4 + $0x228] sm:$0xff]  ;;  %246 = vst [vmem:[%s6815_s5 + $0x108] sm:$0xff] %v245_v33 }
  0x2a   : > { %248 = vst [vmem:[%s6815_s5 + $0x110] sm:$0xff] %v247_v34  ;;  %250 = vst [vmem:[%s6815_s5 + $0x118] sm:$0xff] %v249_v35  ;;  %v251_v36 = vld [vmem:[%s6810_s4 + $0x240] sm:$0xff]  ;;  %v253_v37 = vld [vmem:[%s6810_s4 + $0x248] sm:$0xff] }
  0x2b   : > { %v255_v38 = vld [vmem:[%s6810_s4 + $0x260] sm:$0xff]  ;;  %252 = vst [vmem:[%s6815_s5 + $0x120] sm:$0xff] %v251_v36  ;;  %254 = vst [vmem:[%s6815_s5 + $0x128] sm:$0xff] %v253_v37  ;;  %v257_v39 = vld [vmem:[%s6810_s4 + $0x268] sm:$0xff] }
  0x2c   : > { %256 = vst [vmem:[%s6815_s5 + $0x130] sm:$0xff] %v255_v38  ;;  %v259_v40 = vld [vmem:[%s6810_s4 + $0x280] sm:$0xff]  ;;  %v261_v41 = vld [vmem:[%s6810_s4 + $0x288] sm:$0xff]  ;;  %258 = vst [vmem:[%s6815_s5 + $0x138] sm:$0xff] %v257_v39 }
  0x2d   : > { %260 = vst [vmem:[%s6815_s5 + $0x140] sm:$0xff] %v259_v40  ;;  %262 = vst [vmem:[%s6815_s5 + $0x148] sm:$0xff] %v261_v41  ;;  %v263_v42 = vld [vmem:[%s6810_s4 + $0x2a0] sm:$0xff]  ;;  %v265_v43 = vld [vmem:[%s6810_s4 + $0x2a8] sm:$0xff] }
  0x2e   : > { %v267_v44 = vld [vmem:[%s6810_s4 + $0x2c0] sm:$0xff]  ;;  %264 = vst [vmem:[%s6815_s5 + $0x150] sm:$0xff] %v263_v42  ;;  %266 = vst [vmem:[%s6815_s5 + $0x158] sm:$0xff] %v265_v43  ;;  %v269_v45 = vld [vmem:[%s6810_s4 + $0x2c8] sm:$0xff] }
  0x2f   : > { %268 = vst [vmem:[%s6815_s5 + $0x160] sm:$0xff] %v267_v44  ;;  %v271_v46 = vld [vmem:[%s6810_s4 + $0x2e0] sm:$0xff]  ;;  %v273_v47 = vld [vmem:[%s6810_s4 + $0x2e8] sm:$0xff]  ;;  %270 = vst [vmem:[%s6815_s5 + $0x168] sm:$0xff] %v269_v45 }
  0x30   : > { %272 = vst [vmem:[%s6815_s5 + $0x170] sm:$0xff] %v271_v46  ;;  %274 = vst [vmem:[%s6815_s5 + $0x178] sm:$0xff] %v273_v47  ;;  %v275_v48 = vld [vmem:[%s6810_s4 + $0x300] sm:$0xff]  ;;  %v277_v49 = vld [vmem:[%s6810_s4 + $0x308] sm:$0xff] }
  0x31   : > { %v279_v50 = vld [vmem:[%s6810_s4 + $0x320] sm:$0xff]  ;;  %276 = vst [vmem:[%s6815_s5 + $0x180] sm:$0xff] %v275_v48  ;;  %278 = vst [vmem:[%s6815_s5 + $0x188] sm:$0xff] %v277_v49  ;;  %v281_v51 = vld [vmem:[%s6810_s4 + $0x328] sm:$0xff] }
  0x32   : > { %280 = vst [vmem:[%s6815_s5 + $0x190] sm:$0xff] %v279_v50  ;;  %v283_v52 = vld [vmem:[%s6810_s4 + $0x340] sm:$0xff]  ;;  %v285_v53 = vld [vmem:[%s6810_s4 + $0x348] sm:$0xff]  ;;  %282 = vst [vmem:[%s6815_s5 + $0x198] sm:$0xff] %v281_v51 }
  0x33   : > { %284 = vst [vmem:[%s6815_s5 + $0x1a0] sm:$0xff] %v283_v52  ;;  %286 = vst [vmem:[%s6815_s5 + $0x1a8] sm:$0xff] %v285_v53  ;;  %v287_v54 = vld [vmem:[%s6810_s4 + $0x360] sm:$0xff]  ;;  %v289_v55 = vld [vmem:[%s6810_s4 + $0x368] sm:$0xff] }
  0x34   : > { %v291_v56 = vld [vmem:[%s6810_s4 + $0x380] sm:$0xff]  ;;  %288 = vst [vmem:[%s6815_s5 + $0x1b0] sm:$0xff] %v287_v54  ;;  %290 = vst [vmem:[%s6815_s5 + $0x1b8] sm:$0xff] %v289_v55  ;;  %v293_v57 = vld [vmem:[%s6810_s4 + $0x388] sm:$0xff] }
  0x35   : > { %292 = vst [vmem:[%s6815_s5 + $0x1c0] sm:$0xff] %v291_v56  ;;  %v295_v58 = vld [vmem:[%s6810_s4 + $0x3a0] sm:$0xff]  ;;  %v297_v59 = vld [vmem:[%s6810_s4 + $0x3a8] sm:$0xff]  ;;  %294 = vst [vmem:[%s6815_s5 + $0x1c8] sm:$0xff] %v293_v57 }
  0x36   : > { %296 = vst [vmem:[%s6815_s5 + $0x1d0] sm:$0xff] %v295_v58  ;;  %298 = vst [vmem:[%s6815_s5 + $0x1d8] sm:$0xff] %v297_v59  ;;  %v299_v60 = vld [vmem:[%s6810_s4 + $0x3c0] sm:$0xff]  ;;  %v301_v61 = vld [vmem:[%s6810_s4 + $0x3c8] sm:$0xff] }
  0x37   : > { %v303_v62 = vld [vmem:[%s6810_s4 + $0x3e0] sm:$0xff]  ;;  %300 = vst [vmem:[%s6815_s5 + $0x1e0] sm:$0xff] %v299_v60  ;;  %302 = vst [vmem:[%s6815_s5 + $0x1e8] sm:$0xff] %v301_v61  ;;  %v305_v63 = vld [vmem:[%s6810_s4 + $0x3e8] sm:$0xff] }
  0x38   : > { %304 = vst [vmem:[%s6815_s5 + $0x1f0] sm:$0xff] %v303_v62  ;;  %v307_v0 = vld [vmem:[%s6810_s4 + $0x400] sm:$0xff]  ;;  %v309_v1 = vld [vmem:[%s6810_s4 + $0x408] sm:$0xff]  ;;  %306 = vst [vmem:[%s6815_s5 + $0x1f8] sm:$0xff] %v305_v63 }
  0x39   : > { %308 = vst [vmem:[%s6815_s5 + $0x200] sm:$0xff] %v307_v0  ;;  %310 = vst [vmem:[%s6815_s5 + $0x208] sm:$0xff] %v309_v1  ;;  %v311_v2 = vld [vmem:[%s6810_s4 + $0x420] sm:$0xff]  ;;  %v313_v3 = vld [vmem:[%s6810_s4 + $0x428] sm:$0xff] }
  0x3a   : > { %v315_v4 = vld [vmem:[%s6810_s4 + $0x440] sm:$0xff]  ;;  %312 = vst [vmem:[%s6815_s5 + $0x210] sm:$0xff] %v311_v2  ;;  %314 = vst [vmem:[%s6815_s5 + $0x218] sm:$0xff] %v313_v3  ;;  %v317_v5 = vld [vmem:[%s6810_s4 + $0x448] sm:$0xff] }
  0x3b   : > { %316 = vst [vmem:[%s6815_s5 + $0x220] sm:$0xff] %v315_v4  ;;  %v319_v6 = vld [vmem:[%s6810_s4 + $0x460] sm:$0xff]  ;;  %v321_v7 = vld [vmem:[%s6810_s4 + $0x468] sm:$0xff]  ;;  %318 = vst [vmem:[%s6815_s5 + $0x228] sm:$0xff] %v317_v5 }
  0x3c   : > { %320 = vst [vmem:[%s6815_s5 + $0x230] sm:$0xff] %v319_v6  ;;  %322 = vst [vmem:[%s6815_s5 + $0x238] sm:$0xff] %v321_v7  ;;  %v323_v8 = vld [vmem:[%s6810_s4 + $0x480] sm:$0xff]  ;;  %v325_v9 = vld [vmem:[%s6810_s4 + $0x488] sm:$0xff] }
  0x3d   : > { %v327_v10 = vld [vmem:[%s6810_s4 + $0x4a0] sm:$0xff]  ;;  %324 = vst [vmem:[%s6815_s5 + $0x240] sm:$0xff] %v323_v8  ;;  %326 = vst [vmem:[%s6815_s5 + $0x248] sm:$0xff] %v325_v9  ;;  %v329_v11 = vld [vmem:[%s6810_s4 + $0x4a8] sm:$0xff] }
  0x3e   : > { %328 = vst [vmem:[%s6815_s5 + $0x250] sm:$0xff] %v327_v10  ;;  %v331_v12 = vld [vmem:[%s6810_s4 + $0x4c0] sm:$0xff]  ;;  %v333_v13 = vld [vmem:[%s6810_s4 + $0x4c8] sm:$0xff]  ;;  %330 = vst [vmem:[%s6815_s5 + $0x258] sm:$0xff] %v329_v11 }
  0x3f   : > { %332 = vst [vmem:[%s6815_s5 + $0x260] sm:$0xff] %v331_v12  ;;  %334 = vst [vmem:[%s6815_s5 + $0x268] sm:$0xff] %v333_v13  ;;  %v335_v14 = vld [vmem:[%s6810_s4 + $0x4e0] sm:$0xff]  ;;  %v337_v15 = vld [vmem:[%s6810_s4 + $0x4e8] sm:$0xff] }
  0x40   : > { %v339_v16 = vld [vmem:[%s6810_s4 + $0x500] sm:$0xff]  ;;  %336 = vst [vmem:[%s6815_s5 + $0x270] sm:$0xff] %v335_v14  ;;  %338 = vst [vmem:[%s6815_s5 + $0x278] sm:$0xff] %v337_v15  ;;  %v341_v17 = vld [vmem:[%s6810_s4 + $0x508] sm:$0xff] }
  0x41   : > { %340 = vst [vmem:[%s6815_s5 + $0x280] sm:$0xff] %v339_v16  ;;  %v343_v18 = vld [vmem:[%s6810_s4 + $0x520] sm:$0xff]  ;;  %v345_v19 = vld [vmem:[%s6810_s4 + $0x528] sm:$0xff]  ;;  %342 = vst [vmem:[%s6815_s5 + $0x288] sm:$0xff] %v341_v17 }
  0x42   : > { %344 = vst [vmem:[%s6815_s5 + $0x290] sm:$0xff] %v343_v18  ;;  %346 = vst [vmem:[%s6815_s5 + $0x298] sm:$0xff] %v345_v19  ;;  %v347_v20 = vld [vmem:[%s6810_s4 + $0x540] sm:$0xff]  ;;  %v349_v21 = vld [vmem:[%s6810_s4 + $0x548] sm:$0xff] }
  0x43   : > { %v351_v22 = vld [vmem:[%s6810_s4 + $0x560] sm:$0xff]  ;;  %348 = vst [vmem:[%s6815_s5 + $0x2a0] sm:$0xff] %v347_v20  ;;  %350 = vst [vmem:[%s6815_s5 + $0x2a8] sm:$0xff] %v349_v21  ;;  %v353_v23 = vld [vmem:[%s6810_s4 + $0x568] sm:$0xff] }
  0x44   : > { %352 = vst [vmem:[%s6815_s5 + $0x2b0] sm:$0xff] %v351_v22  ;;  %v355_v24 = vld [vmem:[%s6810_s4 + $0x580] sm:$0xff]  ;;  %v357_v25 = vld [vmem:[%s6810_s4 + $0x588] sm:$0xff]  ;;  %354 = vst [vmem:[%s6815_s5 + $0x2b8] sm:$0xff] %v353_v23 }
  0x45   : > { %356 = vst [vmem:[%s6815_s5 + $0x2c0] sm:$0xff] %v355_v24  ;;  %358 = vst [vmem:[%s6815_s5 + $0x2c8] sm:$0xff] %v357_v25  ;;  %v359_v26 = vld [vmem:[%s6810_s4 + $0x5a0] sm:$0xff]  ;;  %v361_v27 = vld [vmem:[%s6810_s4 + $0x5a8] sm:$0xff] }
  0x46   : > { %v363_v28 = vld [vmem:[%s6810_s4 + $0x5c0] sm:$0xff]  ;;  %360 = vst [vmem:[%s6815_s5 + $0x2d0] sm:$0xff] %v359_v26  ;;  %362 = vst [vmem:[%s6815_s5 + $0x2d8] sm:$0xff] %v361_v27  ;;  %v365_v29 = vld [vmem:[%s6810_s4 + $0x5c8] sm:$0xff] }
  0x47   : > { %364 = vst [vmem:[%s6815_s5 + $0x2e0] sm:$0xff] %v363_v28  ;;  %v367_v30 = vld [vmem:[%s6810_s4 + $0x5e0] sm:$0xff]  ;;  %v369_v31 = vld [vmem:[%s6810_s4 + $0x5e8] sm:$0xff]  ;;  %366 = vst [vmem:[%s6815_s5 + $0x2e8] sm:$0xff] %v365_v29 }
  0x48   : > { %368 = vst [vmem:[%s6815_s5 + $0x2f0] sm:$0xff] %v367_v30  ;;  %370 = vst [vmem:[%s6815_s5 + $0x2f8] sm:$0xff] %v369_v31  ;;  %v371_v32 = vld [vmem:[%s6810_s4 + $0x600] sm:$0xff]  ;;  %v373_v33 = vld [vmem:[%s6810_s4 + $0x608] sm:$0xff] }
  0x49   : > { %v375_v34 = vld [vmem:[%s6810_s4 + $0x620] sm:$0xff]  ;;  %372 = vst [vmem:[%s6815_s5 + $0x300] sm:$0xff] %v371_v32  ;;  %374 = vst [vmem:[%s6815_s5 + $0x308] sm:$0xff] %v373_v33  ;;  %v377_v35 = vld [vmem:[%s6810_s4 + $0x628] sm:$0xff] }
  0x4a   : > { %376 = vst [vmem:[%s6815_s5 + $0x310] sm:$0xff] %v375_v34  ;;  %v379_v36 = vld [vmem:[%s6810_s4 + $0x640] sm:$0xff]  ;;  %v381_v37 = vld [vmem:[%s6810_s4 + $0x648] sm:$0xff]  ;;  %378 = vst [vmem:[%s6815_s5 + $0x318] sm:$0xff] %v377_v35 }
  0x4b   : > { %380 = vst [vmem:[%s6815_s5 + $0x320] sm:$0xff] %v379_v36  ;;  %382 = vst [vmem:[%s6815_s5 + $0x328] sm:$0xff] %v381_v37  ;;  %v383_v38 = vld [vmem:[%s6810_s4 + $0x660] sm:$0xff]  ;;  %v385_v39 = vld [vmem:[%s6810_s4 + $0x668] sm:$0xff] }
  0x4c   : > { %v387_v40 = vld [vmem:[%s6810_s4 + $0x680] sm:$0xff]  ;;  %384 = vst [vmem:[%s6815_s5 + $0x330] sm:$0xff] %v383_v38  ;;  %386 = vst [vmem:[%s6815_s5 + $0x338] sm:$0xff] %v385_v39  ;;  %v389_v41 = vld [vmem:[%s6810_s4 + $0x688] sm:$0xff] }
  0x4d   : > { %388 = vst [vmem:[%s6815_s5 + $0x340] sm:$0xff] %v387_v40  ;;  %v391_v42 = vld [vmem:[%s6810_s4 + $0x6a0] sm:$0xff]  ;;  %v393_v43 = vld [vmem:[%s6810_s4 + $0x6a8] sm:$0xff]  ;;  %390 = vst [vmem:[%s6815_s5 + $0x348] sm:$0xff] %v389_v41 }
  0x4e   : > { %392 = vst [vmem:[%s6815_s5 + $0x350] sm:$0xff] %v391_v42  ;;  %394 = vst [vmem:[%s6815_s5 + $0x358] sm:$0xff] %v393_v43  ;;  %v395_v44 = vld [vmem:[%s6810_s4 + $0x6c0] sm:$0xff]  ;;  %v397_v45 = vld [vmem:[%s6810_s4 + $0x6c8] sm:$0xff] }
  0x4f   : > { %v399_v46 = vld [vmem:[%s6810_s4 + $0x6e0] sm:$0xff]  ;;  %396 = vst [vmem:[%s6815_s5 + $0x360] sm:$0xff] %v395_v44  ;;  %398 = vst [vmem:[%s6815_s5 + $0x368] sm:$0xff] %v397_v45  ;;  %v401_v47 = vld [vmem:[%s6810_s4 + $0x6e8] sm:$0xff] }
  0x50   : > { %400 = vst [vmem:[%s6815_s5 + $0x370] sm:$0xff] %v399_v46  ;;  %v403_v48 = vld [vmem:[%s6810_s4 + $0x700] sm:$0xff]  ;;  %v405_v49 = vld [vmem:[%s6810_s4 + $0x708] sm:$0xff]  ;;  %402 = vst [vmem:[%s6815_s5 + $0x378] sm:$0xff] %v401_v47 }
  0x51   : > { %404 = vst [vmem:[%s6815_s5 + $0x380] sm:$0xff] %v403_v48  ;;  %406 = vst [vmem:[%s6815_s5 + $0x388] sm:$0xff] %v405_v49  ;;  %v407_v50 = vld [vmem:[%s6810_s4 + $0x720] sm:$0xff]  ;;  %v409_v51 = vld [vmem:[%s6810_s4 + $0x728] sm:$0xff] }
  0x52   : > { %v411_v52 = vld [vmem:[%s6810_s4 + $0x740] sm:$0xff]  ;;  %408 = vst [vmem:[%s6815_s5 + $0x390] sm:$0xff] %v407_v50  ;;  %410 = vst [vmem:[%s6815_s5 + $0x398] sm:$0xff] %v409_v51  ;;  %v413_v53 = vld [vmem:[%s6810_s4 + $0x748] sm:$0xff] }
  0x53   : > { %412 = vst [vmem:[%s6815_s5 + $0x3a0] sm:$0xff] %v411_v52  ;;  %v415_v54 = vld [vmem:[%s6810_s4 + $0x760] sm:$0xff]  ;;  %v417_v55 = vld [vmem:[%s6810_s4 + $0x768] sm:$0xff]  ;;  %414 = vst [vmem:[%s6815_s5 + $0x3a8] sm:$0xff] %v413_v53 }
  0x54   : > { %416 = vst [vmem:[%s6815_s5 + $0x3b0] sm:$0xff] %v415_v54  ;;  %418 = vst [vmem:[%s6815_s5 + $0x3b8] sm:$0xff] %v417_v55  ;;  %v419_v56 = vld [vmem:[%s6810_s4 + $0x780] sm:$0xff]  ;;  %v421_v57 = vld [vmem:[%s6810_s4 + $0x788] sm:$0xff] }
  0x55   : > { %v423_v58 = vld [vmem:[%s6810_s4 + $0x7a0] sm:$0xff]  ;;  %420 = vst [vmem:[%s6815_s5 + $0x3c0] sm:$0xff] %v419_v56  ;;  %422 = vst [vmem:[%s6815_s5 + $0x3c8] sm:$0xff] %v421_v57  ;;  %v425_v59 = vld [vmem:[%s6810_s4 + $0x7a8] sm:$0xff] }
  0x56   : > { %424 = vst [vmem:[%s6815_s5 + $0x3d0] sm:$0xff] %v423_v58  ;;  %v427_v60 = vld [vmem:[%s6810_s4 + $0x7c0] sm:$0xff]  ;;  %v429_v61 = vld [vmem:[%s6810_s4 + $0x7c8] sm:$0xff]  ;;  %426 = vst [vmem:[%s6815_s5 + $0x3d8] sm:$0xff] %v425_v59 }
  0x57   : > { %428 = vst [vmem:[%s6815_s5 + $0x3e0] sm:$0xff] %v427_v60  ;;  %430 = vst [vmem:[%s6815_s5 + $0x3e8] sm:$0xff] %v429_v61  ;;  %v431_v62 = vld [vmem:[%s6810_s4 + $0x7e0] sm:$0xff]  ;;  %v433_v63 = vld [vmem:[%s6810_s4 + $0x7e8] sm:$0xff] }
  0x58   : > { %v435_v0 = vld [vmem:[%s6810_s4 + $0x800] sm:$0xff]  ;;  %432 = vst [vmem:[%s6815_s5 + $0x3f0] sm:$0xff] %v431_v62  ;;  %434 = vst [vmem:[%s6815_s5 + $0x3f8] sm:$0xff] %v433_v63  ;;  %v437_v1 = vld [vmem:[%s6810_s4 + $0x808] sm:$0xff] }
  0x59   : > { %436 = vst [vmem:[%s6815_s5 + $0x400] sm:$0xff] %v435_v0  ;;  %v439_v2 = vld [vmem:[%s6810_s4 + $0x820] sm:$0xff]  ;;  %v441_v3 = vld [vmem:[%s6810_s4 + $0x828] sm:$0xff]  ;;  %438 = vst [vmem:[%s6815_s5 + $0x408] sm:$0xff] %v437_v1 }
  0x5a   : > { %440 = vst [vmem:[%s6815_s5 + $0x410] sm:$0xff] %v439_v2  ;;  %442 = vst [vmem:[%s6815_s5 + $0x418] sm:$0xff] %v441_v3  ;;  %v443_v4 = vld [vmem:[%s6810_s4 + $0x840] sm:$0xff]  ;;  %v445_v5 = vld [vmem:[%s6810_s4 + $0x848] sm:$0xff] }
  0x5b   : > { %v447_v6 = vld [vmem:[%s6810_s4 + $0x860] sm:$0xff]  ;;  %444 = vst [vmem:[%s6815_s5 + $0x420] sm:$0xff] %v443_v4  ;;  %446 = vst [vmem:[%s6815_s5 + $0x428] sm:$0xff] %v445_v5  ;;  %v449_v7 = vld [vmem:[%s6810_s4 + $0x868] sm:$0xff] }
  0x5c   : > { %448 = vst [vmem:[%s6815_s5 + $0x430] sm:$0xff] %v447_v6  ;;  %v451_v8 = vld [vmem:[%s6810_s4 + $0x880] sm:$0xff]  ;;  %v453_v9 = vld [vmem:[%s6810_s4 + $0x888] sm:$0xff]  ;;  %450 = vst [vmem:[%s6815_s5 + $0x438] sm:$0xff] %v449_v7 }
  0x5d   : > { %452 = vst [vmem:[%s6815_s5 + $0x440] sm:$0xff] %v451_v8  ;;  %454 = vst [vmem:[%s6815_s5 + $0x448] sm:$0xff] %v453_v9  ;;  %v455_v10 = vld [vmem:[%s6810_s4 + $0x8a0] sm:$0xff]  ;;  %v457_v11 = vld [vmem:[%s6810_s4 + $0x8a8] sm:$0xff] }
  0x5e   : > { %v459_v12 = vld [vmem:[%s6810_s4 + $0x8c0] sm:$0xff]  ;;  %456 = vst [vmem:[%s6815_s5 + $0x450] sm:$0xff] %v455_v10  ;;  %458 = vst [vmem:[%s6815_s5 + $0x458] sm:$0xff] %v457_v11  ;;  %v461_v13 = vld [vmem:[%s6810_s4 + $0x8c8] sm:$0xff] }
  0x5f   : > { %460 = vst [vmem:[%s6815_s5 + $0x460] sm:$0xff] %v459_v12  ;;  %v463_v14 = vld [vmem:[%s6810_s4 + $0x8e0] sm:$0xff]  ;;  %v465_v15 = vld [vmem:[%s6810_s4 + $0x8e8] sm:$0xff]  ;;  %462 = vst [vmem:[%s6815_s5 + $0x468] sm:$0xff] %v461_v13 }
  0x60   : > { %464 = vst [vmem:[%s6815_s5 + $0x470] sm:$0xff] %v463_v14  ;;  %466 = vst [vmem:[%s6815_s5 + $0x478] sm:$0xff] %v465_v15  ;;  %v467_v16 = vld [vmem:[%s6810_s4 + $0x900] sm:$0xff]  ;;  %v469_v17 = vld [vmem:[%s6810_s4 + $0x908] sm:$0xff] }
  0x61   : > { %v471_v18 = vld [vmem:[%s6810_s4 + $0x920] sm:$0xff]  ;;  %468 = vst [vmem:[%s6815_s5 + $0x480] sm:$0xff] %v467_v16  ;;  %470 = vst [vmem:[%s6815_s5 + $0x488] sm:$0xff] %v469_v17  ;;  %v473_v19 = vld [vmem:[%s6810_s4 + $0x928] sm:$0xff] }
  0x62   : > { %472 = vst [vmem:[%s6815_s5 + $0x490] sm:$0xff] %v471_v18  ;;  %v475_v20 = vld [vmem:[%s6810_s4 + $0x940] sm:$0xff]  ;;  %v477_v21 = vld [vmem:[%s6810_s4 + $0x948] sm:$0xff]  ;;  %474 = vst [vmem:[%s6815_s5 + $0x498] sm:$0xff] %v473_v19 }
  0x63   : > { %476 = vst [vmem:[%s6815_s5 + $0x4a0] sm:$0xff] %v475_v20  ;;  %478 = vst [vmem:[%s6815_s5 + $0x4a8] sm:$0xff] %v477_v21  ;;  %v479_v22 = vld [vmem:[%s6810_s4 + $0x960] sm:$0xff]  ;;  %v481_v23 = vld [vmem:[%s6810_s4 + $0x968] sm:$0xff] }
  0x64   : > { %v483_v24 = vld [vmem:[%s6810_s4 + $0x980] sm:$0xff]  ;;  %480 = vst [vmem:[%s6815_s5 + $0x4b0] sm:$0xff] %v479_v22  ;;  %482 = vst [vmem:[%s6815_s5 + $0x4b8] sm:$0xff] %v481_v23  ;;  %v485_v25 = vld [vmem:[%s6810_s4 + $0x988] sm:$0xff] }
  0x65   : > { %484 = vst [vmem:[%s6815_s5 + $0x4c0] sm:$0xff] %v483_v24  ;;  %v487_v26 = vld [vmem:[%s6810_s4 + $0x9a0] sm:$0xff]  ;;  %v489_v27 = vld [vmem:[%s6810_s4 + $0x9a8] sm:$0xff]  ;;  %486 = vst [vmem:[%s6815_s5 + $0x4c8] sm:$0xff] %v485_v25 }
  0x66   : > { %488 = vst [vmem:[%s6815_s5 + $0x4d0] sm:$0xff] %v487_v26  ;;  %490 = vst [vmem:[%s6815_s5 + $0x4d8] sm:$0xff] %v489_v27  ;;  %v491_v28 = vld [vmem:[%s6810_s4 + $0x9c0] sm:$0xff]  ;;  %v493_v29 = vld [vmem:[%s6810_s4 + $0x9c8] sm:$0xff] }
  0x67   : > { %v495_v30 = vld [vmem:[%s6810_s4 + $0x9e0] sm:$0xff]  ;;  %492 = vst [vmem:[%s6815_s5 + $0x4e0] sm:$0xff] %v491_v28  ;;  %494 = vst [vmem:[%s6815_s5 + $0x4e8] sm:$0xff] %v493_v29  ;;  %v497_v31 = vld [vmem:[%s6810_s4 + $0x9e8] sm:$0xff] }
  0x68   : > { %496 = vst [vmem:[%s6815_s5 + $0x4f0] sm:$0xff] %v495_v30  ;;  %v499_v32 = vld [vmem:[%s6810_s4 + $0xa00] sm:$0xff]  ;;  %v501_v33 = vld [vmem:[%s6810_s4 + $0xa08] sm:$0xff]  ;;  %498 = vst [vmem:[%s6815_s5 + $0x4f8] sm:$0xff] %v497_v31 }
  0x69   : > { %500 = vst [vmem:[%s6815_s5 + $0x500] sm:$0xff] %v499_v32  ;;  %502 = vst [vmem:[%s6815_s5 + $0x508] sm:$0xff] %v501_v33  ;;  %v503_v34 = vld [vmem:[%s6810_s4 + $0xa20] sm:$0xff]  ;;  %v505_v35 = vld [vmem:[%s6810_s4 + $0xa28] sm:$0xff] }
  0x6a   : > { %v507_v36 = vld [vmem:[%s6810_s4 + $0xa40] sm:$0xff]  ;;  %504 = vst [vmem:[%s6815_s5 + $0x510] sm:$0xff] %v503_v34  ;;  %506 = vst [vmem:[%s6815_s5 + $0x518] sm:$0xff] %v505_v35  ;;  %v509_v37 = vld [vmem:[%s6810_s4 + $0xa48] sm:$0xff] }
  0x6b   : > { %508 = vst [vmem:[%s6815_s5 + $0x520] sm:$0xff] %v507_v36  ;;  %v511_v38 = vld [vmem:[%s6810_s4 + $0xa60] sm:$0xff]  ;;  %v513_v39 = vld [vmem:[%s6810_s4 + $0xa68] sm:$0xff]  ;;  %510 = vst [vmem:[%s6815_s5 + $0x528] sm:$0xff] %v509_v37 }
  0x6c   : > { %512 = vst [vmem:[%s6815_s5 + $0x530] sm:$0xff] %v511_v38  ;;  %514 = vst [vmem:[%s6815_s5 + $0x538] sm:$0xff] %v513_v39  ;;  %v515_v40 = vld [vmem:[%s6810_s4 + $0xa80] sm:$0xff]  ;;  %v517_v41 = vld [vmem:[%s6810_s4 + $0xa88] sm:$0xff] }
  0x6d   : > { %v519_v42 = vld [vmem:[%s6810_s4 + $0xaa0] sm:$0xff]  ;;  %516 = vst [vmem:[%s6815_s5 + $0x540] sm:$0xff] %v515_v40  ;;  %518 = vst [vmem:[%s6815_s5 + $0x548] sm:$0xff] %v517_v41  ;;  %v521_v43 = vld [vmem:[%s6810_s4 + $0xaa8] sm:$0xff] }
  0x6e   : > { %520 = vst [vmem:[%s6815_s5 + $0x550] sm:$0xff] %v519_v42  ;;  %v523_v44 = vld [vmem:[%s6810_s4 + $0xac0] sm:$0xff]  ;;  %v525_v45 = vld [vmem:[%s6810_s4 + $0xac8] sm:$0xff]  ;;  %522 = vst [vmem:[%s6815_s5 + $0x558] sm:$0xff] %v521_v43 }
  0x6f   : > { %524 = vst [vmem:[%s6815_s5 + $0x560] sm:$0xff] %v523_v44  ;;  %526 = vst [vmem:[%s6815_s5 + $0x568] sm:$0xff] %v525_v45  ;;  %v527_v46 = vld [vmem:[%s6810_s4 + $0xae0] sm:$0xff]  ;;  %v529_v47 = vld [vmem:[%s6810_s4 + $0xae8] sm:$0xff] }
  0x70   : > { %v531_v48 = vld [vmem:[%s6810_s4 + $0xb00] sm:$0xff]  ;;  %528 = vst [vmem:[%s6815_s5 + $0x570] sm:$0xff] %v527_v46  ;;  %530 = vst [vmem:[%s6815_s5 + $0x578] sm:$0xff] %v529_v47  ;;  %v533_v49 = vld [vmem:[%s6810_s4 + $0xb08] sm:$0xff] }
  0x71   : > { %532 = vst [vmem:[%s6815_s5 + $0x580] sm:$0xff] %v531_v48  ;;  %v535_v50 = vld [vmem:[%s6810_s4 + $0xb20] sm:$0xff]  ;;  %v537_v51 = vld [vmem:[%s6810_s4 + $0xb28] sm:$0xff]  ;;  %534 = vst [vmem:[%s6815_s5 + $0x588] sm:$0xff] %v533_v49 }
  0x72   : > { %536 = vst [vmem:[%s6815_s5 + $0x590] sm:$0xff] %v535_v50  ;;  %538 = vst [vmem:[%s6815_s5 + $0x598] sm:$0xff] %v537_v51  ;;  %v539_v52 = vld [vmem:[%s6810_s4 + $0xb40] sm:$0xff]  ;;  %v541_v53 = vld [vmem:[%s6810_s4 + $0xb48] sm:$0xff] }
  0x73   : > { %v543_v54 = vld [vmem:[%s6810_s4 + $0xb60] sm:$0xff]  ;;  %540 = vst [vmem:[%s6815_s5 + $0x5a0] sm:$0xff] %v539_v52  ;;  %542 = vst [vmem:[%s6815_s5 + $0x5a8] sm:$0xff] %v541_v53  ;;  %v545_v55 = vld [vmem:[%s6810_s4 + $0xb68] sm:$0xff] }
  0x74   : > { %544 = vst [vmem:[%s6815_s5 + $0x5b0] sm:$0xff] %v543_v54  ;;  %v547_v56 = vld [vmem:[%s6810_s4 + $0xb80] sm:$0xff]  ;;  %v549_v57 = vld [vmem:[%s6810_s4 + $0xb88] sm:$0xff]  ;;  %546 = vst [vmem:[%s6815_s5 + $0x5b8] sm:$0xff] %v545_v55 }
  0x75   : > { %548 = vst [vmem:[%s6815_s5 + $0x5c0] sm:$0xff] %v547_v56  ;;  %550 = vst [vmem:[%s6815_s5 + $0x5c8] sm:$0xff] %v549_v57  ;;  %v551_v58 = vld [vmem:[%s6810_s4 + $0xba0] sm:$0xff]  ;;  %v553_v59 = vld [vmem:[%s6810_s4 + $0xba8] sm:$0xff] }
  0x76   : > { %v555_v60 = vld [vmem:[%s6810_s4 + $0xbc0] sm:$0xff]  ;;  %552 = vst [vmem:[%s6815_s5 + $0x5d0] sm:$0xff] %v551_v58  ;;  %554 = vst [vmem:[%s6815_s5 + $0x5d8] sm:$0xff] %v553_v59  ;;  %v557_v61 = vld [vmem:[%s6810_s4 + $0xbc8] sm:$0xff] }
  0x77   : > { %556 = vst [vmem:[%s6815_s5 + $0x5e0] sm:$0xff] %v555_v60  ;;  %v559_v62 = vld [vmem:[%s6810_s4 + $0xbe0] sm:$0xff]  ;;  %v561_v63 = vld [vmem:[%s6810_s4 + $0xbe8] sm:$0xff]  ;;  %558 = vst [vmem:[%s6815_s5 + $0x5e8] sm:$0xff] %v557_v61 }
  0x78   : > { %560 = vst [vmem:[%s6815_s5 + $0x5f0] sm:$0xff] %v559_v62  ;;  %562 = vst [vmem:[%s6815_s5 + $0x5f8] sm:$0xff] %v561_v63  ;;  %v563_v0 = vld [vmem:[%s6810_s4 + $0xc00] sm:$0xff]  ;;  %v565_v1 = vld [vmem:[%s6810_s4 + $0xc08] sm:$0xff] }
  0x79   : > { %v567_v2 = vld [vmem:[%s6810_s4 + $0xc20] sm:$0xff]  ;;  %564 = vst [vmem:[%s6815_s5 + $0x600] sm:$0xff] %v563_v0  ;;  %566 = vst [vmem:[%s6815_s5 + $0x608] sm:$0xff] %v565_v1  ;;  %v569_v3 = vld [vmem:[%s6810_s4 + $0xc28] sm:$0xff] }
  0x7a   : > { %568 = vst [vmem:[%s6815_s5 + $0x610] sm:$0xff] %v567_v2  ;;  %v571_v4 = vld [vmem:[%s6810_s4 + $0xc40] sm:$0xff]  ;;  %v573_v5 = vld [vmem:[%s6810_s4 + $0xc48] sm:$0xff]  ;;  %570 = vst [vmem:[%s6815_s5 + $0x618] sm:$0xff] %v569_v3 }
  0x7b   : > { %572 = vst [vmem:[%s6815_s5 + $0x620] sm:$0xff] %v571_v4  ;;  %574 = vst [vmem:[%s6815_s5 + $0x628] sm:$0xff] %v573_v5  ;;  %v575_v6 = vld [vmem:[%s6810_s4 + $0xc60] sm:$0xff]  ;;  %v577_v7 = vld [vmem:[%s6810_s4 + $0xc68] sm:$0xff] }
  0x7c   : > { %v579_v8 = vld [vmem:[%s6810_s4 + $0xc80] sm:$0xff]  ;;  %576 = vst [vmem:[%s6815_s5 + $0x630] sm:$0xff] %v575_v6  ;;  %578 = vst [vmem:[%s6815_s5 + $0x638] sm:$0xff] %v577_v7  ;;  %v581_v9 = vld [vmem:[%s6810_s4 + $0xc88] sm:$0xff] }
  0x7d   : > { %580 = vst [vmem:[%s6815_s5 + $0x640] sm:$0xff] %v579_v8  ;;  %v583_v10 = vld [vmem:[%s6810_s4 + $0xca0] sm:$0xff]  ;;  %v585_v11 = vld [vmem:[%s6810_s4 + $0xca8] sm:$0xff]  ;;  %582 = vst [vmem:[%s6815_s5 + $0x648] sm:$0xff] %v581_v9 }
  0x7e   : > { %584 = vst [vmem:[%s6815_s5 + $0x650] sm:$0xff] %v583_v10  ;;  %586 = vst [vmem:[%s6815_s5 + $0x658] sm:$0xff] %v585_v11  ;;  %v587_v12 = vld [vmem:[%s6810_s4 + $0xcc0] sm:$0xff]  ;;  %v589_v13 = vld [vmem:[%s6810_s4 + $0xcc8] sm:$0xff] }
  0x7f   : > { %v591_v14 = vld [vmem:[%s6810_s4 + $0xce0] sm:$0xff]  ;;  %588 = vst [vmem:[%s6815_s5 + $0x660] sm:$0xff] %v587_v12  ;;  %590 = vst [vmem:[%s6815_s5 + $0x668] sm:$0xff] %v589_v13  ;;  %v593_v15 = vld [vmem:[%s6810_s4 + $0xce8] sm:$0xff] }
  0x80   : > { %592 = vst [vmem:[%s6815_s5 + $0x670] sm:$0xff] %v591_v14  ;;  %v595_v16 = vld [vmem:[%s6810_s4 + $0xd00] sm:$0xff]  ;;  %v597_v17 = vld [vmem:[%s6810_s4 + $0xd08] sm:$0xff]  ;;  %594 = vst [vmem:[%s6815_s5 + $0x678] sm:$0xff] %v593_v15 }
  0x81   : > { %596 = vst [vmem:[%s6815_s5 + $0x680] sm:$0xff] %v595_v16  ;;  %598 = vst [vmem:[%s6815_s5 + $0x688] sm:$0xff] %v597_v17  ;;  %v599_v18 = vld [vmem:[%s6810_s4 + $0xd20] sm:$0xff]  ;;  %v601_v19 = vld [vmem:[%s6810_s4 + $0xd28] sm:$0xff] }
  0x82   : > { %v603_v20 = vld [vmem:[%s6810_s4 + $0xd40] sm:$0xff]  ;;  %600 = vst [vmem:[%s6815_s5 + $0x690] sm:$0xff] %v599_v18  ;;  %602 = vst [vmem:[%s6815_s5 + $0x698] sm:$0xff] %v601_v19  ;;  %v605_v21 = vld [vmem:[%s6810_s4 + $0xd48] sm:$0xff] }
  0x83   : > { %604 = vst [vmem:[%s6815_s5 + $0x6a0] sm:$0xff] %v603_v20  ;;  %v607_v22 = vld [vmem:[%s6810_s4 + $0xd60] sm:$0xff]  ;;  %v609_v23 = vld [vmem:[%s6810_s4 + $0xd68] sm:$0xff]  ;;  %606 = vst [vmem:[%s6815_s5 + $0x6a8] sm:$0xff] %v605_v21 }
  0x84   : > { %608 = vst [vmem:[%s6815_s5 + $0x6b0] sm:$0xff] %v607_v22  ;;  %610 = vst [vmem:[%s6815_s5 + $0x6b8] sm:$0xff] %v609_v23  ;;  %v611_v24 = vld [vmem:[%s6810_s4 + $0xd80] sm:$0xff]  ;;  %v613_v25 = vld [vmem:[%s6810_s4 + $0xd88] sm:$0xff] }
  0x85   : > { %v615_v26 = vld [vmem:[%s6810_s4 + $0xda0] sm:$0xff]  ;;  %612 = vst [vmem:[%s6815_s5 + $0x6c0] sm:$0xff] %v611_v24  ;;  %614 = vst [vmem:[%s6815_s5 + $0x6c8] sm:$0xff] %v613_v25  ;;  %v617_v27 = vld [vmem:[%s6810_s4 + $0xda8] sm:$0xff] }
  0x86   : > { %616 = vst [vmem:[%s6815_s5 + $0x6d0] sm:$0xff] %v615_v26  ;;  %v619_v28 = vld [vmem:[%s6810_s4 + $0xdc0] sm:$0xff]  ;;  %v621_v29 = vld [vmem:[%s6810_s4 + $0xdc8] sm:$0xff]  ;;  %618 = vst [vmem:[%s6815_s5 + $0x6d8] sm:$0xff] %v617_v27 }
  0x87   : > { %620 = vst [vmem:[%s6815_s5 + $0x6e0] sm:$0xff] %v619_v28  ;;  %622 = vst [vmem:[%s6815_s5 + $0x6e8] sm:$0xff] %v621_v29  ;;  %v623_v30 = vld [vmem:[%s6810_s4 + $0xde0] sm:$0xff]  ;;  %v625_v31 = vld [vmem:[%s6810_s4 + $0xde8] sm:$0xff] }
  0x88   : > { %v627_v32 = vld [vmem:[%s6810_s4 + $0xe00] sm:$0xff]  ;;  %624 = vst [vmem:[%s6815_s5 + $0x6f0] sm:$0xff] %v623_v30  ;;  %626 = vst [vmem:[%s6815_s5 + $0x6f8] sm:$0xff] %v625_v31  ;;  %v629_v33 = vld [vmem:[%s6810_s4 + $0xe08] sm:$0xff] }
  0x89   : > { %628 = vst [vmem:[%s6815_s5 + $0x700] sm:$0xff] %v627_v32  ;;  %v631_v34 = vld [vmem:[%s6810_s4 + $0xe20] sm:$0xff]  ;;  %v633_v35 = vld [vmem:[%s6810_s4 + $0xe28] sm:$0xff]  ;;  %630 = vst [vmem:[%s6815_s5 + $0x708] sm:$0xff] %v629_v33 }
  0x8a   : > { %632 = vst [vmem:[%s6815_s5 + $0x710] sm:$0xff] %v631_v34  ;;  %634 = vst [vmem:[%s6815_s5 + $0x718] sm:$0xff] %v633_v35  ;;  %v635_v36 = vld [vmem:[%s6810_s4 + $0xe40] sm:$0xff]  ;;  %v637_v37 = vld [vmem:[%s6810_s4 + $0xe48] sm:$0xff] }
  0x8b   : > { %v639_v38 = vld [vmem:[%s6810_s4 + $0xe60] sm:$0xff]  ;;  %636 = vst [vmem:[%s6815_s5 + $0x720] sm:$0xff] %v635_v36  ;;  %638 = vst [vmem:[%s6815_s5 + $0x728] sm:$0xff] %v637_v37  ;;  %v641_v39 = vld [vmem:[%s6810_s4 + $0xe68] sm:$0xff] }
  0x8c   : > { %640 = vst [vmem:[%s6815_s5 + $0x730] sm:$0xff] %v639_v38  ;;  %v643_v40 = vld [vmem:[%s6810_s4 + $0xe80] sm:$0xff]  ;;  %v645_v41 = vld [vmem:[%s6810_s4 + $0xe88] sm:$0xff]  ;;  %642 = vst [vmem:[%s6815_s5 + $0x738] sm:$0xff] %v641_v39 }
  0x8d   : > { %644 = vst [vmem:[%s6815_s5 + $0x740] sm:$0xff] %v643_v40  ;;  %646 = vst [vmem:[%s6815_s5 + $0x748] sm:$0xff] %v645_v41  ;;  %v647_v42 = vld [vmem:[%s6810_s4 + $0xea0] sm:$0xff]  ;;  %v649_v43 = vld [vmem:[%s6810_s4 + $0xea8] sm:$0xff] }
  0x8e   : > { %v651_v44 = vld [vmem:[%s6810_s4 + $0xec0] sm:$0xff]  ;;  %648 = vst [vmem:[%s6815_s5 + $0x750] sm:$0xff] %v647_v42  ;;  %650 = vst [vmem:[%s6815_s5 + $0x758] sm:$0xff] %v649_v43  ;;  %v653_v45 = vld [vmem:[%s6810_s4 + $0xec8] sm:$0xff] }
  0x8f   : > { %652 = vst [vmem:[%s6815_s5 + $0x760] sm:$0xff] %v651_v44  ;;  %v655_v46 = vld [vmem:[%s6810_s4 + $0xee0] sm:$0xff]  ;;  %v657_v47 = vld [vmem:[%s6810_s4 + $0xee8] sm:$0xff]  ;;  %654 = vst [vmem:[%s6815_s5 + $0x768] sm:$0xff] %v653_v45 }
  0x90   : > { %656 = vst [vmem:[%s6815_s5 + $0x770] sm:$0xff] %v655_v46  ;;  %658 = vst [vmem:[%s6815_s5 + $0x778] sm:$0xff] %v657_v47  ;;  %v659_v48 = vld [vmem:[%s6810_s4 + $0xf00] sm:$0xff]  ;;  %v661_v49 = vld [vmem:[%s6810_s4 + $0xf08] sm:$0xff] }
  0x91   : > { %v663_v50 = vld [vmem:[%s6810_s4 + $0xf20] sm:$0xff]  ;;  %660 = vst [vmem:[%s6815_s5 + $0x780] sm:$0xff] %v659_v48  ;;  %662 = vst [vmem:[%s6815_s5 + $0x788] sm:$0xff] %v661_v49  ;;  %v665_v51 = vld [vmem:[%s6810_s4 + $0xf28] sm:$0xff] }
  0x92   : > { %664 = vst [vmem:[%s6815_s5 + $0x790] sm:$0xff] %v663_v50  ;;  %v667_v52 = vld [vmem:[%s6810_s4 + $0xf40] sm:$0xff]  ;;  %v669_v53 = vld [vmem:[%s6810_s4 + $0xf48] sm:$0xff]  ;;  %666 = vst [vmem:[%s6815_s5 + $0x798] sm:$0xff] %v665_v51 }
  0x93   : > { %668 = vst [vmem:[%s6815_s5 + $0x7a0] sm:$0xff] %v667_v52  ;;  %670 = vst [vmem:[%s6815_s5 + $0x7a8] sm:$0xff] %v669_v53  ;;  %v671_v54 = vld [vmem:[%s6810_s4 + $0xf60] sm:$0xff]  ;;  %v673_v55 = vld [vmem:[%s6810_s4 + $0xf68] sm:$0xff] }
  0x94   : > { %v675_v56 = vld [vmem:[%s6810_s4 + $0xf80] sm:$0xff]  ;;  %672 = vst [vmem:[%s6815_s5 + $0x7b0] sm:$0xff] %v671_v54  ;;  %674 = vst [vmem:[%s6815_s5 + $0x7b8] sm:$0xff] %v673_v55  ;;  %v677_v57 = vld [vmem:[%s6810_s4 + $0xf88] sm:$0xff] }
  0x95   : > { %676 = vst [vmem:[%s6815_s5 + $0x7c0] sm:$0xff] %v675_v56  ;;  %v679_v58 = vld [vmem:[%s6810_s4 + $0xfa0] sm:$0xff]  ;;  %v681_v59 = vld [vmem:[%s6810_s4 + $0xfa8] sm:$0xff]  ;;  %678 = vst [vmem:[%s6815_s5 + $0x7c8] sm:$0xff] %v677_v57 }
  0x96   : > { %680 = vst [vmem:[%s6815_s5 + $0x7d0] sm:$0xff] %v679_v58  ;;  %682 = vst [vmem:[%s6815_s5 + $0x7d8] sm:$0xff] %v681_v59  ;;  %v683_v60 = vld [vmem:[%s6810_s4 + $0xfc0] sm:$0xff]  ;;  %v685_v61 = vld [vmem:[%s6810_s4 + $0xfc8] sm:$0xff] }
  0x97   : > { %v687_v62 = vld [vmem:[%s6810_s4 + $0xfe0] sm:$0xff]  ;;  %684 = vst [vmem:[%s6815_s5 + $0x7e0] sm:$0xff] %v683_v60  ;;  %686 = vst [vmem:[%s6815_s5 + $0x7e8] sm:$0xff] %v685_v61  ;;  %v689_v63 = vld [vmem:[%s6810_s4 + $0xfe8] sm:$0xff] }
  0x98   : > { %688 = vst [vmem:[%s6815_s5 + $0x7f0] sm:$0xff] %v687_v62  ;;  %v691_v0 = vld [vmem:[%s6810_s4 + $0x1000] sm:$0xff]  ;;  %v693_v1 = vld [vmem:[%s6810_s4 + $0x1008] sm:$0xff]  ;;  %690 = vst [vmem:[%s6815_s5 + $0x7f8] sm:$0xff] %v689_v63 }
  0x99   : > { %692 = vst [vmem:[%s6815_s5 + $0x800] sm:$0xff] %v691_v0  ;;  %694 = vst [vmem:[%s6815_s5 + $0x808] sm:$0xff] %v693_v1  ;;  %v695_v2 = vld [vmem:[%s6810_s4 + $0x1020] sm:$0xff]  ;;  %v697_v3 = vld [vmem:[%s6810_s4 + $0x1028] sm:$0xff] }
  0x9a   : > { %v699_v4 = vld [vmem:[%s6810_s4 + $0x1040] sm:$0xff]  ;;  %696 = vst [vmem:[%s6815_s5 + $0x810] sm:$0xff] %v695_v2  ;;  %698 = vst [vmem:[%s6815_s5 + $0x818] sm:$0xff] %v697_v3  ;;  %v701_v5 = vld [vmem:[%s6810_s4 + $0x1048] sm:$0xff] }
  0x9b   : > { %700 = vst [vmem:[%s6815_s5 + $0x820] sm:$0xff] %v699_v4  ;;  %v703_v6 = vld [vmem:[%s6810_s4 + $0x1060] sm:$0xff]  ;;  %v705_v7 = vld [vmem:[%s6810_s4 + $0x1068] sm:$0xff]  ;;  %702 = vst [vmem:[%s6815_s5 + $0x828] sm:$0xff] %v701_v5 }
  0x9c   : > { %704 = vst [vmem:[%s6815_s5 + $0x830] sm:$0xff] %v703_v6  ;;  %706 = vst [vmem:[%s6815_s5 + $0x838] sm:$0xff] %v705_v7  ;;  %v707_v8 = vld [vmem:[%s6810_s4 + $0x1080] sm:$0xff]  ;;  %v709_v9 = vld [vmem:[%s6810_s4 + $0x1088] sm:$0xff] }
  0x9d   : > { %v711_v10 = vld [vmem:[%s6810_s4 + $0x10a0] sm:$0xff]  ;;  %708 = vst [vmem:[%s6815_s5 + $0x840] sm:$0xff] %v707_v8  ;;  %710 = vst [vmem:[%s6815_s5 + $0x848] sm:$0xff] %v709_v9  ;;  %v713_v11 = vld [vmem:[%s6810_s4 + $0x10a8] sm:$0xff] }
  0x9e   : > { %712 = vst [vmem:[%s6815_s5 + $0x850] sm:$0xff] %v711_v10  ;;  %v715_v12 = vld [vmem:[%s6810_s4 + $0x10c0] sm:$0xff]  ;;  %v717_v13 = vld [vmem:[%s6810_s4 + $0x10c8] sm:$0xff]  ;;  %714 = vst [vmem:[%s6815_s5 + $0x858] sm:$0xff] %v713_v11 }
  0x9f   : > { %716 = vst [vmem:[%s6815_s5 + $0x860] sm:$0xff] %v715_v12  ;;  %718 = vst [vmem:[%s6815_s5 + $0x868] sm:$0xff] %v717_v13  ;;  %v719_v14 = vld [vmem:[%s6810_s4 + $0x10e0] sm:$0xff]  ;;  %v721_v15 = vld [vmem:[%s6810_s4 + $0x10e8] sm:$0xff] }
  0xa0   : > { %v723_v16 = vld [vmem:[%s6810_s4 + $0x1100] sm:$0xff]  ;;  %720 = vst [vmem:[%s6815_s5 + $0x870] sm:$0xff] %v719_v14  ;;  %722 = vst [vmem:[%s6815_s5 + $0x878] sm:$0xff] %v721_v15  ;;  %v725_v17 = vld [vmem:[%s6810_s4 + $0x1108] sm:$0xff] }
  0xa1   : > { %724 = vst [vmem:[%s6815_s5 + $0x880] sm:$0xff] %v723_v16  ;;  %v727_v18 = vld [vmem:[%s6810_s4 + $0x1120] sm:$0xff]  ;;  %v729_v19 = vld [vmem:[%s6810_s4 + $0x1128] sm:$0xff]  ;;  %726 = vst [vmem:[%s6815_s5 + $0x888] sm:$0xff] %v725_v17 }
  0xa2   : > { %728 = vst [vmem:[%s6815_s5 + $0x890] sm:$0xff] %v727_v18  ;;  %730 = vst [vmem:[%s6815_s5 + $0x898] sm:$0xff] %v729_v19  ;;  %v731_v20 = vld [vmem:[%s6810_s4 + $0x1140] sm:$0xff]  ;;  %v733_v21 = vld [vmem:[%s6810_s4 + $0x1148] sm:$0xff] }
  0xa3   : > { %v735_v22 = vld [vmem:[%s6810_s4 + $0x1160] sm:$0xff]  ;;  %732 = vst [vmem:[%s6815_s5 + $0x8a0] sm:$0xff] %v731_v20  ;;  %734 = vst [vmem:[%s6815_s5 + $0x8a8] sm:$0xff] %v733_v21  ;;  %v737_v23 = vld [vmem:[%s6810_s4 + $0x1168] sm:$0xff] }
  0xa4   : > { %736 = vst [vmem:[%s6815_s5 + $0x8b0] sm:$0xff] %v735_v22  ;;  %v739_v24 = vld [vmem:[%s6810_s4 + $0x1180] sm:$0xff]  ;;  %v741_v25 = vld [vmem:[%s6810_s4 + $0x1188] sm:$0xff]  ;;  %738 = vst [vmem:[%s6815_s5 + $0x8b8] sm:$0xff] %v737_v23 }
  0xa5   : > { %740 = vst [vmem:[%s6815_s5 + $0x8c0] sm:$0xff] %v739_v24  ;;  %742 = vst [vmem:[%s6815_s5 + $0x8c8] sm:$0xff] %v741_v25  ;;  %v743_v26 = vld [vmem:[%s6810_s4 + $0x11a0] sm:$0xff]  ;;  %v745_v27 = vld [vmem:[%s6810_s4 + $0x11a8] sm:$0xff] }
  0xa6   : > { %v747_v28 = vld [vmem:[%s6810_s4 + $0x11c0] sm:$0xff]  ;;  %744 = vst [vmem:[%s6815_s5 + $0x8d0] sm:$0xff] %v743_v26  ;;  %746 = vst [vmem:[%s6815_s5 + $0x8d8] sm:$0xff] %v745_v27  ;;  %v749_v29 = vld [vmem:[%s6810_s4 + $0x11c8] sm:$0xff] }
  0xa7   : > { %748 = vst [vmem:[%s6815_s5 + $0x8e0] sm:$0xff] %v747_v28  ;;  %v751_v30 = vld [vmem:[%s6810_s4 + $0x11e0] sm:$0xff]  ;;  %v753_v31 = vld [vmem:[%s6810_s4 + $0x11e8] sm:$0xff]  ;;  %750 = vst [vmem:[%s6815_s5 + $0x8e8] sm:$0xff] %v749_v29 }
  0xa8   : > { %752 = vst [vmem:[%s6815_s5 + $0x8f0] sm:$0xff] %v751_v30  ;;  %754 = vst [vmem:[%s6815_s5 + $0x8f8] sm:$0xff] %v753_v31  ;;  %v755_v32 = vld [vmem:[%s6810_s4 + $0x1200] sm:$0xff]  ;;  %v757_v33 = vld [vmem:[%s6810_s4 + $0x1208] sm:$0xff] }
  0xa9   : > { %v759_v34 = vld [vmem:[%s6810_s4 + $0x1220] sm:$0xff]  ;;  %756 = vst [vmem:[%s6815_s5 + $0x900] sm:$0xff] %v755_v32  ;;  %758 = vst [vmem:[%s6815_s5 + $0x908] sm:$0xff] %v757_v33  ;;  %v761_v35 = vld [vmem:[%s6810_s4 + $0x1228] sm:$0xff] }
  0xaa   : > { %760 = vst [vmem:[%s6815_s5 + $0x910] sm:$0xff] %v759_v34  ;;  %v763_v36 = vld [vmem:[%s6810_s4 + $0x1240] sm:$0xff]  ;;  %v765_v37 = vld [vmem:[%s6810_s4 + $0x1248] sm:$0xff]  ;;  %762 = vst [vmem:[%s6815_s5 + $0x918] sm:$0xff] %v761_v35 }
  0xab   : > { %764 = vst [vmem:[%s6815_s5 + $0x920] sm:$0xff] %v763_v36  ;;  %766 = vst [vmem:[%s6815_s5 + $0x928] sm:$0xff] %v765_v37  ;;  %v767_v38 = vld [vmem:[%s6810_s4 + $0x1260] sm:$0xff]  ;;  %v769_v39 = vld [vmem:[%s6810_s4 + $0x1268] sm:$0xff] }
  0xac   : > { %v771_v40 = vld [vmem:[%s6810_s4 + $0x1280] sm:$0xff]  ;;  %768 = vst [vmem:[%s6815_s5 + $0x930] sm:$0xff] %v767_v38  ;;  %770 = vst [vmem:[%s6815_s5 + $0x938] sm:$0xff] %v769_v39  ;;  %v773_v41 = vld [vmem:[%s6810_s4 + $0x1288] sm:$0xff] }
  0xad   : > { %772 = vst [vmem:[%s6815_s5 + $0x940] sm:$0xff] %v771_v40  ;;  %v775_v42 = vld [vmem:[%s6810_s4 + $0x12a0] sm:$0xff]  ;;  %v777_v43 = vld [vmem:[%s6810_s4 + $0x12a8] sm:$0xff]  ;;  %774 = vst [vmem:[%s6815_s5 + $0x948] sm:$0xff] %v773_v41 }
  0xae   : > { %776 = vst [vmem:[%s6815_s5 + $0x950] sm:$0xff] %v775_v42  ;;  %778 = vst [vmem:[%s6815_s5 + $0x958] sm:$0xff] %v777_v43  ;;  %v779_v44 = vld [vmem:[%s6810_s4 + $0x12c0] sm:$0xff]  ;;  %v781_v45 = vld [vmem:[%s6810_s4 + $0x12c8] sm:$0xff] }
  0xaf   : > { %v783_v46 = vld [vmem:[%s6810_s4 + $0x12e0] sm:$0xff]  ;;  %780 = vst [vmem:[%s6815_s5 + $0x960] sm:$0xff] %v779_v44  ;;  %782 = vst [vmem:[%s6815_s5 + $0x968] sm:$0xff] %v781_v45  ;;  %v785_v47 = vld [vmem:[%s6810_s4 + $0x12e8] sm:$0xff] }
  0xb0   : > { %784 = vst [vmem:[%s6815_s5 + $0x970] sm:$0xff] %v783_v46  ;;  %v787_v48 = vld [vmem:[%s6810_s4 + $0x1300] sm:$0xff]  ;;  %v789_v49 = vld [vmem:[%s6810_s4 + $0x1308] sm:$0xff]  ;;  %786 = vst [vmem:[%s6815_s5 + $0x978] sm:$0xff] %v785_v47 }
  0xb1   : > { %788 = vst [vmem:[%s6815_s5 + $0x980] sm:$0xff] %v787_v48  ;;  %790 = vst [vmem:[%s6815_s5 + $0x988] sm:$0xff] %v789_v49  ;;  %v791_v50 = vld [vmem:[%s6810_s4 + $0x1320] sm:$0xff]  ;;  %v793_v51 = vld [vmem:[%s6810_s4 + $0x1328] sm:$0xff] }
  0xb2   : > { %v795_v52 = vld [vmem:[%s6810_s4 + $0x1340] sm:$0xff]  ;;  %792 = vst [vmem:[%s6815_s5 + $0x990] sm:$0xff] %v791_v50  ;;  %794 = vst [vmem:[%s6815_s5 + $0x998] sm:$0xff] %v793_v51  ;;  %v797_v53 = vld [vmem:[%s6810_s4 + $0x1348] sm:$0xff] }
  0xb3   : > { %796 = vst [vmem:[%s6815_s5 + $0x9a0] sm:$0xff] %v795_v52  ;;  %v799_v54 = vld [vmem:[%s6810_s4 + $0x1360] sm:$0xff]  ;;  %v801_v55 = vld [vmem:[%s6810_s4 + $0x1368] sm:$0xff]  ;;  %798 = vst [vmem:[%s6815_s5 + $0x9a8] sm:$0xff] %v797_v53 }
  0xb4   : > { %800 = vst [vmem:[%s6815_s5 + $0x9b0] sm:$0xff] %v799_v54  ;;  %802 = vst [vmem:[%s6815_s5 + $0x9b8] sm:$0xff] %v801_v55  ;;  %v803_v56 = vld [vmem:[%s6810_s4 + $0x1380] sm:$0xff]  ;;  %v805_v57 = vld [vmem:[%s6810_s4 + $0x1388] sm:$0xff] }
  0xb5   : > { %v807_v58 = vld [vmem:[%s6810_s4 + $0x13a0] sm:$0xff]  ;;  %804 = vst [vmem:[%s6815_s5 + $0x9c0] sm:$0xff] %v803_v56  ;;  %806 = vst [vmem:[%s6815_s5 + $0x9c8] sm:$0xff] %v805_v57  ;;  %v809_v59 = vld [vmem:[%s6810_s4 + $0x13a8] sm:$0xff] }
  0xb6   : > { %808 = vst [vmem:[%s6815_s5 + $0x9d0] sm:$0xff] %v807_v58  ;;  %v811_v60 = vld [vmem:[%s6810_s4 + $0x13c0] sm:$0xff]  ;;  %v813_v61 = vld [vmem:[%s6810_s4 + $0x13c8] sm:$0xff]  ;;  %810 = vst [vmem:[%s6815_s5 + $0x9d8] sm:$0xff] %v809_v59 }
  0xb7   : > { %812 = vst [vmem:[%s6815_s5 + $0x9e0] sm:$0xff] %v811_v60  ;;  %814 = vst [vmem:[%s6815_s5 + $0x9e8] sm:$0xff] %v813_v61  ;;  %v815_v62 = vld [vmem:[%s6810_s4 + $0x13e0] sm:$0xff]  ;;  %v817_v63 = vld [vmem:[%s6810_s4 + $0x13e8] sm:$0xff] }
  0xb8   : > { %v819_v0 = vld [vmem:[%s6810_s4 + $0x1400] sm:$0xff]  ;;  %816 = vst [vmem:[%s6815_s5 + $0x9f0] sm:$0xff] %v815_v62  ;;  %818 = vst [vmem:[%s6815_s5 + $0x9f8] sm:$0xff] %v817_v63  ;;  %v821_v1 = vld [vmem:[%s6810_s4 + $0x1408] sm:$0xff] }
  0xb9   : > { %820 = vst [vmem:[%s6815_s5 + $0xa00] sm:$0xff] %v819_v0  ;;  %v823_v2 = vld [vmem:[%s6810_s4 + $0x1420] sm:$0xff]  ;;  %v825_v3 = vld [vmem:[%s6810_s4 + $0x1428] sm:$0xff]  ;;  %822 = vst [vmem:[%s6815_s5 + $0xa08] sm:$0xff] %v821_v1 }
  0xba   : > { %824 = vst [vmem:[%s6815_s5 + $0xa10] sm:$0xff] %v823_v2  ;;  %826 = vst [vmem:[%s6815_s5 + $0xa18] sm:$0xff] %v825_v3  ;;  %v827_v4 = vld [vmem:[%s6810_s4 + $0x1440] sm:$0xff]  ;;  %v829_v5 = vld [vmem:[%s6810_s4 + $0x1448] sm:$0xff] }
  0xbb   : > { %v831_v6 = vld [vmem:[%s6810_s4 + $0x1460] sm:$0xff]  ;;  %828 = vst [vmem:[%s6815_s5 + $0xa20] sm:$0xff] %v827_v4  ;;  %830 = vst [vmem:[%s6815_s5 + $0xa28] sm:$0xff] %v829_v5  ;;  %v833_v7 = vld [vmem:[%s6810_s4 + $0x1468] sm:$0xff] }
  0xbc   : > { %832 = vst [vmem:[%s6815_s5 + $0xa30] sm:$0xff] %v831_v6  ;;  %v835_v8 = vld [vmem:[%s6810_s4 + $0x1480] sm:$0xff]  ;;  %v837_v9 = vld [vmem:[%s6810_s4 + $0x1488] sm:$0xff]  ;;  %834 = vst [vmem:[%s6815_s5 + $0xa38] sm:$0xff] %v833_v7 }
  0xbd   : > { %836 = vst [vmem:[%s6815_s5 + $0xa40] sm:$0xff] %v835_v8  ;;  %838 = vst [vmem:[%s6815_s5 + $0xa48] sm:$0xff] %v837_v9  ;;  %v839_v10 = vld [vmem:[%s6810_s4 + $0x14a0] sm:$0xff]  ;;  %v841_v11 = vld [vmem:[%s6810_s4 + $0x14a8] sm:$0xff] }
  0xbe   : > { %v843_v12 = vld [vmem:[%s6810_s4 + $0x14c0] sm:$0xff]  ;;  %840 = vst [vmem:[%s6815_s5 + $0xa50] sm:$0xff] %v839_v10  ;;  %842 = vst [vmem:[%s6815_s5 + $0xa58] sm:$0xff] %v841_v11  ;;  %v845_v13 = vld [vmem:[%s6810_s4 + $0x14c8] sm:$0xff] }
  0xbf   : > { %844 = vst [vmem:[%s6815_s5 + $0xa60] sm:$0xff] %v843_v12  ;;  %v847_v14 = vld [vmem:[%s6810_s4 + $0x14e0] sm:$0xff]  ;;  %v849_v15 = vld [vmem:[%s6810_s4 + $0x14e8] sm:$0xff]  ;;  %846 = vst [vmem:[%s6815_s5 + $0xa68] sm:$0xff] %v845_v13 }
  0xc0   : > { %848 = vst [vmem:[%s6815_s5 + $0xa70] sm:$0xff] %v847_v14  ;;  %850 = vst [vmem:[%s6815_s5 + $0xa78] sm:$0xff] %v849_v15  ;;  %v851_v16 = vld [vmem:[%s6810_s4 + $0x1500] sm:$0xff]  ;;  %v853_v17 = vld [vmem:[%s6810_s4 + $0x1508] sm:$0xff] }
  0xc1   : > { %v855_v18 = vld [vmem:[%s6810_s4 + $0x1520] sm:$0xff]  ;;  %852 = vst [vmem:[%s6815_s5 + $0xa80] sm:$0xff] %v851_v16  ;;  %854 = vst [vmem:[%s6815_s5 + $0xa88] sm:$0xff] %v853_v17  ;;  %v857_v19 = vld [vmem:[%s6810_s4 + $0x1528] sm:$0xff] }
  0xc2   : > { %856 = vst [vmem:[%s6815_s5 + $0xa90] sm:$0xff] %v855_v18  ;;  %v859_v20 = vld [vmem:[%s6810_s4 + $0x1540] sm:$0xff]  ;;  %v861_v21 = vld [vmem:[%s6810_s4 + $0x1548] sm:$0xff]  ;;  %858 = vst [vmem:[%s6815_s5 + $0xa98] sm:$0xff] %v857_v19 }
  0xc3   : > { %860 = vst [vmem:[%s6815_s5 + $0xaa0] sm:$0xff] %v859_v20  ;;  %862 = vst [vmem:[%s6815_s5 + $0xaa8] sm:$0xff] %v861_v21  ;;  %v863_v22 = vld [vmem:[%s6810_s4 + $0x1560] sm:$0xff]  ;;  %v865_v23 = vld [vmem:[%s6810_s4 + $0x1568] sm:$0xff] }
  0xc4   : > { %v867_v24 = vld [vmem:[%s6810_s4 + $0x1580] sm:$0xff]  ;;  %864 = vst [vmem:[%s6815_s5 + $0xab0] sm:$0xff] %v863_v22  ;;  %866 = vst [vmem:[%s6815_s5 + $0xab8] sm:$0xff] %v865_v23  ;;  %v869_v25 = vld [vmem:[%s6810_s4 + $0x1588] sm:$0xff] }
  0xc5   : > { %868 = vst [vmem:[%s6815_s5 + $0xac0] sm:$0xff] %v867_v24  ;;  %v871_v26 = vld [vmem:[%s6810_s4 + $0x15a0] sm:$0xff]  ;;  %v873_v27 = vld [vmem:[%s6810_s4 + $0x15a8] sm:$0xff]  ;;  %870 = vst [vmem:[%s6815_s5 + $0xac8] sm:$0xff] %v869_v25 }
  0xc6   : > { %872 = vst [vmem:[%s6815_s5 + $0xad0] sm:$0xff] %v871_v26  ;;  %874 = vst [vmem:[%s6815_s5 + $0xad8] sm:$0xff] %v873_v27  ;;  %v875_v28 = vld [vmem:[%s6810_s4 + $0x15c0] sm:$0xff]  ;;  %v877_v29 = vld [vmem:[%s6810_s4 + $0x15c8] sm:$0xff] }
  0xc7   : > { %v879_v30 = vld [vmem:[%s6810_s4 + $0x15e0] sm:$0xff]  ;;  %876 = vst [vmem:[%s6815_s5 + $0xae0] sm:$0xff] %v875_v28  ;;  %878 = vst [vmem:[%s6815_s5 + $0xae8] sm:$0xff] %v877_v29  ;;  %v881_v31 = vld [vmem:[%s6810_s4 + $0x15e8] sm:$0xff] }
  0xc8   : > { %880 = vst [vmem:[%s6815_s5 + $0xaf0] sm:$0xff] %v879_v30  ;;  %v883_v32 = vld [vmem:[%s6810_s4 + $0x1600] sm:$0xff]  ;;  %v885_v33 = vld [vmem:[%s6810_s4 + $0x1608] sm:$0xff]  ;;  %882 = vst [vmem:[%s6815_s5 + $0xaf8] sm:$0xff] %v881_v31 }
  0xc9   : > { %884 = vst [vmem:[%s6815_s5 + $0xb00] sm:$0xff] %v883_v32  ;;  %886 = vst [vmem:[%s6815_s5 + $0xb08] sm:$0xff] %v885_v33  ;;  %v887_v34 = vld [vmem:[%s6810_s4 + $0x1620] sm:$0xff]  ;;  %v889_v35 = vld [vmem:[%s6810_s4 + $0x1628] sm:$0xff] }
  0xca   : > { %v891_v36 = vld [vmem:[%s6810_s4 + $0x1640] sm:$0xff]  ;;  %888 = vst [vmem:[%s6815_s5 + $0xb10] sm:$0xff] %v887_v34  ;;  %890 = vst [vmem:[%s6815_s5 + $0xb18] sm:$0xff] %v889_v35  ;;  %v893_v37 = vld [vmem:[%s6810_s4 + $0x1648] sm:$0xff] }
  0xcb   : > { %892 = vst [vmem:[%s6815_s5 + $0xb20] sm:$0xff] %v891_v36  ;;  %v895_v38 = vld [vmem:[%s6810_s4 + $0x1660] sm:$0xff]  ;;  %v897_v39 = vld [vmem:[%s6810_s4 + $0x1668] sm:$0xff]  ;;  %894 = vst [vmem:[%s6815_s5 + $0xb28] sm:$0xff] %v893_v37 }
  0xcc   : > { %896 = vst [vmem:[%s6815_s5 + $0xb30] sm:$0xff] %v895_v38  ;;  %898 = vst [vmem:[%s6815_s5 + $0xb38] sm:$0xff] %v897_v39  ;;  %v899_v40 = vld [vmem:[%s6810_s4 + $0x1680] sm:$0xff]  ;;  %v901_v41 = vld [vmem:[%s6810_s4 + $0x1688] sm:$0xff] }
  0xcd   : > { %v903_v42 = vld [vmem:[%s6810_s4 + $0x16a0] sm:$0xff]  ;;  %900 = vst [vmem:[%s6815_s5 + $0xb40] sm:$0xff] %v899_v40  ;;  %902 = vst [vmem:[%s6815_s5 + $0xb48] sm:$0xff] %v901_v41  ;;  %v905_v43 = vld [vmem:[%s6810_s4 + $0x16a8] sm:$0xff] }
  0xce   : > { %904 = vst [vmem:[%s6815_s5 + $0xb50] sm:$0xff] %v903_v42  ;;  %v907_v44 = vld [vmem:[%s6810_s4 + $0x16c0] sm:$0xff]  ;;  %v909_v45 = vld [vmem:[%s6810_s4 + $0x16c8] sm:$0xff]  ;;  %906 = vst [vmem:[%s6815_s5 + $0xb58] sm:$0xff] %v905_v43 }
  0xcf   : > { %908 = vst [vmem:[%s6815_s5 + $0xb60] sm:$0xff] %v907_v44  ;;  %910 = vst [vmem:[%s6815_s5 + $0xb68] sm:$0xff] %v909_v45  ;;  %v911_v46 = vld [vmem:[%s6810_s4 + $0x16e0] sm:$0xff]  ;;  %v913_v47 = vld [vmem:[%s6810_s4 + $0x16e8] sm:$0xff] }
  0xd0   : > { %v915_v48 = vld [vmem:[%s6810_s4 + $0x1700] sm:$0xff]  ;;  %912 = vst [vmem:[%s6815_s5 + $0xb70] sm:$0xff] %v911_v46  ;;  %914 = vst [vmem:[%s6815_s5 + $0xb78] sm:$0xff] %v913_v47  ;;  %v917_v49 = vld [vmem:[%s6810_s4 + $0x1708] sm:$0xff] }
  0xd1   : > { %916 = vst [vmem:[%s6815_s5 + $0xb80] sm:$0xff] %v915_v48  ;;  %v919_v50 = vld [vmem:[%s6810_s4 + $0x1720] sm:$0xff]  ;;  %v921_v51 = vld [vmem:[%s6810_s4 + $0x1728] sm:$0xff]  ;;  %918 = vst [vmem:[%s6815_s5 + $0xb88] sm:$0xff] %v917_v49 }
  0xd2   : > { %920 = vst [vmem:[%s6815_s5 + $0xb90] sm:$0xff] %v919_v50  ;;  %922 = vst [vmem:[%s6815_s5 + $0xb98] sm:$0xff] %v921_v51  ;;  %v923_v52 = vld [vmem:[%s6810_s4 + $0x1740] sm:$0xff]  ;;  %v925_v53 = vld [vmem:[%s6810_s4 + $0x1748] sm:$0xff] }
  0xd3   : > { %v927_v54 = vld [vmem:[%s6810_s4 + $0x1760] sm:$0xff]  ;;  %924 = vst [vmem:[%s6815_s5 + $0xba0] sm:$0xff] %v923_v52  ;;  %926 = vst [vmem:[%s6815_s5 + $0xba8] sm:$0xff] %v925_v53  ;;  %v929_v55 = vld [vmem:[%s6810_s4 + $0x1768] sm:$0xff] }
  0xd4   : > { %928 = vst [vmem:[%s6815_s5 + $0xbb0] sm:$0xff] %v927_v54  ;;  %v931_v56 = vld [vmem:[%s6810_s4 + $0x1780] sm:$0xff]  ;;  %v933_v57 = vld [vmem:[%s6810_s4 + $0x1788] sm:$0xff]  ;;  %930 = vst [vmem:[%s6815_s5 + $0xbb8] sm:$0xff] %v929_v55 }
  0xd5   : > { %932 = vst [vmem:[%s6815_s5 + $0xbc0] sm:$0xff] %v931_v56  ;;  %934 = vst [vmem:[%s6815_s5 + $0xbc8] sm:$0xff] %v933_v57  ;;  %v935_v58 = vld [vmem:[%s6810_s4 + $0x17a0] sm:$0xff]  ;;  %v937_v59 = vld [vmem:[%s6810_s4 + $0x17a8] sm:$0xff] }
  0xd6   : > { %v939_v60 = vld [vmem:[%s6810_s4 + $0x17c0] sm:$0xff]  ;;  %936 = vst [vmem:[%s6815_s5 + $0xbd0] sm:$0xff] %v935_v58  ;;  %938 = vst [vmem:[%s6815_s5 + $0xbd8] sm:$0xff] %v937_v59  ;;  %v941_v61 = vld [vmem:[%s6810_s4 + $0x17c8] sm:$0xff] }
  0xd7   : > { %940 = vst [vmem:[%s6815_s5 + $0xbe0] sm:$0xff] %v939_v60  ;;  %v943_v62 = vld [vmem:[%s6810_s4 + $0x17e0] sm:$0xff]  ;;  %v945_v63 = vld [vmem:[%s6810_s4 + $0x17e8] sm:$0xff]  ;;  %942 = vst [vmem:[%s6815_s5 + $0xbe8] sm:$0xff] %v941_v61 }
  0xd8   : > { %944 = vst [vmem:[%s6815_s5 + $0xbf0] sm:$0xff] %v943_v62  ;;  %946 = vst [vmem:[%s6815_s5 + $0xbf8] sm:$0xff] %v945_v63  ;;  %v947_v0 = vld [vmem:[%s6810_s4 + $0x1800] sm:$0xff]  ;;  %v949_v1 = vld [vmem:[%s6810_s4 + $0x1808] sm:$0xff] }
  0xd9   : > { %v951_v2 = vld [vmem:[%s6810_s4 + $0x1820] sm:$0xff]  ;;  %948 = vst [vmem:[%s6815_s5 + $0xc00] sm:$0xff] %v947_v0  ;;  %950 = vst [vmem:[%s6815_s5 + $0xc08] sm:$0xff] %v949_v1  ;;  %v953_v3 = vld [vmem:[%s6810_s4 + $0x1828] sm:$0xff] }
  0xda   : > { %952 = vst [vmem:[%s6815_s5 + $0xc10] sm:$0xff] %v951_v2  ;;  %v955_v4 = vld [vmem:[%s6810_s4 + $0x1840] sm:$0xff]  ;;  %v957_v5 = vld [vmem:[%s6810_s4 + $0x1848] sm:$0xff]  ;;  %954 = vst [vmem:[%s6815_s5 + $0xc18] sm:$0xff] %v953_v3 }
  0xdb   : > { %956 = vst [vmem:[%s6815_s5 + $0xc20] sm:$0xff] %v955_v4  ;;  %958 = vst [vmem:[%s6815_s5 + $0xc28] sm:$0xff] %v957_v5  ;;  %v959_v6 = vld [vmem:[%s6810_s4 + $0x1860] sm:$0xff]  ;;  %v961_v7 = vld [vmem:[%s6810_s4 + $0x1868] sm:$0xff] }
  0xdc   : > { %v963_v8 = vld [vmem:[%s6810_s4 + $0x1880] sm:$0xff]  ;;  %960 = vst [vmem:[%s6815_s5 + $0xc30] sm:$0xff] %v959_v6  ;;  %962 = vst [vmem:[%s6815_s5 + $0xc38] sm:$0xff] %v961_v7  ;;  %v965_v9 = vld [vmem:[%s6810_s4 + $0x1888] sm:$0xff] }
  0xdd   : > { %964 = vst [vmem:[%s6815_s5 + $0xc40] sm:$0xff] %v963_v8  ;;  %v967_v10 = vld [vmem:[%s6810_s4 + $0x18a0] sm:$0xff]  ;;  %v969_v11 = vld [vmem:[%s6810_s4 + $0x18a8] sm:$0xff]  ;;  %966 = vst [vmem:[%s6815_s5 + $0xc48] sm:$0xff] %v965_v9 }
  0xde   : > { %968 = vst [vmem:[%s6815_s5 + $0xc50] sm:$0xff] %v967_v10  ;;  %970 = vst [vmem:[%s6815_s5 + $0xc58] sm:$0xff] %v969_v11  ;;  %v971_v12 = vld [vmem:[%s6810_s4 + $0x18c0] sm:$0xff]  ;;  %v973_v13 = vld [vmem:[%s6810_s4 + $0x18c8] sm:$0xff] }
  0xdf   : > { %v975_v14 = vld [vmem:[%s6810_s4 + $0x18e0] sm:$0xff]  ;;  %972 = vst [vmem:[%s6815_s5 + $0xc60] sm:$0xff] %v971_v12  ;;  %974 = vst [vmem:[%s6815_s5 + $0xc68] sm:$0xff] %v973_v13  ;;  %v977_v15 = vld [vmem:[%s6810_s4 + $0x18e8] sm:$0xff] }
  0xe0   : > { %976 = vst [vmem:[%s6815_s5 + $0xc70] sm:$0xff] %v975_v14  ;;  %v979_v16 = vld [vmem:[%s6810_s4 + $0x1900] sm:$0xff]  ;;  %v981_v17 = vld [vmem:[%s6810_s4 + $0x1908] sm:$0xff]  ;;  %978 = vst [vmem:[%s6815_s5 + $0xc78] sm:$0xff] %v977_v15 }
  0xe1   : > { %980 = vst [vmem:[%s6815_s5 + $0xc80] sm:$0xff] %v979_v16  ;;  %982 = vst [vmem:[%s6815_s5 + $0xc88] sm:$0xff] %v981_v17  ;;  %v983_v18 = vld [vmem:[%s6810_s4 + $0x1920] sm:$0xff]  ;;  %v985_v19 = vld [vmem:[%s6810_s4 + $0x1928] sm:$0xff] }
  0xe2   : > { %v987_v20 = vld [vmem:[%s6810_s4 + $0x1940] sm:$0xff]  ;;  %984 = vst [vmem:[%s6815_s5 + $0xc90] sm:$0xff] %v983_v18  ;;  %986 = vst [vmem:[%s6815_s5 + $0xc98] sm:$0xff] %v985_v19  ;;  %v989_v21 = vld [vmem:[%s6810_s4 + $0x1948] sm:$0xff] }
  0xe3   : > { %988 = vst [vmem:[%s6815_s5 + $0xca0] sm:$0xff] %v987_v20  ;;  %v991_v22 = vld [vmem:[%s6810_s4 + $0x1960] sm:$0xff]  ;;  %v993_v23 = vld [vmem:[%s6810_s4 + $0x1968] sm:$0xff]  ;;  %990 = vst [vmem:[%s6815_s5 + $0xca8] sm:$0xff] %v989_v21 }
  0xe4   : > { %992 = vst [vmem:[%s6815_s5 + $0xcb0] sm:$0xff] %v991_v22  ;;  %994 = vst [vmem:[%s6815_s5 + $0xcb8] sm:$0xff] %v993_v23  ;;  %v995_v24 = vld [vmem:[%s6810_s4 + $0x1980] sm:$0xff]  ;;  %v997_v25 = vld [vmem:[%s6810_s4 + $0x1988] sm:$0xff] }
  0xe5   : > { %v999_v26 = vld [vmem:[%s6810_s4 + $0x19a0] sm:$0xff]  ;;  %996 = vst [vmem:[%s6815_s5 + $0xcc0] sm:$0xff] %v995_v24  ;;  %998 = vst [vmem:[%s6815_s5 + $0xcc8] sm:$0xff] %v997_v25  ;;  %v1001_v27 = vld [vmem:[%s6810_s4 + $0x19a8] sm:$0xff] }
  0xe6   : > { %1000 = vst [vmem:[%s6815_s5 + $0xcd0] sm:$0xff] %v999_v26  ;;  %v1003_v28 = vld [vmem:[%s6810_s4 + $0x19c0] sm:$0xff]  ;;  %v1005_v29 = vld [vmem:[%s6810_s4 + $0x19c8] sm:$0xff]  ;;  %1002 = vst [vmem:[%s6815_s5 + $0xcd8] sm:$0xff] %v1001_v27 }
  0xe7   : > { %1004 = vst [vmem:[%s6815_s5 + $0xce0] sm:$0xff] %v1003_v28  ;;  %1006 = vst [vmem:[%s6815_s5 + $0xce8] sm:$0xff] %v1005_v29  ;;  %v1007_v30 = vld [vmem:[%s6810_s4 + $0x19e0] sm:$0xff]  ;;  %v1009_v31 = vld [vmem:[%s6810_s4 + $0x19e8] sm:$0xff] }
  0xe8   : > { %v1011_v32 = vld [vmem:[%s6810_s4 + $0x1a00] sm:$0xff]  ;;  %1008 = vst [vmem:[%s6815_s5 + $0xcf0] sm:$0xff] %v1007_v30  ;;  %1010 = vst [vmem:[%s6815_s5 + $0xcf8] sm:$0xff] %v1009_v31  ;;  %v1013_v33 = vld [vmem:[%s6810_s4 + $0x1a08] sm:$0xff] }
  0xe9   : > { %1012 = vst [vmem:[%s6815_s5 + $0xd00] sm:$0xff] %v1011_v32  ;;  %v1015_v34 = vld [vmem:[%s6810_s4 + $0x1a20] sm:$0xff]  ;;  %v1017_v35 = vld [vmem:[%s6810_s4 + $0x1a28] sm:$0xff]  ;;  %1014 = vst [vmem:[%s6815_s5 + $0xd08] sm:$0xff] %v1013_v33 }
  0xea   : > { %1016 = vst [vmem:[%s6815_s5 + $0xd10] sm:$0xff] %v1015_v34  ;;  %1018 = vst [vmem:[%s6815_s5 + $0xd18] sm:$0xff] %v1017_v35  ;;  %v1019_v36 = vld [vmem:[%s6810_s4 + $0x1a40] sm:$0xff]  ;;  %v1021_v37 = vld [vmem:[%s6810_s4 + $0x1a48] sm:$0xff] }
  0xeb   : > { %v1023_v38 = vld [vmem:[%s6810_s4 + $0x1a60] sm:$0xff]  ;;  %1020 = vst [vmem:[%s6815_s5 + $0xd20] sm:$0xff] %v1019_v36  ;;  %1022 = vst [vmem:[%s6815_s5 + $0xd28] sm:$0xff] %v1021_v37  ;;  %v1025_v39 = vld [vmem:[%s6810_s4 + $0x1a68] sm:$0xff] }
  0xec   : > { %1024 = vst [vmem:[%s6815_s5 + $0xd30] sm:$0xff] %v1023_v38  ;;  %v1027_v40 = vld [vmem:[%s6810_s4 + $0x1a80] sm:$0xff]  ;;  %v1029_v41 = vld [vmem:[%s6810_s4 + $0x1a88] sm:$0xff]  ;;  %1026 = vst [vmem:[%s6815_s5 + $0xd38] sm:$0xff] %v1025_v39 }
  0xed   : > { %1028 = vst [vmem:[%s6815_s5 + $0xd40] sm:$0xff] %v1027_v40  ;;  %1030 = vst [vmem:[%s6815_s5 + $0xd48] sm:$0xff] %v1029_v41  ;;  %v1031_v42 = vld [vmem:[%s6810_s4 + $0x1aa0] sm:$0xff]  ;;  %v1033_v43 = vld [vmem:[%s6810_s4 + $0x1aa8] sm:$0xff] }
  0xee   : > { %v1035_v44 = vld [vmem:[%s6810_s4 + $0x1ac0] sm:$0xff]  ;;  %1032 = vst [vmem:[%s6815_s5 + $0xd50] sm:$0xff] %v1031_v42  ;;  %1034 = vst [vmem:[%s6815_s5 + $0xd58] sm:$0xff] %v1033_v43  ;;  %v1037_v45 = vld [vmem:[%s6810_s4 + $0x1ac8] sm:$0xff] }
  0xef   : > { %1036 = vst [vmem:[%s6815_s5 + $0xd60] sm:$0xff] %v1035_v44  ;;  %v1039_v46 = vld [vmem:[%s6810_s4 + $0x1ae0] sm:$0xff]  ;;  %v1041_v47 = vld [vmem:[%s6810_s4 + $0x1ae8] sm:$0xff]  ;;  %1038 = vst [vmem:[%s6815_s5 + $0xd68] sm:$0xff] %v1037_v45 }
  0xf0   : > { %1040 = vst [vmem:[%s6815_s5 + $0xd70] sm:$0xff] %v1039_v46  ;;  %1042 = vst [vmem:[%s6815_s5 + $0xd78] sm:$0xff] %v1041_v47  ;;  %v1043_v48 = vld [vmem:[%s6810_s4 + $0x1b00] sm:$0xff]  ;;  %v1045_v49 = vld [vmem:[%s6810_s4 + $0x1b08] sm:$0xff] }
  0xf1   : > { %v1047_v50 = vld [vmem:[%s6810_s4 + $0x1b20] sm:$0xff]  ;;  %1044 = vst [vmem:[%s6815_s5 + $0xd80] sm:$0xff] %v1043_v48  ;;  %1046 = vst [vmem:[%s6815_s5 + $0xd88] sm:$0xff] %v1045_v49  ;;  %v1049_v51 = vld [vmem:[%s6810_s4 + $0x1b28] sm:$0xff] }
  0xf2   : > { %1048 = vst [vmem:[%s6815_s5 + $0xd90] sm:$0xff] %v1047_v50  ;;  %v1051_v52 = vld [vmem:[%s6810_s4 + $0x1b40] sm:$0xff]  ;;  %v1053_v53 = vld [vmem:[%s6810_s4 + $0x1b48] sm:$0xff]  ;;  %1050 = vst [vmem:[%s6815_s5 + $0xd98] sm:$0xff] %v1049_v51 }
  0xf3   : > { %1052 = vst [vmem:[%s6815_s5 + $0xda0] sm:$0xff] %v1051_v52  ;;  %1054 = vst [vmem:[%s6815_s5 + $0xda8] sm:$0xff] %v1053_v53  ;;  %v1055_v54 = vld [vmem:[%s6810_s4 + $0x1b60] sm:$0xff]  ;;  %v1057_v55 = vld [vmem:[%s6810_s4 + $0x1b68] sm:$0xff] }
  0xf4   : > { %v1059_v56 = vld [vmem:[%s6810_s4 + $0x1b80] sm:$0xff]  ;;  %1056 = vst [vmem:[%s6815_s5 + $0xdb0] sm:$0xff] %v1055_v54  ;;  %1058 = vst [vmem:[%s6815_s5 + $0xdb8] sm:$0xff] %v1057_v55  ;;  %v1061_v57 = vld [vmem:[%s6810_s4 + $0x1b88] sm:$0xff] }
  0xf5   : > { %1060 = vst [vmem:[%s6815_s5 + $0xdc0] sm:$0xff] %v1059_v56  ;;  %v1063_v58 = vld [vmem:[%s6810_s4 + $0x1ba0] sm:$0xff]  ;;  %v1065_v59 = vld [vmem:[%s6810_s4 + $0x1ba8] sm:$0xff]  ;;  %1062 = vst [vmem:[%s6815_s5 + $0xdc8] sm:$0xff] %v1061_v57 }
  0xf6   : > { %1064 = vst [vmem:[%s6815_s5 + $0xdd0] sm:$0xff] %v1063_v58  ;;  %1066 = vst [vmem:[%s6815_s5 + $0xdd8] sm:$0xff] %v1065_v59  ;;  %v1067_v60 = vld [vmem:[%s6810_s4 + $0x1bc0] sm:$0xff]  ;;  %v1069_v61 = vld [vmem:[%s6810_s4 + $0x1bc8] sm:$0xff] }
  0xf7   : > { %v1071_v62 = vld [vmem:[%s6810_s4 + $0x1be0] sm:$0xff]  ;;  %1068 = vst [vmem:[%s6815_s5 + $0xde0] sm:$0xff] %v1067_v60  ;;  %1070 = vst [vmem:[%s6815_s5 + $0xde8] sm:$0xff] %v1069_v61  ;;  %v1073_v63 = vld [vmem:[%s6810_s4 + $0x1be8] sm:$0xff] }
  0xf8   : > { %1072 = vst [vmem:[%s6815_s5 + $0xdf0] sm:$0xff] %v1071_v62  ;;  %v1075_v0 = vld [vmem:[%s6810_s4 + $0x1c00] sm:$0xff]  ;;  %v1077_v1 = vld [vmem:[%s6810_s4 + $0x1c08] sm:$0xff]  ;;  %1074 = vst [vmem:[%s6815_s5 + $0xdf8] sm:$0xff] %v1073_v63 }
  0xf9   : > { %1076 = vst [vmem:[%s6815_s5 + $0xe00] sm:$0xff] %v1075_v0  ;;  %1078 = vst [vmem:[%s6815_s5 + $0xe08] sm:$0xff] %v1077_v1  ;;  %v1079_v2 = vld [vmem:[%s6810_s4 + $0x1c20] sm:$0xff]  ;;  %v1081_v3 = vld [vmem:[%s6810_s4 + $0x1c28] sm:$0xff] }
  0xfa   : > { %v1083_v4 = vld [vmem:[%s6810_s4 + $0x1c40] sm:$0xff]  ;;  %1080 = vst [vmem:[%s6815_s5 + $0xe10] sm:$0xff] %v1079_v2  ;;  %1082 = vst [vmem:[%s6815_s5 + $0xe18] sm:$0xff] %v1081_v3  ;;  %v1085_v5 = vld [vmem:[%s6810_s4 + $0x1c48] sm:$0xff] }
  0xfb   : > { %1084 = vst [vmem:[%s6815_s5 + $0xe20] sm:$0xff] %v1083_v4  ;;  %v1087_v6 = vld [vmem:[%s6810_s4 + $0x1c60] sm:$0xff]  ;;  %v1089_v7 = vld [vmem:[%s6810_s4 + $0x1c68] sm:$0xff]  ;;  %1086 = vst [vmem:[%s6815_s5 + $0xe28] sm:$0xff] %v1085_v5 }
  0xfc   : > { %1088 = vst [vmem:[%s6815_s5 + $0xe30] sm:$0xff] %v1087_v6  ;;  %1090 = vst [vmem:[%s6815_s5 + $0xe38] sm:$0xff] %v1089_v7  ;;  %v1091_v8 = vld [vmem:[%s6810_s4 + $0x1c80] sm:$0xff]  ;;  %v1093_v9 = vld [vmem:[%s6810_s4 + $0x1c88] sm:$0xff] }
  0xfd   : > { %v1095_v10 = vld [vmem:[%s6810_s4 + $0x1ca0] sm:$0xff]  ;;  %1092 = vst [vmem:[%s6815_s5 + $0xe40] sm:$0xff] %v1091_v8  ;;  %1094 = vst [vmem:[%s6815_s5 + $0xe48] sm:$0xff] %v1093_v9  ;;  %v1097_v11 = vld [vmem:[%s6810_s4 + $0x1ca8] sm:$0xff] }
  0xfe   : > { %1096 = vst [vmem:[%s6815_s5 + $0xe50] sm:$0xff] %v1095_v10  ;;  %v1099_v12 = vld [vmem:[%s6810_s4 + $0x1cc0] sm:$0xff]  ;;  %v1101_v13 = vld [vmem:[%s6810_s4 + $0x1cc8] sm:$0xff]  ;;  %1098 = vst [vmem:[%s6815_s5 + $0xe58] sm:$0xff] %v1097_v11 }
  0xff   : > { %1100 = vst [vmem:[%s6815_s5 + $0xe60] sm:$0xff] %v1099_v12  ;;  %1102 = vst [vmem:[%s6815_s5 + $0xe68] sm:$0xff] %v1101_v13  ;;  %v1103_v14 = vld [vmem:[%s6810_s4 + $0x1ce0] sm:$0xff]  ;;  %v1105_v15 = vld [vmem:[%s6810_s4 + $0x1ce8] sm:$0xff] }
 0x100   : > { %v1107_v16 = vld [vmem:[%s6810_s4 + $0x1d00] sm:$0xff]  ;;  %1104 = vst [vmem:[%s6815_s5 + $0xe70] sm:$0xff] %v1103_v14  ;;  %1106 = vst [vmem:[%s6815_s5 + $0xe78] sm:$0xff] %v1105_v15  ;;  %v1109_v17 = vld [vmem:[%s6810_s4 + $0x1d08] sm:$0xff] }
 0x101   : > { %1108 = vst [vmem:[%s6815_s5 + $0xe80] sm:$0xff] %v1107_v16  ;;  %v1111_v18 = vld [vmem:[%s6810_s4 + $0x1d20] sm:$0xff]  ;;  %v1113_v19 = vld [vmem:[%s6810_s4 + $0x1d28] sm:$0xff]  ;;  %1110 = vst [vmem:[%s6815_s5 + $0xe88] sm:$0xff] %v1109_v17 }
 0x102   : > { %1112 = vst [vmem:[%s6815_s5 + $0xe90] sm:$0xff] %v1111_v18  ;;  %1114 = vst [vmem:[%s6815_s5 + $0xe98] sm:$0xff] %v1113_v19  ;;  %v1115_v20 = vld [vmem:[%s6810_s4 + $0x1d40] sm:$0xff]  ;;  %v1117_v21 = vld [vmem:[%s6810_s4 + $0x1d48] sm:$0xff] }
 0x103   : > { %v1119_v22 = vld [vmem:[%s6810_s4 + $0x1d60] sm:$0xff]  ;;  %1116 = vst [vmem:[%s6815_s5 + $0xea0] sm:$0xff] %v1115_v20  ;;  %1118 = vst [vmem:[%s6815_s5 + $0xea8] sm:$0xff] %v1117_v21  ;;  %v1121_v23 = vld [vmem:[%s6810_s4 + $0x1d68] sm:$0xff] }
 0x104   : > { %1120 = vst [vmem:[%s6815_s5 + $0xeb0] sm:$0xff] %v1119_v22  ;;  %v1123_v24 = vld [vmem:[%s6810_s4 + $0x1d80] sm:$0xff]  ;;  %v1125_v25 = vld [vmem:[%s6810_s4 + $0x1d88] sm:$0xff]  ;;  %1122 = vst [vmem:[%s6815_s5 + $0xeb8] sm:$0xff] %v1121_v23 }
 0x105   : > { %1124 = vst [vmem:[%s6815_s5 + $0xec0] sm:$0xff] %v1123_v24  ;;  %1126 = vst [vmem:[%s6815_s5 + $0xec8] sm:$0xff] %v1125_v25  ;;  %v1127_v26 = vld [vmem:[%s6810_s4 + $0x1da0] sm:$0xff]  ;;  %v1129_v27 = vld [vmem:[%s6810_s4 + $0x1da8] sm:$0xff] }
 0x106   : > { %v1131_v28 = vld [vmem:[%s6810_s4 + $0x1dc0] sm:$0xff]  ;;  %1128 = vst [vmem:[%s6815_s5 + $0xed0] sm:$0xff] %v1127_v26  ;;  %1130 = vst [vmem:[%s6815_s5 + $0xed8] sm:$0xff] %v1129_v27  ;;  %v1133_v29 = vld [vmem:[%s6810_s4 + $0x1dc8] sm:$0xff] }
 0x107   : > { %1132 = vst [vmem:[%s6815_s5 + $0xee0] sm:$0xff] %v1131_v28  ;;  %v1135_v30 = vld [vmem:[%s6810_s4 + $0x1de0] sm:$0xff]  ;;  %v1137_v31 = vld [vmem:[%s6810_s4 + $0x1de8] sm:$0xff]  ;;  %1134 = vst [vmem:[%s6815_s5 + $0xee8] sm:$0xff] %v1133_v29 }
 0x108   : > { %1136 = vst [vmem:[%s6815_s5 + $0xef0] sm:$0xff] %v1135_v30  ;;  %1138 = vst [vmem:[%s6815_s5 + $0xef8] sm:$0xff] %v1137_v31  ;;  %v1139_v32 = vld [vmem:[%s6810_s4 + $0x1e00] sm:$0xff]  ;;  %v1141_v33 = vld [vmem:[%s6810_s4 + $0x1e08] sm:$0xff] }
 0x109   : > { %v1143_v34 = vld [vmem:[%s6810_s4 + $0x1e20] sm:$0xff]  ;;  %1140 = vst [vmem:[%s6815_s5 + $0xf00] sm:$0xff] %v1139_v32  ;;  %1142 = vst [vmem:[%s6815_s5 + $0xf08] sm:$0xff] %v1141_v33  ;;  %v1145_v35 = vld [vmem:[%s6810_s4 + $0x1e28] sm:$0xff] }
 0x10a   : > { %1144 = vst [vmem:[%s6815_s5 + $0xf10] sm:$0xff] %v1143_v34  ;;  %v1147_v36 = vld [vmem:[%s6810_s4 + $0x1e40] sm:$0xff]  ;;  %v1149_v37 = vld [vmem:[%s6810_s4 + $0x1e48] sm:$0xff]  ;;  %1146 = vst [vmem:[%s6815_s5 + $0xf18] sm:$0xff] %v1145_v35 }
 0x10b   : > { %1148 = vst [vmem:[%s6815_s5 + $0xf20] sm:$0xff] %v1147_v36  ;;  %1150 = vst [vmem:[%s6815_s5 + $0xf28] sm:$0xff] %v1149_v37  ;;  %v1151_v38 = vld [vmem:[%s6810_s4 + $0x1e60] sm:$0xff]  ;;  %v1153_v39 = vld [vmem:[%s6810_s4 + $0x1e68] sm:$0xff] }
 0x10c   : > { %v1155_v40 = vld [vmem:[%s6810_s4 + $0x1e80] sm:$0xff]  ;;  %1152 = vst [vmem:[%s6815_s5 + $0xf30] sm:$0xff] %v1151_v38  ;;  %1154 = vst [vmem:[%s6815_s5 + $0xf38] sm:$0xff] %v1153_v39  ;;  %v1157_v41 = vld [vmem:[%s6810_s4 + $0x1e88] sm:$0xff] }
 0x10d   : > { %1156 = vst [vmem:[%s6815_s5 + $0xf40] sm:$0xff] %v1155_v40  ;;  %v1159_v42 = vld [vmem:[%s6810_s4 + $0x1ea0] sm:$0xff]  ;;  %v1161_v43 = vld [vmem:[%s6810_s4 + $0x1ea8] sm:$0xff]  ;;  %1158 = vst [vmem:[%s6815_s5 + $0xf48] sm:$0xff] %v1157_v41 }
 0x10e   : > { %1160 = vst [vmem:[%s6815_s5 + $0xf50] sm:$0xff] %v1159_v42  ;;  %1162 = vst [vmem:[%s6815_s5 + $0xf58] sm:$0xff] %v1161_v43  ;;  %v1163_v44 = vld [vmem:[%s6810_s4 + $0x1ec0] sm:$0xff]  ;;  %v1165_v45 = vld [vmem:[%s6810_s4 + $0x1ec8] sm:$0xff] }
 0x10f   : > { %v1167_v46 = vld [vmem:[%s6810_s4 + $0x1ee0] sm:$0xff]  ;;  %1164 = vst [vmem:[%s6815_s5 + $0xf60] sm:$0xff] %v1163_v44  ;;  %1166 = vst [vmem:[%s6815_s5 + $0xf68] sm:$0xff] %v1165_v45  ;;  %v1169_v47 = vld [vmem:[%s6810_s4 + $0x1ee8] sm:$0xff] }
 0x110   : > { %1168 = vst [vmem:[%s6815_s5 + $0xf70] sm:$0xff] %v1167_v46  ;;  %v1171_v48 = vld [vmem:[%s6810_s4 + $0x1f00] sm:$0xff]  ;;  %v1173_v49 = vld [vmem:[%s6810_s4 + $0x1f08] sm:$0xff]  ;;  %1170 = vst [vmem:[%s6815_s5 + $0xf78] sm:$0xff] %v1169_v47 }
 0x111   : > { %1172 = vst [vmem:[%s6815_s5 + $0xf80] sm:$0xff] %v1171_v48  ;;  %1174 = vst [vmem:[%s6815_s5 + $0xf88] sm:$0xff] %v1173_v49  ;;  %v1175_v50 = vld [vmem:[%s6810_s4 + $0x1f20] sm:$0xff]  ;;  %v1177_v51 = vld [vmem:[%s6810_s4 + $0x1f28] sm:$0xff] }
 0x112   : > { %v1179_v52 = vld [vmem:[%s6810_s4 + $0x1f40] sm:$0xff]  ;;  %1176 = vst [vmem:[%s6815_s5 + $0xf90] sm:$0xff] %v1175_v50  ;;  %1178 = vst [vmem:[%s6815_s5 + $0xf98] sm:$0xff] %v1177_v51  ;;  %v1181_v53 = vld [vmem:[%s6810_s4 + $0x1f48] sm:$0xff] }
 0x113   : > { %1180 = vst [vmem:[%s6815_s5 + $0xfa0] sm:$0xff] %v1179_v52  ;;  %v1183_v54 = vld [vmem:[%s6810_s4 + $0x1f60] sm:$0xff]  ;;  %v1185_v55 = vld [vmem:[%s6810_s4 + $0x1f68] sm:$0xff]  ;;  %1182 = vst [vmem:[%s6815_s5 + $0xfa8] sm:$0xff] %v1181_v53 }
 0x114   : > { %1184 = vst [vmem:[%s6815_s5 + $0xfb0] sm:$0xff] %v1183_v54  ;;  %1186 = vst [vmem:[%s6815_s5 + $0xfb8] sm:$0xff] %v1185_v55  ;;  %v1187_v56 = vld [vmem:[%s6810_s4 + $0x1f80] sm:$0xff]  ;;  %v1189_v57 = vld [vmem:[%s6810_s4 + $0x1f88] sm:$0xff] }
 0x115   : > { %v1191_v58 = vld [vmem:[%s6810_s4 + $0x1fa0] sm:$0xff]  ;;  %1188 = vst [vmem:[%s6815_s5 + $0xfc0] sm:$0xff] %v1187_v56  ;;  %1190 = vst [vmem:[%s6815_s5 + $0xfc8] sm:$0xff] %v1189_v57  ;;  %v1193_v59 = vld [vmem:[%s6810_s4 + $0x1fa8] sm:$0xff] }
 0x116   : > { %1192 = vst [vmem:[%s6815_s5 + $0xfd0] sm:$0xff] %v1191_v58  ;;  %v1195_v60 = vld [vmem:[%s6810_s4 + $0x1fc0] sm:$0xff]  ;;  %v1197_v61 = vld [vmem:[%s6810_s4 + $0x1fc8] sm:$0xff]  ;;  %1194 = vst [vmem:[%s6815_s5 + $0xfd8] sm:$0xff] %v1193_v59 }
 0x117   : > { %1196 = vst [vmem:[%s6815_s5 + $0xfe0] sm:$0xff] %v1195_v60  ;;  %1198 = vst [vmem:[%s6815_s5 + $0xfe8] sm:$0xff] %v1197_v61  ;;  %v1199_v62 = vld [vmem:[%s6810_s4 + $0x1fe0] sm:$0xff]  ;;  %v1201_v63 = vld [vmem:[%s6810_s4 + $0x1fe8] sm:$0xff] }
 0x118   : > { %1200 = vst [vmem:[%s6815_s5 + $0xff0] sm:$0xff] %v1199_v62  ;;  %1202 = vst [vmem:[%s6815_s5 + $0xff8] sm:$0xff] %v1201_v63 }
 0x119 PF: > { %p5209_p11 = scmp.ge.s32.totalorder %s6725_s17, 1  ;;  %p1215_p12 = scmp.lt.s32.totalorder %s6725_s17, 3 }
 0x11b   : > { %p1216_p13 = pnand %p5209_p11, %p1215_p12 }
 0x11c   : > { %s7841_s6 = sand.u32 (!%p1216_p13), 1, %s6709_s13   ;;  %v7846_v0 = vld [vmem:[%s8488_s0] sm:$0xff] (!%p1216_p13)  ;;  %s5747_s21 = sshll.u32 (!%p1216_p13), %s6717_s15, 9 }
 0x11d   : > { %1219 = sbr.rel (%p1216_p13) target bundleno = 1029 (0x405), region = 51  ;;  %s5210_s9 = sshll.u32 (!%p1216_p13), %s7841_s6, 12  ;;  %v5214_v1 = vcombine.high (!%p1216_p13), %v7846_v0, %v7846_v0 }
 0x11e   : > { %s7851_s10 = scalar_lea.vmem (!%p1216_p13), [#allocation2], %s5210_s9  ;;  %s5212_s9 = sshll.u32 (!%p1216_p13), %s6717_s15, 2 }
 0x11f   : > { %v5863_v2 = vld [vmem:[%s7851_s10 + $0x4] ss:$16 sps:$4 sm:$0xff] (!%p1216_p13)   ;;  %4456 = vmatprep.mubr.bf16.mxu0 (!%p1216_p13), %v5214_v1  ;;  %4784 = vmatprep.mubr.bf16.mxu1 (!%p1216_p13), %v5214_v1  ;;  %v5865_v3 = vld [vmem:[%s7851_s10 + $0xc] ss:$16 sps:$4 sm:$0xff] (!%p1216_p13)   ;;  %v5867_v4 = vld [vmem:[%s7851_s10] ss:$16 sps:$4 sm:$0xff] (!%p1216_p13)   ;;  %s8439_s29 = scalar_lea.hbm (!%p1216_p13), %s8491_s3, %s5747_s21 }
 0x120   : > { %4424 = vmatprep.subr.bf16.mxu0 (!%p1216_p13), %v5863_v2  ;;  %v5868_v5 = vld [vmem:[%s7851_s10 + $0x8] ss:$16 sps:$4 sm:$0xff] (!%p1216_p13)   ;;  %4752 = vmatprep.subr.bf16.mxu1 (!%p1216_p13), %v5865_v3  ;;  %v5869_v6 = vld [vmem:[%s7851_s10 + $0x24] ss:$16 sps:$4 sm:$0xff] (!%p1216_p13)   ;;  %v5871_v7 = vld [vmem:[%s7851_s10 + $0x2c] ss:$16 sps:$4 sm:$0xff] (!%p1216_p13)  }
 0x121   : > { %4425 = vmatpush1.bf16.msra.mxu0 (!%p1216_p13), %v5867_v4  ;;  %4753 = vmatpush1.bf16.msra.mxu1 (!%p1216_p13), %v5868_v5  ;;  %v5873_v8 = vld [vmem:[%s7851_s10 + $0x20] ss:$16 sps:$4 sm:$0xff] (!%p1216_p13)   ;;  %v5874_v9 = vld [vmem:[%s7851_s10 + $0x28] ss:$16 sps:$4 sm:$0xff] (!%p1216_p13)   ;;  %v5875_v10 = vld [vmem:[%s7851_s10 + $0x44] ss:$16 sps:$4 sm:$0xff] (!%p1216_p13)   ;;  %v5213_v5 = vcombine.low (!%p1216_p13), %v7846_v0, %v7846_v0 }
 0x122   : > { %4426 = vmatprep.subr.bf16.mxu0 (!%p1216_p13), %v5869_v6  ;;  %4754 = vmatprep.subr.bf16.mxu1 (!%p1216_p13), %v5871_v7  ;;  %v5877_v11 = vld [vmem:[%s7851_s10 + $0x4c] ss:$16 sps:$4 sm:$0xff] (!%p1216_p13)   ;;  %v5879_v12 = vld [vmem:[%s7851_s10 + $0x40] ss:$16 sps:$4 sm:$0xff] (!%p1216_p13)   ;;  %v5880_v13 = vld [vmem:[%s7851_s10 + $0x48] ss:$16 sps:$4 sm:$0xff] (!%p1216_p13)  }
 0x123   : > { %v5881_v14 = vld [vmem:[%s7851_s10 + $0x64] ss:$16 sps:$4 sm:$0xff] (!%p1216_p13)   ;;  %v5883_v15 = vld [vmem:[%s7851_s10 + $0x6c] ss:$16 sps:$4 sm:$0xff] (!%p1216_p13)   ;;  %v5885_v16 = vld [vmem:[%s7851_s10 + $0x60] ss:$16 sps:$4 sm:$0xff] (!%p1216_p13)  }
 0x124   : > { %v5886_v17 = vld [vmem:[%s7851_s10 + $0x68] ss:$16 sps:$4 sm:$0xff]   ;;  %v5887_v18 = vld [vmem:[%s7851_s10 + $0x84] ss:$16 sps:$4 sm:$0xff]   ;;  %v5889_v19 = vld [vmem:[%s7851_s10 + $0x8c] ss:$16 sps:$4 sm:$0xff]  }
 0x125   : > { %4427 = vmatpush1.bf16.msra.mxu0 %v5873_v8  ;;  %4755 = vmatpush1.bf16.msra.mxu1 %v5874_v9  ;;  %v5891_v20 = vld [vmem:[%s7851_s10 + $0x80] ss:$16 sps:$4 sm:$0xff]   ;;  %v5892_v21 = vld [vmem:[%s7851_s10 + $0x88] ss:$16 sps:$4 sm:$0xff]   ;;  %v5893_v22 = vld [vmem:[%s7851_s10 + $0xa4] ss:$16 sps:$4 sm:$0xff]  }
 0x126   : > { %4428 = vmatprep.subr.bf16.mxu0 %v5875_v10  ;;  %4756 = vmatprep.subr.bf16.mxu1 %v5877_v11  ;;  %v5895_v23 = vld [vmem:[%s7851_s10 + $0xac] ss:$16 sps:$4 sm:$0xff]   ;;  %v5897_v24 = vld [vmem:[%s7851_s10 + $0xa0] ss:$16 sps:$4 sm:$0xff]   ;;  %v5898_v25 = vld [vmem:[%s7851_s10 + $0xa8] ss:$16 sps:$4 sm:$0xff]  }
 0x127   : > { %v5899_v26 = vld [vmem:[%s7851_s10 + $0xc4] ss:$16 sps:$4 sm:$0xff]   ;;  %v5901_v27 = vld [vmem:[%s7851_s10 + $0xcc] ss:$16 sps:$4 sm:$0xff]   ;;  %v5903_v28 = vld [vmem:[%s7851_s10 + $0xc0] ss:$16 sps:$4 sm:$0xff]  }
 0x128   : > { %v5904_v29 = vld [vmem:[%s7851_s10 + $0xc8] ss:$16 sps:$4 sm:$0xff]   ;;  %v5905_v30 = vld [vmem:[%s7851_s10 + $0xe4] ss:$16 sps:$4 sm:$0xff]   ;;  %v5907_v31 = vld [vmem:[%s7851_s10 + $0xec] ss:$16 sps:$4 sm:$0xff]  }
 0x129   : > { %4429 = vmatpush1.bf16.msra.mxu0 %v5879_v12  ;;  %4757 = vmatpush1.bf16.msra.mxu1 %v5880_v13  ;;  %v5909_v32 = vld [vmem:[%s7851_s10 + $0xe0] ss:$16 sps:$4 sm:$0xff]   ;;  %v5910_v33 = vld [vmem:[%s7851_s10 + $0xe8] ss:$16 sps:$4 sm:$0xff]   ;;  %v5911_v34 = vld [vmem:[%s7851_s10 + $0x104] ss:$16 sps:$4 sm:$0xff]  }
 0x12a   : > { %4430 = vmatprep.subr.bf16.mxu0 %v5881_v14  ;;  %4758 = vmatprep.subr.bf16.mxu1 %v5883_v15  ;;  %v5913_v35 = vld [vmem:[%s7851_s10 + $0x10c] ss:$16 sps:$4 sm:$0xff]   ;;  %v5915_v36 = vld [vmem:[%s7851_s10 + $0x100] ss:$16 sps:$4 sm:$0xff]   ;;  %v5916_v37 = vld [vmem:[%s7851_s10 + $0x108] ss:$16 sps:$4 sm:$0xff]  }
 0x12b   : > { %v5917_v38 = vld [vmem:[%s7851_s10 + $0x124] ss:$16 sps:$4 sm:$0xff]   ;;  %v5919_v39 = vld [vmem:[%s7851_s10 + $0x12c] ss:$16 sps:$4 sm:$0xff]   ;;  %v5921_v40 = vld [vmem:[%s7851_s10 + $0x120] ss:$16 sps:$4 sm:$0xff]  }
 0x12c   : > { %v5922_v41 = vld [vmem:[%s7851_s10 + $0x128] ss:$16 sps:$4 sm:$0xff]   ;;  %v5923_v42 = vld [vmem:[%s7851_s10 + $0x144] ss:$16 sps:$4 sm:$0xff]   ;;  %v5925_v43 = vld [vmem:[%s7851_s10 + $0x14c] ss:$16 sps:$4 sm:$0xff]  }
 0x12d   : > { %4431 = vmatpush1.bf16.msra.mxu0 %v5885_v16  ;;  %4759 = vmatpush1.bf16.msra.mxu1 %v5886_v17  ;;  %v5927_v44 = vld [vmem:[%s7851_s10 + $0x140] ss:$16 sps:$4 sm:$0xff]   ;;  %v5928_v45 = vld [vmem:[%s7851_s10 + $0x148] ss:$16 sps:$4 sm:$0xff]   ;;  %v5929_v46 = vld [vmem:[%s7851_s10 + $0x164] ss:$16 sps:$4 sm:$0xff]  }
 0x12e   : > { %4432 = vmatprep.subr.bf16.mxu0 %v5887_v18  ;;  %4760 = vmatprep.subr.bf16.mxu1 %v5889_v19  ;;  %v5931_v47 = vld [vmem:[%s7851_s10 + $0x16c] ss:$16 sps:$4 sm:$0xff]   ;;  %v5933_v48 = vld [vmem:[%s7851_s10 + $0x160] ss:$16 sps:$4 sm:$0xff]   ;;  %v5934_v49 = vld [vmem:[%s7851_s10 + $0x168] ss:$16 sps:$4 sm:$0xff]  }
 0x12f   : > { %v5935_v50 = vld [vmem:[%s7851_s10 + $0x184] ss:$16 sps:$4 sm:$0xff]   ;;  %v5937_v51 = vld [vmem:[%s7851_s10 + $0x18c] ss:$16 sps:$4 sm:$0xff]   ;;  %v5939_v52 = vld [vmem:[%s7851_s10 + $0x180] ss:$16 sps:$4 sm:$0xff]  }
 0x130   : > { %v5940_v53 = vld [vmem:[%s7851_s10 + $0x188] ss:$16 sps:$4 sm:$0xff]   ;;  %v5941_v54 = vld [vmem:[%s7851_s10 + $0x1a4] ss:$16 sps:$4 sm:$0xff]   ;;  %v5943_v55 = vld [vmem:[%s7851_s10 + $0x1ac] ss:$16 sps:$4 sm:$0xff]  }
 0x131   : > { %4433 = vmatpush1.bf16.msra.mxu0 %v5891_v20  ;;  %4761 = vmatpush1.bf16.msra.mxu1 %v5892_v21  ;;  %v5945_v56 = vld [vmem:[%s7851_s10 + $0x1a0] ss:$16 sps:$4 sm:$0xff]   ;;  %v5946_v57 = vld [vmem:[%s7851_s10 + $0x1a8] ss:$16 sps:$4 sm:$0xff]   ;;  %v5947_v58 = vld [vmem:[%s7851_s10 + $0x1c4] ss:$16 sps:$4 sm:$0xff]  }
 0x132   : > { %4434 = vmatprep.subr.bf16.mxu0 %v5893_v22  ;;  %4762 = vmatprep.subr.bf16.mxu1 %v5895_v23  ;;  %v5949_v59 = vld [vmem:[%s7851_s10 + $0x1cc] ss:$16 sps:$4 sm:$0xff]   ;;  %v5951_v60 = vld [vmem:[%s7851_s10 + $0x1c0] ss:$16 sps:$4 sm:$0xff]   ;;  %v5952_v61 = vld [vmem:[%s7851_s10 + $0x1c8] ss:$16 sps:$4 sm:$0xff]  }
 0x133   : > { %v5953_v62 = vld [vmem:[%s7851_s10 + $0x1e4] ss:$16 sps:$4 sm:$0xff]   ;;  %v5955_v63 = vld [vmem:[%s7851_s10 + $0x1ec] ss:$16 sps:$4 sm:$0xff]   ;;  %v5957_v1 = vld [vmem:[%s7851_s10 + $0x1e0] ss:$16 sps:$4 sm:$0xff]  }
 0x134   : > { %v5958_v2 = vld [vmem:[%s7851_s10 + $0x1e8] ss:$16 sps:$4 sm:$0xff]   ;;  %v5963_v3 = vld [vmem:[%s7851_s10 + $0x204] ss:$16 sps:$4 sm:$0xff]   ;;  %v5966_v4 = vld [vmem:[%s7851_s10 + $0x20c] ss:$16 sps:$4 sm:$0xff]  }
 0x135   : > { %4435 = vmatpush1.bf16.msra.mxu0 %v5897_v24  ;;  %4763 = vmatpush1.bf16.msra.mxu1 %v5898_v25  ;;  %v5961_v6 = vld [vmem:[%s7851_s10 + $0x200] ss:$16 sps:$4 sm:$0xff]   ;;  %v5964_v7 = vld [vmem:[%s7851_s10 + $0x208] ss:$16 sps:$4 sm:$0xff]   ;;  %v5969_v8 = vld [vmem:[%s7851_s10 + $0x224] ss:$16 sps:$4 sm:$0xff]  }
 0x136   : > { %4436 = vmatprep.subr.bf16.mxu0 %v5899_v26  ;;  %4764 = vmatprep.subr.bf16.mxu1 %v5901_v27  ;;  %v5972_v9 = vld [vmem:[%s7851_s10 + $0x22c] ss:$16 sps:$4 sm:$0xff]   ;;  %v5967_v10 = vld [vmem:[%s7851_s10 + $0x220] ss:$16 sps:$4 sm:$0xff]   ;;  %v5970_v11 = vld [vmem:[%s7851_s10 + $0x228] ss:$16 sps:$4 sm:$0xff]  }
 0x137   : > { %v5975_v0 = vld [vmem:[%s7851_s10 + $0x244] ss:$16 sps:$4 sm:$0xff]   ;;  %v5978_v12 = vld [vmem:[%s7851_s10 + $0x24c] ss:$16 sps:$4 sm:$0xff]   ;;  %v5973_v13 = vld [vmem:[%s7851_s10 + $0x240] ss:$16 sps:$4 sm:$0xff]  }
 0x138   : > { %v5976_v14 = vld [vmem:[%s7851_s10 + $0x248] ss:$16 sps:$4 sm:$0xff]   ;;  %v5981_v15 = vld [vmem:[%s7851_s10 + $0x264] ss:$16 sps:$4 sm:$0xff]   ;;  %v5984_v16 = vld [vmem:[%s7851_s10 + $0x26c] ss:$16 sps:$4 sm:$0xff]  }
 0x139   : > { %4437 = vmatpush1.bf16.msra.mxu0 %v5903_v28  ;;  %4765 = vmatpush1.bf16.msra.mxu1 %v5904_v29  ;;  %v5979_v17 = vld [vmem:[%s7851_s10 + $0x260] ss:$16 sps:$4 sm:$0xff]   ;;  %v5982_v18 = vld [vmem:[%s7851_s10 + $0x268] ss:$16 sps:$4 sm:$0xff]   ;;  %v5987_v19 = vld [vmem:[%s7851_s10 + $0x284] ss:$16 sps:$4 sm:$0xff]  }
 0x13a   : > { %4438 = vmatprep.subr.bf16.mxu0 %v5905_v30  ;;  %4766 = vmatprep.subr.bf16.mxu1 %v5907_v31  ;;  %v5990_v20 = vld [vmem:[%s7851_s10 + $0x28c] ss:$16 sps:$4 sm:$0xff]   ;;  %v5985_v21 = vld [vmem:[%s7851_s10 + $0x280] ss:$16 sps:$4 sm:$0xff]   ;;  %v5988_v22 = vld [vmem:[%s7851_s10 + $0x288] ss:$16 sps:$4 sm:$0xff]  }
 0x13b   : > { %v5993_v23 = vld [vmem:[%s7851_s10 + $0x2a4] ss:$16 sps:$4 sm:$0xff]   ;;  %v5996_v24 = vld [vmem:[%s7851_s10 + $0x2ac] ss:$16 sps:$4 sm:$0xff]   ;;  %v5991_v25 = vld [vmem:[%s7851_s10 + $0x2a0] ss:$16 sps:$4 sm:$0xff]  }
 0x13c   : > { %v5994_v26 = vld [vmem:[%s7851_s10 + $0x2a8] ss:$16 sps:$4 sm:$0xff]   ;;  %v5999_v27 = vld [vmem:[%s7851_s10 + $0x2c4] ss:$16 sps:$4 sm:$0xff]   ;;  %v6002_v28 = vld [vmem:[%s7851_s10 + $0x2cc] ss:$16 sps:$4 sm:$0xff]  }
 0x13d   : > { %4439 = vmatpush1.bf16.msra.mxu0 %v5909_v32  ;;  %4767 = vmatpush1.bf16.msra.mxu1 %v5910_v33  ;;  %v7948_v29 = vld [vmem:[%s8488_s0 + $0x8] sm:$0xff]  ;;  %v5997_v31 = vld [vmem:[%s7851_s10 + $0x2c0] ss:$16 sps:$4 sm:$0xff]   ;;  %v6005_v33 = vld [vmem:[%s7851_s10 + $0x2e4] ss:$16 sps:$4 sm:$0xff]   ;;  %p1261_p0 = scmp.lt.s32.totalorder %s5212_s9, 7 }
 0x13e   : > { %4440 = vmatprep.subr.bf16.mxu0 %v5911_v34  ;;  %4768 = vmatprep.subr.bf16.mxu1 %v5913_v35  ;;  %v5216_v30 = vcombine.high %v7948_v29, %v7948_v29  ;;  %v6000_v32 = vld [vmem:[%s7851_s10 + $0x2c8] ss:$16 sps:$4 sm:$0xff]   ;;  %v6008_v34 = vld [vmem:[%s7851_s10 + $0x2ec] ss:$16 sps:$4 sm:$0xff]   ;;  %v6003_v35 = vld [vmem:[%s7851_s10 + $0x2e0] ss:$16 sps:$4 sm:$0xff]  }
 0x13f   : > { %s8502_s9 = smov (!%p1261_p0, %s5212_s9), 7  ;;  %s5085_s15 = scalar_lea.sflag [#allocation4], %s7841_s6 }
 0x140   : > { %s1263_s19 = scalar_lea.vmem %s8490_s2, %s8502_s9  ;;  %s6727_s4 = smov [#allocation3]  }
 0x141   : > { %4441 = vmatpush1.bf16.msra.mxu0 %v5915_v36  ;;  %4769 = vmatpush1.bf16.msra.mxu1 %v5916_v37  ;;  %v6006_v36 = vld [vmem:[%s7851_s10 + $0x2e8] ss:$16 sps:$4 sm:$0xff]   ;;  %v6011_v37 = vld [vmem:[%s7851_s10 + $0x304] ss:$16 sps:$4 sm:$0xff]   ;;  %s6651_s5 = sshll.u32 %s6727_s4, 4  ;;  %s6652_s5 = int_to_ptr.vmem [resolvable:$false] %s6651_s5 }
 0x142   : > { %4442 = vmatprep.subr.bf16.mxu0 %v5917_v38  ;;  %4770 = vmatprep.subr.bf16.mxu1 %v5919_v39  ;;  %v6014_v38 = vld [vmem:[%s7851_s10 + $0x30c] ss:$16 sps:$4 sm:$0xff]   ;;  %v6009_v39 = vld [vmem:[%s7851_s10 + $0x300] ss:$16 sps:$4 sm:$0xff]   ;;  %s6653_s7 = scalar_lea.vmem %s6652_s5, 1024 }
 0x145   : > { %4443 = vmatpush1.bf16.msra.mxu0 %v5921_v40  ;;  %4771 = vmatpush1.bf16.msra.mxu1 %v5922_v41  ;;  %v6012_v40 = vld [vmem:[%s7851_s10 + $0x308] ss:$16 sps:$4 sm:$0xff]   ;;  %v6017_v41 = vld [vmem:[%s7851_s10 + $0x324] ss:$16 sps:$4 sm:$0xff]  }
 0x146   : > { %4444 = vmatprep.subr.bf16.mxu0 %v5923_v42  ;;  %4772 = vmatprep.subr.bf16.mxu1 %v5925_v43  ;;  %v6020_v42 = vld [vmem:[%s7851_s10 + $0x32c] ss:$16 sps:$4 sm:$0xff]   ;;  %v6015_v43 = vld [vmem:[%s7851_s10 + $0x320] ss:$16 sps:$4 sm:$0xff]  }
 0x149   : > { %4445 = vmatpush1.bf16.msra.mxu0 %v5927_v44  ;;  %4773 = vmatpush1.bf16.msra.mxu1 %v5928_v45  ;;  %v6018_v44 = vld [vmem:[%s7851_s10 + $0x328] ss:$16 sps:$4 sm:$0xff]   ;;  %v6023_v45 = vld [vmem:[%s7851_s10 + $0x344] ss:$16 sps:$4 sm:$0xff]  }
 0x14a   : > { %4446 = vmatprep.subr.bf16.mxu0 %v5929_v46  ;;  %4774 = vmatprep.subr.bf16.mxu1 %v5931_v47  ;;  %v6026_v46 = vld [vmem:[%s7851_s10 + $0x34c] ss:$16 sps:$4 sm:$0xff]   ;;  %v6021_v47 = vld [vmem:[%s7851_s10 + $0x340] ss:$16 sps:$4 sm:$0xff]  }
 0x14d   : > { %4447 = vmatpush1.bf16.msra.mxu0 %v5933_v48  ;;  %4775 = vmatpush1.bf16.msra.mxu1 %v5934_v49  ;;  %v6024_v48 = vld [vmem:[%s7851_s10 + $0x348] ss:$16 sps:$4 sm:$0xff]   ;;  %v6029_v49 = vld [vmem:[%s7851_s10 + $0x364] ss:$16 sps:$4 sm:$0xff]  }
 0x14e   : > { %4448 = vmatprep.subr.bf16.mxu0 %v5935_v50  ;;  %4776 = vmatprep.subr.bf16.mxu1 %v5937_v51  ;;  %v6032_v50 = vld [vmem:[%s7851_s10 + $0x36c] ss:$16 sps:$4 sm:$0xff]   ;;  %v6027_v51 = vld [vmem:[%s7851_s10 + $0x360] ss:$16 sps:$4 sm:$0xff]  }
 0x151   : > { %4449 = vmatpush1.bf16.msra.mxu0 %v5939_v52  ;;  %4777 = vmatpush1.bf16.msra.mxu1 %v5940_v53  ;;  %v6030_v52 = vld [vmem:[%s7851_s10 + $0x368] ss:$16 sps:$4 sm:$0xff]   ;;  %v6035_v53 = vld [vmem:[%s7851_s10 + $0x384] ss:$16 sps:$4 sm:$0xff]  }
 0x152   : > { %4450 = vmatprep.subr.bf16.mxu0 %v5941_v54  ;;  %4778 = vmatprep.subr.bf16.mxu1 %v5943_v55  ;;  %v6038_v54 = vld [vmem:[%s7851_s10 + $0x38c] ss:$16 sps:$4 sm:$0xff]   ;;  %v6033_v55 = vld [vmem:[%s7851_s10 + $0x380] ss:$16 sps:$4 sm:$0xff]  }
 0x155   : > { %4451 = vmatpush1.bf16.msra.mxu0 %v5945_v56  ;;  %4779 = vmatpush1.bf16.msra.mxu1 %v5946_v57  ;;  %v6036_v56 = vld [vmem:[%s7851_s10 + $0x388] ss:$16 sps:$4 sm:$0xff]   ;;  %v6041_v57 = vld [vmem:[%s7851_s10 + $0x3a4] ss:$16 sps:$4 sm:$0xff]  }
 0x156   : > { %4452 = vmatprep.subr.bf16.mxu0 %v5947_v58  ;;  %4780 = vmatprep.subr.bf16.mxu1 %v5949_v59  ;;  %v6044_v58 = vld [vmem:[%s7851_s10 + $0x3ac] ss:$16 sps:$4 sm:$0xff]   ;;  %v6039_v59 = vld [vmem:[%s7851_s10 + $0x3a0] ss:$16 sps:$4 sm:$0xff]  }
 0x159   : > { %4453 = vmatpush1.bf16.msra.mxu0 %v5951_v60  ;;  %4781 = vmatpush1.bf16.msra.mxu1 %v5952_v61  ;;  %v6042_v60 = vld [vmem:[%s7851_s10 + $0x3a8] ss:$16 sps:$4 sm:$0xff]   ;;  %v6047_v61 = vld [vmem:[%s7851_s10 + $0x3c4] ss:$16 sps:$4 sm:$0xff]  }
 0x15a   : > { %4454 = vmatprep.subr.bf16.mxu0 %v5953_v62  ;;  %4782 = vmatprep.subr.bf16.mxu1 %v5955_v63  ;;  %v6050_v62 = vld [vmem:[%s7851_s10 + $0x3cc] ss:$16 sps:$4 sm:$0xff]   ;;  %v6045_v63 = vld [vmem:[%s7851_s10 + $0x3c0] ss:$16 sps:$4 sm:$0xff]  }
 0x15d   : > { %4455 = vmatpush1.bf16.msra.mxu0 %v5957_v1  ;;  %4783 = vmatpush1.bf16.msra.mxu1 %v5958_v2  ;;  %v6048_v1 = vld [vmem:[%s7851_s10 + $0x3c8] ss:$16 sps:$4 sm:$0xff]   ;;  %v6053_v2 = vld [vmem:[%s7851_s10 + $0x3e4] ss:$16 sps:$4 sm:$0xff]  }
 0x15e   : > { %4465 = vmatprep.subr.bf16.mxu0 %v5963_v3  ;;  %4793 = vmatprep.subr.bf16.mxu1 %v5966_v4  ;;  %v6056_v3 = vld [vmem:[%s7851_s10 + $0x3ec] ss:$16 sps:$4 sm:$0xff]   ;;  %v6051_v4 = vld [vmem:[%s7851_s10 + $0x3e0] ss:$16 sps:$4 sm:$0xff]  }
 0x160   : > { %4457 = vmatmul.mubr.bf16.vlgmr.msra.gmra.mrb[0].mxu0 %v5213_v5  ;;  %4785 = vmatmul.mubr.bf16.vlgmr.msra.gmra.mrb[0].mxu1 %v5213_v5  ;;  %v6054_v5 = vld [vmem:[%s7851_s10 + $0x3e8] ss:$16 sps:$4 sm:$0xff]  }
 0x161   : > { %4466 = vmatpush1.bf16.msra.mxu0 %v5961_v6  ;;  %4794 = vmatpush1.bf16.msra.mxu1 %v5964_v7  ;;  %v6061_v6 = vld [vmem:[%s7851_s10 + $0x404] ss:$16 sps:$4 sm:$0xff]   ;;  %v6064_v7 = vld [vmem:[%s7851_s10 + $0x40c] ss:$16 sps:$4 sm:$0xff]  }
 0x162   : > { %4467 = vmatprep.subr.bf16.mxu0 %v5969_v8  ;;  %4795 = vmatprep.subr.bf16.mxu1 %v5972_v9  ;;  %v5215_v8 = vcombine.low %v7948_v29, %v7948_v29  ;;  %v6059_v9 = vld [vmem:[%s7851_s10 + $0x400] ss:$16 sps:$4 sm:$0xff]   ;;  %v6094_v29 = vld [vmem:[%s7851_s10 + $0x4ac] ss:$16 sps:$4 sm:$0xff]  }
 0x163   : > { %4497 = vmatprep.mubr.bf16.mxu0 %v5216_v30  ;;  %4825 = vmatprep.mubr.bf16.mxu1 %v5216_v30  ;;  %v6089_v30 = vld [vmem:[%s7851_s10 + $0x4a0] ss:$16 sps:$4 sm:$0xff]  }
 0x165   : > { %4468 = vmatpush1.bf16.msra.mxu0 %v5967_v10  ;;  %4796 = vmatpush1.bf16.msra.mxu1 %v5970_v11  ;;  %v6062_v10 = vld [vmem:[%s7851_s10 + $0x408] ss:$16 sps:$4 sm:$0xff]   ;;  %v7999_v11 = vld [vmem:[%s8488_s0 + $0x10] sm:$0xff] }
 0x166   : > { %4469 = vmatprep.subr.bf16.mxu0 %v5975_v0  ;;  %4797 = vmatprep.subr.bf16.mxu1 %v5978_v12  ;;  %v6067_v0 = vld [vmem:[%s7851_s10 + $0x424] ss:$16 sps:$4 sm:$0xff]   ;;  %v6070_v12 = vld [vmem:[%s7851_s10 + $0x42c] ss:$16 sps:$4 sm:$0xff]  }
 0x169   : > { %4470 = vmatpush1.bf16.msra.mxu0 %v5973_v13  ;;  %4798 = vmatpush1.bf16.msra.mxu1 %v5976_v14  ;;  %v5218_v13 = vcombine.high %v7999_v11, %v7999_v11  ;;  %v6065_v14 = vld [vmem:[%s7851_s10 + $0x420] ss:$16 sps:$4 sm:$0xff]  }
 0x16a   : > { %4471 = vmatprep.subr.bf16.mxu0 %v5981_v15  ;;  %4799 = vmatprep.subr.bf16.mxu1 %v5984_v16  ;;  %v6068_v15 = vld [vmem:[%s7851_s10 + $0x428] ss:$16 sps:$4 sm:$0xff]   ;;  %v6073_v16 = vld [vmem:[%s7851_s10 + $0x444] ss:$16 sps:$4 sm:$0xff]  }
 0x16d   : > { %4472 = vmatpush1.bf16.msra.mxu0 %v5979_v17  ;;  %4800 = vmatpush1.bf16.msra.mxu1 %v5982_v18  ;;  %v6076_v17 = vld [vmem:[%s7851_s10 + $0x44c] ss:$16 sps:$4 sm:$0xff]   ;;  %v6071_v18 = vld [vmem:[%s7851_s10 + $0x440] ss:$16 sps:$4 sm:$0xff]  }
 0x16e   : > { %4473 = vmatprep.subr.bf16.mxu0 %v5987_v19  ;;  %4801 = vmatprep.subr.bf16.mxu1 %v5990_v20  ;;  %v6074_v19 = vld [vmem:[%s7851_s10 + $0x448] ss:$16 sps:$4 sm:$0xff]   ;;  %v6079_v20 = vld [vmem:[%s7851_s10 + $0x464] ss:$16 sps:$4 sm:$0xff]  }
 0x171   : > { %4474 = vmatpush1.bf16.msra.mxu0 %v5985_v21  ;;  %4802 = vmatpush1.bf16.msra.mxu1 %v5988_v22  ;;  %v6082_v21 = vld [vmem:[%s7851_s10 + $0x46c] ss:$16 sps:$4 sm:$0xff]   ;;  %v6077_v22 = vld [vmem:[%s7851_s10 + $0x460] ss:$16 sps:$4 sm:$0xff]  }
 0x172   : > { %4475 = vmatprep.subr.bf16.mxu0 %v5993_v23  ;;  %4803 = vmatprep.subr.bf16.mxu1 %v5996_v24  ;;  %v6080_v23 = vld [vmem:[%s7851_s10 + $0x468] ss:$16 sps:$4 sm:$0xff]   ;;  %v6085_v24 = vld [vmem:[%s7851_s10 + $0x484] ss:$16 sps:$4 sm:$0xff]  }
 0x175   : > { %4476 = vmatpush1.bf16.msra.mxu0 %v5991_v25  ;;  %4804 = vmatpush1.bf16.msra.mxu1 %v5994_v26  ;;  %v6088_v25 = vld [vmem:[%s7851_s10 + $0x48c] ss:$16 sps:$4 sm:$0xff]   ;;  %v6083_v26 = vld [vmem:[%s7851_s10 + $0x480] ss:$16 sps:$4 sm:$0xff]  }
 0x176   : > { %4477 = vmatprep.subr.bf16.mxu0 %v5999_v27  ;;  %4805 = vmatprep.subr.bf16.mxu1 %v6002_v28  ;;  %v6086_v27 = vld [vmem:[%s7851_s10 + $0x488] ss:$16 sps:$4 sm:$0xff]   ;;  %v6091_v28 = vld [vmem:[%s7851_s10 + $0x4a4] ss:$16 sps:$4 sm:$0xff]  }
 0x179   : > { %4478 = vmatpush1.bf16.msra.mxu0 %v5997_v31  ;;  %4806 = vmatpush1.bf16.msra.mxu1 %v6000_v32  ;;  %v6092_v31 = vld [vmem:[%s7851_s10 + $0x4a8] ss:$16 sps:$4 sm:$0xff]   ;;  %v6097_v32 = vld [vmem:[%s7851_s10 + $0x4c4] ss:$16 sps:$4 sm:$0xff]  }
 0x17a   : > { %4479 = vmatprep.subr.bf16.mxu0 %v6005_v33  ;;  %4807 = vmatprep.subr.bf16.mxu1 %v6008_v34  ;;  %v6100_v33 = vld [vmem:[%s7851_s10 + $0x4cc] ss:$16 sps:$4 sm:$0xff]   ;;  %v6095_v34 = vld [vmem:[%s7851_s10 + $0x4c0] ss:$16 sps:$4 sm:$0xff]  }
 0x17d   : > { %4480 = vmatpush1.bf16.msra.mxu0 %v6003_v35  ;;  %4808 = vmatpush1.bf16.msra.mxu1 %v6006_v36  ;;  %v6098_v35 = vld [vmem:[%s7851_s10 + $0x4c8] ss:$16 sps:$4 sm:$0xff]   ;;  %v6103_v36 = vld [vmem:[%s7851_s10 + $0x4e4] ss:$16 sps:$4 sm:$0xff]  }
 0x17e   : > { %4481 = vmatprep.subr.bf16.mxu0 %v6011_v37  ;;  %4809 = vmatprep.subr.bf16.mxu1 %v6014_v38  ;;  %v6106_v37 = vld [vmem:[%s7851_s10 + $0x4ec] ss:$16 sps:$4 sm:$0xff]   ;;  %v6101_v38 = vld [vmem:[%s7851_s10 + $0x4e0] ss:$16 sps:$4 sm:$0xff]  }
 0x181   : > { %4482 = vmatpush1.bf16.msra.mxu0 %v6009_v39  ;;  %4810 = vmatpush1.bf16.msra.mxu1 %v6012_v40  ;;  %v6104_v39 = vld [vmem:[%s7851_s10 + $0x4e8] ss:$16 sps:$4 sm:$0xff]   ;;  %v6109_v40 = vld [vmem:[%s7851_s10 + $0x504] ss:$16 sps:$4 sm:$0xff]  }
 0x182   : > { %4483 = vmatprep.subr.bf16.mxu0 %v6017_v41  ;;  %4811 = vmatprep.subr.bf16.mxu1 %v6020_v42  ;;  %v6112_v41 = vld [vmem:[%s7851_s10 + $0x50c] ss:$16 sps:$4 sm:$0xff]   ;;  %v6107_v42 = vld [vmem:[%s7851_s10 + $0x500] ss:$16 sps:$4 sm:$0xff]  }
 0x185   : > { %4484 = vmatpush1.bf16.msra.mxu0 %v6015_v43  ;;  %4812 = vmatpush1.bf16.msra.mxu1 %v6018_v44  ;;  %v6110_v43 = vld [vmem:[%s7851_s10 + $0x508] ss:$16 sps:$4 sm:$0xff]   ;;  %v6115_v44 = vld [vmem:[%s7851_s10 + $0x524] ss:$16 sps:$4 sm:$0xff]  }
 0x186   : > { %4485 = vmatprep.subr.bf16.mxu0 %v6023_v45  ;;  %4813 = vmatprep.subr.bf16.mxu1 %v6026_v46  ;;  %v6118_v45 = vld [vmem:[%s7851_s10 + $0x52c] ss:$16 sps:$4 sm:$0xff]   ;;  %v6113_v46 = vld [vmem:[%s7851_s10 + $0x520] ss:$16 sps:$4 sm:$0xff]  }
 0x189   : > { %4486 = vmatpush1.bf16.msra.mxu0 %v6021_v47  ;;  %4814 = vmatpush1.bf16.msra.mxu1 %v6024_v48  ;;  %v6116_v47 = vld [vmem:[%s7851_s10 + $0x528] ss:$16 sps:$4 sm:$0xff]   ;;  %v6121_v48 = vld [vmem:[%s7851_s10 + $0x544] ss:$16 sps:$4 sm:$0xff]  }
 0x18a   : > { %4487 = vmatprep.subr.bf16.mxu0 %v6029_v49  ;;  %4815 = vmatprep.subr.bf16.mxu1 %v6032_v50  ;;  %v6124_v49 = vld [vmem:[%s7851_s10 + $0x54c] ss:$16 sps:$4 sm:$0xff]   ;;  %v6119_v50 = vld [vmem:[%s7851_s10 + $0x540] ss:$16 sps:$4 sm:$0xff]  }
 0x18d   : > { %4488 = vmatpush1.bf16.msra.mxu0 %v6027_v51  ;;  %4816 = vmatpush1.bf16.msra.mxu1 %v6030_v52  ;;  %v6122_v51 = vld [vmem:[%s7851_s10 + $0x548] ss:$16 sps:$4 sm:$0xff]   ;;  %v6127_v52 = vld [vmem:[%s7851_s10 + $0x564] ss:$16 sps:$4 sm:$0xff]  }
 0x18e   : > { %4489 = vmatprep.subr.bf16.mxu0 %v6035_v53  ;;  %4817 = vmatprep.subr.bf16.mxu1 %v6038_v54  ;;  %v6130_v53 = vld [vmem:[%s7851_s10 + $0x56c] ss:$16 sps:$4 sm:$0xff]   ;;  %v6125_v54 = vld [vmem:[%s7851_s10 + $0x560] ss:$16 sps:$4 sm:$0xff]  }
 0x191   : > { %4490 = vmatpush1.bf16.msra.mxu0 %v6033_v55  ;;  %4818 = vmatpush1.bf16.msra.mxu1 %v6036_v56  ;;  %v6128_v55 = vld [vmem:[%s7851_s10 + $0x568] ss:$16 sps:$4 sm:$0xff]   ;;  %v6133_v56 = vld [vmem:[%s7851_s10 + $0x584] ss:$16 sps:$4 sm:$0xff]  }
 0x192   : > { %4491 = vmatprep.subr.bf16.mxu0 %v6041_v57  ;;  %4819 = vmatprep.subr.bf16.mxu1 %v6044_v58  ;;  %v6136_v57 = vld [vmem:[%s7851_s10 + $0x58c] ss:$16 sps:$4 sm:$0xff]   ;;  %v6131_v58 = vld [vmem:[%s7851_s10 + $0x580] ss:$16 sps:$4 sm:$0xff]  }
 0x195   : > { %4492 = vmatpush1.bf16.msra.mxu0 %v6039_v59  ;;  %4820 = vmatpush1.bf16.msra.mxu1 %v6042_v60  ;;  %v6134_v59 = vld [vmem:[%s7851_s10 + $0x588] ss:$16 sps:$4 sm:$0xff]   ;;  %v6139_v60 = vld [vmem:[%s7851_s10 + $0x5a4] ss:$16 sps:$4 sm:$0xff]  }
 0x196   : > { %4493 = vmatprep.subr.bf16.mxu0 %v6047_v61  ;;  %4821 = vmatprep.subr.bf16.mxu1 %v6050_v62  ;;  %v6142_v61 = vld [vmem:[%s7851_s10 + $0x5ac] ss:$16 sps:$4 sm:$0xff]   ;;  %v6137_v62 = vld [vmem:[%s7851_s10 + $0x5a0] ss:$16 sps:$4 sm:$0xff]  }
 0x199   : > { %4494 = vmatpush1.bf16.msra.mxu0 %v6045_v63  ;;  %4822 = vmatpush1.bf16.msra.mxu1 %v6048_v1  ;;  %v6140_v63 = vld [vmem:[%s7851_s10 + $0x5a8] ss:$16 sps:$4 sm:$0xff]   ;;  %v6145_v1 = vld [vmem:[%s7851_s10 + $0x5c4] ss:$16 sps:$4 sm:$0xff]  }
 0x19a   : > { %4495 = vmatprep.subr.bf16.mxu0 %v6053_v2  ;;  %4823 = vmatprep.subr.bf16.mxu1 %v6056_v3  ;;  %v6148_v2 = vld [vmem:[%s7851_s10 + $0x5cc] ss:$16 sps:$4 sm:$0xff]   ;;  %v6143_v3 = vld [vmem:[%s7851_s10 + $0x5c0] ss:$16 sps:$4 sm:$0xff]  }
 0x19d   : > { %4496 = vmatpush1.bf16.msra.mxu0 %v6051_v4  ;;  %4824 = vmatpush1.bf16.msra.mxu1 %v6054_v5  ;;  %v6146_v4 = vld [vmem:[%s7851_s10 + $0x5c8] ss:$16 sps:$4 sm:$0xff]   ;;  %v6151_v5 = vld [vmem:[%s7851_s10 + $0x5e4] ss:$16 sps:$4 sm:$0xff]  }
 0x19e   : > { %4506 = vmatprep.subr.bf16.mxu0 %v6061_v6  ;;  %4834 = vmatprep.subr.bf16.mxu1 %v6064_v7  ;;  %v6154_v6 = vld [vmem:[%s7851_s10 + $0x5ec] ss:$16 sps:$4 sm:$0xff]   ;;  %v6149_v7 = vld [vmem:[%s7851_s10 + $0x5e0] ss:$16 sps:$4 sm:$0xff]  }
 0x1a0   : > { %4498 = vmatmul.mubr.bf16.vlgmr.msra.gmra.mrb[0].mxu0 %v5215_v8  ;;  %4826 = vmatmul.mubr.bf16.vlgmr.msra.gmra.mrb[0].mxu1 %v5215_v8  ;;  %v6152_v8 = vld [vmem:[%s7851_s10 + $0x5e8] ss:$16 sps:$4 sm:$0xff]  }
 0x1a1   : > { %4507 = vmatpush1.bf16.msra.mxu0 %v6059_v9  ;;  %4835 = vmatpush1.bf16.msra.mxu1 %v6062_v10  ;;  %v6159_v9 = vld [vmem:[%s7851_s10 + $0x604] ss:$16 sps:$4 sm:$0xff]   ;;  %v6162_v10 = vld [vmem:[%s7851_s10 + $0x60c] ss:$16 sps:$4 sm:$0xff]  }
 0x1a2   : > { %4508 = vmatprep.subr.bf16.mxu0 %v6067_v0  ;;  %4836 = vmatprep.subr.bf16.mxu1 %v6070_v12  ;;  %v5217_v0 = vcombine.low %v7999_v11, %v7999_v11  ;;  %v6157_v12 = vld [vmem:[%s7851_s10 + $0x600] ss:$16 sps:$4 sm:$0xff]  }
 0x1a3   : > { %4538 = vmatprep.mubr.bf16.mxu0 %v5218_v13  ;;  %4866 = vmatprep.mubr.bf16.mxu1 %v5218_v13  ;;  %v8071_v13 = vld [vmem:[%s8488_s0 + $0x18] sm:$0xff] }
 0x1a4   : > { %v5220_v11 = vcombine.high %v8071_v13, %v8071_v13 }
 0x1a5   : > { %4509 = vmatpush1.bf16.msra.mxu0 %v6065_v14  ;;  %4837 = vmatpush1.bf16.msra.mxu1 %v6068_v15  ;;  %v6160_v14 = vld [vmem:[%s7851_s10 + $0x608] ss:$16 sps:$4 sm:$0xff]   ;;  %v6165_v15 = vld [vmem:[%s7851_s10 + $0x624] ss:$16 sps:$4 sm:$0xff]  }
 0x1a6   : > { %4510 = vmatprep.subr.bf16.mxu0 %v6073_v16  ;;  %4838 = vmatprep.subr.bf16.mxu1 %v6076_v17  ;;  %v6168_v16 = vld [vmem:[%s7851_s10 + $0x62c] ss:$16 sps:$4 sm:$0xff]   ;;  %v6163_v17 = vld [vmem:[%s7851_s10 + $0x620] ss:$16 sps:$4 sm:$0xff]  }
 0x1a9   : > { %4511 = vmatpush1.bf16.msra.mxu0 %v6071_v18  ;;  %4839 = vmatpush1.bf16.msra.mxu1 %v6074_v19  ;;  %v6166_v18 = vld [vmem:[%s7851_s10 + $0x628] ss:$16 sps:$4 sm:$0xff]   ;;  %v6171_v19 = vld [vmem:[%s7851_s10 + $0x644] ss:$16 sps:$4 sm:$0xff]  }
 0x1aa   : > { %4512 = vmatprep.subr.bf16.mxu0 %v6079_v20  ;;  %4840 = vmatprep.subr.bf16.mxu1 %v6082_v21  ;;  %v6174_v20 = vld [vmem:[%s7851_s10 + $0x64c] ss:$16 sps:$4 sm:$0xff]   ;;  %v6169_v21 = vld [vmem:[%s7851_s10 + $0x640] ss:$16 sps:$4 sm:$0xff]  }
 0x1ad   : > { %4513 = vmatpush1.bf16.msra.mxu0 %v6077_v22  ;;  %4841 = vmatpush1.bf16.msra.mxu1 %v6080_v23  ;;  %v6172_v22 = vld [vmem:[%s7851_s10 + $0x648] ss:$16 sps:$4 sm:$0xff]   ;;  %v6177_v23 = vld [vmem:[%s7851_s10 + $0x664] ss:$16 sps:$4 sm:$0xff]  }
 0x1ae   : > { %4514 = vmatprep.subr.bf16.mxu0 %v6085_v24  ;;  %4842 = vmatprep.subr.bf16.mxu1 %v6088_v25  ;;  %v6180_v24 = vld [vmem:[%s7851_s10 + $0x66c] ss:$16 sps:$4 sm:$0xff]   ;;  %v6175_v25 = vld [vmem:[%s7851_s10 + $0x660] ss:$16 sps:$4 sm:$0xff]  }
 0x1b1   : > { %4515 = vmatpush1.bf16.msra.mxu0 %v6083_v26  ;;  %4843 = vmatpush1.bf16.msra.mxu1 %v6086_v27  ;;  %v6178_v26 = vld [vmem:[%s7851_s10 + $0x668] ss:$16 sps:$4 sm:$0xff]   ;;  %v6183_v27 = vld [vmem:[%s7851_s10 + $0x684] ss:$16 sps:$4 sm:$0xff]  }
 0x1b2   : > { %4516 = vmatprep.subr.bf16.mxu0 %v6091_v28  ;;  %4844 = vmatprep.subr.bf16.mxu1 %v6094_v29  ;;  %v6186_v28 = vld [vmem:[%s7851_s10 + $0x68c] ss:$16 sps:$4 sm:$0xff]   ;;  %v6181_v29 = vld [vmem:[%s7851_s10 + $0x680] ss:$16 sps:$4 sm:$0xff]  }
 0x1b5   : > { %4517 = vmatpush1.bf16.msra.mxu0 %v6089_v30  ;;  %4845 = vmatpush1.bf16.msra.mxu1 %v6092_v31  ;;  %v6184_v30 = vld [vmem:[%s7851_s10 + $0x688] ss:$16 sps:$4 sm:$0xff]   ;;  %v6189_v31 = vld [vmem:[%s7851_s10 + $0x6a4] ss:$16 sps:$4 sm:$0xff]  }
 0x1b6   : > { %4518 = vmatprep.subr.bf16.mxu0 %v6097_v32  ;;  %4846 = vmatprep.subr.bf16.mxu1 %v6100_v33  ;;  %v6192_v32 = vld [vmem:[%s7851_s10 + $0x6ac] ss:$16 sps:$4 sm:$0xff]   ;;  %v6187_v33 = vld [vmem:[%s7851_s10 + $0x6a0] ss:$16 sps:$4 sm:$0xff]  }
 0x1b9   : > { %4519 = vmatpush1.bf16.msra.mxu0 %v6095_v34  ;;  %4847 = vmatpush1.bf16.msra.mxu1 %v6098_v35  ;;  %v6190_v34 = vld [vmem:[%s7851_s10 + $0x6a8] ss:$16 sps:$4 sm:$0xff]   ;;  %v6195_v35 = vld [vmem:[%s7851_s10 + $0x6c4] ss:$16 sps:$4 sm:$0xff]  }
 0x1ba   : > { %4520 = vmatprep.subr.bf16.mxu0 %v6103_v36  ;;  %4848 = vmatprep.subr.bf16.mxu1 %v6106_v37  ;;  %v6198_v36 = vld [vmem:[%s7851_s10 + $0x6cc] ss:$16 sps:$4 sm:$0xff]   ;;  %v6193_v37 = vld [vmem:[%s7851_s10 + $0x6c0] ss:$16 sps:$4 sm:$0xff]  }
 0x1bd   : > { %4521 = vmatpush1.bf16.msra.mxu0 %v6101_v38  ;;  %4849 = vmatpush1.bf16.msra.mxu1 %v6104_v39  ;;  %v6196_v38 = vld [vmem:[%s7851_s10 + $0x6c8] ss:$16 sps:$4 sm:$0xff]   ;;  %v6201_v39 = vld [vmem:[%s7851_s10 + $0x6e4] ss:$16 sps:$4 sm:$0xff]  }
 0x1be   : > { %4522 = vmatprep.subr.bf16.mxu0 %v6109_v40  ;;  %4850 = vmatprep.subr.bf16.mxu1 %v6112_v41  ;;  %v6204_v40 = vld [vmem:[%s7851_s10 + $0x6ec] ss:$16 sps:$4 sm:$0xff]   ;;  %v6199_v41 = vld [vmem:[%s7851_s10 + $0x6e0] ss:$16 sps:$4 sm:$0xff]  }
 0x1c1   : > { %4523 = vmatpush1.bf16.msra.mxu0 %v6107_v42  ;;  %4851 = vmatpush1.bf16.msra.mxu1 %v6110_v43  ;;  %v6202_v42 = vld [vmem:[%s7851_s10 + $0x6e8] ss:$16 sps:$4 sm:$0xff]   ;;  %v6207_v43 = vld [vmem:[%s7851_s10 + $0x704] ss:$16 sps:$4 sm:$0xff]  }
 0x1c2   : > { %4524 = vmatprep.subr.bf16.mxu0 %v6115_v44  ;;  %4852 = vmatprep.subr.bf16.mxu1 %v6118_v45  ;;  %v6210_v44 = vld [vmem:[%s7851_s10 + $0x70c] ss:$16 sps:$4 sm:$0xff]   ;;  %v6205_v45 = vld [vmem:[%s7851_s10 + $0x700] ss:$16 sps:$4 sm:$0xff]  }
 0x1c5   : > { %4525 = vmatpush1.bf16.msra.mxu0 %v6113_v46  ;;  %4853 = vmatpush1.bf16.msra.mxu1 %v6116_v47  ;;  %v6208_v46 = vld [vmem:[%s7851_s10 + $0x708] ss:$16 sps:$4 sm:$0xff]   ;;  %v6213_v47 = vld [vmem:[%s7851_s10 + $0x724] ss:$16 sps:$4 sm:$0xff]  }
 0x1c6   : > { %4526 = vmatprep.subr.bf16.mxu0 %v6121_v48  ;;  %4854 = vmatprep.subr.bf16.mxu1 %v6124_v49  ;;  %v6216_v48 = vld [vmem:[%s7851_s10 + $0x72c] ss:$16 sps:$4 sm:$0xff]   ;;  %v6211_v49 = vld [vmem:[%s7851_s10 + $0x720] ss:$16 sps:$4 sm:$0xff]  }
 0x1c9   : > { %4527 = vmatpush1.bf16.msra.mxu0 %v6119_v50  ;;  %4855 = vmatpush1.bf16.msra.mxu1 %v6122_v51  ;;  %v6214_v50 = vld [vmem:[%s7851_s10 + $0x728] ss:$16 sps:$4 sm:$0xff]   ;;  %v6219_v51 = vld [vmem:[%s7851_s10 + $0x744] ss:$16 sps:$4 sm:$0xff]  }
 0x1ca   : > { %4528 = vmatprep.subr.bf16.mxu0 %v6127_v52  ;;  %4856 = vmatprep.subr.bf16.mxu1 %v6130_v53  ;;  %v6222_v52 = vld [vmem:[%s7851_s10 + $0x74c] ss:$16 sps:$4 sm:$0xff]   ;;  %v6217_v53 = vld [vmem:[%s7851_s10 + $0x740] ss:$16 sps:$4 sm:$0xff]  }
 0x1cd   : > { %4529 = vmatpush1.bf16.msra.mxu0 %v6125_v54  ;;  %4857 = vmatpush1.bf16.msra.mxu1 %v6128_v55  ;;  %v6220_v54 = vld [vmem:[%s7851_s10 + $0x748] ss:$16 sps:$4 sm:$0xff]   ;;  %v6225_v55 = vld [vmem:[%s7851_s10 + $0x764] ss:$16 sps:$4 sm:$0xff]  }
 0x1ce   : > { %4530 = vmatprep.subr.bf16.mxu0 %v6133_v56  ;;  %4858 = vmatprep.subr.bf16.mxu1 %v6136_v57  ;;  %v6228_v56 = vld [vmem:[%s7851_s10 + $0x76c] ss:$16 sps:$4 sm:$0xff]   ;;  %v6223_v57 = vld [vmem:[%s7851_s10 + $0x760] ss:$16 sps:$4 sm:$0xff]  }
 0x1d1   : > { %4531 = vmatpush1.bf16.msra.mxu0 %v6131_v58  ;;  %4859 = vmatpush1.bf16.msra.mxu1 %v6134_v59  ;;  %v6226_v58 = vld [vmem:[%s7851_s10 + $0x768] ss:$16 sps:$4 sm:$0xff]   ;;  %v6231_v59 = vld [vmem:[%s7851_s10 + $0x784] ss:$16 sps:$4 sm:$0xff]  }
 0x1d2   : > { %4532 = vmatprep.subr.bf16.mxu0 %v6139_v60  ;;  %4860 = vmatprep.subr.bf16.mxu1 %v6142_v61  ;;  %v6234_v60 = vld [vmem:[%s7851_s10 + $0x78c] ss:$16 sps:$4 sm:$0xff]   ;;  %v6229_v61 = vld [vmem:[%s7851_s10 + $0x780] ss:$16 sps:$4 sm:$0xff]  }
 0x1d5   : > { %4533 = vmatpush1.bf16.msra.mxu0 %v6137_v62  ;;  %4861 = vmatpush1.bf16.msra.mxu1 %v6140_v63  ;;  %v6232_v62 = vld [vmem:[%s7851_s10 + $0x788] ss:$16 sps:$4 sm:$0xff]   ;;  %v6237_v63 = vld [vmem:[%s7851_s10 + $0x7a4] ss:$16 sps:$4 sm:$0xff]  }
 0x1d6   : > { %4534 = vmatprep.subr.bf16.mxu0 %v6145_v1  ;;  %4862 = vmatprep.subr.bf16.mxu1 %v6148_v2  ;;  %v6240_v1 = vld [vmem:[%s7851_s10 + $0x7ac] ss:$16 sps:$4 sm:$0xff]   ;;  %v6235_v2 = vld [vmem:[%s7851_s10 + $0x7a0] ss:$16 sps:$4 sm:$0xff]  }
 0x1d9   : > { %4535 = vmatpush1.bf16.msra.mxu0 %v6143_v3  ;;  %4863 = vmatpush1.bf16.msra.mxu1 %v6146_v4  ;;  %v6238_v3 = vld [vmem:[%s7851_s10 + $0x7a8] ss:$16 sps:$4 sm:$0xff]   ;;  %v6243_v4 = vld [vmem:[%s7851_s10 + $0x7c4] ss:$16 sps:$4 sm:$0xff]  }
 0x1da   : > { %4536 = vmatprep.subr.bf16.mxu0 %v6151_v5  ;;  %4864 = vmatprep.subr.bf16.mxu1 %v6154_v6  ;;  %v6246_v5 = vld [vmem:[%s7851_s10 + $0x7cc] ss:$16 sps:$4 sm:$0xff]   ;;  %v6241_v6 = vld [vmem:[%s7851_s10 + $0x7c0] ss:$16 sps:$4 sm:$0xff]  }
 0x1dd   : > { %4537 = vmatpush1.bf16.msra.mxu0 %v6149_v7  ;;  %4865 = vmatpush1.bf16.msra.mxu1 %v6152_v8  ;;  %v6244_v7 = vld [vmem:[%s7851_s10 + $0x7c8] ss:$16 sps:$4 sm:$0xff]   ;;  %v6249_v8 = vld [vmem:[%s7851_s10 + $0x7e4] ss:$16 sps:$4 sm:$0xff]  }
 0x1de   : > { %4547 = vmatprep.subr.bf16.mxu0 %v6159_v9  ;;  %4875 = vmatprep.subr.bf16.mxu1 %v6162_v10  ;;  %v6252_v9 = vld [vmem:[%s7851_s10 + $0x7ec] ss:$16 sps:$4 sm:$0xff]   ;;  %v6247_v10 = vld [vmem:[%s7851_s10 + $0x7e0] ss:$16 sps:$4 sm:$0xff]  }
 0x1e0   : > { %4539 = vmatmul.mubr.bf16.vlgmr.msra.gmra.mrb[0].mxu0 %v5217_v0  ;;  %4867 = vmatmul.mubr.bf16.vlgmr.msra.gmra.mrb[0].mxu1 %v5217_v0  ;;  %v6250_v0 = vld [vmem:[%s7851_s10 + $0x7e8] ss:$16 sps:$4 sm:$0xff]  }
 0x1e1   : > { %4548 = vmatpush1.bf16.msra.mxu0 %v6157_v12  ;;  %4876 = vmatpush1.bf16.msra.mxu1 %v6160_v14  ;;  %v6257_v12 = vld [vmem:[%s7851_s10 + $0x804] ss:$16 sps:$4 sm:$0xff]   ;;  %v6260_v14 = vld [vmem:[%s7851_s10 + $0x80c] ss:$16 sps:$4 sm:$0xff]  }
 0x1e2   : > { %4549 = vmatprep.subr.bf16.mxu0 %v6165_v15  ;;  %4877 = vmatprep.subr.bf16.mxu1 %v6168_v16  ;;  %v5219_v15 = vcombine.low %v8071_v13, %v8071_v13  ;;  %v6255_v16 = vld [vmem:[%s7851_s10 + $0x800] ss:$16 sps:$4 sm:$0xff]  }
 0x1e3   : > { %4579 = vmatprep.mubr.bf16.mxu0 %v5220_v11  ;;  %4907 = vmatprep.mubr.bf16.mxu1 %v5220_v11  ;;  %v8144_v11 = vld [vmem:[%s8488_s0 + $0x20] sm:$0xff] }
 0x1e4   : > { %v5222_v13 = vcombine.high %v8144_v11, %v8144_v11 }
 0x1e5   : > { %4550 = vmatpush1.bf16.msra.mxu0 %v6163_v17  ;;  %4878 = vmatpush1.bf16.msra.mxu1 %v6166_v18  ;;  %v6258_v17 = vld [vmem:[%s7851_s10 + $0x808] ss:$16 sps:$4 sm:$0xff]   ;;  %v6263_v18 = vld [vmem:[%s7851_s10 + $0x824] ss:$16 sps:$4 sm:$0xff]  }
 0x1e6   : > { %4551 = vmatprep.subr.bf16.mxu0 %v6171_v19  ;;  %4879 = vmatprep.subr.bf16.mxu1 %v6174_v20  ;;  %v6266_v19 = vld [vmem:[%s7851_s10 + $0x82c] ss:$16 sps:$4 sm:$0xff]   ;;  %v6261_v20 = vld [vmem:[%s7851_s10 + $0x820] ss:$16 sps:$4 sm:$0xff]  }
 0x1e9   : > { %4552 = vmatpush1.bf16.msra.mxu0 %v6169_v21  ;;  %4880 = vmatpush1.bf16.msra.mxu1 %v6172_v22  ;;  %v6264_v21 = vld [vmem:[%s7851_s10 + $0x828] ss:$16 sps:$4 sm:$0xff]   ;;  %v6269_v22 = vld [vmem:[%s7851_s10 + $0x844] ss:$16 sps:$4 sm:$0xff]  }
 0x1ea   : > { %4553 = vmatprep.subr.bf16.mxu0 %v6177_v23  ;;  %4881 = vmatprep.subr.bf16.mxu1 %v6180_v24  ;;  %v6272_v23 = vld [vmem:[%s7851_s10 + $0x84c] ss:$16 sps:$4 sm:$0xff]   ;;  %v6267_v24 = vld [vmem:[%s7851_s10 + $0x840] ss:$16 sps:$4 sm:$0xff]  }
 0x1ed   : > { %4554 = vmatpush1.bf16.msra.mxu0 %v6175_v25  ;;  %4882 = vmatpush1.bf16.msra.mxu1 %v6178_v26  ;;  %v6270_v25 = vld [vmem:[%s7851_s10 + $0x848] ss:$16 sps:$4 sm:$0xff]   ;;  %v6275_v26 = vld [vmem:[%s7851_s10 + $0x864] ss:$16 sps:$4 sm:$0xff]  }
 0x1ee   : > { %4555 = vmatprep.subr.bf16.mxu0 %v6183_v27  ;;  %4883 = vmatprep.subr.bf16.mxu1 %v6186_v28  ;;  %v6278_v27 = vld [vmem:[%s7851_s10 + $0x86c] ss:$16 sps:$4 sm:$0xff]   ;;  %v6273_v28 = vld [vmem:[%s7851_s10 + $0x860] ss:$16 sps:$4 sm:$0xff]  }
 0x1f1   : > { %4556 = vmatpush1.bf16.msra.mxu0 %v6181_v29  ;;  %4884 = vmatpush1.bf16.msra.mxu1 %v6184_v30  ;;  %v6276_v29 = vld [vmem:[%s7851_s10 + $0x868] ss:$16 sps:$4 sm:$0xff]   ;;  %v6281_v30 = vld [vmem:[%s7851_s10 + $0x884] ss:$16 sps:$4 sm:$0xff]  }
 0x1f2   : > { %4557 = vmatprep.subr.bf16.mxu0 %v6189_v31  ;;  %4885 = vmatprep.subr.bf16.mxu1 %v6192_v32  ;;  %v6284_v31 = vld [vmem:[%s7851_s10 + $0x88c] ss:$16 sps:$4 sm:$0xff]   ;;  %v6279_v32 = vld [vmem:[%s7851_s10 + $0x880] ss:$16 sps:$4 sm:$0xff]  }
 0x1f5   : > { %4558 = vmatpush1.bf16.msra.mxu0 %v6187_v33  ;;  %4886 = vmatpush1.bf16.msra.mxu1 %v6190_v34  ;;  %v6282_v33 = vld [vmem:[%s7851_s10 + $0x888] ss:$16 sps:$4 sm:$0xff]   ;;  %v6287_v34 = vld [vmem:[%s7851_s10 + $0x8a4] ss:$16 sps:$4 sm:$0xff]  }
 0x1f6   : > { %4559 = vmatprep.subr.bf16.mxu0 %v6195_v35  ;;  %4887 = vmatprep.subr.bf16.mxu1 %v6198_v36  ;;  %v6290_v35 = vld [vmem:[%s7851_s10 + $0x8ac] ss:$16 sps:$4 sm:$0xff]   ;;  %v6285_v36 = vld [vmem:[%s7851_s10 + $0x8a0] ss:$16 sps:$4 sm:$0xff]  }
 0x1f9   : > { %4560 = vmatpush1.bf16.msra.mxu0 %v6193_v37  ;;  %4888 = vmatpush1.bf16.msra.mxu1 %v6196_v38  ;;  %v6288_v37 = vld [vmem:[%s7851_s10 + $0x8a8] ss:$16 sps:$4 sm:$0xff]   ;;  %v6293_v38 = vld [vmem:[%s7851_s10 + $0x8c4] ss:$16 sps:$4 sm:$0xff]  }
 0x1fa   : > { %4561 = vmatprep.subr.bf16.mxu0 %v6201_v39  ;;  %4889 = vmatprep.subr.bf16.mxu1 %v6204_v40  ;;  %v6296_v39 = vld [vmem:[%s7851_s10 + $0x8cc] ss:$16 sps:$4 sm:$0xff]   ;;  %v6291_v40 = vld [vmem:[%s7851_s10 + $0x8c0] ss:$16 sps:$4 sm:$0xff]  }
 0x1fd   : > { %4562 = vmatpush1.bf16.msra.mxu0 %v6199_v41  ;;  %4890 = vmatpush1.bf16.msra.mxu1 %v6202_v42  ;;  %v6294_v41 = vld [vmem:[%s7851_s10 + $0x8c8] ss:$16 sps:$4 sm:$0xff]   ;;  %v6299_v42 = vld [vmem:[%s7851_s10 + $0x8e4] ss:$16 sps:$4 sm:$0xff]  }
 0x1fe   : > { %4563 = vmatprep.subr.bf16.mxu0 %v6207_v43  ;;  %4891 = vmatprep.subr.bf16.mxu1 %v6210_v44  ;;  %v6302_v43 = vld [vmem:[%s7851_s10 + $0x8ec] ss:$16 sps:$4 sm:$0xff]   ;;  %v6297_v44 = vld [vmem:[%s7851_s10 + $0x8e0] ss:$16 sps:$4 sm:$0xff]  }
 0x201   : > { %4564 = vmatpush1.bf16.msra.mxu0 %v6205_v45  ;;  %4892 = vmatpush1.bf16.msra.mxu1 %v6208_v46  ;;  %v6300_v45 = vld [vmem:[%s7851_s10 + $0x8e8] ss:$16 sps:$4 sm:$0xff]   ;;  %v6305_v46 = vld [vmem:[%s7851_s10 + $0x904] ss:$16 sps:$4 sm:$0xff]  }
 0x202   : > { %4565 = vmatprep.subr.bf16.mxu0 %v6213_v47  ;;  %4893 = vmatprep.subr.bf16.mxu1 %v6216_v48  ;;  %v6308_v47 = vld [vmem:[%s7851_s10 + $0x90c] ss:$16 sps:$4 sm:$0xff]   ;;  %v6303_v48 = vld [vmem:[%s7851_s10 + $0x900] ss:$16 sps:$4 sm:$0xff]  }
 0x205   : > { %4566 = vmatpush1.bf16.msra.mxu0 %v6211_v49  ;;  %4894 = vmatpush1.bf16.msra.mxu1 %v6214_v50  ;;  %v6306_v49 = vld [vmem:[%s7851_s10 + $0x908] ss:$16 sps:$4 sm:$0xff]   ;;  %v6311_v50 = vld [vmem:[%s7851_s10 + $0x924] ss:$16 sps:$4 sm:$0xff]  }
 0x206   : > { %4567 = vmatprep.subr.bf16.mxu0 %v6219_v51  ;;  %4895 = vmatprep.subr.bf16.mxu1 %v6222_v52  ;;  %v6314_v51 = vld [vmem:[%s7851_s10 + $0x92c] ss:$16 sps:$4 sm:$0xff]   ;;  %v6309_v52 = vld [vmem:[%s7851_s10 + $0x920] ss:$16 sps:$4 sm:$0xff]  }
 0x209   : > { %4568 = vmatpush1.bf16.msra.mxu0 %v6217_v53  ;;  %4896 = vmatpush1.bf16.msra.mxu1 %v6220_v54  ;;  %v6312_v53 = vld [vmem:[%s7851_s10 + $0x928] ss:$16 sps:$4 sm:$0xff]   ;;  %v6317_v54 = vld [vmem:[%s7851_s10 + $0x944] ss:$16 sps:$4 sm:$0xff]  }
 0x20a   : > { %4569 = vmatprep.subr.bf16.mxu0 %v6225_v55  ;;  %4897 = vmatprep.subr.bf16.mxu1 %v6228_v56  ;;  %v6320_v55 = vld [vmem:[%s7851_s10 + $0x94c] ss:$16 sps:$4 sm:$0xff]   ;;  %v6315_v56 = vld [vmem:[%s7851_s10 + $0x940] ss:$16 sps:$4 sm:$0xff]  }
 0x20d   : > { %4570 = vmatpush1.bf16.msra.mxu0 %v6223_v57  ;;  %4898 = vmatpush1.bf16.msra.mxu1 %v6226_v58  ;;  %v6318_v57 = vld [vmem:[%s7851_s10 + $0x948] ss:$16 sps:$4 sm:$0xff]   ;;  %v6323_v58 = vld [vmem:[%s7851_s10 + $0x964] ss:$16 sps:$4 sm:$0xff]  }
 0x20e   : > { %4571 = vmatprep.subr.bf16.mxu0 %v6231_v59  ;;  %4899 = vmatprep.subr.bf16.mxu1 %v6234_v60  ;;  %v6326_v59 = vld [vmem:[%s7851_s10 + $0x96c] ss:$16 sps:$4 sm:$0xff]   ;;  %v6321_v60 = vld [vmem:[%s7851_s10 + $0x960] ss:$16 sps:$4 sm:$0xff]  }
 0x211   : > { %4572 = vmatpush1.bf16.msra.mxu0 %v6229_v61  ;;  %4900 = vmatpush1.bf16.msra.mxu1 %v6232_v62  ;;  %v6324_v61 = vld [vmem:[%s7851_s10 + $0x968] ss:$16 sps:$4 sm:$0xff]   ;;  %v6329_v62 = vld [vmem:[%s7851_s10 + $0x984] ss:$16 sps:$4 sm:$0xff]  }
 0x212   : > { %4573 = vmatprep.subr.bf16.mxu0 %v6237_v63  ;;  %4901 = vmatprep.subr.bf16.mxu1 %v6240_v1  ;;  %v6332_v63 = vld [vmem:[%s7851_s10 + $0x98c] ss:$16 sps:$4 sm:$0xff]   ;;  %v6327_v1 = vld [vmem:[%s7851_s10 + $0x980] ss:$16 sps:$4 sm:$0xff]  }
 0x215   : > { %4574 = vmatpush1.bf16.msra.mxu0 %v6235_v2  ;;  %4902 = vmatpush1.bf16.msra.mxu1 %v6238_v3  ;;  %v6330_v2 = vld [vmem:[%s7851_s10 + $0x988] ss:$16 sps:$4 sm:$0xff]   ;;  %v6335_v3 = vld [vmem:[%s7851_s10 + $0x9a4] ss:$16 sps:$4 sm:$0xff]  }
 0x216   : > { %4575 = vmatprep.subr.bf16.mxu0 %v6243_v4  ;;  %4903 = vmatprep.subr.bf16.mxu1 %v6246_v5  ;;  %v6338_v4 = vld [vmem:[%s7851_s10 + $0x9ac] ss:$16 sps:$4 sm:$0xff]   ;;  %v6333_v5 = vld [vmem:[%s7851_s10 + $0x9a0] ss:$16 sps:$4 sm:$0xff]  }
 0x219   : > { %4576 = vmatpush1.bf16.msra.mxu0 %v6241_v6  ;;  %4904 = vmatpush1.bf16.msra.mxu1 %v6244_v7  ;;  %v6336_v6 = vld [vmem:[%s7851_s10 + $0x9a8] ss:$16 sps:$4 sm:$0xff]   ;;  %v6341_v7 = vld [vmem:[%s7851_s10 + $0x9c4] ss:$16 sps:$4 sm:$0xff]  }
 0x21a   : > { %4577 = vmatprep.subr.bf16.mxu0 %v6249_v8  ;;  %4905 = vmatprep.subr.bf16.mxu1 %v6252_v9  ;;  %v6344_v8 = vld [vmem:[%s7851_s10 + $0x9cc] ss:$16 sps:$4 sm:$0xff]   ;;  %v6339_v9 = vld [vmem:[%s7851_s10 + $0x9c0] ss:$16 sps:$4 sm:$0xff]  }
 0x21d   : > { %4578 = vmatpush1.bf16.msra.mxu0 %v6247_v10  ;;  %4906 = vmatpush1.bf16.msra.mxu1 %v6250_v0  ;;  %v6342_v10 = vld [vmem:[%s7851_s10 + $0x9c8] ss:$16 sps:$4 sm:$0xff]   ;;  %v6347_v0 = vld [vmem:[%s7851_s10 + $0x9e4] ss:$16 sps:$4 sm:$0xff]  }
 0x21e   : > { %4588 = vmatprep.subr.bf16.mxu0 %v6257_v12  ;;  %4916 = vmatprep.subr.bf16.mxu1 %v6260_v14  ;;  %v6350_v12 = vld [vmem:[%s7851_s10 + $0x9ec] ss:$16 sps:$4 sm:$0xff]   ;;  %v6345_v14 = vld [vmem:[%s7851_s10 + $0x9e0] ss:$16 sps:$4 sm:$0xff]  }
 0x220   : > { %4580 = vmatmul.mubr.bf16.vlgmr.msra.gmra.mrb[0].mxu0 %v5219_v15  ;;  %4908 = vmatmul.mubr.bf16.vlgmr.msra.gmra.mrb[0].mxu1 %v5219_v15  ;;  %v6348_v15 = vld [vmem:[%s7851_s10 + $0x9e8] ss:$16 sps:$4 sm:$0xff]  }
 0x221   : > { %4589 = vmatpush1.bf16.msra.mxu0 %v6255_v16  ;;  %4917 = vmatpush1.bf16.msra.mxu1 %v6258_v17  ;;  %v6355_v16 = vld [vmem:[%s7851_s10 + $0xa04] ss:$16 sps:$4 sm:$0xff]   ;;  %v6358_v17 = vld [vmem:[%s7851_s10 + $0xa0c] ss:$16 sps:$4 sm:$0xff]  }
 0x222   : > { %4590 = vmatprep.subr.bf16.mxu0 %v6263_v18  ;;  %4918 = vmatprep.subr.bf16.mxu1 %v6266_v19  ;;  %v8214_v18 = vld [vmem:[%s8488_s0 + $0x28] sm:$0xff]  ;;  %v5221_v19 = vcombine.low %v8144_v11, %v8144_v11  ;;  %v6359_v11 = vld [vmem:[%s7851_s10 + $0xa20] ss:$16 sps:$4 sm:$0xff]  }
 0x223   : > { %4620 = vmatprep.mubr.bf16.mxu0 %v5222_v13  ;;  %4948 = vmatprep.mubr.bf16.mxu1 %v5222_v13  ;;  %v6353_v13 = vld [vmem:[%s7851_s10 + $0xa00] ss:$16 sps:$4 sm:$0xff]  }
 0x225   : > { %4591 = vmatpush1.bf16.msra.mxu0 %v6261_v20  ;;  %4919 = vmatpush1.bf16.msra.mxu1 %v6264_v21  ;;  %v6356_v20 = vld [vmem:[%s7851_s10 + $0xa08] ss:$16 sps:$4 sm:$0xff]   ;;  %v6361_v21 = vld [vmem:[%s7851_s10 + $0xa24] ss:$16 sps:$4 sm:$0xff]  }
 0x226   : > { %4592 = vmatprep.subr.bf16.mxu0 %v6269_v22  ;;  %4920 = vmatprep.subr.bf16.mxu1 %v6272_v23  ;;  %v6364_v22 = vld [vmem:[%s7851_s10 + $0xa2c] ss:$16 sps:$4 sm:$0xff]   ;;  %v5224_v23 = vcombine.high %v8214_v18, %v8214_v18 }
 0x229   : > { %4593 = vmatpush1.bf16.msra.mxu0 %v6267_v24  ;;  %4921 = vmatpush1.bf16.msra.mxu1 %v6270_v25  ;;  %v6362_v24 = vld [vmem:[%s7851_s10 + $0xa28] ss:$16 sps:$4 sm:$0xff]   ;;  %v6367_v25 = vld [vmem:[%s7851_s10 + $0xa44] ss:$16 sps:$4 sm:$0xff]  }
 0x22a   : > { %4594 = vmatprep.subr.bf16.mxu0 %v6275_v26  ;;  %4922 = vmatprep.subr.bf16.mxu1 %v6278_v27  ;;  %v6370_v26 = vld [vmem:[%s7851_s10 + $0xa4c] ss:$16 sps:$4 sm:$0xff]   ;;  %v6365_v27 = vld [vmem:[%s7851_s10 + $0xa40] ss:$16 sps:$4 sm:$0xff]  }
 0x22d   : > { %4595 = vmatpush1.bf16.msra.mxu0 %v6273_v28  ;;  %4923 = vmatpush1.bf16.msra.mxu1 %v6276_v29  ;;  %v6368_v28 = vld [vmem:[%s7851_s10 + $0xa48] ss:$16 sps:$4 sm:$0xff]   ;;  %v6373_v29 = vld [vmem:[%s7851_s10 + $0xa64] ss:$16 sps:$4 sm:$0xff]  }
 0x22e   : > { %4596 = vmatprep.subr.bf16.mxu0 %v6281_v30  ;;  %4924 = vmatprep.subr.bf16.mxu1 %v6284_v31  ;;  %v6376_v30 = vld [vmem:[%s7851_s10 + $0xa6c] ss:$16 sps:$4 sm:$0xff]   ;;  %v6371_v31 = vld [vmem:[%s7851_s10 + $0xa60] ss:$16 sps:$4 sm:$0xff]  }
 0x231   : > { %4597 = vmatpush1.bf16.msra.mxu0 %v6279_v32  ;;  %4925 = vmatpush1.bf16.msra.mxu1 %v6282_v33  ;;  %v6374_v32 = vld [vmem:[%s7851_s10 + $0xa68] ss:$16 sps:$4 sm:$0xff]   ;;  %v6379_v33 = vld [vmem:[%s7851_s10 + $0xa84] ss:$16 sps:$4 sm:$0xff]  }
 0x232   : > { %4598 = vmatprep.subr.bf16.mxu0 %v6287_v34  ;;  %4926 = vmatprep.subr.bf16.mxu1 %v6290_v35  ;;  %v6382_v34 = vld [vmem:[%s7851_s10 + $0xa8c] ss:$16 sps:$4 sm:$0xff]   ;;  %v6377_v35 = vld [vmem:[%s7851_s10 + $0xa80] ss:$16 sps:$4 sm:$0xff]  }
 0x235   : > { %4599 = vmatpush1.bf16.msra.mxu0 %v6285_v36  ;;  %4927 = vmatpush1.bf16.msra.mxu1 %v6288_v37  ;;  %v6380_v36 = vld [vmem:[%s7851_s10 + $0xa88] ss:$16 sps:$4 sm:$0xff]   ;;  %v6385_v37 = vld [vmem:[%s7851_s10 + $0xaa4] ss:$16 sps:$4 sm:$0xff]  }
 0x236   : > { %4600 = vmatprep.subr.bf16.mxu0 %v6293_v38  ;;  %4928 = vmatprep.subr.bf16.mxu1 %v6296_v39  ;;  %v6388_v38 = vld [vmem:[%s7851_s10 + $0xaac] ss:$16 sps:$4 sm:$0xff]   ;;  %v6383_v39 = vld [vmem:[%s7851_s10 + $0xaa0] ss:$16 sps:$4 sm:$0xff]  }
 0x239   : > { %4601 = vmatpush1.bf16.msra.mxu0 %v6291_v40  ;;  %4929 = vmatpush1.bf16.msra.mxu1 %v6294_v41  ;;  %v6386_v40 = vld [vmem:[%s7851_s10 + $0xaa8] ss:$16 sps:$4 sm:$0xff]   ;;  %v6391_v41 = vld [vmem:[%s7851_s10 + $0xac4] ss:$16 sps:$4 sm:$0xff]  }
 0x23a   : > { %4602 = vmatprep.subr.bf16.mxu0 %v6299_v42  ;;  %4930 = vmatprep.subr.bf16.mxu1 %v6302_v43  ;;  %v6394_v42 = vld [vmem:[%s7851_s10 + $0xacc] ss:$16 sps:$4 sm:$0xff]   ;;  %v6389_v43 = vld [vmem:[%s7851_s10 + $0xac0] ss:$16 sps:$4 sm:$0xff]  }
 0x23d   : > { %4603 = vmatpush1.bf16.msra.mxu0 %v6297_v44  ;;  %4931 = vmatpush1.bf16.msra.mxu1 %v6300_v45  ;;  %v6392_v44 = vld [vmem:[%s7851_s10 + $0xac8] ss:$16 sps:$4 sm:$0xff]   ;;  %v6397_v45 = vld [vmem:[%s7851_s10 + $0xae4] ss:$16 sps:$4 sm:$0xff]  }
 0x23e   : > { %4604 = vmatprep.subr.bf16.mxu0 %v6305_v46  ;;  %4932 = vmatprep.subr.bf16.mxu1 %v6308_v47  ;;  %v6400_v46 = vld [vmem:[%s7851_s10 + $0xaec] ss:$16 sps:$4 sm:$0xff]   ;;  %v6395_v47 = vld [vmem:[%s7851_s10 + $0xae0] ss:$16 sps:$4 sm:$0xff]  }
 0x241   : > { %4605 = vmatpush1.bf16.msra.mxu0 %v6303_v48  ;;  %4933 = vmatpush1.bf16.msra.mxu1 %v6306_v49  ;;  %v6398_v48 = vld [vmem:[%s7851_s10 + $0xae8] ss:$16 sps:$4 sm:$0xff]   ;;  %v6403_v49 = vld [vmem:[%s7851_s10 + $0xb04] ss:$16 sps:$4 sm:$0xff]  }
 0x242   : > { %4606 = vmatprep.subr.bf16.mxu0 %v6311_v50  ;;  %4934 = vmatprep.subr.bf16.mxu1 %v6314_v51  ;;  %v6406_v50 = vld [vmem:[%s7851_s10 + $0xb0c] ss:$16 sps:$4 sm:$0xff]   ;;  %v6401_v51 = vld [vmem:[%s7851_s10 + $0xb00] ss:$16 sps:$4 sm:$0xff]  }
 0x245   : > { %4607 = vmatpush1.bf16.msra.mxu0 %v6309_v52  ;;  %4935 = vmatpush1.bf16.msra.mxu1 %v6312_v53  ;;  %v6404_v52 = vld [vmem:[%s7851_s10 + $0xb08] ss:$16 sps:$4 sm:$0xff]   ;;  %v6409_v53 = vld [vmem:[%s7851_s10 + $0xb24] ss:$16 sps:$4 sm:$0xff]  }
 0x246   : > { %4608 = vmatprep.subr.bf16.mxu0 %v6317_v54  ;;  %4936 = vmatprep.subr.bf16.mxu1 %v6320_v55  ;;  %v6412_v54 = vld [vmem:[%s7851_s10 + $0xb2c] ss:$16 sps:$4 sm:$0xff]   ;;  %v6407_v55 = vld [vmem:[%s7851_s10 + $0xb20] ss:$16 sps:$4 sm:$0xff]  }
 0x249   : > { %4609 = vmatpush1.bf16.msra.mxu0 %v6315_v56  ;;  %4937 = vmatpush1.bf16.msra.mxu1 %v6318_v57  ;;  %v6410_v56 = vld [vmem:[%s7851_s10 + $0xb28] ss:$16 sps:$4 sm:$0xff]   ;;  %v6415_v57 = vld [vmem:[%s7851_s10 + $0xb44] ss:$16 sps:$4 sm:$0xff]  }
 0x24a   : > { %4610 = vmatprep.subr.bf16.mxu0 %v6323_v58  ;;  %4938 = vmatprep.subr.bf16.mxu1 %v6326_v59  ;;  %v6418_v58 = vld [vmem:[%s7851_s10 + $0xb4c] ss:$16 sps:$4 sm:$0xff]   ;;  %v6413_v59 = vld [vmem:[%s7851_s10 + $0xb40] ss:$16 sps:$4 sm:$0xff]  }
 0x24d   : > { %4611 = vmatpush1.bf16.msra.mxu0 %v6321_v60  ;;  %4939 = vmatpush1.bf16.msra.mxu1 %v6324_v61  ;;  %v6416_v60 = vld [vmem:[%s7851_s10 + $0xb48] ss:$16 sps:$4 sm:$0xff]   ;;  %v6421_v61 = vld [vmem:[%s7851_s10 + $0xb64] ss:$16 sps:$4 sm:$0xff]  }
 0x24e   : > { %4612 = vmatprep.subr.bf16.mxu0 %v6329_v62  ;;  %4940 = vmatprep.subr.bf16.mxu1 %v6332_v63  ;;  %v6424_v62 = vld [vmem:[%s7851_s10 + $0xb6c] ss:$16 sps:$4 sm:$0xff]   ;;  %v6419_v63 = vld [vmem:[%s7851_s10 + $0xb60] ss:$16 sps:$4 sm:$0xff]  }
 0x251   : > { %4613 = vmatpush1.bf16.msra.mxu0 %v6327_v1  ;;  %4941 = vmatpush1.bf16.msra.mxu1 %v6330_v2  ;;  %v6422_v1 = vld [vmem:[%s7851_s10 + $0xb68] ss:$16 sps:$4 sm:$0xff]   ;;  %v6427_v2 = vld [vmem:[%s7851_s10 + $0xb84] ss:$16 sps:$4 sm:$0xff]  }
 0x252   : > { %4614 = vmatprep.subr.bf16.mxu0 %v6335_v3  ;;  %4942 = vmatprep.subr.bf16.mxu1 %v6338_v4  ;;  %v6430_v3 = vld [vmem:[%s7851_s10 + $0xb8c] ss:$16 sps:$4 sm:$0xff]   ;;  %v6425_v4 = vld [vmem:[%s7851_s10 + $0xb80] ss:$16 sps:$4 sm:$0xff]  }
 0x255   : > { %4615 = vmatpush1.bf16.msra.mxu0 %v6333_v5  ;;  %4943 = vmatpush1.bf16.msra.mxu1 %v6336_v6  ;;  %v6428_v5 = vld [vmem:[%s7851_s10 + $0xb88] ss:$16 sps:$4 sm:$0xff]   ;;  %v6433_v6 = vld [vmem:[%s7851_s10 + $0xba4] ss:$16 sps:$4 sm:$0xff]  }
 0x256   : > { %4616 = vmatprep.subr.bf16.mxu0 %v6341_v7  ;;  %4944 = vmatprep.subr.bf16.mxu1 %v6344_v8  ;;  %v6436_v7 = vld [vmem:[%s7851_s10 + $0xbac] ss:$16 sps:$4 sm:$0xff]   ;;  %v6431_v8 = vld [vmem:[%s7851_s10 + $0xba0] ss:$16 sps:$4 sm:$0xff]  }
 0x259   : > { %4617 = vmatpush1.bf16.msra.mxu0 %v6339_v9  ;;  %4945 = vmatpush1.bf16.msra.mxu1 %v6342_v10  ;;  %v6434_v9 = vld [vmem:[%s7851_s10 + $0xba8] ss:$16 sps:$4 sm:$0xff]   ;;  %v6439_v10 = vld [vmem:[%s7851_s10 + $0xbc4] ss:$16 sps:$4 sm:$0xff]  }
 0x25a   : > { %4618 = vmatprep.subr.bf16.mxu0 %v6347_v0  ;;  %4946 = vmatprep.subr.bf16.mxu1 %v6350_v12  ;;  %v6442_v0 = vld [vmem:[%s7851_s10 + $0xbcc] ss:$16 sps:$4 sm:$0xff]   ;;  %v6437_v12 = vld [vmem:[%s7851_s10 + $0xbc0] ss:$16 sps:$4 sm:$0xff]  }
 0x25d   : > { %4619 = vmatpush1.bf16.msra.mxu0 %v6345_v14  ;;  %4947 = vmatpush1.bf16.msra.mxu1 %v6348_v15  ;;  %v6440_v14 = vld [vmem:[%s7851_s10 + $0xbc8] ss:$16 sps:$4 sm:$0xff]   ;;  %v6445_v15 = vld [vmem:[%s7851_s10 + $0xbe4] ss:$16 sps:$4 sm:$0xff]  }
 0x25e   : > { %4629 = vmatprep.subr.bf16.mxu0 %v6355_v16  ;;  %4957 = vmatprep.subr.bf16.mxu1 %v6358_v17  ;;  %v6448_v16 = vld [vmem:[%s7851_s10 + $0xbec] ss:$16 sps:$4 sm:$0xff]   ;;  %v6443_v17 = vld [vmem:[%s7851_s10 + $0xbe0] ss:$16 sps:$4 sm:$0xff]  }
 0x260   : > { %4621 = vmatmul.mubr.bf16.vlgmr.msra.gmra.mrb[0].mxu0 %v5221_v19  ;;  %4949 = vmatmul.mubr.bf16.vlgmr.msra.gmra.mrb[0].mxu1 %v5221_v19  ;;  %v6446_v19 = vld [vmem:[%s7851_s10 + $0xbe8] ss:$16 sps:$4 sm:$0xff]  }
 0x261   : > { %4630 = vmatpush1.bf16.msra.mxu0 %v6353_v13  ;;  %4958 = vmatpush1.bf16.msra.mxu1 %v6356_v20  ;;  %v6453_v13 = vld [vmem:[%s7851_s10 + $0xc04] ss:$16 sps:$4 sm:$0xff]   ;;  %v6456_v20 = vld [vmem:[%s7851_s10 + $0xc0c] ss:$16 sps:$4 sm:$0xff]  }
 0x262   : > { %4631 = vmatprep.subr.bf16.mxu0 %v6361_v21  ;;  %4959 = vmatprep.subr.bf16.mxu1 %v6364_v22  ;;  %v5223_v21 = vcombine.low %v8214_v18, %v8214_v18  ;;  %v8289_v22 = vld [vmem:[%s8488_s0 + $0x30] sm:$0xff] }
 0x263   : > { %4661 = vmatprep.mubr.bf16.mxu0 %v5224_v23  ;;  %4989 = vmatprep.mubr.bf16.mxu1 %v5224_v23  ;;  %v6451_v23 = vld [vmem:[%s7851_s10 + $0xc00] ss:$16 sps:$4 sm:$0xff]   ;;  %v5226_v18 = vcombine.high %v8289_v22, %v8289_v22 }
 0x265   : > { %4632 = vmatpush1.bf16.msra.mxu0 %v6359_v11  ;;  %4960 = vmatpush1.bf16.msra.mxu1 %v6362_v24  ;;  %v6454_v11 = vld [vmem:[%s7851_s10 + $0xc08] ss:$16 sps:$4 sm:$0xff]   ;;  %v6459_v24 = vld [vmem:[%s7851_s10 + $0xc24] ss:$16 sps:$4 sm:$0xff]  }
 0x266   : > { %4633 = vmatprep.subr.bf16.mxu0 %v6367_v25  ;;  %4961 = vmatprep.subr.bf16.mxu1 %v6370_v26  ;;  %v6462_v25 = vld [vmem:[%s7851_s10 + $0xc2c] ss:$16 sps:$4 sm:$0xff]   ;;  %v6457_v26 = vld [vmem:[%s7851_s10 + $0xc20] ss:$16 sps:$4 sm:$0xff]  }
 0x269   : > { %4634 = vmatpush1.bf16.msra.mxu0 %v6365_v27  ;;  %4962 = vmatpush1.bf16.msra.mxu1 %v6368_v28  ;;  %v6460_v27 = vld [vmem:[%s7851_s10 + $0xc28] ss:$16 sps:$4 sm:$0xff]   ;;  %v6465_v28 = vld [vmem:[%s7851_s10 + $0xc44] ss:$16 sps:$4 sm:$0xff]  }
 0x26a   : > { %4635 = vmatprep.subr.bf16.mxu0 %v6373_v29  ;;  %4963 = vmatprep.subr.bf16.mxu1 %v6376_v30  ;;  %v6468_v29 = vld [vmem:[%s7851_s10 + $0xc4c] ss:$16 sps:$4 sm:$0xff]   ;;  %v6463_v30 = vld [vmem:[%s7851_s10 + $0xc40] ss:$16 sps:$4 sm:$0xff]  }
 0x26d   : > { %4636 = vmatpush1.bf16.msra.mxu0 %v6371_v31  ;;  %4964 = vmatpush1.bf16.msra.mxu1 %v6374_v32  ;;  %v6466_v31 = vld [vmem:[%s7851_s10 + $0xc48] ss:$16 sps:$4 sm:$0xff]   ;;  %v6471_v32 = vld [vmem:[%s7851_s10 + $0xc64] ss:$16 sps:$4 sm:$0xff]  }
 0x26e   : > { %4637 = vmatprep.subr.bf16.mxu0 %v6379_v33  ;;  %4965 = vmatprep.subr.bf16.mxu1 %v6382_v34  ;;  %v6474_v33 = vld [vmem:[%s7851_s10 + $0xc6c] ss:$16 sps:$4 sm:$0xff]   ;;  %v6469_v34 = vld [vmem:[%s7851_s10 + $0xc60] ss:$16 sps:$4 sm:$0xff]  }
 0x271   : > { %4638 = vmatpush1.bf16.msra.mxu0 %v6377_v35  ;;  %4966 = vmatpush1.bf16.msra.mxu1 %v6380_v36  ;;  %v6472_v35 = vld [vmem:[%s7851_s10 + $0xc68] ss:$16 sps:$4 sm:$0xff]   ;;  %v6477_v36 = vld [vmem:[%s7851_s10 + $0xc84] ss:$16 sps:$4 sm:$0xff]  }
 0x272   : > { %4639 = vmatprep.subr.bf16.mxu0 %v6385_v37  ;;  %4967 = vmatprep.subr.bf16.mxu1 %v6388_v38  ;;  %v6480_v37 = vld [vmem:[%s7851_s10 + $0xc8c] ss:$16 sps:$4 sm:$0xff]   ;;  %v6475_v38 = vld [vmem:[%s7851_s10 + $0xc80] ss:$16 sps:$4 sm:$0xff]  }
 0x275   : > { %4640 = vmatpush1.bf16.msra.mxu0 %v6383_v39  ;;  %4968 = vmatpush1.bf16.msra.mxu1 %v6386_v40  ;;  %v6478_v39 = vld [vmem:[%s7851_s10 + $0xc88] ss:$16 sps:$4 sm:$0xff]   ;;  %v6483_v40 = vld [vmem:[%s7851_s10 + $0xca4] ss:$16 sps:$4 sm:$0xff]  }
 0x276   : > { %4641 = vmatprep.subr.bf16.mxu0 %v6391_v41  ;;  %4969 = vmatprep.subr.bf16.mxu1 %v6394_v42  ;;  %v6486_v41 = vld [vmem:[%s7851_s10 + $0xcac] ss:$16 sps:$4 sm:$0xff]   ;;  %v6481_v42 = vld [vmem:[%s7851_s10 + $0xca0] ss:$16 sps:$4 sm:$0xff]  }
 0x279   : > { %4642 = vmatpush1.bf16.msra.mxu0 %v6389_v43  ;;  %4970 = vmatpush1.bf16.msra.mxu1 %v6392_v44  ;;  %v6484_v43 = vld [vmem:[%s7851_s10 + $0xca8] ss:$16 sps:$4 sm:$0xff]   ;;  %v6489_v44 = vld [vmem:[%s7851_s10 + $0xcc4] ss:$16 sps:$4 sm:$0xff]  }
 0x27a   : > { %4643 = vmatprep.subr.bf16.mxu0 %v6397_v45  ;;  %4971 = vmatprep.subr.bf16.mxu1 %v6400_v46  ;;  %v6492_v45 = vld [vmem:[%s7851_s10 + $0xccc] ss:$16 sps:$4 sm:$0xff]   ;;  %v6487_v46 = vld [vmem:[%s7851_s10 + $0xcc0] ss:$16 sps:$4 sm:$0xff]  }
 0x27d   : > { %4644 = vmatpush1.bf16.msra.mxu0 %v6395_v47  ;;  %4972 = vmatpush1.bf16.msra.mxu1 %v6398_v48  ;;  %v6490_v47 = vld [vmem:[%s7851_s10 + $0xcc8] ss:$16 sps:$4 sm:$0xff]   ;;  %v6495_v48 = vld [vmem:[%s7851_s10 + $0xce4] ss:$16 sps:$4 sm:$0xff]  }
 0x27e   : > { %4645 = vmatprep.subr.bf16.mxu0 %v6403_v49  ;;  %4973 = vmatprep.subr.bf16.mxu1 %v6406_v50  ;;  %v6498_v49 = vld [vmem:[%s7851_s10 + $0xcec] ss:$16 sps:$4 sm:$0xff]   ;;  %v6493_v50 = vld [vmem:[%s7851_s10 + $0xce0] ss:$16 sps:$4 sm:$0xff]  }
 0x281   : > { %4646 = vmatpush1.bf16.msra.mxu0 %v6401_v51  ;;  %4974 = vmatpush1.bf16.msra.mxu1 %v6404_v52  ;;  %v6496_v51 = vld [vmem:[%s7851_s10 + $0xce8] ss:$16 sps:$4 sm:$0xff]   ;;  %v6501_v52 = vld [vmem:[%s7851_s10 + $0xd04] ss:$16 sps:$4 sm:$0xff]  }
 0x282   : > { %4647 = vmatprep.subr.bf16.mxu0 %v6409_v53  ;;  %4975 = vmatprep.subr.bf16.mxu1 %v6412_v54  ;;  %v6504_v53 = vld [vmem:[%s7851_s10 + $0xd0c] ss:$16 sps:$4 sm:$0xff]   ;;  %v6499_v54 = vld [vmem:[%s7851_s10 + $0xd00] ss:$16 sps:$4 sm:$0xff]  }
 0x285   : > { %4648 = vmatpush1.bf16.msra.mxu0 %v6407_v55  ;;  %4976 = vmatpush1.bf16.msra.mxu1 %v6410_v56  ;;  %v6502_v55 = vld [vmem:[%s7851_s10 + $0xd08] ss:$16 sps:$4 sm:$0xff]   ;;  %v6507_v56 = vld [vmem:[%s7851_s10 + $0xd24] ss:$16 sps:$4 sm:$0xff]  }
 0x286   : > { %4649 = vmatprep.subr.bf16.mxu0 %v6415_v57  ;;  %4977 = vmatprep.subr.bf16.mxu1 %v6418_v58  ;;  %v6510_v57 = vld [vmem:[%s7851_s10 + $0xd2c] ss:$16 sps:$4 sm:$0xff]   ;;  %v6505_v58 = vld [vmem:[%s7851_s10 + $0xd20] ss:$16 sps:$4 sm:$0xff]  }
 0x289   : > { %4650 = vmatpush1.bf16.msra.mxu0 %v6413_v59  ;;  %4978 = vmatpush1.bf16.msra.mxu1 %v6416_v60  ;;  %v6508_v59 = vld [vmem:[%s7851_s10 + $0xd28] ss:$16 sps:$4 sm:$0xff]   ;;  %v6513_v60 = vld [vmem:[%s7851_s10 + $0xd44] ss:$16 sps:$4 sm:$0xff]  }
 0x28a   : > { %4651 = vmatprep.subr.bf16.mxu0 %v6421_v61  ;;  %4979 = vmatprep.subr.bf16.mxu1 %v6424_v62  ;;  %v6516_v61 = vld [vmem:[%s7851_s10 + $0xd4c] ss:$16 sps:$4 sm:$0xff]   ;;  %v6511_v62 = vld [vmem:[%s7851_s10 + $0xd40] ss:$16 sps:$4 sm:$0xff]  }
 0x28d   : > { %4652 = vmatpush1.bf16.msra.mxu0 %v6419_v63  ;;  %4980 = vmatpush1.bf16.msra.mxu1 %v6422_v1  ;;  %v6514_v63 = vld [vmem:[%s7851_s10 + $0xd48] ss:$16 sps:$4 sm:$0xff]   ;;  %v6519_v1 = vld [vmem:[%s7851_s10 + $0xd64] ss:$16 sps:$4 sm:$0xff]  }
 0x28e   : > { %4653 = vmatprep.subr.bf16.mxu0 %v6427_v2  ;;  %4981 = vmatprep.subr.bf16.mxu1 %v6430_v3  ;;  %v6522_v2 = vld [vmem:[%s7851_s10 + $0xd6c] ss:$16 sps:$4 sm:$0xff]   ;;  %v6517_v3 = vld [vmem:[%s7851_s10 + $0xd60] ss:$16 sps:$4 sm:$0xff]  }
 0x291   : > { %4654 = vmatpush1.bf16.msra.mxu0 %v6425_v4  ;;  %4982 = vmatpush1.bf16.msra.mxu1 %v6428_v5  ;;  %v6520_v4 = vld [vmem:[%s7851_s10 + $0xd68] ss:$16 sps:$4 sm:$0xff]   ;;  %v6525_v5 = vld [vmem:[%s7851_s10 + $0xd84] ss:$16 sps:$4 sm:$0xff]  }
 0x292   : > { %4655 = vmatprep.subr.bf16.mxu0 %v6433_v6  ;;  %4983 = vmatprep.subr.bf16.mxu1 %v6436_v7  ;;  %v6528_v6 = vld [vmem:[%s7851_s10 + $0xd8c] ss:$16 sps:$4 sm:$0xff]   ;;  %v6523_v7 = vld [vmem:[%s7851_s10 + $0xd80] ss:$16 sps:$4 sm:$0xff]  }
 0x295   : > { %4656 = vmatpush1.bf16.msra.mxu0 %v6431_v8  ;;  %4984 = vmatpush1.bf16.msra.mxu1 %v6434_v9  ;;  %v6526_v8 = vld [vmem:[%s7851_s10 + $0xd88] ss:$16 sps:$4 sm:$0xff]   ;;  %v6531_v9 = vld [vmem:[%s7851_s10 + $0xda4] ss:$16 sps:$4 sm:$0xff]  }
 0x296   : > { %4657 = vmatprep.subr.bf16.mxu0 %v6439_v10  ;;  %4985 = vmatprep.subr.bf16.mxu1 %v6442_v0  ;;  %v6534_v10 = vld [vmem:[%s7851_s10 + $0xdac] ss:$16 sps:$4 sm:$0xff]   ;;  %v6529_v0 = vld [vmem:[%s7851_s10 + $0xda0] ss:$16 sps:$4 sm:$0xff]  }
 0x299   : > { %4658 = vmatpush1.bf16.msra.mxu0 %v6437_v12  ;;  %4986 = vmatpush1.bf16.msra.mxu1 %v6440_v14  ;;  %v6532_v12 = vld [vmem:[%s7851_s10 + $0xda8] ss:$16 sps:$4 sm:$0xff]   ;;  %v6537_v14 = vld [vmem:[%s7851_s10 + $0xdc4] ss:$16 sps:$4 sm:$0xff]  }
 0x29a   : > { %4659 = vmatprep.subr.bf16.mxu0 %v6445_v15  ;;  %4987 = vmatprep.subr.bf16.mxu1 %v6448_v16  ;;  %v6540_v15 = vld [vmem:[%s7851_s10 + $0xdcc] ss:$16 sps:$4 sm:$0xff]   ;;  %v6535_v16 = vld [vmem:[%s7851_s10 + $0xdc0] ss:$16 sps:$4 sm:$0xff]  }
 0x29d   : > { %4660 = vmatpush1.bf16.msra.mxu0 %v6443_v17  ;;  %4988 = vmatpush1.bf16.msra.mxu1 %v6446_v19  ;;  %v6538_v17 = vld [vmem:[%s7851_s10 + $0xdc8] ss:$16 sps:$4 sm:$0xff]   ;;  %v6543_v19 = vld [vmem:[%s7851_s10 + $0xde4] ss:$16 sps:$4 sm:$0xff]  }
 0x29e   : > { %4670 = vmatprep.subr.bf16.mxu0 %v6453_v13  ;;  %4998 = vmatprep.subr.bf16.mxu1 %v6456_v20  ;;  %v6546_v13 = vld [vmem:[%s7851_s10 + $0xdec] ss:$16 sps:$4 sm:$0xff]   ;;  %v6541_v20 = vld [vmem:[%s7851_s10 + $0xde0] ss:$16 sps:$4 sm:$0xff]  }
 0x2a0   : > { %4662 = vmatmul.mubr.bf16.vlgmr.msra.gmra.mrb[0].mxu0 %v5223_v21  ;;  %4990 = vmatmul.mubr.bf16.vlgmr.msra.gmra.mrb[0].mxu1 %v5223_v21  ;;  %v6544_v21 = vld [vmem:[%s7851_s10 + $0xde8] ss:$16 sps:$4 sm:$0xff]  }
 0x2a1   : > { %4671 = vmatpush1.bf16.msra.mxu0 %v6451_v23  ;;  %4999 = vmatpush1.bf16.msra.mxu1 %v6454_v11  ;;  %v6551_v23 = vld [vmem:[%s7851_s10 + $0xe04] ss:$16 sps:$4 sm:$0xff]   ;;  %v6554_v11 = vld [vmem:[%s7851_s10 + $0xe0c] ss:$16 sps:$4 sm:$0xff]  }
 0x2a2   : > { %4672 = vmatprep.subr.bf16.mxu0 %v6459_v24  ;;  %5000 = vmatprep.subr.bf16.mxu1 %v6462_v25  ;;  %v5225_v24 = vcombine.low %v8289_v22, %v8289_v22  ;;  %v8362_v25 = vld [vmem:[%s8488_s0 + $0x38] sm:$0xff] }
 0x2a3   : > { %4702 = vmatprep.mubr.bf16.mxu0 %v5226_v18  ;;  %5030 = vmatprep.mubr.bf16.mxu1 %v5226_v18  ;;  %v6549_v18 = vld [vmem:[%s7851_s10 + $0xe00] ss:$16 sps:$4 sm:$0xff]   ;;  %v5228_v22 = vcombine.high %v8362_v25, %v8362_v25 }
 0x2a5   : > { %4673 = vmatpush1.bf16.msra.mxu0 %v6457_v26  ;;  %5001 = vmatpush1.bf16.msra.mxu1 %v6460_v27  ;;  %v6552_v26 = vld [vmem:[%s7851_s10 + $0xe08] ss:$16 sps:$4 sm:$0xff]   ;;  %v6557_v27 = vld [vmem:[%s7851_s10 + $0xe24] ss:$16 sps:$4 sm:$0xff]  }
 0x2a6   : > { %4674 = vmatprep.subr.bf16.mxu0 %v6465_v28  ;;  %5002 = vmatprep.subr.bf16.mxu1 %v6468_v29  ;;  %v6560_v28 = vld [vmem:[%s7851_s10 + $0xe2c] ss:$16 sps:$4 sm:$0xff]   ;;  %v6555_v29 = vld [vmem:[%s7851_s10 + $0xe20] ss:$16 sps:$4 sm:$0xff]  }
 0x2a9   : > { %4675 = vmatpush1.bf16.msra.mxu0 %v6463_v30  ;;  %5003 = vmatpush1.bf16.msra.mxu1 %v6466_v31  ;;  %v6558_v30 = vld [vmem:[%s7851_s10 + $0xe28] ss:$16 sps:$4 sm:$0xff]   ;;  %v6563_v31 = vld [vmem:[%s7851_s10 + $0xe44] ss:$16 sps:$4 sm:$0xff]  }
 0x2aa   : > { %4676 = vmatprep.subr.bf16.mxu0 %v6471_v32  ;;  %5004 = vmatprep.subr.bf16.mxu1 %v6474_v33  ;;  %v6566_v32 = vld [vmem:[%s7851_s10 + $0xe4c] ss:$16 sps:$4 sm:$0xff]   ;;  %v6561_v33 = vld [vmem:[%s7851_s10 + $0xe40] ss:$16 sps:$4 sm:$0xff]  }
 0x2ad   : > { %4677 = vmatpush1.bf16.msra.mxu0 %v6469_v34  ;;  %5005 = vmatpush1.bf16.msra.mxu1 %v6472_v35  ;;  %v6564_v34 = vld [vmem:[%s7851_s10 + $0xe48] ss:$16 sps:$4 sm:$0xff]   ;;  %v6569_v35 = vld [vmem:[%s7851_s10 + $0xe64] ss:$16 sps:$4 sm:$0xff]  }
 0x2ae   : > { %4678 = vmatprep.subr.bf16.mxu0 %v6477_v36  ;;  %5006 = vmatprep.subr.bf16.mxu1 %v6480_v37  ;;  %v6572_v36 = vld [vmem:[%s7851_s10 + $0xe6c] ss:$16 sps:$4 sm:$0xff]   ;;  %v6567_v37 = vld [vmem:[%s7851_s10 + $0xe60] ss:$16 sps:$4 sm:$0xff]  }
 0x2b1   : > { %4679 = vmatpush1.bf16.msra.mxu0 %v6475_v38  ;;  %5007 = vmatpush1.bf16.msra.mxu1 %v6478_v39  ;;  %v6570_v38 = vld [vmem:[%s7851_s10 + $0xe68] ss:$16 sps:$4 sm:$0xff]   ;;  %v6575_v39 = vld [vmem:[%s7851_s10 + $0xe84] ss:$16 sps:$4 sm:$0xff]  }
 0x2b2   : > { %4680 = vmatprep.subr.bf16.mxu0 %v6483_v40  ;;  %5008 = vmatprep.subr.bf16.mxu1 %v6486_v41  ;;  %v6578_v40 = vld [vmem:[%s7851_s10 + $0xe8c] ss:$16 sps:$4 sm:$0xff]   ;;  %v6573_v41 = vld [vmem:[%s7851_s10 + $0xe80] ss:$16 sps:$4 sm:$0xff]  }
 0x2b5   : > { %4681 = vmatpush1.bf16.msra.mxu0 %v6481_v42  ;;  %5009 = vmatpush1.bf16.msra.mxu1 %v6484_v43  ;;  %v6576_v42 = vld [vmem:[%s7851_s10 + $0xe88] ss:$16 sps:$4 sm:$0xff]   ;;  %v6581_v43 = vld [vmem:[%s7851_s10 + $0xea4] ss:$16 sps:$4 sm:$0xff]  }
 0x2b6   : > { %4682 = vmatprep.subr.bf16.mxu0 %v6489_v44  ;;  %5010 = vmatprep.subr.bf16.mxu1 %v6492_v45  ;;  %v6584_v44 = vld [vmem:[%s7851_s10 + $0xeac] ss:$16 sps:$4 sm:$0xff]   ;;  %v6579_v45 = vld [vmem:[%s7851_s10 + $0xea0] ss:$16 sps:$4 sm:$0xff]  }
 0x2b9   : > { %4683 = vmatpush1.bf16.msra.mxu0 %v6487_v46  ;;  %5011 = vmatpush1.bf16.msra.mxu1 %v6490_v47  ;;  %v6582_v46 = vld [vmem:[%s7851_s10 + $0xea8] ss:$16 sps:$4 sm:$0xff]   ;;  %v6587_v47 = vld [vmem:[%s7851_s10 + $0xec4] ss:$16 sps:$4 sm:$0xff]  }
 0x2ba   : > { %4684 = vmatprep.subr.bf16.mxu0 %v6495_v48  ;;  %5012 = vmatprep.subr.bf16.mxu1 %v6498_v49  ;;  %v6590_v48 = vld [vmem:[%s7851_s10 + $0xecc] ss:$16 sps:$4 sm:$0xff]   ;;  %v6585_v49 = vld [vmem:[%s7851_s10 + $0xec0] ss:$16 sps:$4 sm:$0xff]  }
 0x2bd   : > { %4685 = vmatpush1.bf16.msra.mxu0 %v6493_v50  ;;  %5013 = vmatpush1.bf16.msra.mxu1 %v6496_v51  ;;  %v6588_v50 = vld [vmem:[%s7851_s10 + $0xec8] ss:$16 sps:$4 sm:$0xff]   ;;  %v6593_v51 = vld [vmem:[%s7851_s10 + $0xee4] ss:$16 sps:$4 sm:$0xff]  }
 0x2be   : > { %4686 = vmatprep.subr.bf16.mxu0 %v6501_v52  ;;  %5014 = vmatprep.subr.bf16.mxu1 %v6504_v53  ;;  %v6596_v52 = vld [vmem:[%s7851_s10 + $0xeec] ss:$16 sps:$4 sm:$0xff]   ;;  %v6591_v53 = vld [vmem:[%s7851_s10 + $0xee0] ss:$16 sps:$4 sm:$0xff]  }
 0x2c1   : > { %4687 = vmatpush1.bf16.msra.mxu0 %v6499_v54  ;;  %5015 = vmatpush1.bf16.msra.mxu1 %v6502_v55  ;;  %v6594_v54 = vld [vmem:[%s7851_s10 + $0xee8] ss:$16 sps:$4 sm:$0xff]   ;;  %v6599_v55 = vld [vmem:[%s7851_s10 + $0xf04] ss:$16 sps:$4 sm:$0xff]  }
 0x2c2   : > { %4688 = vmatprep.subr.bf16.mxu0 %v6507_v56  ;;  %5016 = vmatprep.subr.bf16.mxu1 %v6510_v57  ;;  %v6602_v56 = vld [vmem:[%s7851_s10 + $0xf0c] ss:$16 sps:$4 sm:$0xff]   ;;  %v6597_v57 = vld [vmem:[%s7851_s10 + $0xf00] ss:$16 sps:$4 sm:$0xff]  }
 0x2c5   : > { %4689 = vmatpush1.bf16.msra.mxu0 %v6505_v58  ;;  %5017 = vmatpush1.bf16.msra.mxu1 %v6508_v59  ;;  %v6600_v58 = vld [vmem:[%s7851_s10 + $0xf08] ss:$16 sps:$4 sm:$0xff]   ;;  %v6605_v59 = vld [vmem:[%s7851_s10 + $0xf24] ss:$16 sps:$4 sm:$0xff]  }
 0x2c6   : > { %4690 = vmatprep.subr.bf16.mxu0 %v6513_v60  ;;  %5018 = vmatprep.subr.bf16.mxu1 %v6516_v61  ;;  %v6608_v60 = vld [vmem:[%s7851_s10 + $0xf2c] ss:$16 sps:$4 sm:$0xff]   ;;  %v6603_v61 = vld [vmem:[%s7851_s10 + $0xf20] ss:$16 sps:$4 sm:$0xff]  }
 0x2c9   : > { %4691 = vmatpush1.bf16.msra.mxu0 %v6511_v62  ;;  %5019 = vmatpush1.bf16.msra.mxu1 %v6514_v63  ;;  %v6606_v62 = vld [vmem:[%s7851_s10 + $0xf28] ss:$16 sps:$4 sm:$0xff]   ;;  %v6611_v63 = vld [vmem:[%s7851_s10 + $0xf44] ss:$16 sps:$4 sm:$0xff]  }
 0x2ca   : > { %4692 = vmatprep.subr.bf16.mxu0 %v6519_v1  ;;  %5020 = vmatprep.subr.bf16.mxu1 %v6522_v2  ;;  %v6614_v1 = vld [vmem:[%s7851_s10 + $0xf4c] ss:$16 sps:$4 sm:$0xff]   ;;  %v6609_v2 = vld [vmem:[%s7851_s10 + $0xf40] ss:$16 sps:$4 sm:$0xff]  }
 0x2cd   : > { %4693 = vmatpush1.bf16.msra.mxu0 %v6517_v3  ;;  %5021 = vmatpush1.bf16.msra.mxu1 %v6520_v4  ;;  %v6612_v3 = vld [vmem:[%s7851_s10 + $0xf48] ss:$16 sps:$4 sm:$0xff]   ;;  %v6617_v4 = vld [vmem:[%s7851_s10 + $0xf64] ss:$16 sps:$4 sm:$0xff]  }
 0x2ce   : > { %4694 = vmatprep.subr.bf16.mxu0 %v6525_v5  ;;  %5022 = vmatprep.subr.bf16.mxu1 %v6528_v6  ;;  %v6620_v5 = vld [vmem:[%s7851_s10 + $0xf6c] ss:$16 sps:$4 sm:$0xff]   ;;  %v6615_v6 = vld [vmem:[%s7851_s10 + $0xf60] ss:$16 sps:$4 sm:$0xff]  }
 0x2d1   : > { %4695 = vmatpush1.bf16.msra.mxu0 %v6523_v7  ;;  %5023 = vmatpush1.bf16.msra.mxu1 %v6526_v8  ;;  %v6618_v7 = vld [vmem:[%s7851_s10 + $0xf68] ss:$16 sps:$4 sm:$0xff]   ;;  %v6623_v8 = vld [vmem:[%s7851_s10 + $0xf84] ss:$16 sps:$4 sm:$0xff]  }
 0x2d2   : > { %4696 = vmatprep.subr.bf16.mxu0 %v6531_v9  ;;  %5024 = vmatprep.subr.bf16.mxu1 %v6534_v10  ;;  %v6626_v9 = vld [vmem:[%s7851_s10 + $0xf8c] ss:$16 sps:$4 sm:$0xff]   ;;  %v6621_v10 = vld [vmem:[%s7851_s10 + $0xf80] ss:$16 sps:$4 sm:$0xff]  }
 0x2d5   : > { %4697 = vmatpush1.bf16.msra.mxu0 %v6529_v0  ;;  %5025 = vmatpush1.bf16.msra.mxu1 %v6532_v12  ;;  %v6624_v0 = vld [vmem:[%s7851_s10 + $0xf88] ss:$16 sps:$4 sm:$0xff]   ;;  %v6629_v12 = vld [vmem:[%s7851_s10 + $0xfa4] ss:$16 sps:$4 sm:$0xff]  }
 0x2d6   : > { %4698 = vmatprep.subr.bf16.mxu0 %v6537_v14  ;;  %5026 = vmatprep.subr.bf16.mxu1 %v6540_v15  ;;  %v6632_v14 = vld [vmem:[%s7851_s10 + $0xfac] ss:$16 sps:$4 sm:$0xff]   ;;  %v6627_v15 = vld [vmem:[%s7851_s10 + $0xfa0] ss:$16 sps:$4 sm:$0xff]  }
 0x2d9   : > { %4699 = vmatpush1.bf16.msra.mxu0 %v6535_v16  ;;  %5027 = vmatpush1.bf16.msra.mxu1 %v6538_v17  ;;  %v6630_v16 = vld [vmem:[%s7851_s10 + $0xfa8] ss:$16 sps:$4 sm:$0xff]   ;;  %v6635_v17 = vld [vmem:[%s7851_s10 + $0xfc4] ss:$16 sps:$4 sm:$0xff]  }
 0x2da   : > { %4700 = vmatprep.subr.bf16.mxu0 %v6543_v19  ;;  %5028 = vmatprep.subr.bf16.mxu1 %v6546_v13  ;;  %v6638_v19 = vld [vmem:[%s7851_s10 + $0xfcc] ss:$16 sps:$4 sm:$0xff]   ;;  %v6633_v13 = vld [vmem:[%s7851_s10 + $0xfc0] ss:$16 sps:$4 sm:$0xff]  }
 0x2dd   : > { %4701 = vmatpush1.bf16.msra.mxu0 %v6541_v20  ;;  %5029 = vmatpush1.bf16.msra.mxu1 %v6544_v21  ;;  %v6636_v20 = vld [vmem:[%s7851_s10 + $0xfc8] ss:$16 sps:$4 sm:$0xff]   ;;  %v6641_v21 = vld [vmem:[%s7851_s10 + $0xfe4] ss:$16 sps:$4 sm:$0xff]  }
 0x2de   : > { %4711 = vmatprep.subr.bf16.mxu0 %v6551_v23  ;;  %5039 = vmatprep.subr.bf16.mxu1 %v6554_v11  ;;  %v6644_v23 = vld [vmem:[%s7851_s10 + $0xfec] ss:$16 sps:$4 sm:$0xff]   ;;  %v6639_v11 = vld [vmem:[%s7851_s10 + $0xfe0] ss:$16 sps:$4 sm:$0xff]  }
 0x2e0   : > { %4703 = vmatmul.mubr.bf16.vlgmr.msra.gmra.mrb[0].mxu0 %v5225_v24  ;;  %5031 = vmatmul.mubr.bf16.vlgmr.msra.gmra.mrb[0].mxu1 %v5225_v24  ;;  %v6642_v24 = vld [vmem:[%s7851_s10 + $0xfe8] ss:$16 sps:$4 sm:$0xff]   ;;  %s5211_s10 = sshll.u32 %s7841_s6, 5 }
 0x2e1   : > { %4712 = vmatpush1.bf16.msra.mxu0 %v6549_v18  ;;  %5040 = vmatpush1.bf16.msra.mxu1 %v6552_v26  ;;  %v5227_v18 = vcombine.low %v8362_v25, %v8362_v25  ;;  %v1788_v26 = vlaneseq  ;;  %s1253_s23 = scalar_lea.vmem [#allocation3], %s5211_s10 }
 0x2e2   : > { %4713 = vmatprep.subr.bf16.mxu0 %v6557_v27  ;;  %5041 = vmatprep.subr.bf16.mxu1 %v6560_v28  ;;  %s5101_s26 = sshll.u32 %s1253_s23, 4  ;;  %s8441_s26 = int_to_ptr.vmem [resolvable:$true] %s5101_s26 }
 0x2e3   : > { %4743 = vmatprep.mubr.bf16.mxu0 %v5228_v22  ;;  %5071 = vmatprep.mubr.bf16.mxu1 %v5228_v22  ;;  %v1789_v27 = vshrl.u32 %v1788_v26, 7  ;;  %s6647_s30 = scalar_lea.vmem %s8441_s26, 512  ;;  %p6654_p4 = scmp.lt.s32.totalorder %s8441_s26, %s6652_s5 }
 0x2e4   : > { %p6648_p1 = scmp.ne.s32.totalorder %s8441_s26, %s6647_s30  ;;  %p6655_p6 = scmp.lt.s32.totalorder %s6653_s7, %s6647_s30 }
 0x2e5   : > { %4714 = vmatpush1.bf16.msra.mxu0 %v6555_v29  ;;  %5042 = vmatpush1.bf16.msra.mxu1 %v6558_v30  ;;  %v1790_v28 = vsub.s32 0, %v1789_v27  ;;  %v1798_v22 = vsub.s32 2, %v1789_v27  ;;  %v1786_v29 = vld [vmem:[%s1263_s19] sm:$0xf]  ;;  %v1794_v30 = vsub.s32 1, %v1789_v27  ;;  %v1802_v25 = vsub.s32 3, %v1789_v27 }
 0x2e6   : > { %4715 = vmatprep.subr.bf16.mxu0 %v6563_v31  ;;  %5043 = vmatprep.subr.bf16.mxu1 %v6566_v32  ;;  %p6649_p2 = pnand %p6648_p1, %p6787_p5  ;;  %p6656_p7 = por %p6655_p6, %p6654_p4 }
 0x2e7   : > { %v1791_v31 = vrot.slane %v1786_v29, %v1790_v28  ;;  %v1799_v32 = vrot.slane %v1786_v29, %v1798_v22 }
 0x2e8   : > { %p6650_p3 = pneg %p6649_p2 }
 0x2e9   : > { %4716 = vmatpush1.bf16.msra.mxu0 %v6561_v33  ;;  %5044 = vmatpush1.bf16.msra.mxu1 %v6564_v34  ;;  %v1795_v33 = vrot.slane %v1786_v29, %v1794_v30  ;;  %v1803_v34 = vrot.slane %v1786_v29, %v1802_v25 }
 0x2ea   : > { %4717 = vmatprep.subr.bf16.mxu0 %v6569_v35  ;;  %5045 = vmatprep.subr.bf16.mxu1 %v6572_v36  ;;  %p6657_p8 = pnand %p6656_p7, %p6650_p3 }
 0x2ed   : > { %4718 = vmatpush1.bf16.msra.mxu0 %v6567_v37  ;;  %5046 = vmatpush1.bf16.msra.mxu1 %v6570_v38 }
 0x2ee   : > { %4719 = vmatprep.subr.bf16.mxu0 %v6575_v39  ;;  %5047 = vmatprep.subr.bf16.mxu1 %v6578_v40 }
 0x2f1   : > { %4720 = vmatpush1.bf16.msra.mxu0 %v6573_v41  ;;  %5048 = vmatpush1.bf16.msra.mxu1 %v6576_v42 }
 0x2f2   : > { %4721 = vmatprep.subr.bf16.mxu0 %v6581_v43  ;;  %5049 = vmatprep.subr.bf16.mxu1 %v6584_v44 }
 0x2f5   : > { %4722 = vmatpush1.bf16.msra.mxu0 %v6579_v45  ;;  %5050 = vmatpush1.bf16.msra.mxu1 %v6582_v46 }
 0x2f6   : > { %4723 = vmatprep.subr.bf16.mxu0 %v6587_v47  ;;  %5051 = vmatprep.subr.bf16.mxu1 %v6590_v48 }
 0x2f9   : > { %4724 = vmatpush1.bf16.msra.mxu0 %v6585_v49  ;;  %5052 = vmatpush1.bf16.msra.mxu1 %v6588_v50 }
 0x2fa   : > { %4725 = vmatprep.subr.bf16.mxu0 %v6593_v51  ;;  %5053 = vmatprep.subr.bf16.mxu1 %v6596_v52 }
 0x2fd   : > { %4726 = vmatpush1.bf16.msra.mxu0 %v6591_v53  ;;  %5054 = vmatpush1.bf16.msra.mxu1 %v6594_v54 }
 0x2fe   : > { %4727 = vmatprep.subr.bf16.mxu0 %v6599_v55  ;;  %5055 = vmatprep.subr.bf16.mxu1 %v6602_v56 }
 0x301   : > { %4728 = vmatpush1.bf16.msra.mxu0 %v6597_v57  ;;  %5056 = vmatpush1.bf16.msra.mxu1 %v6600_v58 }
 0x302   : > { %4729 = vmatprep.subr.bf16.mxu0 %v6605_v59  ;;  %5057 = vmatprep.subr.bf16.mxu1 %v6608_v60 }
 0x305   : > { %4730 = vmatpush1.bf16.msra.mxu0 %v6603_v61  ;;  %5058 = vmatpush1.bf16.msra.mxu1 %v6606_v62 }
 0x306   : > { %4731 = vmatprep.subr.bf16.mxu0 %v6611_v63  ;;  %5059 = vmatprep.subr.bf16.mxu1 %v6614_v1 }
 0x309   : > { %4732 = vmatpush1.bf16.msra.mxu0 %v6609_v2  ;;  %5060 = vmatpush1.bf16.msra.mxu1 %v6612_v3 }
 0x30a   : > { %4733 = vmatprep.subr.bf16.mxu0 %v6617_v4  ;;  %5061 = vmatprep.subr.bf16.mxu1 %v6620_v5 }
 0x30d   : > { %4734 = vmatpush1.bf16.msra.mxu0 %v6615_v6  ;;  %5062 = vmatpush1.bf16.msra.mxu1 %v6618_v7 }
 0x30e   : > { %4735 = vmatprep.subr.bf16.mxu0 %v6623_v8  ;;  %5063 = vmatprep.subr.bf16.mxu1 %v6626_v9 }
 0x311   : > { %4736 = vmatpush1.bf16.msra.mxu0 %v6621_v10  ;;  %5064 = vmatpush1.bf16.msra.mxu1 %v6624_v0 }
 0x312   : > { %4737 = vmatprep.subr.bf16.mxu0 %v6629_v12  ;;  %5065 = vmatprep.subr.bf16.mxu1 %v6632_v14 }
 0x315   : > { %4738 = vmatpush1.bf16.msra.mxu0 %v6627_v15  ;;  %5066 = vmatpush1.bf16.msra.mxu1 %v6630_v16 }
 0x316   : > { %4739 = vmatprep.subr.bf16.mxu0 %v6635_v17  ;;  %5067 = vmatprep.subr.bf16.mxu1 %v6638_v19 }
 0x319   : > { %4740 = vmatpush1.bf16.msra.mxu0 %v6633_v13  ;;  %5068 = vmatpush1.bf16.msra.mxu1 %v6636_v20 }
 0x31a   : > { %4741 = vmatprep.subr.bf16.mxu0 %v6641_v21  ;;  %5069 = vmatprep.subr.bf16.mxu1 %v6644_v23 }
 0x31d   : > { %4742 = vmatpush1.bf16.msra.mxu0 %v6639_v11  ;;  %5070 = vmatpush1.bf16.msra.mxu1 %v6642_v24 }
 0x320   : > { %4744 = vmatmul.mubr.bf16.vlgmr.msra.gmra.mrb[0].mxu0 %v5227_v18  ;;  %5072 = vmatmul.mubr.bf16.vlgmr.msra.gmra.mrb[0].mxu1 %v5227_v18 }
 0x3f3   : > { %v4745_v35 = vpop.f32.mrb[0].mxu0  ;;  %v5073_v36 = vpop.f32.mrb[0].mxu1 }
 0x3f4   : > { %v5748_v37 = vadd.f32 %v4745_v35, %v1791_v31  ;;  %v5750_v38 = vadd.f32 %v5073_v36, %v1799_v32  ;;  %v4747_v39 = vpop.f32.mrb[1].mxu0  ;;  %v5075_v40 = vpop.f32.mrb[1].mxu1 }
 0x3f5   : > { %v5749_v41 = vadd.f32 %v4747_v39, %v1795_v33  ;;  %v5751_v42 = vadd.f32 %v5075_v40, %v1803_v34  ;;  %v4749_v43 = vpop.f32.mrb[2].mxu0  ;;  %v5077_v44 = vpop.f32.mrb[2].mxu1 }
 0x3f6   : > { %5080 = vst [vmem:[%s1253_s23] sm:$0xff] %v5748_v37  ;;  %5082 = vst [vmem:[%s1253_s23 + $0x10] sm:$0xff] %v5750_v38  ;;  %v4750_v45 = vpop.f32.mrb[3].mxu0  ;;  %v5078_v46 = vpop.f32.mrb[3].mxu1 }
 0x3f7   : > { %5081 = vst [vmem:[%s1253_s23 + $0x8] sm:$0xff] %v5749_v41  ;;  %5083 = vst [vmem:[%s1253_s23 + $0x18] sm:$0xff] %v5751_v42 }
 0x3f8   : > { %6660 = shalt.err (!%p6657_p8)
}
 0x3f9   : > { %s6661_s6 = scalar_lea.hbm %s8439_s29, 512  ;;  %s6665_s11 = scalar_lea.hbm %s8491_s3, 1024 }
 0x3fa   : > { %p6662_p11 = scmp.ne.s32.totalorder %s8439_s29, %s6661_s6  ;;  %p6666_p0 = scmp.lt.u32.totalorder %s8439_s29, %s8491_s3 }
 0x3fb   : > { %p6667_p1 = scmp.lt.u32.totalorder %s6665_s11, %s6661_s6  ;;  %p6669_p3 = scmp.lt.u32.totalorder %s6661_s6, %s8439_s29 }
 0x3fc   : > { %p6663_p12 = pnand %p6662_p11, %p6787_p5 }
 0x3fd   : > { %p6668_p2 = por %p6667_p1, %p6666_p0 }
 0x3fe   : > { %p6664_p13 = pneg %p6663_p12 }
 0x3ff   : > { %p6670_p4 = por %p6669_p3, %p6668_p2 }
 0x401   : > { %p6671_p6 = pnand %p6670_p4, %p6664_p13 }
 0x403   : > { %6674 = shalt.err (!%p6671_p6)
}
 0x404   : > { %5808 = dma.vmem_to_hbm [thread:$0]  (%p6787_p5), %s8441_s26, 512, %s8439_s29, %s5085_s15  }
 0x405 PF: > { %s5113_s10 = sand.u32 1, %s6705_s12   ;;  %p5811_p7 = pnand %p5205_p10, %p6798_p9 }
 0x406   : > { %s5114_s21 = scalar_lea.sflag [#allocation4], %s5113_s10 }
 0x407   : > { %6700 = dma.done.wait (!%p5811_p7), %s5114_s21, 512  }
 0x408   : > { %6702 = vsyncadd (!%p5811_p7), %s5114_s21, 4294966784  ;;  %s16_s17 = sadd.s32 1, %s6725_s17   ;;  %s8494_s12 = smov %s6709_s13 }
 0x409   : > { %p13_p8 = scmp.ge.s32.totalorder %s16_s17, 4   ;;  %s8495_s13 = smov %s6713_s14 }
 0x40a   : > { %s8496_s14 = smov %s6796_s24  ;;  %s8497_s15 = smov %s6721_s16 }
 0x40b   : > { %s8498_s16 = smov %s8500_s20  ;;  %15 = sbr.rel (!%p13_p8) target bundleno = 4 (0x4), region = 101 }
 0x412   :  { %5119 = vsyncpa [#allocation4], 1 }
 0x413   :  { %5121 = vsyncpa [#allocation4 + $0x1], 1 }

// kernel: simple_net_forward.2
= control target key start
LH: loop header
LB: loop body
LE: loop exit
PB: predicated region body
PF: predicated region fallthrough
CT: control target
= control target key end

     0   :  { %8 = vsyncpa [#allocation3], 0  ;;  %s12340_s0 = inlined_call_operand.vmem [shape: bf16[8,4096], index: 0, kind: input, shape index: {}]   ;;  %s12341_s1 = inlined_call_operand.hbm [shape: bf16[4096,2048], index: 1, kind: input, shape index: {}]   ;;  %s12342_s2 = inlined_call_operand.hbm [shape: f32[1,2048], index: 2, kind: input, shape index: {}]   ;;  %s12343_s3 = inlined_call_operand.vmem [shape: bf16[8,2048], index: 3, kind: output, shape index: {}]  }
   0x1   :  { %10 = vsyncpa [#allocation3 + $0x1], 0 }
   0x2   :  { %11 = vsyncpa [#allocation5], 0 }
   0x3   :  { %13 = vsyncpa [#allocation5 + $0x1], 0  ;;  %s11008_s12 = smov 0   ;;  %s11010_s13 = smov 0  }
   0x4   :  { %s11012_s14 = smov 0   ;;  %s11014_s15 = smov 0  }
   0x5   :  { %s11016_s16 = smov 0   ;;  %s11018_s17 = smov 0  }
   0x6 LB: > { %s8032_s18 = sadd.s32 4294967295, %s10981_s17   ;;  %s28_s19 = sadd.s32 1, %s10977_s16  ;;  %s10981_s17 = sphi %s11018_s17, %s19_s17   ;;  %s10977_s16 = sphi %s11016_s16, %s12356_s16   ;;  %s10973_s15 = sphi %s11014_s15, %s12355_s15   ;;  %s10969_s14 = sphi %s11012_s14, %s12354_s14   ;;  %s10965_s13 = sphi %s11010_s13, %s12353_s13   ;;  %s10961_s12 = sphi %s11008_s12, %s12352_s12  }
   0x7   : > { %p29_p0 = scmp.ge.s32.totalorder %s28_s19, 4  ;;  %s64_s20 = sadd.s32 1, %s10969_s14 }
   0x8   : > { %p71_p1 = scmp.ne.s32.totalorder %s10969_s14, %s10965_s13  ;;  %p72_p2 = scmp.eq.s32.totalorder %s10981_s17, 0 }
   0x9   : > { %s12358_s19 = smov (%p29_p0, %s28_s19), 0  ;;  %p77_p4 = scmp.ne.s32.totalorder %s10965_s13, %s10961_s12 }
   0xa   : > { %p11044_p3 = por %p72_p2, %p71_p1  ;;  %s61_s22 = ssub.s32 %s10977_s16, %s12358_s19 }
   0xb   : > { %p78_p5 = scmp.eq.s32.totalorder %s8032_s18, 0  ;;  %p62_p6 = scmp.eq.s32.totalorder %s61_s22, 0 }
   0xc   : > { %p9247_p8 = scmp.lt.s32.totalorder %s10981_s17, 4  ;;  %s11060_s25 = sand.u32 1, %s10969_s14  }
   0xd   : > { %p11051_p7 = por %p78_p5, %p77_p4  ;;  %s9108_s26 = sshll.u32 %s10977_s16, 8 }
   0xe   : > { %s11057_s24 = scalar_select %p62_p6, %s10969_s14, %s64_s20  }
   0xf   : > { %s12346_s23 = scalar_select %p11051_p7, 1, 0 }
  0x10   : > { %s8037_s27 = sshll.u32 %s11060_s25, 13  ;;  %s11067_s30 = scalar_lea.hbm %s12341_s1, %s9108_s26 }
  0x11   : > { %s167_s4 = scalar_lea.vmem [#allocation2], %s8037_s27  ;;  %p11071_p9 = pnand %p9247_p8, %p11044_p3 }
  0x12   : > { %s174_s5 = sshll.u32 %s167_s4, 4  ;;  %s164_s7 = scalar_lea.sflag [#allocation3], %s11060_s25  ;;  %s11075_s5 = int_to_ptr.vmem [resolvable:$true] %s174_s5 }
  0x13   : > { %s10867_s8 = scalar_lea.hbm %s11067_s30, 131072  ;;  %p10869_p12 = pneg %p11071_p9 }
  0x14   : > { %p10868_p11 = scmp.ne.s32.totalorder %s11067_s30, %s10867_s8  ;;  %s10872_s11 = scalar_lea.hbm %s12341_s1, 524288 }
  0x15   : > { %p10873_p1 = scmp.lt.u32.totalorder %s11067_s30, %s12341_s1  ;;  %p10874_p2 = scmp.lt.u32.totalorder %s10872_s11, %s10867_s8 }
  0x16   : > { %p10870_p13 = pnand %p10869_p12, %p10868_p11  ;;  %p10876_p4 = scmp.lt.u32.totalorder %s10867_s8, %s11067_s30 }
  0x17   : > { %p10875_p3 = por %p10874_p2, %p10873_p1 }
  0x18   : > { %p10871_p0 = pneg %p10870_p13 }
  0x19   : > { %p10877_p5 = por %p10876_p4, %p10875_p3 }
  0x1b   : > { %p10878_p6 = pnand %p10877_p5, %p10871_p0 }
  0x1d   : > { %10881 = shalt.err (!%p10878_p6)
}
  0x1e   : > { %s10882_s20 = scalar_lea.vmem %s11075_s5, 131072  ;;  %s10983_s21 = smov [#allocation2]  }
  0x1f   : > { %p10883_p8 = scmp.ne.s32.totalorder %s11075_s5, %s10882_s20  ;;  %s10887_s22 = sshll.u32 %s10983_s21, 4  ;;  %s10888_s22 = int_to_ptr.vmem [resolvable:$false] %s10887_s22 }
  0x20   : > { %s10889_s26 = scalar_lea.vmem %s10888_s22, 262144  ;;  %p10890_p10 = scmp.lt.s32.totalorder %s11075_s5, %s10888_s22 }
  0x21   : > { %p10885_p11 = pnand %p10883_p8, %p10869_p12  ;;  %p10891_p1 = scmp.lt.s32.totalorder %s10889_s26, %s10882_s20 }
  0x23   : > { %p10886_p13 = pneg %p10885_p11  ;;  %p10892_p2 = por %p10891_p1, %p10890_p10 }
  0x25   : > { %p10893_p3 = pnand %p10892_p2, %p10886_p13 }
  0x27   : > { %10896 = shalt.err (!%p10893_p3)
}
  0x28   : > { %s10984_s27 = smov 1024   ;;  %s10985_s28 = smov 256  }
  0x29   : > { %s10986_s29 = smov 16   ;;  %p201_p0 = scmp.lt.s32.totalorder %s10981_s17, 5 }
  0x2a   : > { %9243 = dma.hbm_to_vmem [thread:$0]  (!%p11071_p9), %s11067_s30, 131072, %s11075_s5, %s164_s7, %s10984_s27, %s10985_s28, %s10986_s29  }
  0x2b   : > { %s8040_s4 = sshll.u32 %s11060_s25, 2  ;;  %s9109_s8 = sshll.u32 %s10977_s16, 6 }
  0x2c   : > { %p12348_p10 = scmp.ge.s32.totalorder %s10981_s17, 1  ;;  %s11118_s12 = scalar_lea.hbm %s12342_s2, %s9109_s8 }
  0x2d   : > { %s188_s18 = scalar_lea.vmem [#allocation4], %s8040_s4  ;;  %s185_s30 = scalar_lea.sflag [#allocation5], %s11060_s25 }
  0x2e   : > { %p11111_p4 = pnand %p12348_p10, %p201_p0  ;;  %s196_s20 = sshll.u32 %s188_s18, 4  ;;  %s197_s20 = int_to_ptr.vmem [resolvable:$true] %s196_s20 }
  0x2f   : > { %s10897_s5 = scalar_lea.hbm %s11118_s12, 64  ;;  %s10902_s22 = scalar_lea.hbm %s12342_s2, 256 }
  0x30   : > { %s12349_s9 = scalar_select %p11111_p4, 1, 0 }
  0x31   : > { %p10898_p5 = scmp.ne.s32.totalorder %s11118_s12, %s10897_s5  ;;  %p10903_p11 = scmp.lt.u32.totalorder %s11118_s12, %s12342_s2 }
  0x32   : > { %p10904_p13 = scmp.lt.u32.totalorder %s10902_s22, %s10897_s5  ;;  %p10906_p2 = scmp.lt.u32.totalorder %s10897_s5, %s11118_s12 }
  0x33   : > { %p10900_p6 = pnand %p10898_p5, %p10869_p12 }
  0x34   : > { %p10905_p1 = por %p10904_p13, %p10903_p11 }
  0x35   : > { %p10901_p8 = pneg %p10900_p6 }
  0x36   : > { %p10907_p3 = por %p10906_p2, %p10905_p1 }
  0x38   : > { %p10908_p0 = pnand %p10907_p3, %p10901_p8 }
  0x3a   : > { %10911 = shalt.err (!%p10908_p0)
}
  0x3b   : > { %s10912_s25 = scalar_lea.vmem %s197_s20, 64  ;;  %s10987_s28 = smov [#allocation4]  }
  0x3c   : > { %p10913_p10 = scmp.ne.s32.totalorder %s197_s20, %s10912_s25  ;;  %s10917_s29 = sshll.u32 %s10987_s28, 4  ;;  %s10918_s29 = int_to_ptr.vmem [resolvable:$false] %s10917_s29 }
  0x3d   : > { %s10919_s4 = scalar_lea.vmem %s10918_s29, 128  ;;  %p10920_p7 = scmp.lt.s32.totalorder %s197_s20, %s10918_s29 }
  0x3e   : > { %p10915_p5 = pnand %p10913_p10, %p10869_p12  ;;  %p10921_p4 = scmp.lt.s32.totalorder %s10919_s4, %s10912_s25 }
  0x40   : > { %p10916_p6 = pneg %p10915_p5  ;;  %p10922_p11 = por %p10921_p4, %p10920_p7 }
  0x42   : > { %p10923_p13 = pnand %p10922_p11, %p10916_p6 }
  0x44   : > { %10926 = shalt.err (!%p10923_p13)
}
  0x45   : > { %9246 = dma.hbm_to_vmem [thread:$0]  (!%p11071_p9), %s11118_s12, 64, %s197_s20, %s185_s30  }
  0x46   : > { %p12350_p8 = scmp.ne.s32.totalorder %s12349_s9, 0 }
  0x47   : > { %s207_s8 = sand.u32 (!%p12350_p8), 1, %s10965_s13   ;;  %p12351_p12 = scmp.ne.s32.totalorder (!%p12350_p8), %s12346_s23, 0 }
  0x48   : > { %205 = sbr.rel (%p12350_p8) target bundleno = 1328 (0x530), region = 32  ;;  %s8044_s10 = sshll.u32 (!%p12350_p8), %s207_s8, 13 }
  0x49   : > { %s208_s11 = scalar_lea.sflag (!%p12350_p8), [#allocation3], %s207_s8  ;;  %s11143_s18 = scalar_lea.vmem (!%p12350_p8), [#allocation2], %s8044_s10 }
  0x4f   : > { %10952 = dma.done.wait (%p12351_p12), %s208_s11, 131072  }
  0x50   : > { %10954 = vsyncadd (%p12351_p12), %s208_s11, 4294836224  ;;  %s8045_s5 = sshll.u32 %s207_s8, 2  ;;  %s217_s6 = scalar_lea.sflag [#allocation5], %s207_s8 }
  0x51   : > { %s11149_s7 = scalar_lea.vmem [#allocation4], %s8045_s5 }
  0x52   : > { %10956 = dma.done.wait (%p12351_p12), %s217_s6, 64  }
  0x53   : > { %10958 = vsyncadd (%p12351_p12), %s217_s6, 4294967232  ;;  %v9299_v0 = vld [vmem:[%s11143_s18 + $0x4] ss:$16 sps:$4 sm:$0xff]   ;;  %v9301_v1 = vld [vmem:[%s11143_s18 + $0xc] ss:$16 sps:$4 sm:$0xff]   ;;  %s8046_s10 = sshll.u32 %s10973_s15, 2 }
  0x54   : > { %6568 = vmatprep.subr.bf16.mxu0 %v9299_v0  ;;  %v9303_v2 = vld [vmem:[%s11143_s18] ss:$16 sps:$4 sm:$0xff]   ;;  %v9304_v3 = vld [vmem:[%s11143_s18 + $0x8] ss:$16 sps:$4 sm:$0xff]   ;;  %7224 = vmatprep.subr.bf16.mxu1 %v9301_v1  ;;  %v9305_v4 = vld [vmem:[%s11143_s18 + $0x24] ss:$16 sps:$4 sm:$0xff]  }
  0x55   : > { %6569 = vmatpush1.bf16.msra.mxu0 %v9303_v2  ;;  %7225 = vmatpush1.bf16.msra.mxu1 %v9304_v3  ;;  %v9307_v5 = vld [vmem:[%s11143_s18 + $0x2c] ss:$16 sps:$4 sm:$0xff]   ;;  %v9309_v6 = vld [vmem:[%s11143_s18 + $0x20] ss:$16 sps:$4 sm:$0xff]   ;;  %v9310_v7 = vld [vmem:[%s11143_s18 + $0x28] ss:$16 sps:$4 sm:$0xff]  }
  0x56   : > { %6570 = vmatprep.subr.bf16.mxu0 %v9305_v4  ;;  %7226 = vmatprep.subr.bf16.mxu1 %v9307_v5  ;;  %v9311_v8 = vld [vmem:[%s11143_s18 + $0x44] ss:$16 sps:$4 sm:$0xff]   ;;  %v9313_v9 = vld [vmem:[%s11143_s18 + $0x4c] ss:$16 sps:$4 sm:$0xff]   ;;  %v9315_v10 = vld [vmem:[%s11143_s18 + $0x40] ss:$16 sps:$4 sm:$0xff]  }
  0x57   : > { %v9316_v11 = vld [vmem:[%s11143_s18 + $0x48] ss:$16 sps:$4 sm:$0xff]   ;;  %v9317_v12 = vld [vmem:[%s11143_s18 + $0x64] ss:$16 sps:$4 sm:$0xff]   ;;  %v9319_v13 = vld [vmem:[%s11143_s18 + $0x6c] ss:$16 sps:$4 sm:$0xff]  }
  0x58   : > { %v9321_v14 = vld [vmem:[%s11143_s18 + $0x60] ss:$16 sps:$4 sm:$0xff]   ;;  %v9322_v15 = vld [vmem:[%s11143_s18 + $0x68] ss:$16 sps:$4 sm:$0xff]   ;;  %v9323_v16 = vld [vmem:[%s11143_s18 + $0x84] ss:$16 sps:$4 sm:$0xff]  }
  0x59   : > { %6571 = vmatpush1.bf16.msra.mxu0 %v9309_v6  ;;  %7227 = vmatpush1.bf16.msra.mxu1 %v9310_v7  ;;  %v9325_v17 = vld [vmem:[%s11143_s18 + $0x8c] ss:$16 sps:$4 sm:$0xff]   ;;  %v9327_v18 = vld [vmem:[%s11143_s18 + $0x80] ss:$16 sps:$4 sm:$0xff]   ;;  %v9328_v19 = vld [vmem:[%s11143_s18 + $0x88] ss:$16 sps:$4 sm:$0xff]  }
  0x5a   : > { %6572 = vmatprep.subr.bf16.mxu0 %v9311_v8  ;;  %7228 = vmatprep.subr.bf16.mxu1 %v9313_v9  ;;  %v9329_v20 = vld [vmem:[%s11143_s18 + $0xa4] ss:$16 sps:$4 sm:$0xff]   ;;  %v9331_v21 = vld [vmem:[%s11143_s18 + $0xac] ss:$16 sps:$4 sm:$0xff]   ;;  %v9333_v22 = vld [vmem:[%s11143_s18 + $0xa0] ss:$16 sps:$4 sm:$0xff]  }
  0x5b   : > { %v9334_v23 = vld [vmem:[%s11143_s18 + $0xa8] ss:$16 sps:$4 sm:$0xff]   ;;  %v9335_v24 = vld [vmem:[%s11143_s18 + $0xc4] ss:$16 sps:$4 sm:$0xff]   ;;  %v9337_v25 = vld [vmem:[%s11143_s18 + $0xcc] ss:$16 sps:$4 sm:$0xff]  }
  0x5c   : > { %v9339_v26 = vld [vmem:[%s11143_s18 + $0xc0] ss:$16 sps:$4 sm:$0xff]   ;;  %v9340_v27 = vld [vmem:[%s11143_s18 + $0xc8] ss:$16 sps:$4 sm:$0xff]   ;;  %v9341_v28 = vld [vmem:[%s11143_s18 + $0xe4] ss:$16 sps:$4 sm:$0xff]  }
  0x5d   : > { %6573 = vmatpush1.bf16.msra.mxu0 %v9315_v10  ;;  %7229 = vmatpush1.bf16.msra.mxu1 %v9316_v11  ;;  %v9343_v29 = vld [vmem:[%s11143_s18 + $0xec] ss:$16 sps:$4 sm:$0xff]   ;;  %v9345_v30 = vld [vmem:[%s11143_s18 + $0xe0] ss:$16 sps:$4 sm:$0xff]   ;;  %v9346_v31 = vld [vmem:[%s11143_s18 + $0xe8] ss:$16 sps:$4 sm:$0xff]  }
  0x5e   : > { %6574 = vmatprep.subr.bf16.mxu0 %v9317_v12  ;;  %7230 = vmatprep.subr.bf16.mxu1 %v9319_v13  ;;  %v9347_v32 = vld [vmem:[%s11143_s18 + $0x104] ss:$16 sps:$4 sm:$0xff]   ;;  %v9349_v33 = vld [vmem:[%s11143_s18 + $0x10c] ss:$16 sps:$4 sm:$0xff]   ;;  %v9351_v34 = vld [vmem:[%s11143_s18 + $0x100] ss:$16 sps:$4 sm:$0xff]  }
  0x5f   : > { %v9352_v35 = vld [vmem:[%s11143_s18 + $0x108] ss:$16 sps:$4 sm:$0xff]   ;;  %v9353_v36 = vld [vmem:[%s11143_s18 + $0x124] ss:$16 sps:$4 sm:$0xff]   ;;  %v9355_v37 = vld [vmem:[%s11143_s18 + $0x12c] ss:$16 sps:$4 sm:$0xff]  }
  0x60   : > { %v9357_v38 = vld [vmem:[%s11143_s18 + $0x120] ss:$16 sps:$4 sm:$0xff]   ;;  %v9358_v39 = vld [vmem:[%s11143_s18 + $0x128] ss:$16 sps:$4 sm:$0xff]   ;;  %v9359_v40 = vld [vmem:[%s11143_s18 + $0x144] ss:$16 sps:$4 sm:$0xff]  }
  0x61   : > { %6575 = vmatpush1.bf16.msra.mxu0 %v9321_v14  ;;  %7231 = vmatpush1.bf16.msra.mxu1 %v9322_v15  ;;  %v9361_v41 = vld [vmem:[%s11143_s18 + $0x14c] ss:$16 sps:$4 sm:$0xff]   ;;  %v9363_v42 = vld [vmem:[%s11143_s18 + $0x140] ss:$16 sps:$4 sm:$0xff]   ;;  %v9364_v43 = vld [vmem:[%s11143_s18 + $0x148] ss:$16 sps:$4 sm:$0xff]  }
  0x62   : > { %6576 = vmatprep.subr.bf16.mxu0 %v9323_v16  ;;  %7232 = vmatprep.subr.bf16.mxu1 %v9325_v17  ;;  %v9365_v44 = vld [vmem:[%s11143_s18 + $0x164] ss:$16 sps:$4 sm:$0xff]   ;;  %v9367_v45 = vld [vmem:[%s11143_s18 + $0x16c] ss:$16 sps:$4 sm:$0xff]   ;;  %v9369_v47 = vld [vmem:[%s11143_s18 + $0x160] ss:$16 sps:$4 sm:$0xff]  }
  0x63   : > { %v274_v46 = vld [vmem:[%s12340_s0] sm:$0xff]  ;;  %v9370_v49 = vld [vmem:[%s11143_s18 + $0x168] ss:$16 sps:$4 sm:$0xff]   ;;  %v9373_v51 = vld [vmem:[%s11143_s18 + $0x18c] ss:$16 sps:$4 sm:$0xff]   ;;  %p267_p7 = scmp.lt.s32.totalorder %s8046_s10, 15 }
  0x64   : > { %v8049_v48 = vcombine.high %v274_v46, %v274_v46  ;;  %v9371_v50 = vld [vmem:[%s11143_s18 + $0x184] ss:$16 sps:$4 sm:$0xff]   ;;  %v9375_v52 = vld [vmem:[%s11143_s18 + $0x180] ss:$16 sps:$4 sm:$0xff]   ;;  %v9376_v53 = vld [vmem:[%s11143_s18 + $0x188] ss:$16 sps:$4 sm:$0xff]   ;;  %v8048_v4 = vcombine.low %v274_v46, %v274_v46 }
  0x65   : > { %6577 = vmatpush1.bf16.msra.mxu0 %v9327_v18  ;;  %7233 = vmatpush1.bf16.msra.mxu1 %v9328_v19  ;;  %v9377_v54 = vld [vmem:[%s11143_s18 + $0x1a4] ss:$16 sps:$4 sm:$0xff]   ;;  %v9379_v55 = vld [vmem:[%s11143_s18 + $0x1ac] ss:$16 sps:$4 sm:$0xff]   ;;  %v9381_v56 = vld [vmem:[%s11143_s18 + $0x1a0] ss:$16 sps:$4 sm:$0xff]  }
  0x66   : > { %6578 = vmatprep.subr.bf16.mxu0 %v9329_v20  ;;  %7234 = vmatprep.subr.bf16.mxu1 %v9331_v21  ;;  %v9382_v57 = vld [vmem:[%s11143_s18 + $0x1a8] ss:$16 sps:$4 sm:$0xff]   ;;  %v9383_v58 = vld [vmem:[%s11143_s18 + $0x1c4] ss:$16 sps:$4 sm:$0xff]   ;;  %v9385_v59 = vld [vmem:[%s11143_s18 + $0x1cc] ss:$16 sps:$4 sm:$0xff]  }
  0x67   : > { %6600 = vmatprep.mubr.bf16.mxu0 %v8049_v48  ;;  %7256 = vmatprep.mubr.bf16.mxu1 %v8049_v48  ;;  %v9387_v60 = vld [vmem:[%s11143_s18 + $0x1c0] ss:$16 sps:$4 sm:$0xff]   ;;  %v9388_v61 = vld [vmem:[%s11143_s18 + $0x1c8] ss:$16 sps:$4 sm:$0xff]   ;;  %v9389_v62 = vld [vmem:[%s11143_s18 + $0x1e4] ss:$16 sps:$4 sm:$0xff]  }
  0x68   : > { %v9391_v63 = vld [vmem:[%s11143_s18 + $0x1ec] ss:$16 sps:$4 sm:$0xff]   ;;  %v9393_v0 = vld [vmem:[%s11143_s18 + $0x1e0] ss:$16 sps:$4 sm:$0xff]   ;;  %v9394_v1 = vld [vmem:[%s11143_s18 + $0x1e8] ss:$16 sps:$4 sm:$0xff]  }
  0x69   : > { %6579 = vmatpush1.bf16.msra.mxu0 %v9333_v22  ;;  %7235 = vmatpush1.bf16.msra.mxu1 %v9334_v23  ;;  %v9399_v2 = vld [vmem:[%s11143_s18 + $0x204] ss:$16 sps:$4 sm:$0xff]   ;;  %v9402_v3 = vld [vmem:[%s11143_s18 + $0x20c] ss:$16 sps:$4 sm:$0xff]   ;;  %v9397_v5 = vld [vmem:[%s11143_s18 + $0x200] ss:$16 sps:$4 sm:$0xff]  }
  0x6a   : > { %6580 = vmatprep.subr.bf16.mxu0 %v9335_v24  ;;  %7236 = vmatprep.subr.bf16.mxu1 %v9337_v25  ;;  %v9400_v6 = vld [vmem:[%s11143_s18 + $0x208] ss:$16 sps:$4 sm:$0xff]   ;;  %v9405_v7 = vld [vmem:[%s11143_s18 + $0x224] ss:$16 sps:$4 sm:$0xff]   ;;  %v9408_v8 = vld [vmem:[%s11143_s18 + $0x22c] ss:$16 sps:$4 sm:$0xff]  }
  0x6b   : > { %v9403_v9 = vld [vmem:[%s11143_s18 + $0x220] ss:$16 sps:$4 sm:$0xff]   ;;  %v9406_v10 = vld [vmem:[%s11143_s18 + $0x228] ss:$16 sps:$4 sm:$0xff]   ;;  %v9411_v11 = vld [vmem:[%s11143_s18 + $0x244] ss:$16 sps:$4 sm:$0xff]  }
  0x6c   : > { %v9414_v12 = vld [vmem:[%s11143_s18 + $0x24c] ss:$16 sps:$4 sm:$0xff]   ;;  %v9409_v13 = vld [vmem:[%s11143_s18 + $0x240] ss:$16 sps:$4 sm:$0xff]   ;;  %v9412_v14 = vld [vmem:[%s11143_s18 + $0x248] ss:$16 sps:$4 sm:$0xff]  }
  0x6d   : > { %6581 = vmatpush1.bf16.msra.mxu0 %v9339_v26  ;;  %7237 = vmatpush1.bf16.msra.mxu1 %v9340_v27  ;;  %v9417_v15 = vld [vmem:[%s11143_s18 + $0x264] ss:$16 sps:$4 sm:$0xff]   ;;  %v9420_v16 = vld [vmem:[%s11143_s18 + $0x26c] ss:$16 sps:$4 sm:$0xff]   ;;  %v9415_v17 = vld [vmem:[%s11143_s18 + $0x260] ss:$16 sps:$4 sm:$0xff]  }
  0x6e   : > { %6582 = vmatprep.subr.bf16.mxu0 %v9341_v28  ;;  %7238 = vmatprep.subr.bf16.mxu1 %v9343_v29  ;;  %v9418_v18 = vld [vmem:[%s11143_s18 + $0x268] ss:$16 sps:$4 sm:$0xff]   ;;  %v9423_v19 = vld [vmem:[%s11143_s18 + $0x284] ss:$16 sps:$4 sm:$0xff]   ;;  %v9426_v20 = vld [vmem:[%s11143_s18 + $0x28c] ss:$16 sps:$4 sm:$0xff]  }
  0x6f   : > { %v9421_v21 = vld [vmem:[%s11143_s18 + $0x280] ss:$16 sps:$4 sm:$0xff]   ;;  %v9424_v22 = vld [vmem:[%s11143_s18 + $0x288] ss:$16 sps:$4 sm:$0xff]   ;;  %v9429_v23 = vld [vmem:[%s11143_s18 + $0x2a4] ss:$16 sps:$4 sm:$0xff]  }
  0x70   : > { %v9432_v24 = vld [vmem:[%s11143_s18 + $0x2ac] ss:$16 sps:$4 sm:$0xff]   ;;  %v9427_v25 = vld [vmem:[%s11143_s18 + $0x2a0] ss:$16 sps:$4 sm:$0xff]   ;;  %v9430_v26 = vld [vmem:[%s11143_s18 + $0x2a8] ss:$16 sps:$4 sm:$0xff]  }
  0x71   : > { %6583 = vmatpush1.bf16.msra.mxu0 %v9345_v30  ;;  %7239 = vmatpush1.bf16.msra.mxu1 %v9346_v31  ;;  %v9435_v27 = vld [vmem:[%s11143_s18 + $0x2c4] ss:$16 sps:$4 sm:$0xff]   ;;  %v9438_v28 = vld [vmem:[%s11143_s18 + $0x2cc] ss:$16 sps:$4 sm:$0xff]   ;;  %v9433_v31 = vld [vmem:[%s11143_s18 + $0x2c0] ss:$16 sps:$4 sm:$0xff]  }
  0x72   : > { %6584 = vmatprep.subr.bf16.mxu0 %v9347_v32  ;;  %7240 = vmatprep.subr.bf16.mxu1 %v9349_v33  ;;  %v11251_v29 = vld [vmem:[%s12340_s0 + $0x8] sm:$0xff]  ;;  %v9441_v33 = vld [vmem:[%s11143_s18 + $0x2e4] ss:$16 sps:$4 sm:$0xff]   ;;  %s12360_s10 = smov (!%p267_p7, %s8046_s10), 15 }
  0x73   : > { %v8051_v30 = vcombine.high %v11251_v29, %v11251_v29  ;;  %v9436_v32 = vld [vmem:[%s11143_s18 + $0x2c8] ss:$16 sps:$4 sm:$0xff]   ;;  %v9462_v46 = vld [vmem:[%s11143_s18 + $0x34c] ss:$16 sps:$4 sm:$0xff]  }
  0x74   : > { %v9460_v48 = vld [vmem:[%s11143_s18 + $0x348] ss:$16 sps:$4 sm:$0xff]  }
  0x75   : > { %6585 = vmatpush1.bf16.msra.mxu0 %v9351_v34  ;;  %7241 = vmatpush1.bf16.msra.mxu1 %v9352_v35  ;;  %v9444_v34 = vld [vmem:[%s11143_s18 + $0x2ec] ss:$16 sps:$4 sm:$0xff]   ;;  %v9439_v35 = vld [vmem:[%s11143_s18 + $0x2e0] ss:$16 sps:$4 sm:$0xff]  }
  0x76   : > { %6586 = vmatprep.subr.bf16.mxu0 %v9353_v36  ;;  %7242 = vmatprep.subr.bf16.mxu1 %v9355_v37  ;;  %v9442_v36 = vld [vmem:[%s11143_s18 + $0x2e8] ss:$16 sps:$4 sm:$0xff]   ;;  %v9447_v37 = vld [vmem:[%s11143_s18 + $0x304] ss:$16 sps:$4 sm:$0xff]  }
  0x79   : > { %6587 = vmatpush1.bf16.msra.mxu0 %v9357_v38  ;;  %7243 = vmatpush1.bf16.msra.mxu1 %v9358_v39  ;;  %v9450_v38 = vld [vmem:[%s11143_s18 + $0x30c] ss:$16 sps:$4 sm:$0xff]   ;;  %v9445_v39 = vld [vmem:[%s11143_s18 + $0x300] ss:$16 sps:$4 sm:$0xff]  }
  0x7a   : > { %6588 = vmatprep.subr.bf16.mxu0 %v9359_v40  ;;  %7244 = vmatprep.subr.bf16.mxu1 %v9361_v41  ;;  %v9448_v40 = vld [vmem:[%s11143_s18 + $0x308] ss:$16 sps:$4 sm:$0xff]   ;;  %v9453_v41 = vld [vmem:[%s11143_s18 + $0x324] ss:$16 sps:$4 sm:$0xff]  }
  0x7d   : > { %6589 = vmatpush1.bf16.msra.mxu0 %v9363_v42  ;;  %7245 = vmatpush1.bf16.msra.mxu1 %v9364_v43  ;;  %v9456_v42 = vld [vmem:[%s11143_s18 + $0x32c] ss:$16 sps:$4 sm:$0xff]   ;;  %v9451_v43 = vld [vmem:[%s11143_s18 + $0x320] ss:$16 sps:$4 sm:$0xff]  }
  0x7e   : > { %6590 = vmatprep.subr.bf16.mxu0 %v9365_v44  ;;  %7246 = vmatprep.subr.bf16.mxu1 %v9367_v45  ;;  %v9454_v44 = vld [vmem:[%s11143_s18 + $0x328] ss:$16 sps:$4 sm:$0xff]   ;;  %v9459_v45 = vld [vmem:[%s11143_s18 + $0x344] ss:$16 sps:$4 sm:$0xff]  }
  0x81   : > { %6591 = vmatpush1.bf16.msra.mxu0 %v9369_v47  ;;  %7247 = vmatpush1.bf16.msra.mxu1 %v9370_v49  ;;  %v9457_v47 = vld [vmem:[%s11143_s18 + $0x340] ss:$16 sps:$4 sm:$0xff]   ;;  %v9465_v49 = vld [vmem:[%s11143_s18 + $0x364] ss:$16 sps:$4 sm:$0xff]  }
  0x82   : > { %6592 = vmatprep.subr.bf16.mxu0 %v9371_v50  ;;  %7248 = vmatprep.subr.bf16.mxu1 %v9373_v51  ;;  %v9468_v50 = vld [vmem:[%s11143_s18 + $0x36c] ss:$16 sps:$4 sm:$0xff]   ;;  %v9463_v51 = vld [vmem:[%s11143_s18 + $0x360] ss:$16 sps:$4 sm:$0xff]  }
  0x85   : > { %6593 = vmatpush1.bf16.msra.mxu0 %v9375_v52  ;;  %7249 = vmatpush1.bf16.msra.mxu1 %v9376_v53  ;;  %v9466_v52 = vld [vmem:[%s11143_s18 + $0x368] ss:$16 sps:$4 sm:$0xff]   ;;  %v9471_v53 = vld [vmem:[%s11143_s18 + $0x384] ss:$16 sps:$4 sm:$0xff]  }
  0x86   : > { %6594 = vmatprep.subr.bf16.mxu0 %v9377_v54  ;;  %7250 = vmatprep.subr.bf16.mxu1 %v9379_v55  ;;  %v9474_v54 = vld [vmem:[%s11143_s18 + $0x38c] ss:$16 sps:$4 sm:$0xff]   ;;  %v9469_v55 = vld [vmem:[%s11143_s18 + $0x380] ss:$16 sps:$4 sm:$0xff]  }
  0x89   : > { %6595 = vmatpush1.bf16.msra.mxu0 %v9381_v56  ;;  %7251 = vmatpush1.bf16.msra.mxu1 %v9382_v57  ;;  %v9472_v56 = vld [vmem:[%s11143_s18 + $0x388] ss:$16 sps:$4 sm:$0xff]   ;;  %v9477_v57 = vld [vmem:[%s11143_s18 + $0x3a4] ss:$16 sps:$4 sm:$0xff]  }
  0x8a   : > { %6596 = vmatprep.subr.bf16.mxu0 %v9383_v58  ;;  %7252 = vmatprep.subr.bf16.mxu1 %v9385_v59  ;;  %v9480_v58 = vld [vmem:[%s11143_s18 + $0x3ac] ss:$16 sps:$4 sm:$0xff]   ;;  %v9475_v59 = vld [vmem:[%s11143_s18 + $0x3a0] ss:$16 sps:$4 sm:$0xff]  }
  0x8d   : > { %6597 = vmatpush1.bf16.msra.mxu0 %v9387_v60  ;;  %7253 = vmatpush1.bf16.msra.mxu1 %v9388_v61  ;;  %v9478_v60 = vld [vmem:[%s11143_s18 + $0x3a8] ss:$16 sps:$4 sm:$0xff]   ;;  %v9483_v61 = vld [vmem:[%s11143_s18 + $0x3c4] ss:$16 sps:$4 sm:$0xff]  }
  0x8e   : > { %6598 = vmatprep.subr.bf16.mxu0 %v9389_v62  ;;  %7254 = vmatprep.subr.bf16.mxu1 %v9391_v63  ;;  %v9486_v62 = vld [vmem:[%s11143_s18 + $0x3cc] ss:$16 sps:$4 sm:$0xff]   ;;  %v9481_v63 = vld [vmem:[%s11143_s18 + $0x3c0] ss:$16 sps:$4 sm:$0xff]  }
  0x91   : > { %6599 = vmatpush1.bf16.msra.mxu0 %v9393_v0  ;;  %7255 = vmatpush1.bf16.msra.mxu1 %v9394_v1  ;;  %v9484_v0 = vld [vmem:[%s11143_s18 + $0x3c8] ss:$16 sps:$4 sm:$0xff]   ;;  %v9489_v1 = vld [vmem:[%s11143_s18 + $0x3e4] ss:$16 sps:$4 sm:$0xff]  }
  0x92   : > { %6609 = vmatprep.subr.bf16.mxu0 %v9399_v2  ;;  %7265 = vmatprep.subr.bf16.mxu1 %v9402_v3  ;;  %v9492_v2 = vld [vmem:[%s11143_s18 + $0x3ec] ss:$16 sps:$4 sm:$0xff]   ;;  %v9487_v3 = vld [vmem:[%s11143_s18 + $0x3e0] ss:$16 sps:$4 sm:$0xff]  }
  0x94   : > { %6601 = vmatmul.mubr.bf16.vlgmr.msra.gmra.mrb[0].mxu0 %v8048_v4  ;;  %7257 = vmatmul.mubr.bf16.vlgmr.msra.gmra.mrb[0].mxu1 %v8048_v4  ;;  %v9490_v4 = vld [vmem:[%s11143_s18 + $0x3e8] ss:$16 sps:$4 sm:$0xff]  }
  0x95   : > { %6610 = vmatpush1.bf16.msra.mxu0 %v9397_v5  ;;  %7266 = vmatpush1.bf16.msra.mxu1 %v9400_v6  ;;  %v9497_v5 = vld [vmem:[%s11143_s18 + $0x404] ss:$16 sps:$4 sm:$0xff]   ;;  %v9500_v6 = vld [vmem:[%s11143_s18 + $0x40c] ss:$16 sps:$4 sm:$0xff]  }
  0x96   : > { %6611 = vmatprep.subr.bf16.mxu0 %v9405_v7  ;;  %7267 = vmatprep.subr.bf16.mxu1 %v9408_v8  ;;  %v8050_v7 = vcombine.low %v11251_v29, %v11251_v29  ;;  %v9495_v8 = vld [vmem:[%s11143_s18 + $0x400] ss:$16 sps:$4 sm:$0xff]   ;;  %v9530_v29 = vld [vmem:[%s11143_s18 + $0x4ac] ss:$16 sps:$4 sm:$0xff]  }
  0x97   : > { %6641 = vmatprep.mubr.bf16.mxu0 %v8051_v30  ;;  %7297 = vmatprep.mubr.bf16.mxu1 %v8051_v30  ;;  %v9525_v30 = vld [vmem:[%s11143_s18 + $0x4a0] ss:$16 sps:$4 sm:$0xff]  }
  0x99   : > { %6612 = vmatpush1.bf16.msra.mxu0 %v9403_v9  ;;  %7268 = vmatpush1.bf16.msra.mxu1 %v9406_v10  ;;  %v9498_v9 = vld [vmem:[%s11143_s18 + $0x408] ss:$16 sps:$4 sm:$0xff]   ;;  %v9503_v10 = vld [vmem:[%s11143_s18 + $0x424] ss:$16 sps:$4 sm:$0xff]  }
  0x9a   : > { %6613 = vmatprep.subr.bf16.mxu0 %v9411_v11  ;;  %7269 = vmatprep.subr.bf16.mxu1 %v9414_v12  ;;  %v11303_v11 = vld [vmem:[%s12340_s0 + $0x10] sm:$0xff]  ;;  %v9506_v12 = vld [vmem:[%s11143_s18 + $0x42c] ss:$16 sps:$4 sm:$0xff]  }
  0x9d   : > { %6614 = vmatpush1.bf16.msra.mxu0 %v9409_v13  ;;  %7270 = vmatpush1.bf16.msra.mxu1 %v9412_v14  ;;  %v8053_v13 = vcombine.high %v11303_v11, %v11303_v11  ;;  %v9501_v14 = vld [vmem:[%s11143_s18 + $0x420] ss:$16 sps:$4 sm:$0xff]  }
  0x9e   : > { %6615 = vmatprep.subr.bf16.mxu0 %v9417_v15  ;;  %7271 = vmatprep.subr.bf16.mxu1 %v9420_v16  ;;  %v9504_v15 = vld [vmem:[%s11143_s18 + $0x428] ss:$16 sps:$4 sm:$0xff]   ;;  %v9509_v16 = vld [vmem:[%s11143_s18 + $0x444] ss:$16 sps:$4 sm:$0xff]  }
  0xa1   : > { %6616 = vmatpush1.bf16.msra.mxu0 %v9415_v17  ;;  %7272 = vmatpush1.bf16.msra.mxu1 %v9418_v18  ;;  %v9512_v17 = vld [vmem:[%s11143_s18 + $0x44c] ss:$16 sps:$4 sm:$0xff]   ;;  %v9507_v18 = vld [vmem:[%s11143_s18 + $0x440] ss:$16 sps:$4 sm:$0xff]  }
  0xa2   : > { %6617 = vmatprep.subr.bf16.mxu0 %v9423_v19  ;;  %7273 = vmatprep.subr.bf16.mxu1 %v9426_v20  ;;  %v9510_v19 = vld [vmem:[%s11143_s18 + $0x448] ss:$16 sps:$4 sm:$0xff]   ;;  %v9515_v20 = vld [vmem:[%s11143_s18 + $0x464] ss:$16 sps:$4 sm:$0xff]  }
  0xa5   : > { %6618 = vmatpush1.bf16.msra.mxu0 %v9421_v21  ;;  %7274 = vmatpush1.bf16.msra.mxu1 %v9424_v22  ;;  %v9518_v21 = vld [vmem:[%s11143_s18 + $0x46c] ss:$16 sps:$4 sm:$0xff]   ;;  %v9513_v22 = vld [vmem:[%s11143_s18 + $0x460] ss:$16 sps:$4 sm:$0xff]  }
  0xa6   : > { %6619 = vmatprep.subr.bf16.mxu0 %v9429_v23  ;;  %7275 = vmatprep.subr.bf16.mxu1 %v9432_v24  ;;  %v9516_v23 = vld [vmem:[%s11143_s18 + $0x468] ss:$16 sps:$4 sm:$0xff]   ;;  %v9521_v24 = vld [vmem:[%s11143_s18 + $0x484] ss:$16 sps:$4 sm:$0xff]  }
  0xa9   : > { %6620 = vmatpush1.bf16.msra.mxu0 %v9427_v25  ;;  %7276 = vmatpush1.bf16.msra.mxu1 %v9430_v26  ;;  %v9524_v25 = vld [vmem:[%s11143_s18 + $0x48c] ss:$16 sps:$4 sm:$0xff]   ;;  %v9519_v26 = vld [vmem:[%s11143_s18 + $0x480] ss:$16 sps:$4 sm:$0xff]  }
  0xaa   : > { %6621 = vmatprep.subr.bf16.mxu0 %v9435_v27  ;;  %7277 = vmatprep.subr.bf16.mxu1 %v9438_v28  ;;  %v9522_v27 = vld [vmem:[%s11143_s18 + $0x488] ss:$16 sps:$4 sm:$0xff]   ;;  %v9527_v28 = vld [vmem:[%s11143_s18 + $0x4a4] ss:$16 sps:$4 sm:$0xff]  }
  0xad   : > { %6622 = vmatpush1.bf16.msra.mxu0 %v9433_v31  ;;  %7278 = vmatpush1.bf16.msra.mxu1 %v9436_v32  ;;  %v9528_v31 = vld [vmem:[%s11143_s18 + $0x4a8] ss:$16 sps:$4 sm:$0xff]   ;;  %v9533_v32 = vld [vmem:[%s11143_s18 + $0x4c4] ss:$16 sps:$4 sm:$0xff]  }
  0xae   : > { %6623 = vmatprep.subr.bf16.mxu0 %v9441_v33  ;;  %7279 = vmatprep.subr.bf16.mxu1 %v9444_v34  ;;  %v9536_v33 = vld [vmem:[%s11143_s18 + $0x4cc] ss:$16 sps:$4 sm:$0xff]   ;;  %v9531_v34 = vld [vmem:[%s11143_s18 + $0x4c0] ss:$16 sps:$4 sm:$0xff]  }
  0xb1   : > { %6624 = vmatpush1.bf16.msra.mxu0 %v9439_v35  ;;  %7280 = vmatpush1.bf16.msra.mxu1 %v9442_v36  ;;  %v9534_v35 = vld [vmem:[%s11143_s18 + $0x4c8] ss:$16 sps:$4 sm:$0xff]   ;;  %v9539_v36 = vld [vmem:[%s11143_s18 + $0x4e4] ss:$16 sps:$4 sm:$0xff]  }
  0xb2   : > { %6625 = vmatprep.subr.bf16.mxu0 %v9447_v37  ;;  %7281 = vmatprep.subr.bf16.mxu1 %v9450_v38  ;;  %v9542_v37 = vld [vmem:[%s11143_s18 + $0x4ec] ss:$16 sps:$4 sm:$0xff]   ;;  %v9537_v38 = vld [vmem:[%s11143_s18 + $0x4e0] ss:$16 sps:$4 sm:$0xff]  }
  0xb5   : > { %6626 = vmatpush1.bf16.msra.mxu0 %v9445_v39  ;;  %7282 = vmatpush1.bf16.msra.mxu1 %v9448_v40  ;;  %v9540_v39 = vld [vmem:[%s11143_s18 + $0x4e8] ss:$16 sps:$4 sm:$0xff]   ;;  %v9545_v40 = vld [vmem:[%s11143_s18 + $0x504] ss:$16 sps:$4 sm:$0xff]  }
  0xb6   : > { %6627 = vmatprep.subr.bf16.mxu0 %v9453_v41  ;;  %7283 = vmatprep.subr.bf16.mxu1 %v9456_v42  ;;  %v9548_v41 = vld [vmem:[%s11143_s18 + $0x50c] ss:$16 sps:$4 sm:$0xff]   ;;  %v9543_v42 = vld [vmem:[%s11143_s18 + $0x500] ss:$16 sps:$4 sm:$0xff]  }
  0xb9   : > { %6628 = vmatpush1.bf16.msra.mxu0 %v9451_v43  ;;  %7284 = vmatpush1.bf16.msra.mxu1 %v9454_v44  ;;  %v9546_v43 = vld [vmem:[%s11143_s18 + $0x508] ss:$16 sps:$4 sm:$0xff]   ;;  %v9551_v44 = vld [vmem:[%s11143_s18 + $0x524] ss:$16 sps:$4 sm:$0xff]  }
  0xba   : > { %6629 = vmatprep.subr.bf16.mxu0 %v9459_v45  ;;  %7285 = vmatprep.subr.bf16.mxu1 %v9462_v46  ;;  %v9554_v45 = vld [vmem:[%s11143_s18 + $0x52c] ss:$16 sps:$4 sm:$0xff]   ;;  %v9549_v46 = vld [vmem:[%s11143_s18 + $0x520] ss:$16 sps:$4 sm:$0xff]  }
  0xbd   : > { %6630 = vmatpush1.bf16.msra.mxu0 %v9457_v47  ;;  %7286 = vmatpush1.bf16.msra.mxu1 %v9460_v48  ;;  %v9552_v47 = vld [vmem:[%s11143_s18 + $0x528] ss:$16 sps:$4 sm:$0xff]   ;;  %v9557_v48 = vld [vmem:[%s11143_s18 + $0x544] ss:$16 sps:$4 sm:$0xff]  }
  0xbe   : > { %6631 = vmatprep.subr.bf16.mxu0 %v9465_v49  ;;  %7287 = vmatprep.subr.bf16.mxu1 %v9468_v50  ;;  %v9560_v49 = vld [vmem:[%s11143_s18 + $0x54c] ss:$16 sps:$4 sm:$0xff]   ;;  %v9555_v50 = vld [vmem:[%s11143_s18 + $0x540] ss:$16 sps:$4 sm:$0xff]  }
  0xc1   : > { %6632 = vmatpush1.bf16.msra.mxu0 %v9463_v51  ;;  %7288 = vmatpush1.bf16.msra.mxu1 %v9466_v52  ;;  %v9558_v51 = vld [vmem:[%s11143_s18 + $0x548] ss:$16 sps:$4 sm:$0xff]   ;;  %v9563_v52 = vld [vmem:[%s11143_s18 + $0x564] ss:$16 sps:$4 sm:$0xff]  }
  0xc2   : > { %6633 = vmatprep.subr.bf16.mxu0 %v9471_v53  ;;  %7289 = vmatprep.subr.bf16.mxu1 %v9474_v54  ;;  %v9566_v53 = vld [vmem:[%s11143_s18 + $0x56c] ss:$16 sps:$4 sm:$0xff]   ;;  %v9561_v54 = vld [vmem:[%s11143_s18 + $0x560] ss:$16 sps:$4 sm:$0xff]  }
  0xc5   : > { %6634 = vmatpush1.bf16.msra.mxu0 %v9469_v55  ;;  %7290 = vmatpush1.bf16.msra.mxu1 %v9472_v56  ;;  %v9564_v55 = vld [vmem:[%s11143_s18 + $0x568] ss:$16 sps:$4 sm:$0xff]   ;;  %v9569_v56 = vld [vmem:[%s11143_s18 + $0x584] ss:$16 sps:$4 sm:$0xff]  }
  0xc6   : > { %6635 = vmatprep.subr.bf16.mxu0 %v9477_v57  ;;  %7291 = vmatprep.subr.bf16.mxu1 %v9480_v58  ;;  %v9572_v57 = vld [vmem:[%s11143_s18 + $0x58c] ss:$16 sps:$4 sm:$0xff]   ;;  %v9567_v58 = vld [vmem:[%s11143_s18 + $0x580] ss:$16 sps:$4 sm:$0xff]  }
  0xc9   : > { %6636 = vmatpush1.bf16.msra.mxu0 %v9475_v59  ;;  %7292 = vmatpush1.bf16.msra.mxu1 %v9478_v60  ;;  %v9570_v59 = vld [vmem:[%s11143_s18 + $0x588] ss:$16 sps:$4 sm:$0xff]   ;;  %v9575_v60 = vld [vmem:[%s11143_s18 + $0x5a4] ss:$16 sps:$4 sm:$0xff]  }
  0xca   : > { %6637 = vmatprep.subr.bf16.mxu0 %v9483_v61  ;;  %7293 = vmatprep.subr.bf16.mxu1 %v9486_v62  ;;  %v9578_v61 = vld [vmem:[%s11143_s18 + $0x5ac] ss:$16 sps:$4 sm:$0xff]   ;;  %v9573_v62 = vld [vmem:[%s11143_s18 + $0x5a0] ss:$16 sps:$4 sm:$0xff]  }
  0xcd   : > { %6638 = vmatpush1.bf16.msra.mxu0 %v9481_v63  ;;  %7294 = vmatpush1.bf16.msra.mxu1 %v9484_v0  ;;  %v9576_v63 = vld [vmem:[%s11143_s18 + $0x5a8] ss:$16 sps:$4 sm:$0xff]   ;;  %v9581_v0 = vld [vmem:[%s11143_s18 + $0x5c4] ss:$16 sps:$4 sm:$0xff]  }
  0xce   : > { %6639 = vmatprep.subr.bf16.mxu0 %v9489_v1  ;;  %7295 = vmatprep.subr.bf16.mxu1 %v9492_v2  ;;  %v9584_v1 = vld [vmem:[%s11143_s18 + $0x5cc] ss:$16 sps:$4 sm:$0xff]   ;;  %v9579_v2 = vld [vmem:[%s11143_s18 + $0x5c0] ss:$16 sps:$4 sm:$0xff]  }
  0xd1   : > { %6640 = vmatpush1.bf16.msra.mxu0 %v9487_v3  ;;  %7296 = vmatpush1.bf16.msra.mxu1 %v9490_v4  ;;  %v9582_v3 = vld [vmem:[%s11143_s18 + $0x5c8] ss:$16 sps:$4 sm:$0xff]   ;;  %v9587_v4 = vld [vmem:[%s11143_s18 + $0x5e4] ss:$16 sps:$4 sm:$0xff]  }
  0xd2   : > { %6650 = vmatprep.subr.bf16.mxu0 %v9497_v5  ;;  %7306 = vmatprep.subr.bf16.mxu1 %v9500_v6  ;;  %v9590_v5 = vld [vmem:[%s11143_s18 + $0x5ec] ss:$16 sps:$4 sm:$0xff]   ;;  %v9585_v6 = vld [vmem:[%s11143_s18 + $0x5e0] ss:$16 sps:$4 sm:$0xff]  }
  0xd4   : > { %6642 = vmatmul.mubr.bf16.vlgmr.msra.gmra.mrb[0].mxu0 %v8050_v7  ;;  %7298 = vmatmul.mubr.bf16.vlgmr.msra.gmra.mrb[0].mxu1 %v8050_v7  ;;  %v9588_v7 = vld [vmem:[%s11143_s18 + $0x5e8] ss:$16 sps:$4 sm:$0xff]  }
  0xd5   : > { %6651 = vmatpush1.bf16.msra.mxu0 %v9495_v8  ;;  %7307 = vmatpush1.bf16.msra.mxu1 %v9498_v9  ;;  %v9595_v8 = vld [vmem:[%s11143_s18 + $0x604] ss:$16 sps:$4 sm:$0xff]   ;;  %v9598_v9 = vld [vmem:[%s11143_s18 + $0x60c] ss:$16 sps:$4 sm:$0xff]  }
  0xd6   : > { %6652 = vmatprep.subr.bf16.mxu0 %v9503_v10  ;;  %7308 = vmatprep.subr.bf16.mxu1 %v9506_v12  ;;  %v9593_v10 = vld [vmem:[%s11143_s18 + $0x600] ss:$16 sps:$4 sm:$0xff]   ;;  %v8052_v12 = vcombine.low %v11303_v11, %v11303_v11 }
  0xd7   : > { %6682 = vmatprep.mubr.bf16.mxu0 %v8053_v13  ;;  %7338 = vmatprep.mubr.bf16.mxu1 %v8053_v13  ;;  %v9596_v13 = vld [vmem:[%s11143_s18 + $0x608] ss:$16 sps:$4 sm:$0xff]   ;;  %v9599_v11 = vld [vmem:[%s11143_s18 + $0x620] ss:$16 sps:$4 sm:$0xff]  }
  0xd9   : > { %6653 = vmatpush1.bf16.msra.mxu0 %v9501_v14  ;;  %7309 = vmatpush1.bf16.msra.mxu1 %v9504_v15  ;;  %v11375_v14 = vld [vmem:[%s12340_s0 + $0x18] sm:$0xff]  ;;  %v9601_v15 = vld [vmem:[%s11143_s18 + $0x624] ss:$16 sps:$4 sm:$0xff]  }
  0xda   : > { %6654 = vmatprep.subr.bf16.mxu0 %v9509_v16  ;;  %7310 = vmatprep.subr.bf16.mxu1 %v9512_v17  ;;  %v9604_v16 = vld [vmem:[%s11143_s18 + $0x62c] ss:$16 sps:$4 sm:$0xff]   ;;  %v8055_v17 = vcombine.high %v11375_v14, %v11375_v14 }
  0xdd   : > { %6655 = vmatpush1.bf16.msra.mxu0 %v9507_v18  ;;  %7311 = vmatpush1.bf16.msra.mxu1 %v9510_v19  ;;  %v9602_v18 = vld [vmem:[%s11143_s18 + $0x628] ss:$16 sps:$4 sm:$0xff]   ;;  %v9607_v19 = vld [vmem:[%s11143_s18 + $0x644] ss:$16 sps:$4 sm:$0xff]  }
  0xde   : > { %6656 = vmatprep.subr.bf16.mxu0 %v9515_v20  ;;  %7312 = vmatprep.subr.bf16.mxu1 %v9518_v21  ;;  %v9610_v20 = vld [vmem:[%s11143_s18 + $0x64c] ss:$16 sps:$4 sm:$0xff]   ;;  %v9605_v21 = vld [vmem:[%s11143_s18 + $0x640] ss:$16 sps:$4 sm:$0xff]  }
  0xe1   : > { %6657 = vmatpush1.bf16.msra.mxu0 %v9513_v22  ;;  %7313 = vmatpush1.bf16.msra.mxu1 %v9516_v23  ;;  %v9608_v22 = vld [vmem:[%s11143_s18 + $0x648] ss:$16 sps:$4 sm:$0xff]   ;;  %v9613_v23 = vld [vmem:[%s11143_s18 + $0x664] ss:$16 sps:$4 sm:$0xff]  }
  0xe2   : > { %6658 = vmatprep.subr.bf16.mxu0 %v9521_v24  ;;  %7314 = vmatprep.subr.bf16.mxu1 %v9524_v25  ;;  %v9616_v24 = vld [vmem:[%s11143_s18 + $0x66c] ss:$16 sps:$4 sm:$0xff]   ;;  %v9611_v25 = vld [vmem:[%s11143_s18 + $0x660] ss:$16 sps:$4 sm:$0xff]  }
  0xe5   : > { %6659 = vmatpush1.bf16.msra.mxu0 %v9519_v26  ;;  %7315 = vmatpush1.bf16.msra.mxu1 %v9522_v27  ;;  %v9614_v26 = vld [vmem:[%s11143_s18 + $0x668] ss:$16 sps:$4 sm:$0xff]   ;;  %v9619_v27 = vld [vmem:[%s11143_s18 + $0x684] ss:$16 sps:$4 sm:$0xff]  }
  0xe6   : > { %6660 = vmatprep.subr.bf16.mxu0 %v9527_v28  ;;  %7316 = vmatprep.subr.bf16.mxu1 %v9530_v29  ;;  %v9622_v28 = vld [vmem:[%s11143_s18 + $0x68c] ss:$16 sps:$4 sm:$0xff]   ;;  %v9617_v29 = vld [vmem:[%s11143_s18 + $0x680] ss:$16 sps:$4 sm:$0xff]  }
  0xe9   : > { %6661 = vmatpush1.bf16.msra.mxu0 %v9525_v30  ;;  %7317 = vmatpush1.bf16.msra.mxu1 %v9528_v31  ;;  %v9620_v30 = vld [vmem:[%s11143_s18 + $0x688] ss:$16 sps:$4 sm:$0xff]   ;;  %v9625_v31 = vld [vmem:[%s11143_s18 + $0x6a4] ss:$16 sps:$4 sm:$0xff]  }
  0xea   : > { %6662 = vmatprep.subr.bf16.mxu0 %v9533_v32  ;;  %7318 = vmatprep.subr.bf16.mxu1 %v9536_v33  ;;  %v9628_v32 = vld [vmem:[%s11143_s18 + $0x6ac] ss:$16 sps:$4 sm:$0xff]   ;;  %v9623_v33 = vld [vmem:[%s11143_s18 + $0x6a0] ss:$16 sps:$4 sm:$0xff]  }
  0xed   : > { %6663 = vmatpush1.bf16.msra.mxu0 %v9531_v34  ;;  %7319 = vmatpush1.bf16.msra.mxu1 %v9534_v35  ;;  %v9626_v34 = vld [vmem:[%s11143_s18 + $0x6a8] ss:$16 sps:$4 sm:$0xff]   ;;  %v9631_v35 = vld [vmem:[%s11143_s18 + $0x6c4] ss:$16 sps:$4 sm:$0xff]  }
  0xee   : > { %6664 = vmatprep.subr.bf16.mxu0 %v9539_v36  ;;  %7320 = vmatprep.subr.bf16.mxu1 %v9542_v37  ;;  %v9634_v36 = vld [vmem:[%s11143_s18 + $0x6cc] ss:$16 sps:$4 sm:$0xff]   ;;  %v9629_v37 = vld [vmem:[%s11143_s18 + $0x6c0] ss:$16 sps:$4 sm:$0xff]  }
  0xf1   : > { %6665 = vmatpush1.bf16.msra.mxu0 %v9537_v38  ;;  %7321 = vmatpush1.bf16.msra.mxu1 %v9540_v39  ;;  %v9632_v38 = vld [vmem:[%s11143_s18 + $0x6c8] ss:$16 sps:$4 sm:$0xff]   ;;  %v9637_v39 = vld [vmem:[%s11143_s18 + $0x6e4] ss:$16 sps:$4 sm:$0xff]  }
  0xf2   : > { %6666 = vmatprep.subr.bf16.mxu0 %v9545_v40  ;;  %7322 = vmatprep.subr.bf16.mxu1 %v9548_v41  ;;  %v9640_v40 = vld [vmem:[%s11143_s18 + $0x6ec] ss:$16 sps:$4 sm:$0xff]   ;;  %v9635_v41 = vld [vmem:[%s11143_s18 + $0x6e0] ss:$16 sps:$4 sm:$0xff]  }
  0xf5   : > { %6667 = vmatpush1.bf16.msra.mxu0 %v9543_v42  ;;  %7323 = vmatpush1.bf16.msra.mxu1 %v9546_v43  ;;  %v9638_v42 = vld [vmem:[%s11143_s18 + $0x6e8] ss:$16 sps:$4 sm:$0xff]   ;;  %v9643_v43 = vld [vmem:[%s11143_s18 + $0x704] ss:$16 sps:$4 sm:$0xff]  }
  0xf6   : > { %6668 = vmatprep.subr.bf16.mxu0 %v9551_v44  ;;  %7324 = vmatprep.subr.bf16.mxu1 %v9554_v45  ;;  %v9646_v44 = vld [vmem:[%s11143_s18 + $0x70c] ss:$16 sps:$4 sm:$0xff]   ;;  %v9641_v45 = vld [vmem:[%s11143_s18 + $0x700] ss:$16 sps:$4 sm:$0xff]  }
  0xf9   : > { %6669 = vmatpush1.bf16.msra.mxu0 %v9549_v46  ;;  %7325 = vmatpush1.bf16.msra.mxu1 %v9552_v47  ;;  %v9644_v46 = vld [vmem:[%s11143_s18 + $0x708] ss:$16 sps:$4 sm:$0xff]   ;;  %v9649_v47 = vld [vmem:[%s11143_s18 + $0x724] ss:$16 sps:$4 sm:$0xff]  }
  0xfa   : > { %6670 = vmatprep.subr.bf16.mxu0 %v9557_v48  ;;  %7326 = vmatprep.subr.bf16.mxu1 %v9560_v49  ;;  %v9652_v48 = vld [vmem:[%s11143_s18 + $0x72c] ss:$16 sps:$4 sm:$0xff]   ;;  %v9647_v49 = vld [vmem:[%s11143_s18 + $0x720] ss:$16 sps:$4 sm:$0xff]  }
  0xfd   : > { %6671 = vmatpush1.bf16.msra.mxu0 %v9555_v50  ;;  %7327 = vmatpush1.bf16.msra.mxu1 %v9558_v51  ;;  %v9650_v50 = vld [vmem:[%s11143_s18 + $0x728] ss:$16 sps:$4 sm:$0xff]   ;;  %v9655_v51 = vld [vmem:[%s11143_s18 + $0x744] ss:$16 sps:$4 sm:$0xff]  }
  0xfe   : > { %6672 = vmatprep.subr.bf16.mxu0 %v9563_v52  ;;  %7328 = vmatprep.subr.bf16.mxu1 %v9566_v53  ;;  %v9658_v52 = vld [vmem:[%s11143_s18 + $0x74c] ss:$16 sps:$4 sm:$0xff]   ;;  %v9653_v53 = vld [vmem:[%s11143_s18 + $0x740] ss:$16 sps:$4 sm:$0xff]  }
 0x101   : > { %6673 = vmatpush1.bf16.msra.mxu0 %v9561_v54  ;;  %7329 = vmatpush1.bf16.msra.mxu1 %v9564_v55  ;;  %v9656_v54 = vld [vmem:[%s11143_s18 + $0x748] ss:$16 sps:$4 sm:$0xff]   ;;  %v9661_v55 = vld [vmem:[%s11143_s18 + $0x764] ss:$16 sps:$4 sm:$0xff]  }
 0x102   : > { %6674 = vmatprep.subr.bf16.mxu0 %v9569_v56  ;;  %7330 = vmatprep.subr.bf16.mxu1 %v9572_v57  ;;  %v9664_v56 = vld [vmem:[%s11143_s18 + $0x76c] ss:$16 sps:$4 sm:$0xff]   ;;  %v9659_v57 = vld [vmem:[%s11143_s18 + $0x760] ss:$16 sps:$4 sm:$0xff]  }
 0x105   : > { %6675 = vmatpush1.bf16.msra.mxu0 %v9567_v58  ;;  %7331 = vmatpush1.bf16.msra.mxu1 %v9570_v59  ;;  %v9662_v58 = vld [vmem:[%s11143_s18 + $0x768] ss:$16 sps:$4 sm:$0xff]   ;;  %v9667_v59 = vld [vmem:[%s11143_s18 + $0x784] ss:$16 sps:$4 sm:$0xff]  }
 0x106   : > { %6676 = vmatprep.subr.bf16.mxu0 %v9575_v60  ;;  %7332 = vmatprep.subr.bf16.mxu1 %v9578_v61  ;;  %v9670_v60 = vld [vmem:[%s11143_s18 + $0x78c] ss:$16 sps:$4 sm:$0xff]   ;;  %v9665_v61 = vld [vmem:[%s11143_s18 + $0x780] ss:$16 sps:$4 sm:$0xff]  }
 0x109   : > { %6677 = vmatpush1.bf16.msra.mxu0 %v9573_v62  ;;  %7333 = vmatpush1.bf16.msra.mxu1 %v9576_v63  ;;  %v9668_v62 = vld [vmem:[%s11143_s18 + $0x788] ss:$16 sps:$4 sm:$0xff]   ;;  %v9673_v63 = vld [vmem:[%s11143_s18 + $0x7a4] ss:$16 sps:$4 sm:$0xff]  }
 0x10a   : > { %6678 = vmatprep.subr.bf16.mxu0 %v9581_v0  ;;  %7334 = vmatprep.subr.bf16.mxu1 %v9584_v1  ;;  %v9676_v0 = vld [vmem:[%s11143_s18 + $0x7ac] ss:$16 sps:$4 sm:$0xff]   ;;  %v9671_v1 = vld [vmem:[%s11143_s18 + $0x7a0] ss:$16 sps:$4 sm:$0xff]  }
 0x10d   : > { %6679 = vmatpush1.bf16.msra.mxu0 %v9579_v2  ;;  %7335 = vmatpush1.bf16.msra.mxu1 %v9582_v3  ;;  %v9674_v2 = vld [vmem:[%s11143_s18 + $0x7a8] ss:$16 sps:$4 sm:$0xff]   ;;  %v9679_v3 = vld [vmem:[%s11143_s18 + $0x7c4] ss:$16 sps:$4 sm:$0xff]  }
 0x10e   : > { %6680 = vmatprep.subr.bf16.mxu0 %v9587_v4  ;;  %7336 = vmatprep.subr.bf16.mxu1 %v9590_v5  ;;  %v9682_v4 = vld [vmem:[%s11143_s18 + $0x7cc] ss:$16 sps:$4 sm:$0xff]   ;;  %v9677_v5 = vld [vmem:[%s11143_s18 + $0x7c0] ss:$16 sps:$4 sm:$0xff]  }
 0x111   : > { %6681 = vmatpush1.bf16.msra.mxu0 %v9585_v6  ;;  %7337 = vmatpush1.bf16.msra.mxu1 %v9588_v7  ;;  %v9680_v6 = vld [vmem:[%s11143_s18 + $0x7c8] ss:$16 sps:$4 sm:$0xff]   ;;  %v9685_v7 = vld [vmem:[%s11143_s18 + $0x7e4] ss:$16 sps:$4 sm:$0xff]  }
 0x112   : > { %6691 = vmatprep.subr.bf16.mxu0 %v9595_v8  ;;  %7347 = vmatprep.subr.bf16.mxu1 %v9598_v9  ;;  %v9688_v8 = vld [vmem:[%s11143_s18 + $0x7ec] ss:$16 sps:$4 sm:$0xff]   ;;  %v9683_v9 = vld [vmem:[%s11143_s18 + $0x7e0] ss:$16 sps:$4 sm:$0xff]  }
 0x114   : > { %6683 = vmatmul.mubr.bf16.vlgmr.msra.gmra.mrb[0].mxu0 %v8052_v12  ;;  %7339 = vmatmul.mubr.bf16.vlgmr.msra.gmra.mrb[0].mxu1 %v8052_v12  ;;  %v9693_v12 = vld [vmem:[%s11143_s18 + $0x804] ss:$16 sps:$4 sm:$0xff]  }
 0x115   : > { %6692 = vmatpush1.bf16.msra.mxu0 %v9593_v10  ;;  %7348 = vmatpush1.bf16.msra.mxu1 %v9596_v13  ;;  %v9686_v10 = vld [vmem:[%s11143_s18 + $0x7e8] ss:$16 sps:$4 sm:$0xff]   ;;  %v9696_v13 = vld [vmem:[%s11143_s18 + $0x80c] ss:$16 sps:$4 sm:$0xff]  }
 0x116   : > { %6693 = vmatprep.subr.bf16.mxu0 %v9601_v15  ;;  %7349 = vmatprep.subr.bf16.mxu1 %v9604_v16  ;;  %v9691_v15 = vld [vmem:[%s11143_s18 + $0x800] ss:$16 sps:$4 sm:$0xff]   ;;  %v8054_v16 = vcombine.low %v11375_v14, %v11375_v14 }
 0x117   : > { %6723 = vmatprep.mubr.bf16.mxu0 %v8055_v17  ;;  %7379 = vmatprep.mubr.bf16.mxu1 %v8055_v17  ;;  %v11447_v17 = vld [vmem:[%s12340_s0 + $0x20] sm:$0xff] }
 0x118   : > { %v9697_v14 = vld [vmem:[%s11143_s18 + $0x820] ss:$16 sps:$4 sm:$0xff]  }
 0x119   : > { %6694 = vmatpush1.bf16.msra.mxu0 %v9599_v11  ;;  %7350 = vmatpush1.bf16.msra.mxu1 %v9602_v18  ;;  %v9694_v11 = vld [vmem:[%s11143_s18 + $0x808] ss:$16 sps:$4 sm:$0xff]   ;;  %v9699_v18 = vld [vmem:[%s11143_s18 + $0x824] ss:$16 sps:$4 sm:$0xff]  }
 0x11a   : > { %6695 = vmatprep.subr.bf16.mxu0 %v9607_v19  ;;  %7351 = vmatprep.subr.bf16.mxu1 %v9610_v20  ;;  %v9702_v19 = vld [vmem:[%s11143_s18 + $0x82c] ss:$16 sps:$4 sm:$0xff]   ;;  %v8057_v20 = vcombine.high %v11447_v17, %v11447_v17 }
 0x11d   : > { %6696 = vmatpush1.bf16.msra.mxu0 %v9605_v21  ;;  %7352 = vmatpush1.bf16.msra.mxu1 %v9608_v22  ;;  %v9700_v21 = vld [vmem:[%s11143_s18 + $0x828] ss:$16 sps:$4 sm:$0xff]   ;;  %v9705_v22 = vld [vmem:[%s11143_s18 + $0x844] ss:$16 sps:$4 sm:$0xff]  }
 0x11e   : > { %6697 = vmatprep.subr.bf16.mxu0 %v9613_v23  ;;  %7353 = vmatprep.subr.bf16.mxu1 %v9616_v24  ;;  %v9708_v23 = vld [vmem:[%s11143_s18 + $0x84c] ss:$16 sps:$4 sm:$0xff]   ;;  %v9703_v24 = vld [vmem:[%s11143_s18 + $0x840] ss:$16 sps:$4 sm:$0xff]  }
 0x121   : > { %6698 = vmatpush1.bf16.msra.mxu0 %v9611_v25  ;;  %7354 = vmatpush1.bf16.msra.mxu1 %v9614_v26  ;;  %v9706_v25 = vld [vmem:[%s11143_s18 + $0x848] ss:$16 sps:$4 sm:$0xff]   ;;  %v9711_v26 = vld [vmem:[%s11143_s18 + $0x864] ss:$16 sps:$4 sm:$0xff]  }
 0x122   : > { %6699 = vmatprep.subr.bf16.mxu0 %v9619_v27  ;;  %7355 = vmatprep.subr.bf16.mxu1 %v9622_v28  ;;  %v9714_v27 = vld [vmem:[%s11143_s18 + $0x86c] ss:$16 sps:$4 sm:$0xff]   ;;  %v9709_v28 = vld [vmem:[%s11143_s18 + $0x860] ss:$16 sps:$4 sm:$0xff]  }
 0x125   : > { %6700 = vmatpush1.bf16.msra.mxu0 %v9617_v29  ;;  %7356 = vmatpush1.bf16.msra.mxu1 %v9620_v30  ;;  %v9712_v29 = vld [vmem:[%s11143_s18 + $0x868] ss:$16 sps:$4 sm:$0xff]   ;;  %v9717_v30 = vld [vmem:[%s11143_s18 + $0x884] ss:$16 sps:$4 sm:$0xff]  }
 0x126   : > { %6701 = vmatprep.subr.bf16.mxu0 %v9625_v31  ;;  %7357 = vmatprep.subr.bf16.mxu1 %v9628_v32  ;;  %v9720_v31 = vld [vmem:[%s11143_s18 + $0x88c] ss:$16 sps:$4 sm:$0xff]   ;;  %v9715_v32 = vld [vmem:[%s11143_s18 + $0x880] ss:$16 sps:$4 sm:$0xff]  }
 0x129   : > { %6702 = vmatpush1.bf16.msra.mxu0 %v9623_v33  ;;  %7358 = vmatpush1.bf16.msra.mxu1 %v9626_v34  ;;  %v9718_v33 = vld [vmem:[%s11143_s18 + $0x888] ss:$16 sps:$4 sm:$0xff]   ;;  %v9723_v34 = vld [vmem:[%s11143_s18 + $0x8a4] ss:$16 sps:$4 sm:$0xff]  }
 0x12a   : > { %6703 = vmatprep.subr.bf16.mxu0 %v9631_v35  ;;  %7359 = vmatprep.subr.bf16.mxu1 %v9634_v36  ;;  %v9726_v35 = vld [vmem:[%s11143_s18 + $0x8ac] ss:$16 sps:$4 sm:$0xff]   ;;  %v9721_v36 = vld [vmem:[%s11143_s18 + $0x8a0] ss:$16 sps:$4 sm:$0xff]  }
 0x12d   : > { %6704 = vmatpush1.bf16.msra.mxu0 %v9629_v37  ;;  %7360 = vmatpush1.bf16.msra.mxu1 %v9632_v38  ;;  %v9724_v37 = vld [vmem:[%s11143_s18 + $0x8a8] ss:$16 sps:$4 sm:$0xff]   ;;  %v9729_v38 = vld [vmem:[%s11143_s18 + $0x8c4] ss:$16 sps:$4 sm:$0xff]  }
 0x12e   : > { %6705 = vmatprep.subr.bf16.mxu0 %v9637_v39  ;;  %7361 = vmatprep.subr.bf16.mxu1 %v9640_v40  ;;  %v9732_v39 = vld [vmem:[%s11143_s18 + $0x8cc] ss:$16 sps:$4 sm:$0xff]   ;;  %v9727_v40 = vld [vmem:[%s11143_s18 + $0x8c0] ss:$16 sps:$4 sm:$0xff]  }
 0x131   : > { %6706 = vmatpush1.bf16.msra.mxu0 %v9635_v41  ;;  %7362 = vmatpush1.bf16.msra.mxu1 %v9638_v42  ;;  %v9730_v41 = vld [vmem:[%s11143_s18 + $0x8c8] ss:$16 sps:$4 sm:$0xff]   ;;  %v9735_v42 = vld [vmem:[%s11143_s18 + $0x8e4] ss:$16 sps:$4 sm:$0xff]  }
 0x132   : > { %6707 = vmatprep.subr.bf16.mxu0 %v9643_v43  ;;  %7363 = vmatprep.subr.bf16.mxu1 %v9646_v44  ;;  %v9738_v43 = vld [vmem:[%s11143_s18 + $0x8ec] ss:$16 sps:$4 sm:$0xff]   ;;  %v9733_v44 = vld [vmem:[%s11143_s18 + $0x8e0] ss:$16 sps:$4 sm:$0xff]  }
 0x135   : > { %6708 = vmatpush1.bf16.msra.mxu0 %v9641_v45  ;;  %7364 = vmatpush1.bf16.msra.mxu1 %v9644_v46  ;;  %v9736_v45 = vld [vmem:[%s11143_s18 + $0x8e8] ss:$16 sps:$4 sm:$0xff]   ;;  %v9741_v46 = vld [vmem:[%s11143_s18 + $0x904] ss:$16 sps:$4 sm:$0xff]  }
 0x136   : > { %6709 = vmatprep.subr.bf16.mxu0 %v9649_v47  ;;  %7365 = vmatprep.subr.bf16.mxu1 %v9652_v48  ;;  %v9744_v47 = vld [vmem:[%s11143_s18 + $0x90c] ss:$16 sps:$4 sm:$0xff]   ;;  %v9739_v48 = vld [vmem:[%s11143_s18 + $0x900] ss:$16 sps:$4 sm:$0xff]  }
 0x139   : > { %6710 = vmatpush1.bf16.msra.mxu0 %v9647_v49  ;;  %7366 = vmatpush1.bf16.msra.mxu1 %v9650_v50  ;;  %v9742_v49 = vld [vmem:[%s11143_s18 + $0x908] ss:$16 sps:$4 sm:$0xff]   ;;  %v9747_v50 = vld [vmem:[%s11143_s18 + $0x924] ss:$16 sps:$4 sm:$0xff]  }
 0x13a   : > { %6711 = vmatprep.subr.bf16.mxu0 %v9655_v51  ;;  %7367 = vmatprep.subr.bf16.mxu1 %v9658_v52  ;;  %v9750_v51 = vld [vmem:[%s11143_s18 + $0x92c] ss:$16 sps:$4 sm:$0xff]   ;;  %v9745_v52 = vld [vmem:[%s11143_s18 + $0x920] ss:$16 sps:$4 sm:$0xff]  }
 0x13d   : > { %6712 = vmatpush1.bf16.msra.mxu0 %v9653_v53  ;;  %7368 = vmatpush1.bf16.msra.mxu1 %v9656_v54  ;;  %v9748_v53 = vld [vmem:[%s11143_s18 + $0x928] ss:$16 sps:$4 sm:$0xff]   ;;  %v9753_v54 = vld [vmem:[%s11143_s18 + $0x944] ss:$16 sps:$4 sm:$0xff]  }
 0x13e   : > { %6713 = vmatprep.subr.bf16.mxu0 %v9661_v55  ;;  %7369 = vmatprep.subr.bf16.mxu1 %v9664_v56  ;;  %v9756_v55 = vld [vmem:[%s11143_s18 + $0x94c] ss:$16 sps:$4 sm:$0xff]   ;;  %v9751_v56 = vld [vmem:[%s11143_s18 + $0x940] ss:$16 sps:$4 sm:$0xff]  }
 0x141   : > { %6714 = vmatpush1.bf16.msra.mxu0 %v9659_v57  ;;  %7370 = vmatpush1.bf16.msra.mxu1 %v9662_v58  ;;  %v9754_v57 = vld [vmem:[%s11143_s18 + $0x948] ss:$16 sps:$4 sm:$0xff]   ;;  %v9759_v58 = vld [vmem:[%s11143_s18 + $0x964] ss:$16 sps:$4 sm:$0xff]  }
 0x142   : > { %6715 = vmatprep.subr.bf16.mxu0 %v9667_v59  ;;  %7371 = vmatprep.subr.bf16.mxu1 %v9670_v60  ;;  %v9762_v59 = vld [vmem:[%s11143_s18 + $0x96c] ss:$16 sps:$4 sm:$0xff]   ;;  %v9757_v60 = vld [vmem:[%s11143_s18 + $0x960] ss:$16 sps:$4 sm:$0xff]  }
 0x145   : > { %6716 = vmatpush1.bf16.msra.mxu0 %v9665_v61  ;;  %7372 = vmatpush1.bf16.msra.mxu1 %v9668_v62  ;;  %v9760_v61 = vld [vmem:[%s11143_s18 + $0x968] ss:$16 sps:$4 sm:$0xff]   ;;  %v9765_v62 = vld [vmem:[%s11143_s18 + $0x984] ss:$16 sps:$4 sm:$0xff]  }
 0x146   : > { %6717 = vmatprep.subr.bf16.mxu0 %v9673_v63  ;;  %7373 = vmatprep.subr.bf16.mxu1 %v9676_v0  ;;  %v9768_v63 = vld [vmem:[%s11143_s18 + $0x98c] ss:$16 sps:$4 sm:$0xff]   ;;  %v9763_v0 = vld [vmem:[%s11143_s18 + $0x980] ss:$16 sps:$4 sm:$0xff]  }
 0x149   : > { %6718 = vmatpush1.bf16.msra.mxu0 %v9671_v1  ;;  %7374 = vmatpush1.bf16.msra.mxu1 %v9674_v2  ;;  %v9766_v1 = vld [vmem:[%s11143_s18 + $0x988] ss:$16 sps:$4 sm:$0xff]   ;;  %v9771_v2 = vld [vmem:[%s11143_s18 + $0x9a4] ss:$16 sps:$4 sm:$0xff]  }
 0x14a   : > { %6719 = vmatprep.subr.bf16.mxu0 %v9679_v3  ;;  %7375 = vmatprep.subr.bf16.mxu1 %v9682_v4  ;;  %v9774_v3 = vld [vmem:[%s11143_s18 + $0x9ac] ss:$16 sps:$4 sm:$0xff]   ;;  %v9769_v4 = vld [vmem:[%s11143_s18 + $0x9a0] ss:$16 sps:$4 sm:$0xff]  }
 0x14d   : > { %6720 = vmatpush1.bf16.msra.mxu0 %v9677_v5  ;;  %7376 = vmatpush1.bf16.msra.mxu1 %v9680_v6  ;;  %v9772_v5 = vld [vmem:[%s11143_s18 + $0x9a8] ss:$16 sps:$4 sm:$0xff]   ;;  %v9777_v6 = vld [vmem:[%s11143_s18 + $0x9c4] ss:$16 sps:$4 sm:$0xff]  }
 0x14e   : > { %6721 = vmatprep.subr.bf16.mxu0 %v9685_v7  ;;  %7377 = vmatprep.subr.bf16.mxu1 %v9688_v8  ;;  %v9780_v7 = vld [vmem:[%s11143_s18 + $0x9cc] ss:$16 sps:$4 sm:$0xff]   ;;  %v9775_v8 = vld [vmem:[%s11143_s18 + $0x9c0] ss:$16 sps:$4 sm:$0xff]  }
 0x151   : > { %6722 = vmatpush1.bf16.msra.mxu0 %v9683_v9  ;;  %7378 = vmatpush1.bf16.msra.mxu1 %v9686_v10  ;;  %v9778_v9 = vld [vmem:[%s11143_s18 + $0x9c8] ss:$16 sps:$4 sm:$0xff]   ;;  %v9783_v10 = vld [vmem:[%s11143_s18 + $0x9e4] ss:$16 sps:$4 sm:$0xff]  }
 0x152   : > { %6732 = vmatprep.subr.bf16.mxu0 %v9693_v12  ;;  %7388 = vmatprep.subr.bf16.mxu1 %v9696_v13  ;;  %v9786_v12 = vld [vmem:[%s11143_s18 + $0x9ec] ss:$16 sps:$4 sm:$0xff]   ;;  %v9781_v13 = vld [vmem:[%s11143_s18 + $0x9e0] ss:$16 sps:$4 sm:$0xff]  }
 0x154   : > { %6724 = vmatmul.mubr.bf16.vlgmr.msra.gmra.mrb[0].mxu0 %v8054_v16  ;;  %7380 = vmatmul.mubr.bf16.vlgmr.msra.gmra.mrb[0].mxu1 %v8054_v16  ;;  %v9791_v16 = vld [vmem:[%s11143_s18 + $0xa04] ss:$16 sps:$4 sm:$0xff]  }
 0x155   : > { %6733 = vmatpush1.bf16.msra.mxu0 %v9691_v15  ;;  %7389 = vmatpush1.bf16.msra.mxu1 %v9694_v11  ;;  %v9784_v15 = vld [vmem:[%s11143_s18 + $0x9e8] ss:$16 sps:$4 sm:$0xff]   ;;  %v9794_v11 = vld [vmem:[%s11143_s18 + $0xa0c] ss:$16 sps:$4 sm:$0xff]  }
 0x156   : > { %6734 = vmatprep.subr.bf16.mxu0 %v9699_v18  ;;  %7390 = vmatprep.subr.bf16.mxu1 %v9702_v19  ;;  %v11517_v18 = vld [vmem:[%s12340_s0 + $0x28] sm:$0xff]  ;;  %v8056_v19 = vcombine.low %v11447_v17, %v11447_v17  ;;  %v9795_v17 = vld [vmem:[%s11143_s18 + $0xa20] ss:$16 sps:$4 sm:$0xff]  }
 0x157   : > { %6764 = vmatprep.mubr.bf16.mxu0 %v8057_v20  ;;  %7420 = vmatprep.mubr.bf16.mxu1 %v8057_v20  ;;  %v9789_v20 = vld [vmem:[%s11143_s18 + $0xa00] ss:$16 sps:$4 sm:$0xff]  }
 0x159   : > { %6735 = vmatpush1.bf16.msra.mxu0 %v9697_v14  ;;  %7391 = vmatpush1.bf16.msra.mxu1 %v9700_v21  ;;  %v9792_v14 = vld [vmem:[%s11143_s18 + $0xa08] ss:$16 sps:$4 sm:$0xff]   ;;  %v9797_v21 = vld [vmem:[%s11143_s18 + $0xa24] ss:$16 sps:$4 sm:$0xff]  }
 0x15a   : > { %6736 = vmatprep.subr.bf16.mxu0 %v9705_v22  ;;  %7392 = vmatprep.subr.bf16.mxu1 %v9708_v23  ;;  %v9800_v22 = vld [vmem:[%s11143_s18 + $0xa2c] ss:$16 sps:$4 sm:$0xff]   ;;  %v8059_v23 = vcombine.high %v11517_v18, %v11517_v18 }
 0x15d   : > { %6737 = vmatpush1.bf16.msra.mxu0 %v9703_v24  ;;  %7393 = vmatpush1.bf16.msra.mxu1 %v9706_v25  ;;  %v9798_v24 = vld [vmem:[%s11143_s18 + $0xa28] ss:$16 sps:$4 sm:$0xff]   ;;  %v9803_v25 = vld [vmem:[%s11143_s18 + $0xa44] ss:$16 sps:$4 sm:$0xff]  }
 0x15e   : > { %6738 = vmatprep.subr.bf16.mxu0 %v9711_v26  ;;  %7394 = vmatprep.subr.bf16.mxu1 %v9714_v27  ;;  %v9806_v26 = vld [vmem:[%s11143_s18 + $0xa4c] ss:$16 sps:$4 sm:$0xff]   ;;  %v9801_v27 = vld [vmem:[%s11143_s18 + $0xa40] ss:$16 sps:$4 sm:$0xff]  }
 0x161   : > { %6739 = vmatpush1.bf16.msra.mxu0 %v9709_v28  ;;  %7395 = vmatpush1.bf16.msra.mxu1 %v9712_v29  ;;  %v9804_v28 = vld [vmem:[%s11143_s18 + $0xa48] ss:$16 sps:$4 sm:$0xff]   ;;  %v9809_v29 = vld [vmem:[%s11143_s18 + $0xa64] ss:$16 sps:$4 sm:$0xff]  }
 0x162   : > { %6740 = vmatprep.subr.bf16.mxu0 %v9717_v30  ;;  %7396 = vmatprep.subr.bf16.mxu1 %v9720_v31  ;;  %v9812_v30 = vld [vmem:[%s11143_s18 + $0xa6c] ss:$16 sps:$4 sm:$0xff]   ;;  %v9807_v31 = vld [vmem:[%s11143_s18 + $0xa60] ss:$16 sps:$4 sm:$0xff]  }
 0x165   : > { %6741 = vmatpush1.bf16.msra.mxu0 %v9715_v32  ;;  %7397 = vmatpush1.bf16.msra.mxu1 %v9718_v33  ;;  %v9810_v32 = vld [vmem:[%s11143_s18 + $0xa68] ss:$16 sps:$4 sm:$0xff]   ;;  %v9815_v33 = vld [vmem:[%s11143_s18 + $0xa84] ss:$16 sps:$4 sm:$0xff]  }
 0x166   : > { %6742 = vmatprep.subr.bf16.mxu0 %v9723_v34  ;;  %7398 = vmatprep.subr.bf16.mxu1 %v9726_v35  ;;  %v9818_v34 = vld [vmem:[%s11143_s18 + $0xa8c] ss:$16 sps:$4 sm:$0xff]   ;;  %v9813_v35 = vld [vmem:[%s11143_s18 + $0xa80] ss:$16 sps:$4 sm:$0xff]  }
 0x169   : > { %6743 = vmatpush1.bf16.msra.mxu0 %v9721_v36  ;;  %7399 = vmatpush1.bf16.msra.mxu1 %v9724_v37  ;;  %v9816_v36 = vld [vmem:[%s11143_s18 + $0xa88] ss:$16 sps:$4 sm:$0xff]   ;;  %v9821_v37 = vld [vmem:[%s11143_s18 + $0xaa4] ss:$16 sps:$4 sm:$0xff]  }
 0x16a   : > { %6744 = vmatprep.subr.bf16.mxu0 %v9729_v38  ;;  %7400 = vmatprep.subr.bf16.mxu1 %v9732_v39  ;;  %v9824_v38 = vld [vmem:[%s11143_s18 + $0xaac] ss:$16 sps:$4 sm:$0xff]   ;;  %v9819_v39 = vld [vmem:[%s11143_s18 + $0xaa0] ss:$16 sps:$4 sm:$0xff]  }
 0x16d   : > { %6745 = vmatpush1.bf16.msra.mxu0 %v9727_v40  ;;  %7401 = vmatpush1.bf16.msra.mxu1 %v9730_v41  ;;  %v9822_v40 = vld [vmem:[%s11143_s18 + $0xaa8] ss:$16 sps:$4 sm:$0xff]   ;;  %v9827_v41 = vld [vmem:[%s11143_s18 + $0xac4] ss:$16 sps:$4 sm:$0xff]  }
 0x16e   : > { %6746 = vmatprep.subr.bf16.mxu0 %v9735_v42  ;;  %7402 = vmatprep.subr.bf16.mxu1 %v9738_v43  ;;  %v9830_v42 = vld [vmem:[%s11143_s18 + $0xacc] ss:$16 sps:$4 sm:$0xff]   ;;  %v9825_v43 = vld [vmem:[%s11143_s18 + $0xac0] ss:$16 sps:$4 sm:$0xff]  }
 0x171   : > { %6747 = vmatpush1.bf16.msra.mxu0 %v9733_v44  ;;  %7403 = vmatpush1.bf16.msra.mxu1 %v9736_v45  ;;  %v9828_v44 = vld [vmem:[%s11143_s18 + $0xac8] ss:$16 sps:$4 sm:$0xff]   ;;  %v9833_v45 = vld [vmem:[%s11143_s18 + $0xae4] ss:$16 sps:$4 sm:$0xff]  }
 0x172   : > { %6748 = vmatprep.subr.bf16.mxu0 %v9741_v46  ;;  %7404 = vmatprep.subr.bf16.mxu1 %v9744_v47  ;;  %v9836_v46 = vld [vmem:[%s11143_s18 + $0xaec] ss:$16 sps:$4 sm:$0xff]   ;;  %v9831_v47 = vld [vmem:[%s11143_s18 + $0xae0] ss:$16 sps:$4 sm:$0xff]  }
 0x175   : > { %6749 = vmatpush1.bf16.msra.mxu0 %v9739_v48  ;;  %7405 = vmatpush1.bf16.msra.mxu1 %v9742_v49  ;;  %v9834_v48 = vld [vmem:[%s11143_s18 + $0xae8] ss:$16 sps:$4 sm:$0xff]   ;;  %v9839_v49 = vld [vmem:[%s11143_s18 + $0xb04] ss:$16 sps:$4 sm:$0xff]  }
 0x176   : > { %6750 = vmatprep.subr.bf16.mxu0 %v9747_v50  ;;  %7406 = vmatprep.subr.bf16.mxu1 %v9750_v51  ;;  %v9842_v50 = vld [vmem:[%s11143_s18 + $0xb0c] ss:$16 sps:$4 sm:$0xff]   ;;  %v9837_v51 = vld [vmem:[%s11143_s18 + $0xb00] ss:$16 sps:$4 sm:$0xff]  }
 0x179   : > { %6751 = vmatpush1.bf16.msra.mxu0 %v9745_v52  ;;  %7407 = vmatpush1.bf16.msra.mxu1 %v9748_v53  ;;  %v9840_v52 = vld [vmem:[%s11143_s18 + $0xb08] ss:$16 sps:$4 sm:$0xff]   ;;  %v9845_v53 = vld [vmem:[%s11143_s18 + $0xb24] ss:$16 sps:$4 sm:$0xff]  }
 0x17a   : > { %6752 = vmatprep.subr.bf16.mxu0 %v9753_v54  ;;  %7408 = vmatprep.subr.bf16.mxu1 %v9756_v55  ;;  %v9848_v54 = vld [vmem:[%s11143_s18 + $0xb2c] ss:$16 sps:$4 sm:$0xff]   ;;  %v9843_v55 = vld [vmem:[%s11143_s18 + $0xb20] ss:$16 sps:$4 sm:$0xff]  }
 0x17d   : > { %6753 = vmatpush1.bf16.msra.mxu0 %v9751_v56  ;;  %7409 = vmatpush1.bf16.msra.mxu1 %v9754_v57  ;;  %v9846_v56 = vld [vmem:[%s11143_s18 + $0xb28] ss:$16 sps:$4 sm:$0xff]   ;;  %v9851_v57 = vld [vmem:[%s11143_s18 + $0xb44] ss:$16 sps:$4 sm:$0xff]  }
 0x17e   : > { %6754 = vmatprep.subr.bf16.mxu0 %v9759_v58  ;;  %7410 = vmatprep.subr.bf16.mxu1 %v9762_v59  ;;  %v9854_v58 = vld [vmem:[%s11143_s18 + $0xb4c] ss:$16 sps:$4 sm:$0xff]   ;;  %v9849_v59 = vld [vmem:[%s11143_s18 + $0xb40] ss:$16 sps:$4 sm:$0xff]  }
 0x181   : > { %6755 = vmatpush1.bf16.msra.mxu0 %v9757_v60  ;;  %7411 = vmatpush1.bf16.msra.mxu1 %v9760_v61  ;;  %v9852_v60 = vld [vmem:[%s11143_s18 + $0xb48] ss:$16 sps:$4 sm:$0xff]   ;;  %v9857_v61 = vld [vmem:[%s11143_s18 + $0xb64] ss:$16 sps:$4 sm:$0xff]  }
 0x182   : > { %6756 = vmatprep.subr.bf16.mxu0 %v9765_v62  ;;  %7412 = vmatprep.subr.bf16.mxu1 %v9768_v63  ;;  %v9860_v62 = vld [vmem:[%s11143_s18 + $0xb6c] ss:$16 sps:$4 sm:$0xff]   ;;  %v9855_v63 = vld [vmem:[%s11143_s18 + $0xb60] ss:$16 sps:$4 sm:$0xff]  }
 0x185   : > { %6757 = vmatpush1.bf16.msra.mxu0 %v9763_v0  ;;  %7413 = vmatpush1.bf16.msra.mxu1 %v9766_v1  ;;  %v9858_v0 = vld [vmem:[%s11143_s18 + $0xb68] ss:$16 sps:$4 sm:$0xff]   ;;  %v9863_v1 = vld [vmem:[%s11143_s18 + $0xb84] ss:$16 sps:$4 sm:$0xff]  }
 0x186   : > { %6758 = vmatprep.subr.bf16.mxu0 %v9771_v2  ;;  %7414 = vmatprep.subr.bf16.mxu1 %v9774_v3  ;;  %v9866_v2 = vld [vmem:[%s11143_s18 + $0xb8c] ss:$16 sps:$4 sm:$0xff]   ;;  %v9861_v3 = vld [vmem:[%s11143_s18 + $0xb80] ss:$16 sps:$4 sm:$0xff]  }
 0x189   : > { %6759 = vmatpush1.bf16.msra.mxu0 %v9769_v4  ;;  %7415 = vmatpush1.bf16.msra.mxu1 %v9772_v5  ;;  %v9864_v4 = vld [vmem:[%s11143_s18 + $0xb88] ss:$16 sps:$4 sm:$0xff]   ;;  %v9869_v5 = vld [vmem:[%s11143_s18 + $0xba4] ss:$16 sps:$4 sm:$0xff]  }
 0x18a   : > { %6760 = vmatprep.subr.bf16.mxu0 %v9777_v6  ;;  %7416 = vmatprep.subr.bf16.mxu1 %v9780_v7  ;;  %v9872_v6 = vld [vmem:[%s11143_s18 + $0xbac] ss:$16 sps:$4 sm:$0xff]   ;;  %v9867_v7 = vld [vmem:[%s11143_s18 + $0xba0] ss:$16 sps:$4 sm:$0xff]  }
 0x18d   : > { %6761 = vmatpush1.bf16.msra.mxu0 %v9775_v8  ;;  %7417 = vmatpush1.bf16.msra.mxu1 %v9778_v9  ;;  %v9870_v8 = vld [vmem:[%s11143_s18 + $0xba8] ss:$16 sps:$4 sm:$0xff]   ;;  %v9875_v9 = vld [vmem:[%s11143_s18 + $0xbc4] ss:$16 sps:$4 sm:$0xff]  }
 0x18e   : > { %6762 = vmatprep.subr.bf16.mxu0 %v9783_v10  ;;  %7418 = vmatprep.subr.bf16.mxu1 %v9786_v12  ;;  %v9878_v10 = vld [vmem:[%s11143_s18 + $0xbcc] ss:$16 sps:$4 sm:$0xff]   ;;  %v9873_v12 = vld [vmem:[%s11143_s18 + $0xbc0] ss:$16 sps:$4 sm:$0xff]  }
 0x191   : > { %6763 = vmatpush1.bf16.msra.mxu0 %v9781_v13  ;;  %7419 = vmatpush1.bf16.msra.mxu1 %v9784_v15  ;;  %v9876_v13 = vld [vmem:[%s11143_s18 + $0xbc8] ss:$16 sps:$4 sm:$0xff]   ;;  %v9881_v15 = vld [vmem:[%s11143_s18 + $0xbe4] ss:$16 sps:$4 sm:$0xff]  }
 0x192   : > { %6773 = vmatprep.subr.bf16.mxu0 %v9791_v16  ;;  %7429 = vmatprep.subr.bf16.mxu1 %v9794_v11  ;;  %v9884_v16 = vld [vmem:[%s11143_s18 + $0xbec] ss:$16 sps:$4 sm:$0xff]   ;;  %v9879_v11 = vld [vmem:[%s11143_s18 + $0xbe0] ss:$16 sps:$4 sm:$0xff]  }
 0x194   : > { %6765 = vmatmul.mubr.bf16.vlgmr.msra.gmra.mrb[0].mxu0 %v8056_v19  ;;  %7421 = vmatmul.mubr.bf16.vlgmr.msra.gmra.mrb[0].mxu1 %v8056_v19  ;;  %v9882_v19 = vld [vmem:[%s11143_s18 + $0xbe8] ss:$16 sps:$4 sm:$0xff]  }
 0x195   : > { %6774 = vmatpush1.bf16.msra.mxu0 %v9789_v20  ;;  %7430 = vmatpush1.bf16.msra.mxu1 %v9792_v14  ;;  %v9889_v20 = vld [vmem:[%s11143_s18 + $0xc04] ss:$16 sps:$4 sm:$0xff]   ;;  %v9892_v14 = vld [vmem:[%s11143_s18 + $0xc0c] ss:$16 sps:$4 sm:$0xff]  }
 0x196   : > { %6775 = vmatprep.subr.bf16.mxu0 %v9797_v21  ;;  %7431 = vmatprep.subr.bf16.mxu1 %v9800_v22  ;;  %v11590_v21 = vld [vmem:[%s12340_s0 + $0x30] sm:$0xff]  ;;  %v8058_v22 = vcombine.low %v11517_v18, %v11517_v18 }
 0x197   : > { %6805 = vmatprep.mubr.bf16.mxu0 %v8059_v23  ;;  %7461 = vmatprep.mubr.bf16.mxu1 %v8059_v23  ;;  %v9887_v23 = vld [vmem:[%s11143_s18 + $0xc00] ss:$16 sps:$4 sm:$0xff]  }
 0x198   : > { %v9893_v18 = vld [vmem:[%s11143_s18 + $0xc20] ss:$16 sps:$4 sm:$0xff]  }
 0x199   : > { %6776 = vmatpush1.bf16.msra.mxu0 %v9795_v17  ;;  %7432 = vmatpush1.bf16.msra.mxu1 %v9798_v24  ;;  %v9890_v17 = vld [vmem:[%s11143_s18 + $0xc08] ss:$16 sps:$4 sm:$0xff]   ;;  %v9895_v24 = vld [vmem:[%s11143_s18 + $0xc24] ss:$16 sps:$4 sm:$0xff]  }
 0x19a   : > { %6777 = vmatprep.subr.bf16.mxu0 %v9803_v25  ;;  %7433 = vmatprep.subr.bf16.mxu1 %v9806_v26  ;;  %v9898_v25 = vld [vmem:[%s11143_s18 + $0xc2c] ss:$16 sps:$4 sm:$0xff]   ;;  %v8061_v26 = vcombine.high %v11590_v21, %v11590_v21 }
 0x19d   : > { %6778 = vmatpush1.bf16.msra.mxu0 %v9801_v27  ;;  %7434 = vmatpush1.bf16.msra.mxu1 %v9804_v28  ;;  %v9896_v27 = vld [vmem:[%s11143_s18 + $0xc28] ss:$16 sps:$4 sm:$0xff]   ;;  %v9901_v28 = vld [vmem:[%s11143_s18 + $0xc44] ss:$16 sps:$4 sm:$0xff]  }
 0x19e   : > { %6779 = vmatprep.subr.bf16.mxu0 %v9809_v29  ;;  %7435 = vmatprep.subr.bf16.mxu1 %v9812_v30  ;;  %v9904_v29 = vld [vmem:[%s11143_s18 + $0xc4c] ss:$16 sps:$4 sm:$0xff]   ;;  %v9899_v30 = vld [vmem:[%s11143_s18 + $0xc40] ss:$16 sps:$4 sm:$0xff]  }
 0x1a1   : > { %6780 = vmatpush1.bf16.msra.mxu0 %v9807_v31  ;;  %7436 = vmatpush1.bf16.msra.mxu1 %v9810_v32  ;;  %v9902_v31 = vld [vmem:[%s11143_s18 + $0xc48] ss:$16 sps:$4 sm:$0xff]   ;;  %v9907_v32 = vld [vmem:[%s11143_s18 + $0xc64] ss:$16 sps:$4 sm:$0xff]  }
 0x1a2   : > { %6781 = vmatprep.subr.bf16.mxu0 %v9815_v33  ;;  %7437 = vmatprep.subr.bf16.mxu1 %v9818_v34  ;;  %v9910_v33 = vld [vmem:[%s11143_s18 + $0xc6c] ss:$16 sps:$4 sm:$0xff]   ;;  %v9905_v34 = vld [vmem:[%s11143_s18 + $0xc60] ss:$16 sps:$4 sm:$0xff]  }
 0x1a5   : > { %6782 = vmatpush1.bf16.msra.mxu0 %v9813_v35  ;;  %7438 = vmatpush1.bf16.msra.mxu1 %v9816_v36  ;;  %v9908_v35 = vld [vmem:[%s11143_s18 + $0xc68] ss:$16 sps:$4 sm:$0xff]   ;;  %v9913_v36 = vld [vmem:[%s11143_s18 + $0xc84] ss:$16 sps:$4 sm:$0xff]  }
 0x1a6   : > { %6783 = vmatprep.subr.bf16.mxu0 %v9821_v37  ;;  %7439 = vmatprep.subr.bf16.mxu1 %v9824_v38  ;;  %v9916_v37 = vld [vmem:[%s11143_s18 + $0xc8c] ss:$16 sps:$4 sm:$0xff]   ;;  %v9911_v38 = vld [vmem:[%s11143_s18 + $0xc80] ss:$16 sps:$4 sm:$0xff]  }
 0x1a9   : > { %6784 = vmatpush1.bf16.msra.mxu0 %v9819_v39  ;;  %7440 = vmatpush1.bf16.msra.mxu1 %v9822_v40  ;;  %v9914_v39 = vld [vmem:[%s11143_s18 + $0xc88] ss:$16 sps:$4 sm:$0xff]   ;;  %v9919_v40 = vld [vmem:[%s11143_s18 + $0xca4] ss:$16 sps:$4 sm:$0xff]  }
 0x1aa   : > { %6785 = vmatprep.subr.bf16.mxu0 %v9827_v41  ;;  %7441 = vmatprep.subr.bf16.mxu1 %v9830_v42  ;;  %v9922_v41 = vld [vmem:[%s11143_s18 + $0xcac] ss:$16 sps:$4 sm:$0xff]   ;;  %v9917_v42 = vld [vmem:[%s11143_s18 + $0xca0] ss:$16 sps:$4 sm:$0xff]  }
 0x1ad   : > { %6786 = vmatpush1.bf16.msra.mxu0 %v9825_v43  ;;  %7442 = vmatpush1.bf16.msra.mxu1 %v9828_v44  ;;  %v9920_v43 = vld [vmem:[%s11143_s18 + $0xca8] ss:$16 sps:$4 sm:$0xff]   ;;  %v9925_v44 = vld [vmem:[%s11143_s18 + $0xcc4] ss:$16 sps:$4 sm:$0xff]  }
 0x1ae   : > { %6787 = vmatprep.subr.bf16.mxu0 %v9833_v45  ;;  %7443 = vmatprep.subr.bf16.mxu1 %v9836_v46  ;;  %v9928_v45 = vld [vmem:[%s11143_s18 + $0xccc] ss:$16 sps:$4 sm:$0xff]   ;;  %v9923_v46 = vld [vmem:[%s11143_s18 + $0xcc0] ss:$16 sps:$4 sm:$0xff]  }
 0x1b1   : > { %6788 = vmatpush1.bf16.msra.mxu0 %v9831_v47  ;;  %7444 = vmatpush1.bf16.msra.mxu1 %v9834_v48  ;;  %v9926_v47 = vld [vmem:[%s11143_s18 + $0xcc8] ss:$16 sps:$4 sm:$0xff]   ;;  %v9931_v48 = vld [vmem:[%s11143_s18 + $0xce4] ss:$16 sps:$4 sm:$0xff]  }
 0x1b2   : > { %6789 = vmatprep.subr.bf16.mxu0 %v9839_v49  ;;  %7445 = vmatprep.subr.bf16.mxu1 %v9842_v50  ;;  %v9934_v49 = vld [vmem:[%s11143_s18 + $0xcec] ss:$16 sps:$4 sm:$0xff]   ;;  %v9929_v50 = vld [vmem:[%s11143_s18 + $0xce0] ss:$16 sps:$4 sm:$0xff]  }
 0x1b5   : > { %6790 = vmatpush1.bf16.msra.mxu0 %v9837_v51  ;;  %7446 = vmatpush1.bf16.msra.mxu1 %v9840_v52  ;;  %v9932_v51 = vld [vmem:[%s11143_s18 + $0xce8] ss:$16 sps:$4 sm:$0xff]   ;;  %v9937_v52 = vld [vmem:[%s11143_s18 + $0xd04] ss:$16 sps:$4 sm:$0xff]  }
 0x1b6   : > { %6791 = vmatprep.subr.bf16.mxu0 %v9845_v53  ;;  %7447 = vmatprep.subr.bf16.mxu1 %v9848_v54  ;;  %v9940_v53 = vld [vmem:[%s11143_s18 + $0xd0c] ss:$16 sps:$4 sm:$0xff]   ;;  %v9935_v54 = vld [vmem:[%s11143_s18 + $0xd00] ss:$16 sps:$4 sm:$0xff]  }
 0x1b9   : > { %6792 = vmatpush1.bf16.msra.mxu0 %v9843_v55  ;;  %7448 = vmatpush1.bf16.msra.mxu1 %v9846_v56  ;;  %v9938_v55 = vld [vmem:[%s11143_s18 + $0xd08] ss:$16 sps:$4 sm:$0xff]   ;;  %v9943_v56 = vld [vmem:[%s11143_s18 + $0xd24] ss:$16 sps:$4 sm:$0xff]  }
 0x1ba   : > { %6793 = vmatprep.subr.bf16.mxu0 %v9851_v57  ;;  %7449 = vmatprep.subr.bf16.mxu1 %v9854_v58  ;;  %v9946_v57 = vld [vmem:[%s11143_s18 + $0xd2c] ss:$16 sps:$4 sm:$0xff]   ;;  %v9941_v58 = vld [vmem:[%s11143_s18 + $0xd20] ss:$16 sps:$4 sm:$0xff]  }
 0x1bd   : > { %6794 = vmatpush1.bf16.msra.mxu0 %v9849_v59  ;;  %7450 = vmatpush1.bf16.msra.mxu1 %v9852_v60  ;;  %v9944_v59 = vld [vmem:[%s11143_s18 + $0xd28] ss:$16 sps:$4 sm:$0xff]   ;;  %v9949_v60 = vld [vmem:[%s11143_s18 + $0xd44] ss:$16 sps:$4 sm:$0xff]  }
 0x1be   : > { %6795 = vmatprep.subr.bf16.mxu0 %v9857_v61  ;;  %7451 = vmatprep.subr.bf16.mxu1 %v9860_v62  ;;  %v9952_v61 = vld [vmem:[%s11143_s18 + $0xd4c] ss:$16 sps:$4 sm:$0xff]   ;;  %v9947_v62 = vld [vmem:[%s11143_s18 + $0xd40] ss:$16 sps:$4 sm:$0xff]  }
 0x1c1   : > { %6796 = vmatpush1.bf16.msra.mxu0 %v9855_v63  ;;  %7452 = vmatpush1.bf16.msra.mxu1 %v9858_v0  ;;  %v9950_v63 = vld [vmem:[%s11143_s18 + $0xd48] ss:$16 sps:$4 sm:$0xff]   ;;  %v9955_v0 = vld [vmem:[%s11143_s18 + $0xd64] ss:$16 sps:$4 sm:$0xff]  }
 0x1c2   : > { %6797 = vmatprep.subr.bf16.mxu0 %v9863_v1  ;;  %7453 = vmatprep.subr.bf16.mxu1 %v9866_v2  ;;  %v9958_v1 = vld [vmem:[%s11143_s18 + $0xd6c] ss:$16 sps:$4 sm:$0xff]   ;;  %v9953_v2 = vld [vmem:[%s11143_s18 + $0xd60] ss:$16 sps:$4 sm:$0xff]  }
 0x1c5   : > { %6798 = vmatpush1.bf16.msra.mxu0 %v9861_v3  ;;  %7454 = vmatpush1.bf16.msra.mxu1 %v9864_v4  ;;  %v9956_v3 = vld [vmem:[%s11143_s18 + $0xd68] ss:$16 sps:$4 sm:$0xff]   ;;  %v9961_v4 = vld [vmem:[%s11143_s18 + $0xd84] ss:$16 sps:$4 sm:$0xff]  }
 0x1c6   : > { %6799 = vmatprep.subr.bf16.mxu0 %v9869_v5  ;;  %7455 = vmatprep.subr.bf16.mxu1 %v9872_v6  ;;  %v9964_v5 = vld [vmem:[%s11143_s18 + $0xd8c] ss:$16 sps:$4 sm:$0xff]   ;;  %v9959_v6 = vld [vmem:[%s11143_s18 + $0xd80] ss:$16 sps:$4 sm:$0xff]  }
 0x1c9   : > { %6800 = vmatpush1.bf16.msra.mxu0 %v9867_v7  ;;  %7456 = vmatpush1.bf16.msra.mxu1 %v9870_v8  ;;  %v9962_v7 = vld [vmem:[%s11143_s18 + $0xd88] ss:$16 sps:$4 sm:$0xff]   ;;  %v9967_v8 = vld [vmem:[%s11143_s18 + $0xda4] ss:$16 sps:$4 sm:$0xff]  }
 0x1ca   : > { %6801 = vmatprep.subr.bf16.mxu0 %v9875_v9  ;;  %7457 = vmatprep.subr.bf16.mxu1 %v9878_v10  ;;  %v9970_v9 = vld [vmem:[%s11143_s18 + $0xdac] ss:$16 sps:$4 sm:$0xff]   ;;  %v9965_v10 = vld [vmem:[%s11143_s18 + $0xda0] ss:$16 sps:$4 sm:$0xff]  }
 0x1cd   : > { %6802 = vmatpush1.bf16.msra.mxu0 %v9873_v12  ;;  %7458 = vmatpush1.bf16.msra.mxu1 %v9876_v13  ;;  %v9968_v12 = vld [vmem:[%s11143_s18 + $0xda8] ss:$16 sps:$4 sm:$0xff]   ;;  %v9973_v13 = vld [vmem:[%s11143_s18 + $0xdc4] ss:$16 sps:$4 sm:$0xff]  }
 0x1ce   : > { %6803 = vmatprep.subr.bf16.mxu0 %v9881_v15  ;;  %7459 = vmatprep.subr.bf16.mxu1 %v9884_v16  ;;  %v9976_v15 = vld [vmem:[%s11143_s18 + $0xdcc] ss:$16 sps:$4 sm:$0xff]   ;;  %v9971_v16 = vld [vmem:[%s11143_s18 + $0xdc0] ss:$16 sps:$4 sm:$0xff]  }
 0x1d1   : > { %6804 = vmatpush1.bf16.msra.mxu0 %v9879_v11  ;;  %7460 = vmatpush1.bf16.msra.mxu1 %v9882_v19  ;;  %v9974_v11 = vld [vmem:[%s11143_s18 + $0xdc8] ss:$16 sps:$4 sm:$0xff]   ;;  %v9979_v19 = vld [vmem:[%s11143_s18 + $0xde4] ss:$16 sps:$4 sm:$0xff]  }
 0x1d2   : > { %6814 = vmatprep.subr.bf16.mxu0 %v9889_v20  ;;  %7470 = vmatprep.subr.bf16.mxu1 %v9892_v14  ;;  %v9982_v20 = vld [vmem:[%s11143_s18 + $0xdec] ss:$16 sps:$4 sm:$0xff]   ;;  %v9977_v14 = vld [vmem:[%s11143_s18 + $0xde0] ss:$16 sps:$4 sm:$0xff]  }
 0x1d4   : > { %6806 = vmatmul.mubr.bf16.vlgmr.msra.gmra.mrb[0].mxu0 %v8058_v22  ;;  %7462 = vmatmul.mubr.bf16.vlgmr.msra.gmra.mrb[0].mxu1 %v8058_v22  ;;  %v9980_v22 = vld [vmem:[%s11143_s18 + $0xde8] ss:$16 sps:$4 sm:$0xff]  }
 0x1d5   : > { %6815 = vmatpush1.bf16.msra.mxu0 %v9887_v23  ;;  %7471 = vmatpush1.bf16.msra.mxu1 %v9890_v17  ;;  %v9987_v23 = vld [vmem:[%s11143_s18 + $0xe04] ss:$16 sps:$4 sm:$0xff]   ;;  %v9990_v17 = vld [vmem:[%s11143_s18 + $0xe0c] ss:$16 sps:$4 sm:$0xff]  }
 0x1d6   : > { %6816 = vmatprep.subr.bf16.mxu0 %v9895_v24  ;;  %7472 = vmatprep.subr.bf16.mxu1 %v9898_v25  ;;  %v11663_v24 = vld [vmem:[%s12340_s0 + $0x38] sm:$0xff]  ;;  %v8060_v25 = vcombine.low %v11590_v21, %v11590_v21  ;;  %v9991_v21 = vld [vmem:[%s11143_s18 + $0xe20] ss:$16 sps:$4 sm:$0xff]  }
 0x1d7   : > { %6846 = vmatprep.mubr.bf16.mxu0 %v8061_v26  ;;  %7502 = vmatprep.mubr.bf16.mxu1 %v8061_v26  ;;  %v9985_v26 = vld [vmem:[%s11143_s18 + $0xe00] ss:$16 sps:$4 sm:$0xff]  }
 0x1d9   : > { %6817 = vmatpush1.bf16.msra.mxu0 %v9893_v18  ;;  %7473 = vmatpush1.bf16.msra.mxu1 %v9896_v27  ;;  %v9988_v18 = vld [vmem:[%s11143_s18 + $0xe08] ss:$16 sps:$4 sm:$0xff]   ;;  %v9993_v27 = vld [vmem:[%s11143_s18 + $0xe24] ss:$16 sps:$4 sm:$0xff]  }
 0x1da   : > { %6818 = vmatprep.subr.bf16.mxu0 %v9901_v28  ;;  %7474 = vmatprep.subr.bf16.mxu1 %v9904_v29  ;;  %v9996_v28 = vld [vmem:[%s11143_s18 + $0xe2c] ss:$16 sps:$4 sm:$0xff]   ;;  %v8063_v29 = vcombine.high %v11663_v24, %v11663_v24 }
 0x1dd   : > { %6819 = vmatpush1.bf16.msra.mxu0 %v9899_v30  ;;  %7475 = vmatpush1.bf16.msra.mxu1 %v9902_v31  ;;  %v9994_v30 = vld [vmem:[%s11143_s18 + $0xe28] ss:$16 sps:$4 sm:$0xff]   ;;  %v9999_v31 = vld [vmem:[%s11143_s18 + $0xe44] ss:$16 sps:$4 sm:$0xff]  }
 0x1de   : > { %6820 = vmatprep.subr.bf16.mxu0 %v9907_v32  ;;  %7476 = vmatprep.subr.bf16.mxu1 %v9910_v33  ;;  %v10002_v32 = vld [vmem:[%s11143_s18 + $0xe4c] ss:$16 sps:$4 sm:$0xff]   ;;  %v9997_v33 = vld [vmem:[%s11143_s18 + $0xe40] ss:$16 sps:$4 sm:$0xff]  }
 0x1e1   : > { %6821 = vmatpush1.bf16.msra.mxu0 %v9905_v34  ;;  %7477 = vmatpush1.bf16.msra.mxu1 %v9908_v35  ;;  %v10000_v34 = vld [vmem:[%s11143_s18 + $0xe48] ss:$16 sps:$4 sm:$0xff]   ;;  %v10005_v35 = vld [vmem:[%s11143_s18 + $0xe64] ss:$16 sps:$4 sm:$0xff]  }
 0x1e2   : > { %6822 = vmatprep.subr.bf16.mxu0 %v9913_v36  ;;  %7478 = vmatprep.subr.bf16.mxu1 %v9916_v37  ;;  %v10008_v36 = vld [vmem:[%s11143_s18 + $0xe6c] ss:$16 sps:$4 sm:$0xff]   ;;  %v10003_v37 = vld [vmem:[%s11143_s18 + $0xe60] ss:$16 sps:$4 sm:$0xff]  }
 0x1e5   : > { %6823 = vmatpush1.bf16.msra.mxu0 %v9911_v38  ;;  %7479 = vmatpush1.bf16.msra.mxu1 %v9914_v39  ;;  %v10006_v38 = vld [vmem:[%s11143_s18 + $0xe68] ss:$16 sps:$4 sm:$0xff]   ;;  %v10011_v39 = vld [vmem:[%s11143_s18 + $0xe84] ss:$16 sps:$4 sm:$0xff]  }
 0x1e6   : > { %6824 = vmatprep.subr.bf16.mxu0 %v9919_v40  ;;  %7480 = vmatprep.subr.bf16.mxu1 %v9922_v41  ;;  %v10014_v40 = vld [vmem:[%s11143_s18 + $0xe8c] ss:$16 sps:$4 sm:$0xff]   ;;  %v10009_v41 = vld [vmem:[%s11143_s18 + $0xe80] ss:$16 sps:$4 sm:$0xff]  }
 0x1e9   : > { %6825 = vmatpush1.bf16.msra.mxu0 %v9917_v42  ;;  %7481 = vmatpush1.bf16.msra.mxu1 %v9920_v43  ;;  %v10012_v42 = vld [vmem:[%s11143_s18 + $0xe88] ss:$16 sps:$4 sm:$0xff]   ;;  %v10017_v43 = vld [vmem:[%s11143_s18 + $0xea4] ss:$16 sps:$4 sm:$0xff]  }
 0x1ea   : > { %6826 = vmatprep.subr.bf16.mxu0 %v9925_v44  ;;  %7482 = vmatprep.subr.bf16.mxu1 %v9928_v45  ;;  %v10020_v44 = vld [vmem:[%s11143_s18 + $0xeac] ss:$16 sps:$4 sm:$0xff]   ;;  %v10015_v45 = vld [vmem:[%s11143_s18 + $0xea0] ss:$16 sps:$4 sm:$0xff]  }
 0x1ed   : > { %6827 = vmatpush1.bf16.msra.mxu0 %v9923_v46  ;;  %7483 = vmatpush1.bf16.msra.mxu1 %v9926_v47  ;;  %v10018_v46 = vld [vmem:[%s11143_s18 + $0xea8] ss:$16 sps:$4 sm:$0xff]   ;;  %v10023_v47 = vld [vmem:[%s11143_s18 + $0xec4] ss:$16 sps:$4 sm:$0xff]  }
 0x1ee   : > { %6828 = vmatprep.subr.bf16.mxu0 %v9931_v48  ;;  %7484 = vmatprep.subr.bf16.mxu1 %v9934_v49  ;;  %v10026_v48 = vld [vmem:[%s11143_s18 + $0xecc] ss:$16 sps:$4 sm:$0xff]   ;;  %v10021_v49 = vld [vmem:[%s11143_s18 + $0xec0] ss:$16 sps:$4 sm:$0xff]  }
 0x1f1   : > { %6829 = vmatpush1.bf16.msra.mxu0 %v9929_v50  ;;  %7485 = vmatpush1.bf16.msra.mxu1 %v9932_v51  ;;  %v10024_v50 = vld [vmem:[%s11143_s18 + $0xec8] ss:$16 sps:$4 sm:$0xff]   ;;  %v10029_v51 = vld [vmem:[%s11143_s18 + $0xee4] ss:$16 sps:$4 sm:$0xff]  }
 0x1f2   : > { %6830 = vmatprep.subr.bf16.mxu0 %v9937_v52  ;;  %7486 = vmatprep.subr.bf16.mxu1 %v9940_v53  ;;  %v10032_v52 = vld [vmem:[%s11143_s18 + $0xeec] ss:$16 sps:$4 sm:$0xff]   ;;  %v10027_v53 = vld [vmem:[%s11143_s18 + $0xee0] ss:$16 sps:$4 sm:$0xff]  }
 0x1f5   : > { %6831 = vmatpush1.bf16.msra.mxu0 %v9935_v54  ;;  %7487 = vmatpush1.bf16.msra.mxu1 %v9938_v55  ;;  %v10030_v54 = vld [vmem:[%s11143_s18 + $0xee8] ss:$16 sps:$4 sm:$0xff]   ;;  %v10035_v55 = vld [vmem:[%s11143_s18 + $0xf04] ss:$16 sps:$4 sm:$0xff]  }
 0x1f6   : > { %6832 = vmatprep.subr.bf16.mxu0 %v9943_v56  ;;  %7488 = vmatprep.subr.bf16.mxu1 %v9946_v57  ;;  %v10038_v56 = vld [vmem:[%s11143_s18 + $0xf0c] ss:$16 sps:$4 sm:$0xff]   ;;  %v10033_v57 = vld [vmem:[%s11143_s18 + $0xf00] ss:$16 sps:$4 sm:$0xff]  }
 0x1f9   : > { %6833 = vmatpush1.bf16.msra.mxu0 %v9941_v58  ;;  %7489 = vmatpush1.bf16.msra.mxu1 %v9944_v59  ;;  %v10036_v58 = vld [vmem:[%s11143_s18 + $0xf08] ss:$16 sps:$4 sm:$0xff]   ;;  %v10041_v59 = vld [vmem:[%s11143_s18 + $0xf24] ss:$16 sps:$4 sm:$0xff]  }
 0x1fa   : > { %6834 = vmatprep.subr.bf16.mxu0 %v9949_v60  ;;  %7490 = vmatprep.subr.bf16.mxu1 %v9952_v61  ;;  %v10044_v60 = vld [vmem:[%s11143_s18 + $0xf2c] ss:$16 sps:$4 sm:$0xff]   ;;  %v10039_v61 = vld [vmem:[%s11143_s18 + $0xf20] ss:$16 sps:$4 sm:$0xff]  }
 0x1fd   : > { %6835 = vmatpush1.bf16.msra.mxu0 %v9947_v62  ;;  %7491 = vmatpush1.bf16.msra.mxu1 %v9950_v63  ;;  %v10042_v62 = vld [vmem:[%s11143_s18 + $0xf28] ss:$16 sps:$4 sm:$0xff]   ;;  %v10047_v63 = vld [vmem:[%s11143_s18 + $0xf44] ss:$16 sps:$4 sm:$0xff]  }
 0x1fe   : > { %6836 = vmatprep.subr.bf16.mxu0 %v9955_v0  ;;  %7492 = vmatprep.subr.bf16.mxu1 %v9958_v1  ;;  %v10050_v0 = vld [vmem:[%s11143_s18 + $0xf4c] ss:$16 sps:$4 sm:$0xff]   ;;  %v10045_v1 = vld [vmem:[%s11143_s18 + $0xf40] ss:$16 sps:$4 sm:$0xff]  }
 0x201   : > { %6837 = vmatpush1.bf16.msra.mxu0 %v9953_v2  ;;  %7493 = vmatpush1.bf16.msra.mxu1 %v9956_v3  ;;  %v10048_v2 = vld [vmem:[%s11143_s18 + $0xf48] ss:$16 sps:$4 sm:$0xff]   ;;  %v10053_v3 = vld [vmem:[%s11143_s18 + $0xf64] ss:$16 sps:$4 sm:$0xff]  }
 0x202   : > { %6838 = vmatprep.subr.bf16.mxu0 %v9961_v4  ;;  %7494 = vmatprep.subr.bf16.mxu1 %v9964_v5  ;;  %v10056_v4 = vld [vmem:[%s11143_s18 + $0xf6c] ss:$16 sps:$4 sm:$0xff]   ;;  %v10051_v5 = vld [vmem:[%s11143_s18 + $0xf60] ss:$16 sps:$4 sm:$0xff]  }
 0x205   : > { %6839 = vmatpush1.bf16.msra.mxu0 %v9959_v6  ;;  %7495 = vmatpush1.bf16.msra.mxu1 %v9962_v7  ;;  %v10054_v6 = vld [vmem:[%s11143_s18 + $0xf68] ss:$16 sps:$4 sm:$0xff]   ;;  %v10059_v7 = vld [vmem:[%s11143_s18 + $0xf84] ss:$16 sps:$4 sm:$0xff]  }
 0x206   : > { %6840 = vmatprep.subr.bf16.mxu0 %v9967_v8  ;;  %7496 = vmatprep.subr.bf16.mxu1 %v9970_v9  ;;  %v10062_v8 = vld [vmem:[%s11143_s18 + $0xf8c] ss:$16 sps:$4 sm:$0xff]   ;;  %v10057_v9 = vld [vmem:[%s11143_s18 + $0xf80] ss:$16 sps:$4 sm:$0xff]  }
 0x209   : > { %6841 = vmatpush1.bf16.msra.mxu0 %v9965_v10  ;;  %7497 = vmatpush1.bf16.msra.mxu1 %v9968_v12  ;;  %v10060_v10 = vld [vmem:[%s11143_s18 + $0xf88] ss:$16 sps:$4 sm:$0xff]   ;;  %v10065_v12 = vld [vmem:[%s11143_s18 + $0xfa4] ss:$16 sps:$4 sm:$0xff]  }
 0x20a   : > { %6842 = vmatprep.subr.bf16.mxu0 %v9973_v13  ;;  %7498 = vmatprep.subr.bf16.mxu1 %v9976_v15  ;;  %v10068_v13 = vld [vmem:[%s11143_s18 + $0xfac] ss:$16 sps:$4 sm:$0xff]   ;;  %v10063_v15 = vld [vmem:[%s11143_s18 + $0xfa0] ss:$16 sps:$4 sm:$0xff]  }
 0x20d   : > { %6843 = vmatpush1.bf16.msra.mxu0 %v9971_v16  ;;  %7499 = vmatpush1.bf16.msra.mxu1 %v9974_v11  ;;  %v10066_v16 = vld [vmem:[%s11143_s18 + $0xfa8] ss:$16 sps:$4 sm:$0xff]   ;;  %v10071_v11 = vld [vmem:[%s11143_s18 + $0xfc4] ss:$16 sps:$4 sm:$0xff]  }
 0x20e   : > { %6844 = vmatprep.subr.bf16.mxu0 %v9979_v19  ;;  %7500 = vmatprep.subr.bf16.mxu1 %v9982_v20  ;;  %v10074_v19 = vld [vmem:[%s11143_s18 + $0xfcc] ss:$16 sps:$4 sm:$0xff]   ;;  %v10069_v20 = vld [vmem:[%s11143_s18 + $0xfc0] ss:$16 sps:$4 sm:$0xff]  }
 0x211   : > { %6845 = vmatpush1.bf16.msra.mxu0 %v9977_v14  ;;  %7501 = vmatpush1.bf16.msra.mxu1 %v9980_v22  ;;  %v10072_v14 = vld [vmem:[%s11143_s18 + $0xfc8] ss:$16 sps:$4 sm:$0xff]   ;;  %v10077_v22 = vld [vmem:[%s11143_s18 + $0xfe4] ss:$16 sps:$4 sm:$0xff]  }
 0x212   : > { %6855 = vmatprep.subr.bf16.mxu0 %v9987_v23  ;;  %7511 = vmatprep.subr.bf16.mxu1 %v9990_v17  ;;  %v10080_v23 = vld [vmem:[%s11143_s18 + $0xfec] ss:$16 sps:$4 sm:$0xff]   ;;  %v10075_v17 = vld [vmem:[%s11143_s18 + $0xfe0] ss:$16 sps:$4 sm:$0xff]  }
 0x214   : > { %6847 = vmatmul.mubr.bf16.vlgmr.msra.gmra.mrb[0].mxu0 %v8060_v25  ;;  %7503 = vmatmul.mubr.bf16.vlgmr.msra.gmra.mrb[0].mxu1 %v8060_v25  ;;  %v10078_v25 = vld [vmem:[%s11143_s18 + $0xfe8] ss:$16 sps:$4 sm:$0xff]  }
 0x215   : > { %6856 = vmatpush1.bf16.msra.mxu0 %v9985_v26  ;;  %7512 = vmatpush1.bf16.msra.mxu1 %v9988_v18  ;;  %v10085_v26 = vld [vmem:[%s11143_s18 + $0x1004] ss:$16 sps:$4 sm:$0xff]   ;;  %v10088_v18 = vld [vmem:[%s11143_s18 + $0x100c] ss:$16 sps:$4 sm:$0xff]  }
 0x216   : > { %6857 = vmatprep.subr.bf16.mxu0 %v9993_v27  ;;  %7513 = vmatprep.subr.bf16.mxu1 %v9996_v28  ;;  %v11736_v27 = vld [vmem:[%s12340_s0 + $0x40] sm:$0xff]  ;;  %v8062_v28 = vcombine.low %v11663_v24, %v11663_v24 }
 0x217   : > { %6887 = vmatprep.mubr.bf16.mxu0 %v8063_v29  ;;  %7543 = vmatprep.mubr.bf16.mxu1 %v8063_v29  ;;  %v10083_v29 = vld [vmem:[%s11143_s18 + $0x1000] ss:$16 sps:$4 sm:$0xff]  }
 0x218   : > { %v10089_v24 = vld [vmem:[%s11143_s18 + $0x1020] ss:$16 sps:$4 sm:$0xff]  }
 0x219   : > { %6858 = vmatpush1.bf16.msra.mxu0 %v9991_v21  ;;  %7514 = vmatpush1.bf16.msra.mxu1 %v9994_v30  ;;  %v10086_v21 = vld [vmem:[%s11143_s18 + $0x1008] ss:$16 sps:$4 sm:$0xff]   ;;  %v10091_v30 = vld [vmem:[%s11143_s18 + $0x1024] ss:$16 sps:$4 sm:$0xff]  }
 0x21a   : > { %6859 = vmatprep.subr.bf16.mxu0 %v9999_v31  ;;  %7515 = vmatprep.subr.bf16.mxu1 %v10002_v32  ;;  %v10094_v31 = vld [vmem:[%s11143_s18 + $0x102c] ss:$16 sps:$4 sm:$0xff]   ;;  %v8065_v32 = vcombine.high %v11736_v27, %v11736_v27 }
 0x21d   : > { %6860 = vmatpush1.bf16.msra.mxu0 %v9997_v33  ;;  %7516 = vmatpush1.bf16.msra.mxu1 %v10000_v34  ;;  %v10092_v33 = vld [vmem:[%s11143_s18 + $0x1028] ss:$16 sps:$4 sm:$0xff]   ;;  %v10097_v34 = vld [vmem:[%s11143_s18 + $0x1044] ss:$16 sps:$4 sm:$0xff]  }
 0x21e   : > { %6861 = vmatprep.subr.bf16.mxu0 %v10005_v35  ;;  %7517 = vmatprep.subr.bf16.mxu1 %v10008_v36  ;;  %v10100_v35 = vld [vmem:[%s11143_s18 + $0x104c] ss:$16 sps:$4 sm:$0xff]   ;;  %v10095_v36 = vld [vmem:[%s11143_s18 + $0x1040] ss:$16 sps:$4 sm:$0xff]  }
 0x221   : > { %6862 = vmatpush1.bf16.msra.mxu0 %v10003_v37  ;;  %7518 = vmatpush1.bf16.msra.mxu1 %v10006_v38  ;;  %v10098_v37 = vld [vmem:[%s11143_s18 + $0x1048] ss:$16 sps:$4 sm:$0xff]   ;;  %v10103_v38 = vld [vmem:[%s11143_s18 + $0x1064] ss:$16 sps:$4 sm:$0xff]  }
 0x222   : > { %6863 = vmatprep.subr.bf16.mxu0 %v10011_v39  ;;  %7519 = vmatprep.subr.bf16.mxu1 %v10014_v40  ;;  %v10106_v39 = vld [vmem:[%s11143_s18 + $0x106c] ss:$16 sps:$4 sm:$0xff]   ;;  %v10101_v40 = vld [vmem:[%s11143_s18 + $0x1060] ss:$16 sps:$4 sm:$0xff]  }
 0x225   : > { %6864 = vmatpush1.bf16.msra.mxu0 %v10009_v41  ;;  %7520 = vmatpush1.bf16.msra.mxu1 %v10012_v42  ;;  %v10104_v41 = vld [vmem:[%s11143_s18 + $0x1068] ss:$16 sps:$4 sm:$0xff]   ;;  %v10109_v42 = vld [vmem:[%s11143_s18 + $0x1084] ss:$16 sps:$4 sm:$0xff]  }
 0x226   : > { %6865 = vmatprep.subr.bf16.mxu0 %v10017_v43  ;;  %7521 = vmatprep.subr.bf16.mxu1 %v10020_v44  ;;  %v10112_v43 = vld [vmem:[%s11143_s18 + $0x108c] ss:$16 sps:$4 sm:$0xff]   ;;  %v10107_v44 = vld [vmem:[%s11143_s18 + $0x1080] ss:$16 sps:$4 sm:$0xff]  }
 0x229   : > { %6866 = vmatpush1.bf16.msra.mxu0 %v10015_v45  ;;  %7522 = vmatpush1.bf16.msra.mxu1 %v10018_v46  ;;  %v10110_v45 = vld [vmem:[%s11143_s18 + $0x1088] ss:$16 sps:$4 sm:$0xff]   ;;  %v10115_v46 = vld [vmem:[%s11143_s18 + $0x10a4] ss:$16 sps:$4 sm:$0xff]  }
 0x22a   : > { %6867 = vmatprep.subr.bf16.mxu0 %v10023_v47  ;;  %7523 = vmatprep.subr.bf16.mxu1 %v10026_v48  ;;  %v10118_v47 = vld [vmem:[%s11143_s18 + $0x10ac] ss:$16 sps:$4 sm:$0xff]   ;;  %v10113_v48 = vld [vmem:[%s11143_s18 + $0x10a0] ss:$16 sps:$4 sm:$0xff]  }
 0x22d   : > { %6868 = vmatpush1.bf16.msra.mxu0 %v10021_v49  ;;  %7524 = vmatpush1.bf16.msra.mxu1 %v10024_v50  ;;  %v10116_v49 = vld [vmem:[%s11143_s18 + $0x10a8] ss:$16 sps:$4 sm:$0xff]   ;;  %v10121_v50 = vld [vmem:[%s11143_s18 + $0x10c4] ss:$16 sps:$4 sm:$0xff]  }
 0x22e   : > { %6869 = vmatprep.subr.bf16.mxu0 %v10029_v51  ;;  %7525 = vmatprep.subr.bf16.mxu1 %v10032_v52  ;;  %v10124_v51 = vld [vmem:[%s11143_s18 + $0x10cc] ss:$16 sps:$4 sm:$0xff]   ;;  %v10119_v52 = vld [vmem:[%s11143_s18 + $0x10c0] ss:$16 sps:$4 sm:$0xff]  }
 0x231   : > { %6870 = vmatpush1.bf16.msra.mxu0 %v10027_v53  ;;  %7526 = vmatpush1.bf16.msra.mxu1 %v10030_v54  ;;  %v10122_v53 = vld [vmem:[%s11143_s18 + $0x10c8] ss:$16 sps:$4 sm:$0xff]   ;;  %v10127_v54 = vld [vmem:[%s11143_s18 + $0x10e4] ss:$16 sps:$4 sm:$0xff]  }
 0x232   : > { %6871 = vmatprep.subr.bf16.mxu0 %v10035_v55  ;;  %7527 = vmatprep.subr.bf16.mxu1 %v10038_v56  ;;  %v10130_v55 = vld [vmem:[%s11143_s18 + $0x10ec] ss:$16 sps:$4 sm:$0xff]   ;;  %v10125_v56 = vld [vmem:[%s11143_s18 + $0x10e0] ss:$16 sps:$4 sm:$0xff]  }
 0x235   : > { %6872 = vmatpush1.bf16.msra.mxu0 %v10033_v57  ;;  %7528 = vmatpush1.bf16.msra.mxu1 %v10036_v58  ;;  %v10128_v57 = vld [vmem:[%s11143_s18 + $0x10e8] ss:$16 sps:$4 sm:$0xff]   ;;  %v10133_v58 = vld [vmem:[%s11143_s18 + $0x1104] ss:$16 sps:$4 sm:$0xff]  }
 0x236   : > { %6873 = vmatprep.subr.bf16.mxu0 %v10041_v59  ;;  %7529 = vmatprep.subr.bf16.mxu1 %v10044_v60  ;;  %v10136_v59 = vld [vmem:[%s11143_s18 + $0x110c] ss:$16 sps:$4 sm:$0xff]   ;;  %v10131_v60 = vld [vmem:[%s11143_s18 + $0x1100] ss:$16 sps:$4 sm:$0xff]  }
 0x239   : > { %6874 = vmatpush1.bf16.msra.mxu0 %v10039_v61  ;;  %7530 = vmatpush1.bf16.msra.mxu1 %v10042_v62  ;;  %v10134_v61 = vld [vmem:[%s11143_s18 + $0x1108] ss:$16 sps:$4 sm:$0xff]   ;;  %v10139_v62 = vld [vmem:[%s11143_s18 + $0x1124] ss:$16 sps:$4 sm:$0xff]  }
 0x23a   : > { %6875 = vmatprep.subr.bf16.mxu0 %v10047_v63  ;;  %7531 = vmatprep.subr.bf16.mxu1 %v10050_v0  ;;  %v10142_v63 = vld [vmem:[%s11143_s18 + $0x112c] ss:$16 sps:$4 sm:$0xff]   ;;  %v10137_v0 = vld [vmem:[%s11143_s18 + $0x1120] ss:$16 sps:$4 sm:$0xff]  }
 0x23d   : > { %6876 = vmatpush1.bf16.msra.mxu0 %v10045_v1  ;;  %7532 = vmatpush1.bf16.msra.mxu1 %v10048_v2  ;;  %v10140_v1 = vld [vmem:[%s11143_s18 + $0x1128] ss:$16 sps:$4 sm:$0xff]   ;;  %v10145_v2 = vld [vmem:[%s11143_s18 + $0x1144] ss:$16 sps:$4 sm:$0xff]  }
 0x23e   : > { %6877 = vmatprep.subr.bf16.mxu0 %v10053_v3  ;;  %7533 = vmatprep.subr.bf16.mxu1 %v10056_v4  ;;  %v10148_v3 = vld [vmem:[%s11143_s18 + $0x114c] ss:$16 sps:$4 sm:$0xff]   ;;  %v10143_v4 = vld [vmem:[%s11143_s18 + $0x1140] ss:$16 sps:$4 sm:$0xff]  }
 0x241   : > { %6878 = vmatpush1.bf16.msra.mxu0 %v10051_v5  ;;  %7534 = vmatpush1.bf16.msra.mxu1 %v10054_v6  ;;  %v10146_v5 = vld [vmem:[%s11143_s18 + $0x1148] ss:$16 sps:$4 sm:$0xff]   ;;  %v10151_v6 = vld [vmem:[%s11143_s18 + $0x1164] ss:$16 sps:$4 sm:$0xff]  }
 0x242   : > { %6879 = vmatprep.subr.bf16.mxu0 %v10059_v7  ;;  %7535 = vmatprep.subr.bf16.mxu1 %v10062_v8  ;;  %v10154_v7 = vld [vmem:[%s11143_s18 + $0x116c] ss:$16 sps:$4 sm:$0xff]   ;;  %v10149_v8 = vld [vmem:[%s11143_s18 + $0x1160] ss:$16 sps:$4 sm:$0xff]  }
 0x245   : > { %6880 = vmatpush1.bf16.msra.mxu0 %v10057_v9  ;;  %7536 = vmatpush1.bf16.msra.mxu1 %v10060_v10  ;;  %v10152_v9 = vld [vmem:[%s11143_s18 + $0x1168] ss:$16 sps:$4 sm:$0xff]   ;;  %v10157_v10 = vld [vmem:[%s11143_s18 + $0x1184] ss:$16 sps:$4 sm:$0xff]  }
 0x246   : > { %6881 = vmatprep.subr.bf16.mxu0 %v10065_v12  ;;  %7537 = vmatprep.subr.bf16.mxu1 %v10068_v13  ;;  %v10160_v12 = vld [vmem:[%s11143_s18 + $0x118c] ss:$16 sps:$4 sm:$0xff]   ;;  %v10155_v13 = vld [vmem:[%s11143_s18 + $0x1180] ss:$16 sps:$4 sm:$0xff]  }
 0x249   : > { %6882 = vmatpush1.bf16.msra.mxu0 %v10063_v15  ;;  %7538 = vmatpush1.bf16.msra.mxu1 %v10066_v16  ;;  %v10158_v15 = vld [vmem:[%s11143_s18 + $0x1188] ss:$16 sps:$4 sm:$0xff]   ;;  %v10163_v16 = vld [vmem:[%s11143_s18 + $0x11a4] ss:$16 sps:$4 sm:$0xff]  }
 0x24a   : > { %6883 = vmatprep.subr.bf16.mxu0 %v10071_v11  ;;  %7539 = vmatprep.subr.bf16.mxu1 %v10074_v19  ;;  %v10166_v11 = vld [vmem:[%s11143_s18 + $0x11ac] ss:$16 sps:$4 sm:$0xff]   ;;  %v10161_v19 = vld [vmem:[%s11143_s18 + $0x11a0] ss:$16 sps:$4 sm:$0xff]  }
 0x24d   : > { %6884 = vmatpush1.bf16.msra.mxu0 %v10069_v20  ;;  %7540 = vmatpush1.bf16.msra.mxu1 %v10072_v14  ;;  %v10164_v20 = vld [vmem:[%s11143_s18 + $0x11a8] ss:$16 sps:$4 sm:$0xff]   ;;  %v10169_v14 = vld [vmem:[%s11143_s18 + $0x11c4] ss:$16 sps:$4 sm:$0xff]  }
 0x24e   : > { %6885 = vmatprep.subr.bf16.mxu0 %v10077_v22  ;;  %7541 = vmatprep.subr.bf16.mxu1 %v10080_v23  ;;  %v10172_v22 = vld [vmem:[%s11143_s18 + $0x11cc] ss:$16 sps:$4 sm:$0xff]   ;;  %v10167_v23 = vld [vmem:[%s11143_s18 + $0x11c0] ss:$16 sps:$4 sm:$0xff]  }
 0x251   : > { %6886 = vmatpush1.bf16.msra.mxu0 %v10075_v17  ;;  %7542 = vmatpush1.bf16.msra.mxu1 %v10078_v25  ;;  %v10170_v17 = vld [vmem:[%s11143_s18 + $0x11c8] ss:$16 sps:$4 sm:$0xff]   ;;  %v10175_v25 = vld [vmem:[%s11143_s18 + $0x11e4] ss:$16 sps:$4 sm:$0xff]  }
 0x252   : > { %6896 = vmatprep.subr.bf16.mxu0 %v10085_v26  ;;  %7552 = vmatprep.subr.bf16.mxu1 %v10088_v18  ;;  %v10178_v26 = vld [vmem:[%s11143_s18 + $0x11ec] ss:$16 sps:$4 sm:$0xff]   ;;  %v10173_v18 = vld [vmem:[%s11143_s18 + $0x11e0] ss:$16 sps:$4 sm:$0xff]  }
 0x254   : > { %6888 = vmatmul.mubr.bf16.vlgmr.msra.gmra.mrb[0].mxu0 %v8062_v28  ;;  %7544 = vmatmul.mubr.bf16.vlgmr.msra.gmra.mrb[0].mxu1 %v8062_v28  ;;  %v10176_v28 = vld [vmem:[%s11143_s18 + $0x11e8] ss:$16 sps:$4 sm:$0xff]  }
 0x255   : > { %6897 = vmatpush1.bf16.msra.mxu0 %v10083_v29  ;;  %7553 = vmatpush1.bf16.msra.mxu1 %v10086_v21  ;;  %v10183_v29 = vld [vmem:[%s11143_s18 + $0x1204] ss:$16 sps:$4 sm:$0xff]   ;;  %v10186_v21 = vld [vmem:[%s11143_s18 + $0x120c] ss:$16 sps:$4 sm:$0xff]  }
 0x256   : > { %6898 = vmatprep.subr.bf16.mxu0 %v10091_v30  ;;  %7554 = vmatprep.subr.bf16.mxu1 %v10094_v31  ;;  %v11809_v30 = vld [vmem:[%s12340_s0 + $0x48] sm:$0xff]  ;;  %v8064_v31 = vcombine.low %v11736_v27, %v11736_v27  ;;  %v10187_v27 = vld [vmem:[%s11143_s18 + $0x1220] ss:$16 sps:$4 sm:$0xff]  }
 0x257   : > { %6928 = vmatprep.mubr.bf16.mxu0 %v8065_v32  ;;  %7584 = vmatprep.mubr.bf16.mxu1 %v8065_v32  ;;  %v10181_v32 = vld [vmem:[%s11143_s18 + $0x1200] ss:$16 sps:$4 sm:$0xff]  }
 0x259   : > { %6899 = vmatpush1.bf16.msra.mxu0 %v10089_v24  ;;  %7555 = vmatpush1.bf16.msra.mxu1 %v10092_v33  ;;  %v10184_v24 = vld [vmem:[%s11143_s18 + $0x1208] ss:$16 sps:$4 sm:$0xff]   ;;  %v10189_v33 = vld [vmem:[%s11143_s18 + $0x1224] ss:$16 sps:$4 sm:$0xff]  }
 0x25a   : > { %6900 = vmatprep.subr.bf16.mxu0 %v10097_v34  ;;  %7556 = vmatprep.subr.bf16.mxu1 %v10100_v35  ;;  %v10192_v34 = vld [vmem:[%s11143_s18 + $0x122c] ss:$16 sps:$4 sm:$0xff]   ;;  %v8067_v35 = vcombine.high %v11809_v30, %v11809_v30 }
 0x25d   : > { %6901 = vmatpush1.bf16.msra.mxu0 %v10095_v36  ;;  %7557 = vmatpush1.bf16.msra.mxu1 %v10098_v37  ;;  %v10190_v36 = vld [vmem:[%s11143_s18 + $0x1228] ss:$16 sps:$4 sm:$0xff]   ;;  %v10195_v37 = vld [vmem:[%s11143_s18 + $0x1244] ss:$16 sps:$4 sm:$0xff]  }
 0x25e   : > { %6902 = vmatprep.subr.bf16.mxu0 %v10103_v38  ;;  %7558 = vmatprep.subr.bf16.mxu1 %v10106_v39  ;;  %v10198_v38 = vld [vmem:[%s11143_s18 + $0x124c] ss:$16 sps:$4 sm:$0xff]   ;;  %v10193_v39 = vld [vmem:[%s11143_s18 + $0x1240] ss:$16 sps:$4 sm:$0xff]  }
 0x261   : > { %6903 = vmatpush1.bf16.msra.mxu0 %v10101_v40  ;;  %7559 = vmatpush1.bf16.msra.mxu1 %v10104_v41  ;;  %v10196_v40 = vld [vmem:[%s11143_s18 + $0x1248] ss:$16 sps:$4 sm:$0xff]   ;;  %v10201_v41 = vld [vmem:[%s11143_s18 + $0x1264] ss:$16 sps:$4 sm:$0xff]  }
 0x262   : > { %6904 = vmatprep.subr.bf16.mxu0 %v10109_v42  ;;  %7560 = vmatprep.subr.bf16.mxu1 %v10112_v43  ;;  %v10204_v42 = vld [vmem:[%s11143_s18 + $0x126c] ss:$16 sps:$4 sm:$0xff]   ;;  %v10199_v43 = vld [vmem:[%s11143_s18 + $0x1260] ss:$16 sps:$4 sm:$0xff]  }
 0x265   : > { %6905 = vmatpush1.bf16.msra.mxu0 %v10107_v44  ;;  %7561 = vmatpush1.bf16.msra.mxu1 %v10110_v45  ;;  %v10202_v44 = vld [vmem:[%s11143_s18 + $0x1268] ss:$16 sps:$4 sm:$0xff]   ;;  %v10207_v45 = vld [vmem:[%s11143_s18 + $0x1284] ss:$16 sps:$4 sm:$0xff]  }
 0x266   : > { %6906 = vmatprep.subr.bf16.mxu0 %v10115_v46  ;;  %7562 = vmatprep.subr.bf16.mxu1 %v10118_v47  ;;  %v10210_v46 = vld [vmem:[%s11143_s18 + $0x128c] ss:$16 sps:$4 sm:$0xff]   ;;  %v10205_v47 = vld [vmem:[%s11143_s18 + $0x1280] ss:$16 sps:$4 sm:$0xff]  }
 0x269   : > { %6907 = vmatpush1.bf16.msra.mxu0 %v10113_v48  ;;  %7563 = vmatpush1.bf16.msra.mxu1 %v10116_v49  ;;  %v10208_v48 = vld [vmem:[%s11143_s18 + $0x1288] ss:$16 sps:$4 sm:$0xff]   ;;  %v10213_v49 = vld [vmem:[%s11143_s18 + $0x12a4] ss:$16 sps:$4 sm:$0xff]  }
 0x26a   : > { %6908 = vmatprep.subr.bf16.mxu0 %v10121_v50  ;;  %7564 = vmatprep.subr.bf16.mxu1 %v10124_v51  ;;  %v10216_v50 = vld [vmem:[%s11143_s18 + $0x12ac] ss:$16 sps:$4 sm:$0xff]   ;;  %v10211_v51 = vld [vmem:[%s11143_s18 + $0x12a0] ss:$16 sps:$4 sm:$0xff]  }
 0x26d   : > { %6909 = vmatpush1.bf16.msra.mxu0 %v10119_v52  ;;  %7565 = vmatpush1.bf16.msra.mxu1 %v10122_v53  ;;  %v10214_v52 = vld [vmem:[%s11143_s18 + $0x12a8] ss:$16 sps:$4 sm:$0xff]   ;;  %v10219_v53 = vld [vmem:[%s11143_s18 + $0x12c4] ss:$16 sps:$4 sm:$0xff]  }
 0x26e   : > { %6910 = vmatprep.subr.bf16.mxu0 %v10127_v54  ;;  %7566 = vmatprep.subr.bf16.mxu1 %v10130_v55  ;;  %v10222_v54 = vld [vmem:[%s11143_s18 + $0x12cc] ss:$16 sps:$4 sm:$0xff]   ;;  %v10217_v55 = vld [vmem:[%s11143_s18 + $0x12c0] ss:$16 sps:$4 sm:$0xff]  }
 0x271   : > { %6911 = vmatpush1.bf16.msra.mxu0 %v10125_v56  ;;  %7567 = vmatpush1.bf16.msra.mxu1 %v10128_v57  ;;  %v10220_v56 = vld [vmem:[%s11143_s18 + $0x12c8] ss:$16 sps:$4 sm:$0xff]   ;;  %v10225_v57 = vld [vmem:[%s11143_s18 + $0x12e4] ss:$16 sps:$4 sm:$0xff]  }
 0x272   : > { %6912 = vmatprep.subr.bf16.mxu0 %v10133_v58  ;;  %7568 = vmatprep.subr.bf16.mxu1 %v10136_v59  ;;  %v10228_v58 = vld [vmem:[%s11143_s18 + $0x12ec] ss:$16 sps:$4 sm:$0xff]   ;;  %v10223_v59 = vld [vmem:[%s11143_s18 + $0x12e0] ss:$16 sps:$4 sm:$0xff]  }
 0x275   : > { %6913 = vmatpush1.bf16.msra.mxu0 %v10131_v60  ;;  %7569 = vmatpush1.bf16.msra.mxu1 %v10134_v61  ;;  %v10226_v60 = vld [vmem:[%s11143_s18 + $0x12e8] ss:$16 sps:$4 sm:$0xff]   ;;  %v10231_v61 = vld [vmem:[%s11143_s18 + $0x1304] ss:$16 sps:$4 sm:$0xff]  }
 0x276   : > { %6914 = vmatprep.subr.bf16.mxu0 %v10139_v62  ;;  %7570 = vmatprep.subr.bf16.mxu1 %v10142_v63  ;;  %v10234_v62 = vld [vmem:[%s11143_s18 + $0x130c] ss:$16 sps:$4 sm:$0xff]   ;;  %v10229_v63 = vld [vmem:[%s11143_s18 + $0x1300] ss:$16 sps:$4 sm:$0xff]  }
 0x279   : > { %6915 = vmatpush1.bf16.msra.mxu0 %v10137_v0  ;;  %7571 = vmatpush1.bf16.msra.mxu1 %v10140_v1  ;;  %v10232_v0 = vld [vmem:[%s11143_s18 + $0x1308] ss:$16 sps:$4 sm:$0xff]   ;;  %v10237_v1 = vld [vmem:[%s11143_s18 + $0x1324] ss:$16 sps:$4 sm:$0xff]  }
 0x27a   : > { %6916 = vmatprep.subr.bf16.mxu0 %v10145_v2  ;;  %7572 = vmatprep.subr.bf16.mxu1 %v10148_v3  ;;  %v10240_v2 = vld [vmem:[%s11143_s18 + $0x132c] ss:$16 sps:$4 sm:$0xff]   ;;  %v10235_v3 = vld [vmem:[%s11143_s18 + $0x1320] ss:$16 sps:$4 sm:$0xff]  }
 0x27d   : > { %6917 = vmatpush1.bf16.msra.mxu0 %v10143_v4  ;;  %7573 = vmatpush1.bf16.msra.mxu1 %v10146_v5  ;;  %v10238_v4 = vld [vmem:[%s11143_s18 + $0x1328] ss:$16 sps:$4 sm:$0xff]   ;;  %v10243_v5 = vld [vmem:[%s11143_s18 + $0x1344] ss:$16 sps:$4 sm:$0xff]  }
 0x27e   : > { %6918 = vmatprep.subr.bf16.mxu0 %v10151_v6  ;;  %7574 = vmatprep.subr.bf16.mxu1 %v10154_v7  ;;  %v10246_v6 = vld [vmem:[%s11143_s18 + $0x134c] ss:$16 sps:$4 sm:$0xff]   ;;  %v10241_v7 = vld [vmem:[%s11143_s18 + $0x1340] ss:$16 sps:$4 sm:$0xff]  }
 0x281   : > { %6919 = vmatpush1.bf16.msra.mxu0 %v10149_v8  ;;  %7575 = vmatpush1.bf16.msra.mxu1 %v10152_v9  ;;  %v10244_v8 = vld [vmem:[%s11143_s18 + $0x1348] ss:$16 sps:$4 sm:$0xff]   ;;  %v10249_v9 = vld [vmem:[%s11143_s18 + $0x1364] ss:$16 sps:$4 sm:$0xff]  }
 0x282   : > { %6920 = vmatprep.subr.bf16.mxu0 %v10157_v10  ;;  %7576 = vmatprep.subr.bf16.mxu1 %v10160_v12  ;;  %v10252_v10 = vld [vmem:[%s11143_s18 + $0x136c] ss:$16 sps:$4 sm:$0xff]   ;;  %v10247_v12 = vld [vmem:[%s11143_s18 + $0x1360] ss:$16 sps:$4 sm:$0xff]  }
 0x285   : > { %6921 = vmatpush1.bf16.msra.mxu0 %v10155_v13  ;;  %7577 = vmatpush1.bf16.msra.mxu1 %v10158_v15  ;;  %v10250_v13 = vld [vmem:[%s11143_s18 + $0x1368] ss:$16 sps:$4 sm:$0xff]   ;;  %v10255_v15 = vld [vmem:[%s11143_s18 + $0x1384] ss:$16 sps:$4 sm:$0xff]  }
 0x286   : > { %6922 = vmatprep.subr.bf16.mxu0 %v10163_v16  ;;  %7578 = vmatprep.subr.bf16.mxu1 %v10166_v11  ;;  %v10258_v16 = vld [vmem:[%s11143_s18 + $0x138c] ss:$16 sps:$4 sm:$0xff]   ;;  %v10253_v11 = vld [vmem:[%s11143_s18 + $0x1380] ss:$16 sps:$4 sm:$0xff]  }
 0x289   : > { %6923 = vmatpush1.bf16.msra.mxu0 %v10161_v19  ;;  %7579 = vmatpush1.bf16.msra.mxu1 %v10164_v20  ;;  %v10256_v19 = vld [vmem:[%s11143_s18 + $0x1388] ss:$16 sps:$4 sm:$0xff]   ;;  %v10261_v20 = vld [vmem:[%s11143_s18 + $0x13a4] ss:$16 sps:$4 sm:$0xff]  }
 0x28a   : > { %6924 = vmatprep.subr.bf16.mxu0 %v10169_v14  ;;  %7580 = vmatprep.subr.bf16.mxu1 %v10172_v22  ;;  %v10264_v14 = vld [vmem:[%s11143_s18 + $0x13ac] ss:$16 sps:$4 sm:$0xff]   ;;  %v10259_v22 = vld [vmem:[%s11143_s18 + $0x13a0] ss:$16 sps:$4 sm:$0xff]  }
 0x28d   : > { %6925 = vmatpush1.bf16.msra.mxu0 %v10167_v23  ;;  %7581 = vmatpush1.bf16.msra.mxu1 %v10170_v17  ;;  %v10262_v23 = vld [vmem:[%s11143_s18 + $0x13a8] ss:$16 sps:$4 sm:$0xff]   ;;  %v10267_v17 = vld [vmem:[%s11143_s18 + $0x13c4] ss:$16 sps:$4 sm:$0xff]  }
 0x28e   : > { %6926 = vmatprep.subr.bf16.mxu0 %v10175_v25  ;;  %7582 = vmatprep.subr.bf16.mxu1 %v10178_v26  ;;  %v10270_v25 = vld [vmem:[%s11143_s18 + $0x13cc] ss:$16 sps:$4 sm:$0xff]   ;;  %v10265_v26 = vld [vmem:[%s11143_s18 + $0x13c0] ss:$16 sps:$4 sm:$0xff]  }
 0x291   : > { %6927 = vmatpush1.bf16.msra.mxu0 %v10173_v18  ;;  %7583 = vmatpush1.bf16.msra.mxu1 %v10176_v28  ;;  %v10268_v18 = vld [vmem:[%s11143_s18 + $0x13c8] ss:$16 sps:$4 sm:$0xff]   ;;  %v10273_v28 = vld [vmem:[%s11143_s18 + $0x13e4] ss:$16 sps:$4 sm:$0xff]  }
 0x292   : > { %6937 = vmatprep.subr.bf16.mxu0 %v10183_v29  ;;  %7593 = vmatprep.subr.bf16.mxu1 %v10186_v21  ;;  %v10276_v29 = vld [vmem:[%s11143_s18 + $0x13ec] ss:$16 sps:$4 sm:$0xff]   ;;  %v10271_v21 = vld [vmem:[%s11143_s18 + $0x13e0] ss:$16 sps:$4 sm:$0xff]  }
 0x294   : > { %6929 = vmatmul.mubr.bf16.vlgmr.msra.gmra.mrb[0].mxu0 %v8064_v31  ;;  %7585 = vmatmul.mubr.bf16.vlgmr.msra.gmra.mrb[0].mxu1 %v8064_v31  ;;  %v10274_v31 = vld [vmem:[%s11143_s18 + $0x13e8] ss:$16 sps:$4 sm:$0xff]  }
 0x295   : > { %6938 = vmatpush1.bf16.msra.mxu0 %v10181_v32  ;;  %7594 = vmatpush1.bf16.msra.mxu1 %v10184_v24  ;;  %v10281_v32 = vld [vmem:[%s11143_s18 + $0x1404] ss:$16 sps:$4 sm:$0xff]   ;;  %v10284_v24 = vld [vmem:[%s11143_s18 + $0x140c] ss:$16 sps:$4 sm:$0xff]  }
 0x296   : > { %6939 = vmatprep.subr.bf16.mxu0 %v10189_v33  ;;  %7595 = vmatprep.subr.bf16.mxu1 %v10192_v34  ;;  %v8066_v33 = vcombine.low %v11809_v30, %v11809_v30  ;;  %v11884_v34 = vld [vmem:[%s12340_s0 + $0x50] sm:$0xff] }
 0x297   : > { %6969 = vmatprep.mubr.bf16.mxu0 %v8067_v35  ;;  %7625 = vmatprep.mubr.bf16.mxu1 %v8067_v35  ;;  %v10279_v35 = vld [vmem:[%s11143_s18 + $0x1400] ss:$16 sps:$4 sm:$0xff]   ;;  %v8069_v30 = vcombine.high %v11884_v34, %v11884_v34 }
 0x299   : > { %6940 = vmatpush1.bf16.msra.mxu0 %v10187_v27  ;;  %7596 = vmatpush1.bf16.msra.mxu1 %v10190_v36  ;;  %v10282_v27 = vld [vmem:[%s11143_s18 + $0x1408] ss:$16 sps:$4 sm:$0xff]   ;;  %v10287_v36 = vld [vmem:[%s11143_s18 + $0x1424] ss:$16 sps:$4 sm:$0xff]  }
 0x29a   : > { %6941 = vmatprep.subr.bf16.mxu0 %v10195_v37  ;;  %7597 = vmatprep.subr.bf16.mxu1 %v10198_v38  ;;  %v10290_v37 = vld [vmem:[%s11143_s18 + $0x142c] ss:$16 sps:$4 sm:$0xff]   ;;  %v10285_v38 = vld [vmem:[%s11143_s18 + $0x1420] ss:$16 sps:$4 sm:$0xff]  }
 0x29d   : > { %6942 = vmatpush1.bf16.msra.mxu0 %v10193_v39  ;;  %7598 = vmatpush1.bf16.msra.mxu1 %v10196_v40  ;;  %v10288_v39 = vld [vmem:[%s11143_s18 + $0x1428] ss:$16 sps:$4 sm:$0xff]   ;;  %v10293_v40 = vld [vmem:[%s11143_s18 + $0x1444] ss:$16 sps:$4 sm:$0xff]  }
 0x29e   : > { %6943 = vmatprep.subr.bf16.mxu0 %v10201_v41  ;;  %7599 = vmatprep.subr.bf16.mxu1 %v10204_v42  ;;  %v10296_v41 = vld [vmem:[%s11143_s18 + $0x144c] ss:$16 sps:$4 sm:$0xff]   ;;  %v10291_v42 = vld [vmem:[%s11143_s18 + $0x1440] ss:$16 sps:$4 sm:$0xff]  }
 0x2a1   : > { %6944 = vmatpush1.bf16.msra.mxu0 %v10199_v43  ;;  %7600 = vmatpush1.bf16.msra.mxu1 %v10202_v44  ;;  %v10294_v43 = vld [vmem:[%s11143_s18 + $0x1448] ss:$16 sps:$4 sm:$0xff]   ;;  %v10299_v44 = vld [vmem:[%s11143_s18 + $0x1464] ss:$16 sps:$4 sm:$0xff]  }
 0x2a2   : > { %6945 = vmatprep.subr.bf16.mxu0 %v10207_v45  ;;  %7601 = vmatprep.subr.bf16.mxu1 %v10210_v46  ;;  %v10302_v45 = vld [vmem:[%s11143_s18 + $0x146c] ss:$16 sps:$4 sm:$0xff]   ;;  %v10297_v46 = vld [vmem:[%s11143_s18 + $0x1460] ss:$16 sps:$4 sm:$0xff]  }
 0x2a5   : > { %6946 = vmatpush1.bf16.msra.mxu0 %v10205_v47  ;;  %7602 = vmatpush1.bf16.msra.mxu1 %v10208_v48  ;;  %v10300_v47 = vld [vmem:[%s11143_s18 + $0x1468] ss:$16 sps:$4 sm:$0xff]   ;;  %v10305_v48 = vld [vmem:[%s11143_s18 + $0x1484] ss:$16 sps:$4 sm:$0xff]  }
 0x2a6   : > { %6947 = vmatprep.subr.bf16.mxu0 %v10213_v49  ;;  %7603 = vmatprep.subr.bf16.mxu1 %v10216_v50  ;;  %v10308_v49 = vld [vmem:[%s11143_s18 + $0x148c] ss:$16 sps:$4 sm:$0xff]   ;;  %v10303_v50 = vld [vmem:[%s11143_s18 + $0x1480] ss:$16 sps:$4 sm:$0xff]  }
 0x2a9   : > { %6948 = vmatpush1.bf16.msra.mxu0 %v10211_v51  ;;  %7604 = vmatpush1.bf16.msra.mxu1 %v10214_v52  ;;  %v10306_v51 = vld [vmem:[%s11143_s18 + $0x1488] ss:$16 sps:$4 sm:$0xff]   ;;  %v10311_v52 = vld [vmem:[%s11143_s18 + $0x14a4] ss:$16 sps:$4 sm:$0xff]  }
 0x2aa   : > { %6949 = vmatprep.subr.bf16.mxu0 %v10219_v53  ;;  %7605 = vmatprep.subr.bf16.mxu1 %v10222_v54  ;;  %v10314_v53 = vld [vmem:[%s11143_s18 + $0x14ac] ss:$16 sps:$4 sm:$0xff]   ;;  %v10309_v54 = vld [vmem:[%s11143_s18 + $0x14a0] ss:$16 sps:$4 sm:$0xff]  }
 0x2ad   : > { %6950 = vmatpush1.bf16.msra.mxu0 %v10217_v55  ;;  %7606 = vmatpush1.bf16.msra.mxu1 %v10220_v56  ;;  %v10312_v55 = vld [vmem:[%s11143_s18 + $0x14a8] ss:$16 sps:$4 sm:$0xff]   ;;  %v10317_v56 = vld [vmem:[%s11143_s18 + $0x14c4] ss:$16 sps:$4 sm:$0xff]  }
 0x2ae   : > { %6951 = vmatprep.subr.bf16.mxu0 %v10225_v57  ;;  %7607 = vmatprep.subr.bf16.mxu1 %v10228_v58  ;;  %v10320_v57 = vld [vmem:[%s11143_s18 + $0x14cc] ss:$16 sps:$4 sm:$0xff]   ;;  %v10315_v58 = vld [vmem:[%s11143_s18 + $0x14c0] ss:$16 sps:$4 sm:$0xff]  }
 0x2b1   : > { %6952 = vmatpush1.bf16.msra.mxu0 %v10223_v59  ;;  %7608 = vmatpush1.bf16.msra.mxu1 %v10226_v60  ;;  %v10318_v59 = vld [vmem:[%s11143_s18 + $0x14c8] ss:$16 sps:$4 sm:$0xff]   ;;  %v10323_v60 = vld [vmem:[%s11143_s18 + $0x14e4] ss:$16 sps:$4 sm:$0xff]  }
 0x2b2   : > { %6953 = vmatprep.subr.bf16.mxu0 %v10231_v61  ;;  %7609 = vmatprep.subr.bf16.mxu1 %v10234_v62  ;;  %v10326_v61 = vld [vmem:[%s11143_s18 + $0x14ec] ss:$16 sps:$4 sm:$0xff]   ;;  %v10321_v62 = vld [vmem:[%s11143_s18 + $0x14e0] ss:$16 sps:$4 sm:$0xff]  }
 0x2b5   : > { %6954 = vmatpush1.bf16.msra.mxu0 %v10229_v63  ;;  %7610 = vmatpush1.bf16.msra.mxu1 %v10232_v0  ;;  %v10324_v63 = vld [vmem:[%s11143_s18 + $0x14e8] ss:$16 sps:$4 sm:$0xff]   ;;  %v10329_v0 = vld [vmem:[%s11143_s18 + $0x1504] ss:$16 sps:$4 sm:$0xff]  }
 0x2b6   : > { %6955 = vmatprep.subr.bf16.mxu0 %v10237_v1  ;;  %7611 = vmatprep.subr.bf16.mxu1 %v10240_v2  ;;  %v10332_v1 = vld [vmem:[%s11143_s18 + $0x150c] ss:$16 sps:$4 sm:$0xff]   ;;  %v10327_v2 = vld [vmem:[%s11143_s18 + $0x1500] ss:$16 sps:$4 sm:$0xff]  }
 0x2b9   : > { %6956 = vmatpush1.bf16.msra.mxu0 %v10235_v3  ;;  %7612 = vmatpush1.bf16.msra.mxu1 %v10238_v4  ;;  %v10330_v3 = vld [vmem:[%s11143_s18 + $0x1508] ss:$16 sps:$4 sm:$0xff]   ;;  %v10335_v4 = vld [vmem:[%s11143_s18 + $0x1524] ss:$16 sps:$4 sm:$0xff]  }
 0x2ba   : > { %6957 = vmatprep.subr.bf16.mxu0 %v10243_v5  ;;  %7613 = vmatprep.subr.bf16.mxu1 %v10246_v6  ;;  %v10338_v5 = vld [vmem:[%s11143_s18 + $0x152c] ss:$16 sps:$4 sm:$0xff]   ;;  %v10333_v6 = vld [vmem:[%s11143_s18 + $0x1520] ss:$16 sps:$4 sm:$0xff]  }
 0x2bd   : > { %6958 = vmatpush1.bf16.msra.mxu0 %v10241_v7  ;;  %7614 = vmatpush1.bf16.msra.mxu1 %v10244_v8  ;;  %v10336_v7 = vld [vmem:[%s11143_s18 + $0x1528] ss:$16 sps:$4 sm:$0xff]   ;;  %v10341_v8 = vld [vmem:[%s11143_s18 + $0x1544] ss:$16 sps:$4 sm:$0xff]  }
 0x2be   : > { %6959 = vmatprep.subr.bf16.mxu0 %v10249_v9  ;;  %7615 = vmatprep.subr.bf16.mxu1 %v10252_v10  ;;  %v10344_v9 = vld [vmem:[%s11143_s18 + $0x154c] ss:$16 sps:$4 sm:$0xff]   ;;  %v10339_v10 = vld [vmem:[%s11143_s18 + $0x1540] ss:$16 sps:$4 sm:$0xff]  }
 0x2c1   : > { %6960 = vmatpush1.bf16.msra.mxu0 %v10247_v12  ;;  %7616 = vmatpush1.bf16.msra.mxu1 %v10250_v13  ;;  %v10342_v12 = vld [vmem:[%s11143_s18 + $0x1548] ss:$16 sps:$4 sm:$0xff]   ;;  %v10347_v13 = vld [vmem:[%s11143_s18 + $0x1564] ss:$16 sps:$4 sm:$0xff]  }
 0x2c2   : > { %6961 = vmatprep.subr.bf16.mxu0 %v10255_v15  ;;  %7617 = vmatprep.subr.bf16.mxu1 %v10258_v16  ;;  %v10350_v15 = vld [vmem:[%s11143_s18 + $0x156c] ss:$16 sps:$4 sm:$0xff]   ;;  %v10345_v16 = vld [vmem:[%s11143_s18 + $0x1560] ss:$16 sps:$4 sm:$0xff]  }
 0x2c5   : > { %6962 = vmatpush1.bf16.msra.mxu0 %v10253_v11  ;;  %7618 = vmatpush1.bf16.msra.mxu1 %v10256_v19  ;;  %v10348_v11 = vld [vmem:[%s11143_s18 + $0x1568] ss:$16 sps:$4 sm:$0xff]   ;;  %v10353_v19 = vld [vmem:[%s11143_s18 + $0x1584] ss:$16 sps:$4 sm:$0xff]  }
 0x2c6   : > { %6963 = vmatprep.subr.bf16.mxu0 %v10261_v20  ;;  %7619 = vmatprep.subr.bf16.mxu1 %v10264_v14  ;;  %v10356_v20 = vld [vmem:[%s11143_s18 + $0x158c] ss:$16 sps:$4 sm:$0xff]   ;;  %v10351_v14 = vld [vmem:[%s11143_s18 + $0x1580] ss:$16 sps:$4 sm:$0xff]  }
 0x2c9   : > { %6964 = vmatpush1.bf16.msra.mxu0 %v10259_v22  ;;  %7620 = vmatpush1.bf16.msra.mxu1 %v10262_v23  ;;  %v10354_v22 = vld [vmem:[%s11143_s18 + $0x1588] ss:$16 sps:$4 sm:$0xff]   ;;  %v10359_v23 = vld [vmem:[%s11143_s18 + $0x15a4] ss:$16 sps:$4 sm:$0xff]  }
 0x2ca   : > { %6965 = vmatprep.subr.bf16.mxu0 %v10267_v17  ;;  %7621 = vmatprep.subr.bf16.mxu1 %v10270_v25  ;;  %v10362_v17 = vld [vmem:[%s11143_s18 + $0x15ac] ss:$16 sps:$4 sm:$0xff]   ;;  %v10357_v25 = vld [vmem:[%s11143_s18 + $0x15a0] ss:$16 sps:$4 sm:$0xff]  }
 0x2cd   : > { %6966 = vmatpush1.bf16.msra.mxu0 %v10265_v26  ;;  %7622 = vmatpush1.bf16.msra.mxu1 %v10268_v18  ;;  %v10360_v26 = vld [vmem:[%s11143_s18 + $0x15a8] ss:$16 sps:$4 sm:$0xff]   ;;  %v10365_v18 = vld [vmem:[%s11143_s18 + $0x15c4] ss:$16 sps:$4 sm:$0xff]  }
 0x2ce   : > { %6967 = vmatprep.subr.bf16.mxu0 %v10273_v28  ;;  %7623 = vmatprep.subr.bf16.mxu1 %v10276_v29  ;;  %v10368_v28 = vld [vmem:[%s11143_s18 + $0x15cc] ss:$16 sps:$4 sm:$0xff]   ;;  %v10363_v29 = vld [vmem:[%s11143_s18 + $0x15c0] ss:$16 sps:$4 sm:$0xff]  }
 0x2d1   : > { %6968 = vmatpush1.bf16.msra.mxu0 %v10271_v21  ;;  %7624 = vmatpush1.bf16.msra.mxu1 %v10274_v31  ;;  %v10366_v21 = vld [vmem:[%s11143_s18 + $0x15c8] ss:$16 sps:$4 sm:$0xff]   ;;  %v10371_v31 = vld [vmem:[%s11143_s18 + $0x15e4] ss:$16 sps:$4 sm:$0xff]  }
 0x2d2   : > { %6978 = vmatprep.subr.bf16.mxu0 %v10281_v32  ;;  %7634 = vmatprep.subr.bf16.mxu1 %v10284_v24  ;;  %v10374_v32 = vld [vmem:[%s11143_s18 + $0x15ec] ss:$16 sps:$4 sm:$0xff]   ;;  %v10369_v24 = vld [vmem:[%s11143_s18 + $0x15e0] ss:$16 sps:$4 sm:$0xff]  }
 0x2d4   : > { %6970 = vmatmul.mubr.bf16.vlgmr.msra.gmra.mrb[0].mxu0 %v8066_v33  ;;  %7626 = vmatmul.mubr.bf16.vlgmr.msra.gmra.mrb[0].mxu1 %v8066_v33  ;;  %v10372_v33 = vld [vmem:[%s11143_s18 + $0x15e8] ss:$16 sps:$4 sm:$0xff]  }
 0x2d5   : > { %6979 = vmatpush1.bf16.msra.mxu0 %v10279_v35  ;;  %7635 = vmatpush1.bf16.msra.mxu1 %v10282_v27  ;;  %v10379_v35 = vld [vmem:[%s11143_s18 + $0x1604] ss:$16 sps:$4 sm:$0xff]   ;;  %v10382_v27 = vld [vmem:[%s11143_s18 + $0x160c] ss:$16 sps:$4 sm:$0xff]  }
 0x2d6   : > { %6980 = vmatprep.subr.bf16.mxu0 %v10287_v36  ;;  %7636 = vmatprep.subr.bf16.mxu1 %v10290_v37  ;;  %v8068_v36 = vcombine.low %v11884_v34, %v11884_v34  ;;  %v11957_v37 = vld [vmem:[%s12340_s0 + $0x58] sm:$0xff] }
 0x2d7   : > { %7010 = vmatprep.mubr.bf16.mxu0 %v8069_v30  ;;  %7666 = vmatprep.mubr.bf16.mxu1 %v8069_v30  ;;  %v10377_v30 = vld [vmem:[%s11143_s18 + $0x1600] ss:$16 sps:$4 sm:$0xff]   ;;  %v8071_v34 = vcombine.high %v11957_v37, %v11957_v37 }
 0x2d9   : > { %6981 = vmatpush1.bf16.msra.mxu0 %v10285_v38  ;;  %7637 = vmatpush1.bf16.msra.mxu1 %v10288_v39  ;;  %v10380_v38 = vld [vmem:[%s11143_s18 + $0x1608] ss:$16 sps:$4 sm:$0xff]   ;;  %v10385_v39 = vld [vmem:[%s11143_s18 + $0x1624] ss:$16 sps:$4 sm:$0xff]  }
 0x2da   : > { %6982 = vmatprep.subr.bf16.mxu0 %v10293_v40  ;;  %7638 = vmatprep.subr.bf16.mxu1 %v10296_v41  ;;  %v10388_v40 = vld [vmem:[%s11143_s18 + $0x162c] ss:$16 sps:$4 sm:$0xff]   ;;  %v10383_v41 = vld [vmem:[%s11143_s18 + $0x1620] ss:$16 sps:$4 sm:$0xff]  }
 0x2dd   : > { %6983 = vmatpush1.bf16.msra.mxu0 %v10291_v42  ;;  %7639 = vmatpush1.bf16.msra.mxu1 %v10294_v43  ;;  %v10386_v42 = vld [vmem:[%s11143_s18 + $0x1628] ss:$16 sps:$4 sm:$0xff]   ;;  %v10391_v43 = vld [vmem:[%s11143_s18 + $0x1644] ss:$16 sps:$4 sm:$0xff]  }
 0x2de   : > { %6984 = vmatprep.subr.bf16.mxu0 %v10299_v44  ;;  %7640 = vmatprep.subr.bf16.mxu1 %v10302_v45  ;;  %v10394_v44 = vld [vmem:[%s11143_s18 + $0x164c] ss:$16 sps:$4 sm:$0xff]   ;;  %v10389_v45 = vld [vmem:[%s11143_s18 + $0x1640] ss:$16 sps:$4 sm:$0xff]  }
 0x2e1   : > { %6985 = vmatpush1.bf16.msra.mxu0 %v10297_v46  ;;  %7641 = vmatpush1.bf16.msra.mxu1 %v10300_v47  ;;  %v10392_v46 = vld [vmem:[%s11143_s18 + $0x1648] ss:$16 sps:$4 sm:$0xff]   ;;  %v10397_v47 = vld [vmem:[%s11143_s18 + $0x1664] ss:$16 sps:$4 sm:$0xff]  }
 0x2e2   : > { %6986 = vmatprep.subr.bf16.mxu0 %v10305_v48  ;;  %7642 = vmatprep.subr.bf16.mxu1 %v10308_v49  ;;  %v10400_v48 = vld [vmem:[%s11143_s18 + $0x166c] ss:$16 sps:$4 sm:$0xff]   ;;  %v10395_v49 = vld [vmem:[%s11143_s18 + $0x1660] ss:$16 sps:$4 sm:$0xff]  }
 0x2e5   : > { %6987 = vmatpush1.bf16.msra.mxu0 %v10303_v50  ;;  %7643 = vmatpush1.bf16.msra.mxu1 %v10306_v51  ;;  %v10398_v50 = vld [vmem:[%s11143_s18 + $0x1668] ss:$16 sps:$4 sm:$0xff]   ;;  %v10403_v51 = vld [vmem:[%s11143_s18 + $0x1684] ss:$16 sps:$4 sm:$0xff]  }
 0x2e6   : > { %6988 = vmatprep.subr.bf16.mxu0 %v10311_v52  ;;  %7644 = vmatprep.subr.bf16.mxu1 %v10314_v53  ;;  %v10406_v52 = vld [vmem:[%s11143_s18 + $0x168c] ss:$16 sps:$4 sm:$0xff]   ;;  %v10401_v53 = vld [vmem:[%s11143_s18 + $0x1680] ss:$16 sps:$4 sm:$0xff]  }
 0x2e9   : > { %6989 = vmatpush1.bf16.msra.mxu0 %v10309_v54  ;;  %7645 = vmatpush1.bf16.msra.mxu1 %v10312_v55  ;;  %v10404_v54 = vld [vmem:[%s11143_s18 + $0x1688] ss:$16 sps:$4 sm:$0xff]   ;;  %v10409_v55 = vld [vmem:[%s11143_s18 + $0x16a4] ss:$16 sps:$4 sm:$0xff]  }
 0x2ea   : > { %6990 = vmatprep.subr.bf16.mxu0 %v10317_v56  ;;  %7646 = vmatprep.subr.bf16.mxu1 %v10320_v57  ;;  %v10412_v56 = vld [vmem:[%s11143_s18 + $0x16ac] ss:$16 sps:$4 sm:$0xff]   ;;  %v10407_v57 = vld [vmem:[%s11143_s18 + $0x16a0] ss:$16 sps:$4 sm:$0xff]  }
 0x2ed   : > { %6991 = vmatpush1.bf16.msra.mxu0 %v10315_v58  ;;  %7647 = vmatpush1.bf16.msra.mxu1 %v10318_v59  ;;  %v10410_v58 = vld [vmem:[%s11143_s18 + $0x16a8] ss:$16 sps:$4 sm:$0xff]   ;;  %v10415_v59 = vld [vmem:[%s11143_s18 + $0x16c4] ss:$16 sps:$4 sm:$0xff]  }
 0x2ee   : > { %6992 = vmatprep.subr.bf16.mxu0 %v10323_v60  ;;  %7648 = vmatprep.subr.bf16.mxu1 %v10326_v61  ;;  %v10418_v60 = vld [vmem:[%s11143_s18 + $0x16cc] ss:$16 sps:$4 sm:$0xff]   ;;  %v10413_v61 = vld [vmem:[%s11143_s18 + $0x16c0] ss:$16 sps:$4 sm:$0xff]  }
 0x2f1   : > { %6993 = vmatpush1.bf16.msra.mxu0 %v10321_v62  ;;  %7649 = vmatpush1.bf16.msra.mxu1 %v10324_v63  ;;  %v10416_v62 = vld [vmem:[%s11143_s18 + $0x16c8] ss:$16 sps:$4 sm:$0xff]   ;;  %v10421_v63 = vld [vmem:[%s11143_s18 + $0x16e4] ss:$16 sps:$4 sm:$0xff]  }
 0x2f2   : > { %6994 = vmatprep.subr.bf16.mxu0 %v10329_v0  ;;  %7650 = vmatprep.subr.bf16.mxu1 %v10332_v1  ;;  %v10424_v0 = vld [vmem:[%s11143_s18 + $0x16ec] ss:$16 sps:$4 sm:$0xff]   ;;  %v10419_v1 = vld [vmem:[%s11143_s18 + $0x16e0] ss:$16 sps:$4 sm:$0xff]  }
 0x2f5   : > { %6995 = vmatpush1.bf16.msra.mxu0 %v10327_v2  ;;  %7651 = vmatpush1.bf16.msra.mxu1 %v10330_v3  ;;  %v10422_v2 = vld [vmem:[%s11143_s18 + $0x16e8] ss:$16 sps:$4 sm:$0xff]   ;;  %v10427_v3 = vld [vmem:[%s11143_s18 + $0x1704] ss:$16 sps:$4 sm:$0xff]  }
 0x2f6   : > { %6996 = vmatprep.subr.bf16.mxu0 %v10335_v4  ;;  %7652 = vmatprep.subr.bf16.mxu1 %v10338_v5  ;;  %v10430_v4 = vld [vmem:[%s11143_s18 + $0x170c] ss:$16 sps:$4 sm:$0xff]   ;;  %v10425_v5 = vld [vmem:[%s11143_s18 + $0x1700] ss:$16 sps:$4 sm:$0xff]  }
 0x2f9   : > { %6997 = vmatpush1.bf16.msra.mxu0 %v10333_v6  ;;  %7653 = vmatpush1.bf16.msra.mxu1 %v10336_v7  ;;  %v10428_v6 = vld [vmem:[%s11143_s18 + $0x1708] ss:$16 sps:$4 sm:$0xff]   ;;  %v10433_v7 = vld [vmem:[%s11143_s18 + $0x1724] ss:$16 sps:$4 sm:$0xff]  }
 0x2fa   : > { %6998 = vmatprep.subr.bf16.mxu0 %v10341_v8  ;;  %7654 = vmatprep.subr.bf16.mxu1 %v10344_v9  ;;  %v10436_v8 = vld [vmem:[%s11143_s18 + $0x172c] ss:$16 sps:$4 sm:$0xff]   ;;  %v10431_v9 = vld [vmem:[%s11143_s18 + $0x1720] ss:$16 sps:$4 sm:$0xff]  }
 0x2fd   : > { %6999 = vmatpush1.bf16.msra.mxu0 %v10339_v10  ;;  %7655 = vmatpush1.bf16.msra.mxu1 %v10342_v12  ;;  %v10434_v10 = vld [vmem:[%s11143_s18 + $0x1728] ss:$16 sps:$4 sm:$0xff]   ;;  %v10439_v12 = vld [vmem:[%s11143_s18 + $0x1744] ss:$16 sps:$4 sm:$0xff]  }
 0x2fe   : > { %7000 = vmatprep.subr.bf16.mxu0 %v10347_v13  ;;  %7656 = vmatprep.subr.bf16.mxu1 %v10350_v15  ;;  %v10442_v13 = vld [vmem:[%s11143_s18 + $0x174c] ss:$16 sps:$4 sm:$0xff]   ;;  %v10437_v15 = vld [vmem:[%s11143_s18 + $0x1740] ss:$16 sps:$4 sm:$0xff]  }
 0x301   : > { %7001 = vmatpush1.bf16.msra.mxu0 %v10345_v16  ;;  %7657 = vmatpush1.bf16.msra.mxu1 %v10348_v11  ;;  %v10440_v16 = vld [vmem:[%s11143_s18 + $0x1748] ss:$16 sps:$4 sm:$0xff]   ;;  %v10445_v11 = vld [vmem:[%s11143_s18 + $0x1764] ss:$16 sps:$4 sm:$0xff]  }
 0x302   : > { %7002 = vmatprep.subr.bf16.mxu0 %v10353_v19  ;;  %7658 = vmatprep.subr.bf16.mxu1 %v10356_v20  ;;  %v10448_v19 = vld [vmem:[%s11143_s18 + $0x176c] ss:$16 sps:$4 sm:$0xff]   ;;  %v10443_v20 = vld [vmem:[%s11143_s18 + $0x1760] ss:$16 sps:$4 sm:$0xff]  }
 0x305   : > { %7003 = vmatpush1.bf16.msra.mxu0 %v10351_v14  ;;  %7659 = vmatpush1.bf16.msra.mxu1 %v10354_v22  ;;  %v10446_v14 = vld [vmem:[%s11143_s18 + $0x1768] ss:$16 sps:$4 sm:$0xff]   ;;  %v10451_v22 = vld [vmem:[%s11143_s18 + $0x1784] ss:$16 sps:$4 sm:$0xff]  }
 0x306   : > { %7004 = vmatprep.subr.bf16.mxu0 %v10359_v23  ;;  %7660 = vmatprep.subr.bf16.mxu1 %v10362_v17  ;;  %v10454_v23 = vld [vmem:[%s11143_s18 + $0x178c] ss:$16 sps:$4 sm:$0xff]   ;;  %v10449_v17 = vld [vmem:[%s11143_s18 + $0x1780] ss:$16 sps:$4 sm:$0xff]  }
 0x309   : > { %7005 = vmatpush1.bf16.msra.mxu0 %v10357_v25  ;;  %7661 = vmatpush1.bf16.msra.mxu1 %v10360_v26  ;;  %v10452_v25 = vld [vmem:[%s11143_s18 + $0x1788] ss:$16 sps:$4 sm:$0xff]   ;;  %v10457_v26 = vld [vmem:[%s11143_s18 + $0x17a4] ss:$16 sps:$4 sm:$0xff]  }
 0x30a   : > { %7006 = vmatprep.subr.bf16.mxu0 %v10365_v18  ;;  %7662 = vmatprep.subr.bf16.mxu1 %v10368_v28  ;;  %v10460_v18 = vld [vmem:[%s11143_s18 + $0x17ac] ss:$16 sps:$4 sm:$0xff]   ;;  %v10455_v28 = vld [vmem:[%s11143_s18 + $0x17a0] ss:$16 sps:$4 sm:$0xff]  }
 0x30d   : > { %7007 = vmatpush1.bf16.msra.mxu0 %v10363_v29  ;;  %7663 = vmatpush1.bf16.msra.mxu1 %v10366_v21  ;;  %v10458_v29 = vld [vmem:[%s11143_s18 + $0x17a8] ss:$16 sps:$4 sm:$0xff]   ;;  %v10463_v21 = vld [vmem:[%s11143_s18 + $0x17c4] ss:$16 sps:$4 sm:$0xff]  }
 0x30e   : > { %7008 = vmatprep.subr.bf16.mxu0 %v10371_v31  ;;  %7664 = vmatprep.subr.bf16.mxu1 %v10374_v32  ;;  %v10466_v31 = vld [vmem:[%s11143_s18 + $0x17cc] ss:$16 sps:$4 sm:$0xff]   ;;  %v10461_v32 = vld [vmem:[%s11143_s18 + $0x17c0] ss:$16 sps:$4 sm:$0xff]  }
 0x311   : > { %7009 = vmatpush1.bf16.msra.mxu0 %v10369_v24  ;;  %7665 = vmatpush1.bf16.msra.mxu1 %v10372_v33  ;;  %v10464_v24 = vld [vmem:[%s11143_s18 + $0x17c8] ss:$16 sps:$4 sm:$0xff]   ;;  %v10469_v33 = vld [vmem:[%s11143_s18 + $0x17e4] ss:$16 sps:$4 sm:$0xff]  }
 0x312   : > { %7019 = vmatprep.subr.bf16.mxu0 %v10379_v35  ;;  %7675 = vmatprep.subr.bf16.mxu1 %v10382_v27  ;;  %v10472_v35 = vld [vmem:[%s11143_s18 + $0x17ec] ss:$16 sps:$4 sm:$0xff]   ;;  %v10467_v27 = vld [vmem:[%s11143_s18 + $0x17e0] ss:$16 sps:$4 sm:$0xff]  }
 0x314   : > { %7011 = vmatmul.mubr.bf16.vlgmr.msra.gmra.mrb[0].mxu0 %v8068_v36  ;;  %7667 = vmatmul.mubr.bf16.vlgmr.msra.gmra.mrb[0].mxu1 %v8068_v36  ;;  %v10470_v36 = vld [vmem:[%s11143_s18 + $0x17e8] ss:$16 sps:$4 sm:$0xff]  }
 0x315   : > { %7020 = vmatpush1.bf16.msra.mxu0 %v10377_v30  ;;  %7676 = vmatpush1.bf16.msra.mxu1 %v10380_v38  ;;  %v10477_v30 = vld [vmem:[%s11143_s18 + $0x1804] ss:$16 sps:$4 sm:$0xff]   ;;  %v10480_v38 = vld [vmem:[%s11143_s18 + $0x180c] ss:$16 sps:$4 sm:$0xff]  }
 0x316   : > { %7021 = vmatprep.subr.bf16.mxu0 %v10385_v39  ;;  %7677 = vmatprep.subr.bf16.mxu1 %v10388_v40  ;;  %v8070_v39 = vcombine.low %v11957_v37, %v11957_v37  ;;  %v12030_v40 = vld [vmem:[%s12340_s0 + $0x60] sm:$0xff] }
 0x317   : > { %7051 = vmatprep.mubr.bf16.mxu0 %v8071_v34  ;;  %7707 = vmatprep.mubr.bf16.mxu1 %v8071_v34  ;;  %v10475_v34 = vld [vmem:[%s11143_s18 + $0x1800] ss:$16 sps:$4 sm:$0xff]   ;;  %v8073_v37 = vcombine.high %v12030_v40, %v12030_v40 }
 0x319   : > { %7022 = vmatpush1.bf16.msra.mxu0 %v10383_v41  ;;  %7678 = vmatpush1.bf16.msra.mxu1 %v10386_v42  ;;  %v10478_v41 = vld [vmem:[%s11143_s18 + $0x1808] ss:$16 sps:$4 sm:$0xff]   ;;  %v10483_v42 = vld [vmem:[%s11143_s18 + $0x1824] ss:$16 sps:$4 sm:$0xff]  }
 0x31a   : > { %7023 = vmatprep.subr.bf16.mxu0 %v10391_v43  ;;  %7679 = vmatprep.subr.bf16.mxu1 %v10394_v44  ;;  %v10486_v43 = vld [vmem:[%s11143_s18 + $0x182c] ss:$16 sps:$4 sm:$0xff]   ;;  %v10481_v44 = vld [vmem:[%s11143_s18 + $0x1820] ss:$16 sps:$4 sm:$0xff]  }
 0x31d   : > { %7024 = vmatpush1.bf16.msra.mxu0 %v10389_v45  ;;  %7680 = vmatpush1.bf16.msra.mxu1 %v10392_v46  ;;  %v10484_v45 = vld [vmem:[%s11143_s18 + $0x1828] ss:$16 sps:$4 sm:$0xff]   ;;  %v10489_v46 = vld [vmem:[%s11143_s18 + $0x1844] ss:$16 sps:$4 sm:$0xff]  }
 0x31e   : > { %7025 = vmatprep.subr.bf16.mxu0 %v10397_v47  ;;  %7681 = vmatprep.subr.bf16.mxu1 %v10400_v48  ;;  %v10492_v47 = vld [vmem:[%s11143_s18 + $0x184c] ss:$16 sps:$4 sm:$0xff]   ;;  %v10487_v48 = vld [vmem:[%s11143_s18 + $0x1840] ss:$16 sps:$4 sm:$0xff]  }
 0x321   : > { %7026 = vmatpush1.bf16.msra.mxu0 %v10395_v49  ;;  %7682 = vmatpush1.bf16.msra.mxu1 %v10398_v50  ;;  %v10490_v49 = vld [vmem:[%s11143_s18 + $0x1848] ss:$16 sps:$4 sm:$0xff]   ;;  %v10495_v50 = vld [vmem:[%s11143_s18 + $0x1864] ss:$16 sps:$4 sm:$0xff]  }
 0x322   : > { %7027 = vmatprep.subr.bf16.mxu0 %v10403_v51  ;;  %7683 = vmatprep.subr.bf16.mxu1 %v10406_v52  ;;  %v10498_v51 = vld [vmem:[%s11143_s18 + $0x186c] ss:$16 sps:$4 sm:$0xff]   ;;  %v10493_v52 = vld [vmem:[%s11143_s18 + $0x1860] ss:$16 sps:$4 sm:$0xff]  }
 0x325   : > { %7028 = vmatpush1.bf16.msra.mxu0 %v10401_v53  ;;  %7684 = vmatpush1.bf16.msra.mxu1 %v10404_v54  ;;  %v10496_v53 = vld [vmem:[%s11143_s18 + $0x1868] ss:$16 sps:$4 sm:$0xff]   ;;  %v10501_v54 = vld [vmem:[%s11143_s18 + $0x1884] ss:$16 sps:$4 sm:$0xff]  }
 0x326   : > { %7029 = vmatprep.subr.bf16.mxu0 %v10409_v55  ;;  %7685 = vmatprep.subr.bf16.mxu1 %v10412_v56  ;;  %v10504_v55 = vld [vmem:[%s11143_s18 + $0x188c] ss:$16 sps:$4 sm:$0xff]   ;;  %v10499_v56 = vld [vmem:[%s11143_s18 + $0x1880] ss:$16 sps:$4 sm:$0xff]  }
 0x329   : > { %7030 = vmatpush1.bf16.msra.mxu0 %v10407_v57  ;;  %7686 = vmatpush1.bf16.msra.mxu1 %v10410_v58  ;;  %v10502_v57 = vld [vmem:[%s11143_s18 + $0x1888] ss:$16 sps:$4 sm:$0xff]   ;;  %v10507_v58 = vld [vmem:[%s11143_s18 + $0x18a4] ss:$16 sps:$4 sm:$0xff]  }
 0x32a   : > { %7031 = vmatprep.subr.bf16.mxu0 %v10415_v59  ;;  %7687 = vmatprep.subr.bf16.mxu1 %v10418_v60  ;;  %v10510_v59 = vld [vmem:[%s11143_s18 + $0x18ac] ss:$16 sps:$4 sm:$0xff]   ;;  %v10505_v60 = vld [vmem:[%s11143_s18 + $0x18a0] ss:$16 sps:$4 sm:$0xff]  }
 0x32d   : > { %7032 = vmatpush1.bf16.msra.mxu0 %v10413_v61  ;;  %7688 = vmatpush1.bf16.msra.mxu1 %v10416_v62  ;;  %v10508_v61 = vld [vmem:[%s11143_s18 + $0x18a8] ss:$16 sps:$4 sm:$0xff]   ;;  %v10513_v62 = vld [vmem:[%s11143_s18 + $0x18c4] ss:$16 sps:$4 sm:$0xff]  }
 0x32e   : > { %7033 = vmatprep.subr.bf16.mxu0 %v10421_v63  ;;  %7689 = vmatprep.subr.bf16.mxu1 %v10424_v0  ;;  %v10516_v63 = vld [vmem:[%s11143_s18 + $0x18cc] ss:$16 sps:$4 sm:$0xff]   ;;  %v10511_v0 = vld [vmem:[%s11143_s18 + $0x18c0] ss:$16 sps:$4 sm:$0xff]  }
 0x331   : > { %7034 = vmatpush1.bf16.msra.mxu0 %v10419_v1  ;;  %7690 = vmatpush1.bf16.msra.mxu1 %v10422_v2  ;;  %v10514_v1 = vld [vmem:[%s11143_s18 + $0x18c8] ss:$16 sps:$4 sm:$0xff]   ;;  %v10519_v2 = vld [vmem:[%s11143_s18 + $0x18e4] ss:$16 sps:$4 sm:$0xff]  }
 0x332   : > { %7035 = vmatprep.subr.bf16.mxu0 %v10427_v3  ;;  %7691 = vmatprep.subr.bf16.mxu1 %v10430_v4  ;;  %v10522_v3 = vld [vmem:[%s11143_s18 + $0x18ec] ss:$16 sps:$4 sm:$0xff]   ;;  %v10517_v4 = vld [vmem:[%s11143_s18 + $0x18e0] ss:$16 sps:$4 sm:$0xff]  }
 0x335   : > { %7036 = vmatpush1.bf16.msra.mxu0 %v10425_v5  ;;  %7692 = vmatpush1.bf16.msra.mxu1 %v10428_v6  ;;  %v10520_v5 = vld [vmem:[%s11143_s18 + $0x18e8] ss:$16 sps:$4 sm:$0xff]   ;;  %v10525_v6 = vld [vmem:[%s11143_s18 + $0x1904] ss:$16 sps:$4 sm:$0xff]  }
 0x336   : > { %7037 = vmatprep.subr.bf16.mxu0 %v10433_v7  ;;  %7693 = vmatprep.subr.bf16.mxu1 %v10436_v8  ;;  %v10528_v7 = vld [vmem:[%s11143_s18 + $0x190c] ss:$16 sps:$4 sm:$0xff]   ;;  %v10523_v8 = vld [vmem:[%s11143_s18 + $0x1900] ss:$16 sps:$4 sm:$0xff]  }
 0x339   : > { %7038 = vmatpush1.bf16.msra.mxu0 %v10431_v9  ;;  %7694 = vmatpush1.bf16.msra.mxu1 %v10434_v10  ;;  %v10526_v9 = vld [vmem:[%s11143_s18 + $0x1908] ss:$16 sps:$4 sm:$0xff]   ;;  %v10531_v10 = vld [vmem:[%s11143_s18 + $0x1924] ss:$16 sps:$4 sm:$0xff]  }
 0x33a   : > { %7039 = vmatprep.subr.bf16.mxu0 %v10439_v12  ;;  %7695 = vmatprep.subr.bf16.mxu1 %v10442_v13  ;;  %v10534_v12 = vld [vmem:[%s11143_s18 + $0x192c] ss:$16 sps:$4 sm:$0xff]   ;;  %v10529_v13 = vld [vmem:[%s11143_s18 + $0x1920] ss:$16 sps:$4 sm:$0xff]  }
 0x33d   : > { %7040 = vmatpush1.bf16.msra.mxu0 %v10437_v15  ;;  %7696 = vmatpush1.bf16.msra.mxu1 %v10440_v16  ;;  %v10532_v15 = vld [vmem:[%s11143_s18 + $0x1928] ss:$16 sps:$4 sm:$0xff]   ;;  %v10537_v16 = vld [vmem:[%s11143_s18 + $0x1944] ss:$16 sps:$4 sm:$0xff]  }
 0x33e   : > { %7041 = vmatprep.subr.bf16.mxu0 %v10445_v11  ;;  %7697 = vmatprep.subr.bf16.mxu1 %v10448_v19  ;;  %v10540_v11 = vld [vmem:[%s11143_s18 + $0x194c] ss:$16 sps:$4 sm:$0xff]   ;;  %v10535_v19 = vld [vmem:[%s11143_s18 + $0x1940] ss:$16 sps:$4 sm:$0xff]  }
 0x341   : > { %7042 = vmatpush1.bf16.msra.mxu0 %v10443_v20  ;;  %7698 = vmatpush1.bf16.msra.mxu1 %v10446_v14  ;;  %v10538_v20 = vld [vmem:[%s11143_s18 + $0x1948] ss:$16 sps:$4 sm:$0xff]   ;;  %v10543_v14 = vld [vmem:[%s11143_s18 + $0x1964] ss:$16 sps:$4 sm:$0xff]  }
 0x342   : > { %7043 = vmatprep.subr.bf16.mxu0 %v10451_v22  ;;  %7699 = vmatprep.subr.bf16.mxu1 %v10454_v23  ;;  %v10546_v22 = vld [vmem:[%s11143_s18 + $0x196c] ss:$16 sps:$4 sm:$0xff]   ;;  %v10541_v23 = vld [vmem:[%s11143_s18 + $0x1960] ss:$16 sps:$4 sm:$0xff]  }
 0x345   : > { %7044 = vmatpush1.bf16.msra.mxu0 %v10449_v17  ;;  %7700 = vmatpush1.bf16.msra.mxu1 %v10452_v25  ;;  %v10544_v17 = vld [vmem:[%s11143_s18 + $0x1968] ss:$16 sps:$4 sm:$0xff]   ;;  %v10549_v25 = vld [vmem:[%s11143_s18 + $0x1984] ss:$16 sps:$4 sm:$0xff]  }
 0x346   : > { %7045 = vmatprep.subr.bf16.mxu0 %v10457_v26  ;;  %7701 = vmatprep.subr.bf16.mxu1 %v10460_v18  ;;  %v10552_v26 = vld [vmem:[%s11143_s18 + $0x198c] ss:$16 sps:$4 sm:$0xff]   ;;  %v10547_v18 = vld [vmem:[%s11143_s18 + $0x1980] ss:$16 sps:$4 sm:$0xff]  }
 0x349   : > { %7046 = vmatpush1.bf16.msra.mxu0 %v10455_v28  ;;  %7702 = vmatpush1.bf16.msra.mxu1 %v10458_v29  ;;  %v10550_v28 = vld [vmem:[%s11143_s18 + $0x1988] ss:$16 sps:$4 sm:$0xff]   ;;  %v10555_v29 = vld [vmem:[%s11143_s18 + $0x19a4] ss:$16 sps:$4 sm:$0xff]  }
 0x34a   : > { %7047 = vmatprep.subr.bf16.mxu0 %v10463_v21  ;;  %7703 = vmatprep.subr.bf16.mxu1 %v10466_v31  ;;  %v10558_v21 = vld [vmem:[%s11143_s18 + $0x19ac] ss:$16 sps:$4 sm:$0xff]   ;;  %v10553_v31 = vld [vmem:[%s11143_s18 + $0x19a0] ss:$16 sps:$4 sm:$0xff]  }
 0x34d   : > { %7048 = vmatpush1.bf16.msra.mxu0 %v10461_v32  ;;  %7704 = vmatpush1.bf16.msra.mxu1 %v10464_v24  ;;  %v10556_v32 = vld [vmem:[%s11143_s18 + $0x19a8] ss:$16 sps:$4 sm:$0xff]   ;;  %v10561_v24 = vld [vmem:[%s11143_s18 + $0x19c4] ss:$16 sps:$4 sm:$0xff]  }
 0x34e   : > { %7049 = vmatprep.subr.bf16.mxu0 %v10469_v33  ;;  %7705 = vmatprep.subr.bf16.mxu1 %v10472_v35  ;;  %v10564_v33 = vld [vmem:[%s11143_s18 + $0x19cc] ss:$16 sps:$4 sm:$0xff]   ;;  %v10559_v35 = vld [vmem:[%s11143_s18 + $0x19c0] ss:$16 sps:$4 sm:$0xff]  }
 0x351   : > { %7050 = vmatpush1.bf16.msra.mxu0 %v10467_v27  ;;  %7706 = vmatpush1.bf16.msra.mxu1 %v10470_v36  ;;  %v10562_v27 = vld [vmem:[%s11143_s18 + $0x19c8] ss:$16 sps:$4 sm:$0xff]   ;;  %v10567_v36 = vld [vmem:[%s11143_s18 + $0x19e4] ss:$16 sps:$4 sm:$0xff]  }
 0x352   : > { %7060 = vmatprep.subr.bf16.mxu0 %v10477_v30  ;;  %7716 = vmatprep.subr.bf16.mxu1 %v10480_v38  ;;  %v10570_v30 = vld [vmem:[%s11143_s18 + $0x19ec] ss:$16 sps:$4 sm:$0xff]   ;;  %v10565_v38 = vld [vmem:[%s11143_s18 + $0x19e0] ss:$16 sps:$4 sm:$0xff]  }
 0x354   : > { %7052 = vmatmul.mubr.bf16.vlgmr.msra.gmra.mrb[0].mxu0 %v8070_v39  ;;  %7708 = vmatmul.mubr.bf16.vlgmr.msra.gmra.mrb[0].mxu1 %v8070_v39  ;;  %v10568_v39 = vld [vmem:[%s11143_s18 + $0x19e8] ss:$16 sps:$4 sm:$0xff]  }
 0x355   : > { %7061 = vmatpush1.bf16.msra.mxu0 %v10475_v34  ;;  %7717 = vmatpush1.bf16.msra.mxu1 %v10478_v41  ;;  %v10575_v34 = vld [vmem:[%s11143_s18 + $0x1a04] ss:$16 sps:$4 sm:$0xff]   ;;  %v10578_v41 = vld [vmem:[%s11143_s18 + $0x1a0c] ss:$16 sps:$4 sm:$0xff]  }
 0x356   : > { %7062 = vmatprep.subr.bf16.mxu0 %v10483_v42  ;;  %7718 = vmatprep.subr.bf16.mxu1 %v10486_v43  ;;  %v8072_v42 = vcombine.low %v12030_v40, %v12030_v40  ;;  %v12103_v43 = vld [vmem:[%s12340_s0 + $0x68] sm:$0xff] }
 0x357   : > { %7092 = vmatprep.mubr.bf16.mxu0 %v8073_v37  ;;  %7748 = vmatprep.mubr.bf16.mxu1 %v8073_v37  ;;  %v10573_v37 = vld [vmem:[%s11143_s18 + $0x1a00] ss:$16 sps:$4 sm:$0xff]   ;;  %v8075_v40 = vcombine.high %v12103_v43, %v12103_v43 }
 0x359   : > { %7063 = vmatpush1.bf16.msra.mxu0 %v10481_v44  ;;  %7719 = vmatpush1.bf16.msra.mxu1 %v10484_v45  ;;  %v10576_v44 = vld [vmem:[%s11143_s18 + $0x1a08] ss:$16 sps:$4 sm:$0xff]   ;;  %v10581_v45 = vld [vmem:[%s11143_s18 + $0x1a24] ss:$16 sps:$4 sm:$0xff]  }
 0x35a   : > { %7064 = vmatprep.subr.bf16.mxu0 %v10489_v46  ;;  %7720 = vmatprep.subr.bf16.mxu1 %v10492_v47  ;;  %v10584_v46 = vld [vmem:[%s11143_s18 + $0x1a2c] ss:$16 sps:$4 sm:$0xff]   ;;  %v10579_v47 = vld [vmem:[%s11143_s18 + $0x1a20] ss:$16 sps:$4 sm:$0xff]  }
 0x35d   : > { %7065 = vmatpush1.bf16.msra.mxu0 %v10487_v48  ;;  %7721 = vmatpush1.bf16.msra.mxu1 %v10490_v49  ;;  %v10582_v48 = vld [vmem:[%s11143_s18 + $0x1a28] ss:$16 sps:$4 sm:$0xff]   ;;  %v10587_v49 = vld [vmem:[%s11143_s18 + $0x1a44] ss:$16 sps:$4 sm:$0xff]  }
 0x35e   : > { %7066 = vmatprep.subr.bf16.mxu0 %v10495_v50  ;;  %7722 = vmatprep.subr.bf16.mxu1 %v10498_v51  ;;  %v10590_v50 = vld [vmem:[%s11143_s18 + $0x1a4c] ss:$16 sps:$4 sm:$0xff]   ;;  %v10585_v51 = vld [vmem:[%s11143_s18 + $0x1a40] ss:$16 sps:$4 sm:$0xff]  }
 0x361   : > { %7067 = vmatpush1.bf16.msra.mxu0 %v10493_v52  ;;  %7723 = vmatpush1.bf16.msra.mxu1 %v10496_v53  ;;  %v10588_v52 = vld [vmem:[%s11143_s18 + $0x1a48] ss:$16 sps:$4 sm:$0xff]   ;;  %v10593_v53 = vld [vmem:[%s11143_s18 + $0x1a64] ss:$16 sps:$4 sm:$0xff]  }
 0x362   : > { %7068 = vmatprep.subr.bf16.mxu0 %v10501_v54  ;;  %7724 = vmatprep.subr.bf16.mxu1 %v10504_v55  ;;  %v10596_v54 = vld [vmem:[%s11143_s18 + $0x1a6c] ss:$16 sps:$4 sm:$0xff]   ;;  %v10591_v55 = vld [vmem:[%s11143_s18 + $0x1a60] ss:$16 sps:$4 sm:$0xff]  }
 0x365   : > { %7069 = vmatpush1.bf16.msra.mxu0 %v10499_v56  ;;  %7725 = vmatpush1.bf16.msra.mxu1 %v10502_v57  ;;  %v10594_v56 = vld [vmem:[%s11143_s18 + $0x1a68] ss:$16 sps:$4 sm:$0xff]   ;;  %v10599_v57 = vld [vmem:[%s11143_s18 + $0x1a84] ss:$16 sps:$4 sm:$0xff]  }
 0x366   : > { %7070 = vmatprep.subr.bf16.mxu0 %v10507_v58  ;;  %7726 = vmatprep.subr.bf16.mxu1 %v10510_v59  ;;  %v10602_v58 = vld [vmem:[%s11143_s18 + $0x1a8c] ss:$16 sps:$4 sm:$0xff]   ;;  %v10597_v59 = vld [vmem:[%s11143_s18 + $0x1a80] ss:$16 sps:$4 sm:$0xff]  }
 0x369   : > { %7071 = vmatpush1.bf16.msra.mxu0 %v10505_v60  ;;  %7727 = vmatpush1.bf16.msra.mxu1 %v10508_v61  ;;  %v10600_v60 = vld [vmem:[%s11143_s18 + $0x1a88] ss:$16 sps:$4 sm:$0xff]   ;;  %v10605_v61 = vld [vmem:[%s11143_s18 + $0x1aa4] ss:$16 sps:$4 sm:$0xff]  }
 0x36a   : > { %7072 = vmatprep.subr.bf16.mxu0 %v10513_v62  ;;  %7728 = vmatprep.subr.bf16.mxu1 %v10516_v63  ;;  %v10608_v62 = vld [vmem:[%s11143_s18 + $0x1aac] ss:$16 sps:$4 sm:$0xff]   ;;  %v10603_v63 = vld [vmem:[%s11143_s18 + $0x1aa0] ss:$16 sps:$4 sm:$0xff]  }
 0x36d   : > { %7073 = vmatpush1.bf16.msra.mxu0 %v10511_v0  ;;  %7729 = vmatpush1.bf16.msra.mxu1 %v10514_v1  ;;  %v10606_v0 = vld [vmem:[%s11143_s18 + $0x1aa8] ss:$16 sps:$4 sm:$0xff]   ;;  %v10611_v1 = vld [vmem:[%s11143_s18 + $0x1ac4] ss:$16 sps:$4 sm:$0xff]  }
 0x36e   : > { %7074 = vmatprep.subr.bf16.mxu0 %v10519_v2  ;;  %7730 = vmatprep.subr.bf16.mxu1 %v10522_v3  ;;  %v10614_v2 = vld [vmem:[%s11143_s18 + $0x1acc] ss:$16 sps:$4 sm:$0xff]   ;;  %v10609_v3 = vld [vmem:[%s11143_s18 + $0x1ac0] ss:$16 sps:$4 sm:$0xff]  }
 0x371   : > { %7075 = vmatpush1.bf16.msra.mxu0 %v10517_v4  ;;  %7731 = vmatpush1.bf16.msra.mxu1 %v10520_v5  ;;  %v10612_v4 = vld [vmem:[%s11143_s18 + $0x1ac8] ss:$16 sps:$4 sm:$0xff]   ;;  %v10617_v5 = vld [vmem:[%s11143_s18 + $0x1ae4] ss:$16 sps:$4 sm:$0xff]  }
 0x372   : > { %7076 = vmatprep.subr.bf16.mxu0 %v10525_v6  ;;  %7732 = vmatprep.subr.bf16.mxu1 %v10528_v7  ;;  %v10620_v6 = vld [vmem:[%s11143_s18 + $0x1aec] ss:$16 sps:$4 sm:$0xff]   ;;  %v10615_v7 = vld [vmem:[%s11143_s18 + $0x1ae0] ss:$16 sps:$4 sm:$0xff]  }
 0x375   : > { %7077 = vmatpush1.bf16.msra.mxu0 %v10523_v8  ;;  %7733 = vmatpush1.bf16.msra.mxu1 %v10526_v9  ;;  %v10618_v8 = vld [vmem:[%s11143_s18 + $0x1ae8] ss:$16 sps:$4 sm:$0xff]   ;;  %v10623_v9 = vld [vmem:[%s11143_s18 + $0x1b04] ss:$16 sps:$4 sm:$0xff]  }
 0x376   : > { %7078 = vmatprep.subr.bf16.mxu0 %v10531_v10  ;;  %7734 = vmatprep.subr.bf16.mxu1 %v10534_v12  ;;  %v10626_v10 = vld [vmem:[%s11143_s18 + $0x1b0c] ss:$16 sps:$4 sm:$0xff]   ;;  %v10621_v12 = vld [vmem:[%s11143_s18 + $0x1b00] ss:$16 sps:$4 sm:$0xff]  }
 0x379   : > { %7079 = vmatpush1.bf16.msra.mxu0 %v10529_v13  ;;  %7735 = vmatpush1.bf16.msra.mxu1 %v10532_v15  ;;  %v10624_v13 = vld [vmem:[%s11143_s18 + $0x1b08] ss:$16 sps:$4 sm:$0xff]   ;;  %v10629_v15 = vld [vmem:[%s11143_s18 + $0x1b24] ss:$16 sps:$4 sm:$0xff]  }
 0x37a   : > { %7080 = vmatprep.subr.bf16.mxu0 %v10537_v16  ;;  %7736 = vmatprep.subr.bf16.mxu1 %v10540_v11  ;;  %v10632_v16 = vld [vmem:[%s11143_s18 + $0x1b2c] ss:$16 sps:$4 sm:$0xff]   ;;  %v10627_v11 = vld [vmem:[%s11143_s18 + $0x1b20] ss:$16 sps:$4 sm:$0xff]  }
 0x37d   : > { %7081 = vmatpush1.bf16.msra.mxu0 %v10535_v19  ;;  %7737 = vmatpush1.bf16.msra.mxu1 %v10538_v20  ;;  %v10630_v19 = vld [vmem:[%s11143_s18 + $0x1b28] ss:$16 sps:$4 sm:$0xff]   ;;  %v10635_v20 = vld [vmem:[%s11143_s18 + $0x1b44] ss:$16 sps:$4 sm:$0xff]  }
 0x37e   : > { %7082 = vmatprep.subr.bf16.mxu0 %v10543_v14  ;;  %7738 = vmatprep.subr.bf16.mxu1 %v10546_v22  ;;  %v10638_v14 = vld [vmem:[%s11143_s18 + $0x1b4c] ss:$16 sps:$4 sm:$0xff]   ;;  %v10633_v22 = vld [vmem:[%s11143_s18 + $0x1b40] ss:$16 sps:$4 sm:$0xff]  }
 0x381   : > { %7083 = vmatpush1.bf16.msra.mxu0 %v10541_v23  ;;  %7739 = vmatpush1.bf16.msra.mxu1 %v10544_v17  ;;  %v10636_v23 = vld [vmem:[%s11143_s18 + $0x1b48] ss:$16 sps:$4 sm:$0xff]   ;;  %v10641_v17 = vld [vmem:[%s11143_s18 + $0x1b64] ss:$16 sps:$4 sm:$0xff]  }
 0x382   : > { %7084 = vmatprep.subr.bf16.mxu0 %v10549_v25  ;;  %7740 = vmatprep.subr.bf16.mxu1 %v10552_v26  ;;  %v10644_v25 = vld [vmem:[%s11143_s18 + $0x1b6c] ss:$16 sps:$4 sm:$0xff]   ;;  %v10639_v26 = vld [vmem:[%s11143_s18 + $0x1b60] ss:$16 sps:$4 sm:$0xff]  }
 0x385   : > { %7085 = vmatpush1.bf16.msra.mxu0 %v10547_v18  ;;  %7741 = vmatpush1.bf16.msra.mxu1 %v10550_v28  ;;  %v10642_v18 = vld [vmem:[%s11143_s18 + $0x1b68] ss:$16 sps:$4 sm:$0xff]   ;;  %v10647_v28 = vld [vmem:[%s11143_s18 + $0x1b84] ss:$16 sps:$4 sm:$0xff]  }
 0x386   : > { %7086 = vmatprep.subr.bf16.mxu0 %v10555_v29  ;;  %7742 = vmatprep.subr.bf16.mxu1 %v10558_v21  ;;  %v10650_v29 = vld [vmem:[%s11143_s18 + $0x1b8c] ss:$16 sps:$4 sm:$0xff]   ;;  %v10645_v21 = vld [vmem:[%s11143_s18 + $0x1b80] ss:$16 sps:$4 sm:$0xff]  }
 0x389   : > { %7087 = vmatpush1.bf16.msra.mxu0 %v10553_v31  ;;  %7743 = vmatpush1.bf16.msra.mxu1 %v10556_v32  ;;  %v10648_v31 = vld [vmem:[%s11143_s18 + $0x1b88] ss:$16 sps:$4 sm:$0xff]   ;;  %v10653_v32 = vld [vmem:[%s11143_s18 + $0x1ba4] ss:$16 sps:$4 sm:$0xff]  }
 0x38a   : > { %7088 = vmatprep.subr.bf16.mxu0 %v10561_v24  ;;  %7744 = vmatprep.subr.bf16.mxu1 %v10564_v33  ;;  %v10656_v24 = vld [vmem:[%s11143_s18 + $0x1bac] ss:$16 sps:$4 sm:$0xff]   ;;  %v10651_v33 = vld [vmem:[%s11143_s18 + $0x1ba0] ss:$16 sps:$4 sm:$0xff]  }
 0x38d   : > { %7089 = vmatpush1.bf16.msra.mxu0 %v10559_v35  ;;  %7745 = vmatpush1.bf16.msra.mxu1 %v10562_v27  ;;  %v10654_v35 = vld [vmem:[%s11143_s18 + $0x1ba8] ss:$16 sps:$4 sm:$0xff]   ;;  %v10659_v27 = vld [vmem:[%s11143_s18 + $0x1bc4] ss:$16 sps:$4 sm:$0xff]  }
 0x38e   : > { %7090 = vmatprep.subr.bf16.mxu0 %v10567_v36  ;;  %7746 = vmatprep.subr.bf16.mxu1 %v10570_v30  ;;  %v10662_v36 = vld [vmem:[%s11143_s18 + $0x1bcc] ss:$16 sps:$4 sm:$0xff]   ;;  %v10657_v30 = vld [vmem:[%s11143_s18 + $0x1bc0] ss:$16 sps:$4 sm:$0xff]  }
 0x391   : > { %7091 = vmatpush1.bf16.msra.mxu0 %v10565_v38  ;;  %7747 = vmatpush1.bf16.msra.mxu1 %v10568_v39  ;;  %v10660_v38 = vld [vmem:[%s11143_s18 + $0x1bc8] ss:$16 sps:$4 sm:$0xff]   ;;  %v10665_v39 = vld [vmem:[%s11143_s18 + $0x1be4] ss:$16 sps:$4 sm:$0xff]  }
 0x392   : > { %7101 = vmatprep.subr.bf16.mxu0 %v10575_v34  ;;  %7757 = vmatprep.subr.bf16.mxu1 %v10578_v41  ;;  %v10668_v34 = vld [vmem:[%s11143_s18 + $0x1bec] ss:$16 sps:$4 sm:$0xff]   ;;  %v10663_v41 = vld [vmem:[%s11143_s18 + $0x1be0] ss:$16 sps:$4 sm:$0xff]  }
 0x394   : > { %7093 = vmatmul.mubr.bf16.vlgmr.msra.gmra.mrb[0].mxu0 %v8072_v42  ;;  %7749 = vmatmul.mubr.bf16.vlgmr.msra.gmra.mrb[0].mxu1 %v8072_v42  ;;  %v10666_v42 = vld [vmem:[%s11143_s18 + $0x1be8] ss:$16 sps:$4 sm:$0xff]  }
 0x395   : > { %7102 = vmatpush1.bf16.msra.mxu0 %v10573_v37  ;;  %7758 = vmatpush1.bf16.msra.mxu1 %v10576_v44  ;;  %v10673_v37 = vld [vmem:[%s11143_s18 + $0x1c04] ss:$16 sps:$4 sm:$0xff]   ;;  %v10676_v44 = vld [vmem:[%s11143_s18 + $0x1c0c] ss:$16 sps:$4 sm:$0xff]  }
 0x396   : > { %7103 = vmatprep.subr.bf16.mxu0 %v10581_v45  ;;  %7759 = vmatprep.subr.bf16.mxu1 %v10584_v46  ;;  %v8074_v45 = vcombine.low %v12103_v43, %v12103_v43  ;;  %v12176_v46 = vld [vmem:[%s12340_s0 + $0x70] sm:$0xff] }
 0x397   : > { %7133 = vmatprep.mubr.bf16.mxu0 %v8075_v40  ;;  %7789 = vmatprep.mubr.bf16.mxu1 %v8075_v40  ;;  %v10671_v40 = vld [vmem:[%s11143_s18 + $0x1c00] ss:$16 sps:$4 sm:$0xff]   ;;  %v8077_v43 = vcombine.high %v12176_v46, %v12176_v46 }
 0x399   : > { %7104 = vmatpush1.bf16.msra.mxu0 %v10579_v47  ;;  %7760 = vmatpush1.bf16.msra.mxu1 %v10582_v48  ;;  %v10674_v47 = vld [vmem:[%s11143_s18 + $0x1c08] ss:$16 sps:$4 sm:$0xff]   ;;  %v10679_v48 = vld [vmem:[%s11143_s18 + $0x1c24] ss:$16 sps:$4 sm:$0xff]  }
 0x39a   : > { %7105 = vmatprep.subr.bf16.mxu0 %v10587_v49  ;;  %7761 = vmatprep.subr.bf16.mxu1 %v10590_v50  ;;  %v10682_v49 = vld [vmem:[%s11143_s18 + $0x1c2c] ss:$16 sps:$4 sm:$0xff]   ;;  %v10677_v50 = vld [vmem:[%s11143_s18 + $0x1c20] ss:$16 sps:$4 sm:$0xff]  }
 0x39d   : > { %7106 = vmatpush1.bf16.msra.mxu0 %v10585_v51  ;;  %7762 = vmatpush1.bf16.msra.mxu1 %v10588_v52  ;;  %v10680_v51 = vld [vmem:[%s11143_s18 + $0x1c28] ss:$16 sps:$4 sm:$0xff]   ;;  %v10685_v52 = vld [vmem:[%s11143_s18 + $0x1c44] ss:$16 sps:$4 sm:$0xff]  }
 0x39e   : > { %7107 = vmatprep.subr.bf16.mxu0 %v10593_v53  ;;  %7763 = vmatprep.subr.bf16.mxu1 %v10596_v54  ;;  %v10688_v53 = vld [vmem:[%s11143_s18 + $0x1c4c] ss:$16 sps:$4 sm:$0xff]   ;;  %v10683_v54 = vld [vmem:[%s11143_s18 + $0x1c40] ss:$16 sps:$4 sm:$0xff]  }
 0x3a1   : > { %7108 = vmatpush1.bf16.msra.mxu0 %v10591_v55  ;;  %7764 = vmatpush1.bf16.msra.mxu1 %v10594_v56  ;;  %v10686_v55 = vld [vmem:[%s11143_s18 + $0x1c48] ss:$16 sps:$4 sm:$0xff]   ;;  %v10691_v56 = vld [vmem:[%s11143_s18 + $0x1c64] ss:$16 sps:$4 sm:$0xff]  }
 0x3a2   : > { %7109 = vmatprep.subr.bf16.mxu0 %v10599_v57  ;;  %7765 = vmatprep.subr.bf16.mxu1 %v10602_v58  ;;  %v10694_v57 = vld [vmem:[%s11143_s18 + $0x1c6c] ss:$16 sps:$4 sm:$0xff]   ;;  %v10689_v58 = vld [vmem:[%s11143_s18 + $0x1c60] ss:$16 sps:$4 sm:$0xff]  }
 0x3a5   : > { %7110 = vmatpush1.bf16.msra.mxu0 %v10597_v59  ;;  %7766 = vmatpush1.bf16.msra.mxu1 %v10600_v60  ;;  %v10692_v59 = vld [vmem:[%s11143_s18 + $0x1c68] ss:$16 sps:$4 sm:$0xff]   ;;  %v10697_v60 = vld [vmem:[%s11143_s18 + $0x1c84] ss:$16 sps:$4 sm:$0xff]  }
 0x3a6   : > { %7111 = vmatprep.subr.bf16.mxu0 %v10605_v61  ;;  %7767 = vmatprep.subr.bf16.mxu1 %v10608_v62  ;;  %v10700_v61 = vld [vmem:[%s11143_s18 + $0x1c8c] ss:$16 sps:$4 sm:$0xff]   ;;  %v10695_v62 = vld [vmem:[%s11143_s18 + $0x1c80] ss:$16 sps:$4 sm:$0xff]  }
 0x3a9   : > { %7112 = vmatpush1.bf16.msra.mxu0 %v10603_v63  ;;  %7768 = vmatpush1.bf16.msra.mxu1 %v10606_v0  ;;  %v10698_v63 = vld [vmem:[%s11143_s18 + $0x1c88] ss:$16 sps:$4 sm:$0xff]   ;;  %v10703_v0 = vld [vmem:[%s11143_s18 + $0x1ca4] ss:$16 sps:$4 sm:$0xff]  }
 0x3aa   : > { %7113 = vmatprep.subr.bf16.mxu0 %v10611_v1  ;;  %7769 = vmatprep.subr.bf16.mxu1 %v10614_v2  ;;  %v10706_v1 = vld [vmem:[%s11143_s18 + $0x1cac] ss:$16 sps:$4 sm:$0xff]   ;;  %v10701_v2 = vld [vmem:[%s11143_s18 + $0x1ca0] ss:$16 sps:$4 sm:$0xff]  }
 0x3ad   : > { %7114 = vmatpush1.bf16.msra.mxu0 %v10609_v3  ;;  %7770 = vmatpush1.bf16.msra.mxu1 %v10612_v4  ;;  %v10704_v3 = vld [vmem:[%s11143_s18 + $0x1ca8] ss:$16 sps:$4 sm:$0xff]   ;;  %v10709_v4 = vld [vmem:[%s11143_s18 + $0x1cc4] ss:$16 sps:$4 sm:$0xff]  }
 0x3ae   : > { %7115 = vmatprep.subr.bf16.mxu0 %v10617_v5  ;;  %7771 = vmatprep.subr.bf16.mxu1 %v10620_v6  ;;  %v10712_v5 = vld [vmem:[%s11143_s18 + $0x1ccc] ss:$16 sps:$4 sm:$0xff]   ;;  %v10707_v6 = vld [vmem:[%s11143_s18 + $0x1cc0] ss:$16 sps:$4 sm:$0xff]  }
 0x3b1   : > { %7116 = vmatpush1.bf16.msra.mxu0 %v10615_v7  ;;  %7772 = vmatpush1.bf16.msra.mxu1 %v10618_v8  ;;  %v10710_v7 = vld [vmem:[%s11143_s18 + $0x1cc8] ss:$16 sps:$4 sm:$0xff]   ;;  %v10715_v8 = vld [vmem:[%s11143_s18 + $0x1ce4] ss:$16 sps:$4 sm:$0xff]  }
 0x3b2   : > { %7117 = vmatprep.subr.bf16.mxu0 %v10623_v9  ;;  %7773 = vmatprep.subr.bf16.mxu1 %v10626_v10  ;;  %v10718_v9 = vld [vmem:[%s11143_s18 + $0x1cec] ss:$16 sps:$4 sm:$0xff]   ;;  %v10713_v10 = vld [vmem:[%s11143_s18 + $0x1ce0] ss:$16 sps:$4 sm:$0xff]  }
 0x3b5   : > { %7118 = vmatpush1.bf16.msra.mxu0 %v10621_v12  ;;  %7774 = vmatpush1.bf16.msra.mxu1 %v10624_v13  ;;  %v10716_v12 = vld [vmem:[%s11143_s18 + $0x1ce8] ss:$16 sps:$4 sm:$0xff]   ;;  %v10721_v13 = vld [vmem:[%s11143_s18 + $0x1d04] ss:$16 sps:$4 sm:$0xff]  }
 0x3b6   : > { %7119 = vmatprep.subr.bf16.mxu0 %v10629_v15  ;;  %7775 = vmatprep.subr.bf16.mxu1 %v10632_v16  ;;  %v10724_v15 = vld [vmem:[%s11143_s18 + $0x1d0c] ss:$16 sps:$4 sm:$0xff]   ;;  %v10719_v16 = vld [vmem:[%s11143_s18 + $0x1d00] ss:$16 sps:$4 sm:$0xff]  }
 0x3b9   : > { %7120 = vmatpush1.bf16.msra.mxu0 %v10627_v11  ;;  %7776 = vmatpush1.bf16.msra.mxu1 %v10630_v19  ;;  %v10722_v11 = vld [vmem:[%s11143_s18 + $0x1d08] ss:$16 sps:$4 sm:$0xff]   ;;  %v10727_v19 = vld [vmem:[%s11143_s18 + $0x1d24] ss:$16 sps:$4 sm:$0xff]  }
 0x3ba   : > { %7121 = vmatprep.subr.bf16.mxu0 %v10635_v20  ;;  %7777 = vmatprep.subr.bf16.mxu1 %v10638_v14  ;;  %v10730_v20 = vld [vmem:[%s11143_s18 + $0x1d2c] ss:$16 sps:$4 sm:$0xff]   ;;  %v10725_v14 = vld [vmem:[%s11143_s18 + $0x1d20] ss:$16 sps:$4 sm:$0xff]  }
 0x3bd   : > { %7122 = vmatpush1.bf16.msra.mxu0 %v10633_v22  ;;  %7778 = vmatpush1.bf16.msra.mxu1 %v10636_v23  ;;  %v10728_v22 = vld [vmem:[%s11143_s18 + $0x1d28] ss:$16 sps:$4 sm:$0xff]   ;;  %v10733_v23 = vld [vmem:[%s11143_s18 + $0x1d44] ss:$16 sps:$4 sm:$0xff]  }
 0x3be   : > { %7123 = vmatprep.subr.bf16.mxu0 %v10641_v17  ;;  %7779 = vmatprep.subr.bf16.mxu1 %v10644_v25  ;;  %v10736_v17 = vld [vmem:[%s11143_s18 + $0x1d4c] ss:$16 sps:$4 sm:$0xff]   ;;  %v10731_v25 = vld [vmem:[%s11143_s18 + $0x1d40] ss:$16 sps:$4 sm:$0xff]  }
 0x3c1   : > { %7124 = vmatpush1.bf16.msra.mxu0 %v10639_v26  ;;  %7780 = vmatpush1.bf16.msra.mxu1 %v10642_v18  ;;  %v10734_v26 = vld [vmem:[%s11143_s18 + $0x1d48] ss:$16 sps:$4 sm:$0xff]   ;;  %v10739_v18 = vld [vmem:[%s11143_s18 + $0x1d64] ss:$16 sps:$4 sm:$0xff]  }
 0x3c2   : > { %7125 = vmatprep.subr.bf16.mxu0 %v10647_v28  ;;  %7781 = vmatprep.subr.bf16.mxu1 %v10650_v29  ;;  %v10742_v28 = vld [vmem:[%s11143_s18 + $0x1d6c] ss:$16 sps:$4 sm:$0xff]   ;;  %v10737_v29 = vld [vmem:[%s11143_s18 + $0x1d60] ss:$16 sps:$4 sm:$0xff]  }
 0x3c5   : > { %7126 = vmatpush1.bf16.msra.mxu0 %v10645_v21  ;;  %7782 = vmatpush1.bf16.msra.mxu1 %v10648_v31  ;;  %v10740_v21 = vld [vmem:[%s11143_s18 + $0x1d68] ss:$16 sps:$4 sm:$0xff]   ;;  %v10745_v31 = vld [vmem:[%s11143_s18 + $0x1d84] ss:$16 sps:$4 sm:$0xff]  }
 0x3c6   : > { %7127 = vmatprep.subr.bf16.mxu0 %v10653_v32  ;;  %7783 = vmatprep.subr.bf16.mxu1 %v10656_v24  ;;  %v10748_v32 = vld [vmem:[%s11143_s18 + $0x1d8c] ss:$16 sps:$4 sm:$0xff]   ;;  %v10743_v24 = vld [vmem:[%s11143_s18 + $0x1d80] ss:$16 sps:$4 sm:$0xff]  }
 0x3c9   : > { %7128 = vmatpush1.bf16.msra.mxu0 %v10651_v33  ;;  %7784 = vmatpush1.bf16.msra.mxu1 %v10654_v35  ;;  %v10746_v33 = vld [vmem:[%s11143_s18 + $0x1d88] ss:$16 sps:$4 sm:$0xff]   ;;  %v10751_v35 = vld [vmem:[%s11143_s18 + $0x1da4] ss:$16 sps:$4 sm:$0xff]  }
 0x3ca   : > { %7129 = vmatprep.subr.bf16.mxu0 %v10659_v27  ;;  %7785 = vmatprep.subr.bf16.mxu1 %v10662_v36  ;;  %v10754_v27 = vld [vmem:[%s11143_s18 + $0x1dac] ss:$16 sps:$4 sm:$0xff]   ;;  %v10749_v36 = vld [vmem:[%s11143_s18 + $0x1da0] ss:$16 sps:$4 sm:$0xff]  }
 0x3cd   : > { %7130 = vmatpush1.bf16.msra.mxu0 %v10657_v30  ;;  %7786 = vmatpush1.bf16.msra.mxu1 %v10660_v38  ;;  %v10752_v30 = vld [vmem:[%s11143_s18 + $0x1da8] ss:$16 sps:$4 sm:$0xff]   ;;  %v10757_v38 = vld [vmem:[%s11143_s18 + $0x1dc4] ss:$16 sps:$4 sm:$0xff]  }
 0x3ce   : > { %7131 = vmatprep.subr.bf16.mxu0 %v10665_v39  ;;  %7787 = vmatprep.subr.bf16.mxu1 %v10668_v34  ;;  %v10760_v39 = vld [vmem:[%s11143_s18 + $0x1dcc] ss:$16 sps:$4 sm:$0xff]   ;;  %v10755_v34 = vld [vmem:[%s11143_s18 + $0x1dc0] ss:$16 sps:$4 sm:$0xff]  }
 0x3d1   : > { %7132 = vmatpush1.bf16.msra.mxu0 %v10663_v41  ;;  %7788 = vmatpush1.bf16.msra.mxu1 %v10666_v42  ;;  %v10758_v41 = vld [vmem:[%s11143_s18 + $0x1dc8] ss:$16 sps:$4 sm:$0xff]   ;;  %v10763_v42 = vld [vmem:[%s11143_s18 + $0x1de4] ss:$16 sps:$4 sm:$0xff]  }
 0x3d2   : > { %7142 = vmatprep.subr.bf16.mxu0 %v10673_v37  ;;  %7798 = vmatprep.subr.bf16.mxu1 %v10676_v44  ;;  %v10766_v37 = vld [vmem:[%s11143_s18 + $0x1dec] ss:$16 sps:$4 sm:$0xff]   ;;  %v10761_v44 = vld [vmem:[%s11143_s18 + $0x1de0] ss:$16 sps:$4 sm:$0xff]  }
 0x3d4   : > { %7134 = vmatmul.mubr.bf16.vlgmr.msra.gmra.mrb[0].mxu0 %v8074_v45  ;;  %7790 = vmatmul.mubr.bf16.vlgmr.msra.gmra.mrb[0].mxu1 %v8074_v45  ;;  %v10764_v45 = vld [vmem:[%s11143_s18 + $0x1de8] ss:$16 sps:$4 sm:$0xff]  }
 0x3d5   : > { %7143 = vmatpush1.bf16.msra.mxu0 %v10671_v40  ;;  %7799 = vmatpush1.bf16.msra.mxu1 %v10674_v47  ;;  %v10771_v40 = vld [vmem:[%s11143_s18 + $0x1e04] ss:$16 sps:$4 sm:$0xff]   ;;  %v10774_v47 = vld [vmem:[%s11143_s18 + $0x1e0c] ss:$16 sps:$4 sm:$0xff]  }
 0x3d6   : > { %7144 = vmatprep.subr.bf16.mxu0 %v10679_v48  ;;  %7800 = vmatprep.subr.bf16.mxu1 %v10682_v49  ;;  %v8076_v48 = vcombine.low %v12176_v46, %v12176_v46  ;;  %v12249_v49 = vld [vmem:[%s12340_s0 + $0x78] sm:$0xff] }
 0x3d7   : > { %7174 = vmatprep.mubr.bf16.mxu0 %v8077_v43  ;;  %7830 = vmatprep.mubr.bf16.mxu1 %v8077_v43  ;;  %v10769_v43 = vld [vmem:[%s11143_s18 + $0x1e00] ss:$16 sps:$4 sm:$0xff]   ;;  %v8079_v46 = vcombine.high %v12249_v49, %v12249_v49 }
 0x3d9   : > { %7145 = vmatpush1.bf16.msra.mxu0 %v10677_v50  ;;  %7801 = vmatpush1.bf16.msra.mxu1 %v10680_v51  ;;  %v10772_v50 = vld [vmem:[%s11143_s18 + $0x1e08] ss:$16 sps:$4 sm:$0xff]   ;;  %v10777_v51 = vld [vmem:[%s11143_s18 + $0x1e24] ss:$16 sps:$4 sm:$0xff]  }
 0x3da   : > { %7146 = vmatprep.subr.bf16.mxu0 %v10685_v52  ;;  %7802 = vmatprep.subr.bf16.mxu1 %v10688_v53  ;;  %v10780_v52 = vld [vmem:[%s11143_s18 + $0x1e2c] ss:$16 sps:$4 sm:$0xff]   ;;  %v10775_v53 = vld [vmem:[%s11143_s18 + $0x1e20] ss:$16 sps:$4 sm:$0xff]  }
 0x3dd   : > { %7147 = vmatpush1.bf16.msra.mxu0 %v10683_v54  ;;  %7803 = vmatpush1.bf16.msra.mxu1 %v10686_v55  ;;  %v10778_v54 = vld [vmem:[%s11143_s18 + $0x1e28] ss:$16 sps:$4 sm:$0xff]   ;;  %v10783_v55 = vld [vmem:[%s11143_s18 + $0x1e44] ss:$16 sps:$4 sm:$0xff]  }
 0x3de   : > { %7148 = vmatprep.subr.bf16.mxu0 %v10691_v56  ;;  %7804 = vmatprep.subr.bf16.mxu1 %v10694_v57  ;;  %v10786_v56 = vld [vmem:[%s11143_s18 + $0x1e4c] ss:$16 sps:$4 sm:$0xff]   ;;  %v10781_v57 = vld [vmem:[%s11143_s18 + $0x1e40] ss:$16 sps:$4 sm:$0xff]  }
 0x3e1   : > { %7149 = vmatpush1.bf16.msra.mxu0 %v10689_v58  ;;  %7805 = vmatpush1.bf16.msra.mxu1 %v10692_v59  ;;  %v10784_v58 = vld [vmem:[%s11143_s18 + $0x1e48] ss:$16 sps:$4 sm:$0xff]   ;;  %v10789_v59 = vld [vmem:[%s11143_s18 + $0x1e64] ss:$16 sps:$4 sm:$0xff]  }
 0x3e2   : > { %7150 = vmatprep.subr.bf16.mxu0 %v10697_v60  ;;  %7806 = vmatprep.subr.bf16.mxu1 %v10700_v61  ;;  %v10792_v60 = vld [vmem:[%s11143_s18 + $0x1e6c] ss:$16 sps:$4 sm:$0xff]   ;;  %v10787_v61 = vld [vmem:[%s11143_s18 + $0x1e60] ss:$16 sps:$4 sm:$0xff]  }
 0x3e5   : > { %7151 = vmatpush1.bf16.msra.mxu0 %v10695_v62  ;;  %7807 = vmatpush1.bf16.msra.mxu1 %v10698_v63  ;;  %v10790_v62 = vld [vmem:[%s11143_s18 + $0x1e68] ss:$16 sps:$4 sm:$0xff]   ;;  %v10795_v63 = vld [vmem:[%s11143_s18 + $0x1e84] ss:$16 sps:$4 sm:$0xff]  }
 0x3e6   : > { %7152 = vmatprep.subr.bf16.mxu0 %v10703_v0  ;;  %7808 = vmatprep.subr.bf16.mxu1 %v10706_v1  ;;  %v10798_v0 = vld [vmem:[%s11143_s18 + $0x1e8c] ss:$16 sps:$4 sm:$0xff]   ;;  %v10793_v1 = vld [vmem:[%s11143_s18 + $0x1e80] ss:$16 sps:$4 sm:$0xff]  }
 0x3e9   : > { %7153 = vmatpush1.bf16.msra.mxu0 %v10701_v2  ;;  %7809 = vmatpush1.bf16.msra.mxu1 %v10704_v3  ;;  %v10796_v2 = vld [vmem:[%s11143_s18 + $0x1e88] ss:$16 sps:$4 sm:$0xff]   ;;  %v10801_v3 = vld [vmem:[%s11143_s18 + $0x1ea4] ss:$16 sps:$4 sm:$0xff]  }
 0x3ea   : > { %7154 = vmatprep.subr.bf16.mxu0 %v10709_v4  ;;  %7810 = vmatprep.subr.bf16.mxu1 %v10712_v5  ;;  %v10804_v4 = vld [vmem:[%s11143_s18 + $0x1eac] ss:$16 sps:$4 sm:$0xff]   ;;  %v10799_v5 = vld [vmem:[%s11143_s18 + $0x1ea0] ss:$16 sps:$4 sm:$0xff]  }
 0x3ed   : > { %7155 = vmatpush1.bf16.msra.mxu0 %v10707_v6  ;;  %7811 = vmatpush1.bf16.msra.mxu1 %v10710_v7  ;;  %v10802_v6 = vld [vmem:[%s11143_s18 + $0x1ea8] ss:$16 sps:$4 sm:$0xff]   ;;  %v10807_v7 = vld [vmem:[%s11143_s18 + $0x1ec4] ss:$16 sps:$4 sm:$0xff]  }
 0x3ee   : > { %7156 = vmatprep.subr.bf16.mxu0 %v10715_v8  ;;  %7812 = vmatprep.subr.bf16.mxu1 %v10718_v9  ;;  %v10810_v8 = vld [vmem:[%s11143_s18 + $0x1ecc] ss:$16 sps:$4 sm:$0xff]   ;;  %v10805_v9 = vld [vmem:[%s11143_s18 + $0x1ec0] ss:$16 sps:$4 sm:$0xff]  }
 0x3f1   : > { %7157 = vmatpush1.bf16.msra.mxu0 %v10713_v10  ;;  %7813 = vmatpush1.bf16.msra.mxu1 %v10716_v12  ;;  %v10808_v10 = vld [vmem:[%s11143_s18 + $0x1ec8] ss:$16 sps:$4 sm:$0xff]   ;;  %v10813_v12 = vld [vmem:[%s11143_s18 + $0x1ee4] ss:$16 sps:$4 sm:$0xff]  }
 0x3f2   : > { %7158 = vmatprep.subr.bf16.mxu0 %v10721_v13  ;;  %7814 = vmatprep.subr.bf16.mxu1 %v10724_v15  ;;  %v10816_v13 = vld [vmem:[%s11143_s18 + $0x1eec] ss:$16 sps:$4 sm:$0xff]   ;;  %v10811_v15 = vld [vmem:[%s11143_s18 + $0x1ee0] ss:$16 sps:$4 sm:$0xff]  }
 0x3f5   : > { %7159 = vmatpush1.bf16.msra.mxu0 %v10719_v16  ;;  %7815 = vmatpush1.bf16.msra.mxu1 %v10722_v11  ;;  %v10814_v16 = vld [vmem:[%s11143_s18 + $0x1ee8] ss:$16 sps:$4 sm:$0xff]   ;;  %v10819_v11 = vld [vmem:[%s11143_s18 + $0x1f04] ss:$16 sps:$4 sm:$0xff]  }
 0x3f6   : > { %7160 = vmatprep.subr.bf16.mxu0 %v10727_v19  ;;  %7816 = vmatprep.subr.bf16.mxu1 %v10730_v20  ;;  %v10822_v19 = vld [vmem:[%s11143_s18 + $0x1f0c] ss:$16 sps:$4 sm:$0xff]   ;;  %v10817_v20 = vld [vmem:[%s11143_s18 + $0x1f00] ss:$16 sps:$4 sm:$0xff]  }
 0x3f9   : > { %7161 = vmatpush1.bf16.msra.mxu0 %v10725_v14  ;;  %7817 = vmatpush1.bf16.msra.mxu1 %v10728_v22  ;;  %v10820_v14 = vld [vmem:[%s11143_s18 + $0x1f08] ss:$16 sps:$4 sm:$0xff]   ;;  %v10825_v22 = vld [vmem:[%s11143_s18 + $0x1f24] ss:$16 sps:$4 sm:$0xff]  }
 0x3fa   : > { %7162 = vmatprep.subr.bf16.mxu0 %v10733_v23  ;;  %7818 = vmatprep.subr.bf16.mxu1 %v10736_v17  ;;  %v10828_v23 = vld [vmem:[%s11143_s18 + $0x1f2c] ss:$16 sps:$4 sm:$0xff]   ;;  %v10823_v17 = vld [vmem:[%s11143_s18 + $0x1f20] ss:$16 sps:$4 sm:$0xff]  }
 0x3fd   : > { %7163 = vmatpush1.bf16.msra.mxu0 %v10731_v25  ;;  %7819 = vmatpush1.bf16.msra.mxu1 %v10734_v26  ;;  %v10826_v25 = vld [vmem:[%s11143_s18 + $0x1f28] ss:$16 sps:$4 sm:$0xff]   ;;  %v10831_v26 = vld [vmem:[%s11143_s18 + $0x1f44] ss:$16 sps:$4 sm:$0xff]  }
 0x3fe   : > { %7164 = vmatprep.subr.bf16.mxu0 %v10739_v18  ;;  %7820 = vmatprep.subr.bf16.mxu1 %v10742_v28  ;;  %v10834_v18 = vld [vmem:[%s11143_s18 + $0x1f4c] ss:$16 sps:$4 sm:$0xff]   ;;  %v10829_v28 = vld [vmem:[%s11143_s18 + $0x1f40] ss:$16 sps:$4 sm:$0xff]  }
 0x401   : > { %7165 = vmatpush1.bf16.msra.mxu0 %v10737_v29  ;;  %7821 = vmatpush1.bf16.msra.mxu1 %v10740_v21  ;;  %v10832_v29 = vld [vmem:[%s11143_s18 + $0x1f48] ss:$16 sps:$4 sm:$0xff]   ;;  %v10837_v21 = vld [vmem:[%s11143_s18 + $0x1f64] ss:$16 sps:$4 sm:$0xff]  }
 0x402   : > { %7166 = vmatprep.subr.bf16.mxu0 %v10745_v31  ;;  %7822 = vmatprep.subr.bf16.mxu1 %v10748_v32  ;;  %v10840_v31 = vld [vmem:[%s11143_s18 + $0x1f6c] ss:$16 sps:$4 sm:$0xff]   ;;  %v10835_v32 = vld [vmem:[%s11143_s18 + $0x1f60] ss:$16 sps:$4 sm:$0xff]  }
 0x405   : > { %7167 = vmatpush1.bf16.msra.mxu0 %v10743_v24  ;;  %7823 = vmatpush1.bf16.msra.mxu1 %v10746_v33  ;;  %v10838_v24 = vld [vmem:[%s11143_s18 + $0x1f68] ss:$16 sps:$4 sm:$0xff]   ;;  %v10843_v33 = vld [vmem:[%s11143_s18 + $0x1f84] ss:$16 sps:$4 sm:$0xff]  }
 0x406   : > { %7168 = vmatprep.subr.bf16.mxu0 %v10751_v35  ;;  %7824 = vmatprep.subr.bf16.mxu1 %v10754_v27  ;;  %v10846_v35 = vld [vmem:[%s11143_s18 + $0x1f8c] ss:$16 sps:$4 sm:$0xff]   ;;  %v10841_v27 = vld [vmem:[%s11143_s18 + $0x1f80] ss:$16 sps:$4 sm:$0xff]  }
 0x409   : > { %7169 = vmatpush1.bf16.msra.mxu0 %v10749_v36  ;;  %7825 = vmatpush1.bf16.msra.mxu1 %v10752_v30  ;;  %v10844_v36 = vld [vmem:[%s11143_s18 + $0x1f88] ss:$16 sps:$4 sm:$0xff]   ;;  %v10849_v30 = vld [vmem:[%s11143_s18 + $0x1fa4] ss:$16 sps:$4 sm:$0xff]  }
 0x40a   : > { %7170 = vmatprep.subr.bf16.mxu0 %v10757_v38  ;;  %7826 = vmatprep.subr.bf16.mxu1 %v10760_v39  ;;  %v10852_v38 = vld [vmem:[%s11143_s18 + $0x1fac] ss:$16 sps:$4 sm:$0xff]   ;;  %v10847_v39 = vld [vmem:[%s11143_s18 + $0x1fa0] ss:$16 sps:$4 sm:$0xff]  }
 0x40d   : > { %7171 = vmatpush1.bf16.msra.mxu0 %v10755_v34  ;;  %7827 = vmatpush1.bf16.msra.mxu1 %v10758_v41  ;;  %v10850_v34 = vld [vmem:[%s11143_s18 + $0x1fa8] ss:$16 sps:$4 sm:$0xff]   ;;  %v10855_v41 = vld [vmem:[%s11143_s18 + $0x1fc4] ss:$16 sps:$4 sm:$0xff]  }
 0x40e   : > { %7172 = vmatprep.subr.bf16.mxu0 %v10763_v42  ;;  %7828 = vmatprep.subr.bf16.mxu1 %v10766_v37  ;;  %v10858_v42 = vld [vmem:[%s11143_s18 + $0x1fcc] ss:$16 sps:$4 sm:$0xff]   ;;  %v10853_v37 = vld [vmem:[%s11143_s18 + $0x1fc0] ss:$16 sps:$4 sm:$0xff]  }
 0x411   : > { %7173 = vmatpush1.bf16.msra.mxu0 %v10761_v44  ;;  %7829 = vmatpush1.bf16.msra.mxu1 %v10764_v45  ;;  %v10856_v44 = vld [vmem:[%s11143_s18 + $0x1fc8] ss:$16 sps:$4 sm:$0xff]   ;;  %v10861_v45 = vld [vmem:[%s11143_s18 + $0x1fe4] ss:$16 sps:$4 sm:$0xff]  }
 0x412   : > { %7183 = vmatprep.subr.bf16.mxu0 %v10771_v40  ;;  %7839 = vmatprep.subr.bf16.mxu1 %v10774_v47  ;;  %v10864_v40 = vld [vmem:[%s11143_s18 + $0x1fec] ss:$16 sps:$4 sm:$0xff]   ;;  %v10859_v47 = vld [vmem:[%s11143_s18 + $0x1fe0] ss:$16 sps:$4 sm:$0xff]  }
 0x414   : > { %7175 = vmatmul.mubr.bf16.vlgmr.msra.gmra.mrb[0].mxu0 %v8076_v48  ;;  %7831 = vmatmul.mubr.bf16.vlgmr.msra.gmra.mrb[0].mxu1 %v8076_v48  ;;  %v10862_v48 = vld [vmem:[%s11143_s18 + $0x1fe8] ss:$16 sps:$4 sm:$0xff]   ;;  %s8047_s18 = sshll.u32 %s12360_s10, 2 }
 0x415   : > { %7184 = vmatpush1.bf16.msra.mxu0 %v10769_v43  ;;  %7840 = vmatpush1.bf16.msra.mxu1 %v10772_v50  ;;  %v8078_v43 = vcombine.low %v12249_v49, %v12249_v49  ;;  %v1316_v50 = vlaneseq  ;;  %s272_s11 = scalar_lea.vmem %s12343_s3, %s8047_s18 }
 0x416   : > { %7185 = vmatprep.subr.bf16.mxu0 %v10777_v51  ;;  %7841 = vmatprep.subr.bf16.mxu1 %v10780_v52 }
 0x417   : > { %7215 = vmatprep.mubr.bf16.mxu0 %v8079_v46  ;;  %7871 = vmatprep.mubr.bf16.mxu1 %v8079_v46  ;;  %v1317_v51 = vshrl.u32 %v1316_v50, 7 }
 0x419   : > { %7186 = vmatpush1.bf16.msra.mxu0 %v10775_v53  ;;  %7842 = vmatpush1.bf16.msra.mxu1 %v10778_v54  ;;  %v1318_v52 = vsub.s32 0, %v1317_v51  ;;  %v1326_v46 = vsub.s32 2, %v1317_v51  ;;  %v1314_v53 = vld [vmem:[%s11149_s7] sm:$0xf]  ;;  %v1322_v54 = vsub.s32 1, %v1317_v51 }
 0x41a   : > { %7187 = vmatprep.subr.bf16.mxu0 %v10783_v55  ;;  %7843 = vmatprep.subr.bf16.mxu1 %v10786_v56  ;;  %v1330_v55 = vsub.s32 3, %v1317_v51 }
 0x41b   : > { %v1319_v56 = vrot.slane %v1314_v53, %v1318_v52 }
 0x41d   : > { %7188 = vmatpush1.bf16.msra.mxu0 %v10781_v57  ;;  %7844 = vmatpush1.bf16.msra.mxu1 %v10784_v58  ;;  %v1327_v57 = vrot.slane %v1314_v53, %v1326_v46  ;;  %v1323_v58 = vrot.slane %v1314_v53, %v1322_v54 }
 0x41e   : > { %7189 = vmatprep.subr.bf16.mxu0 %v10789_v59  ;;  %7845 = vmatprep.subr.bf16.mxu1 %v10792_v60  ;;  %v1331_v59 = vrot.slane %v1314_v53, %v1330_v55 }
 0x421   : > { %7190 = vmatpush1.bf16.msra.mxu0 %v10787_v61  ;;  %7846 = vmatpush1.bf16.msra.mxu1 %v10790_v62 }
 0x422   : > { %7191 = vmatprep.subr.bf16.mxu0 %v10795_v63  ;;  %7847 = vmatprep.subr.bf16.mxu1 %v10798_v0 }
 0x425   : > { %7192 = vmatpush1.bf16.msra.mxu0 %v10793_v1  ;;  %7848 = vmatpush1.bf16.msra.mxu1 %v10796_v2 }
 0x426   : > { %7193 = vmatprep.subr.bf16.mxu0 %v10801_v3  ;;  %7849 = vmatprep.subr.bf16.mxu1 %v10804_v4 }
 0x429   : > { %7194 = vmatpush1.bf16.msra.mxu0 %v10799_v5  ;;  %7850 = vmatpush1.bf16.msra.mxu1 %v10802_v6 }
 0x42a   : > { %7195 = vmatprep.subr.bf16.mxu0 %v10807_v7  ;;  %7851 = vmatprep.subr.bf16.mxu1 %v10810_v8 }
 0x42d   : > { %7196 = vmatpush1.bf16.msra.mxu0 %v10805_v9  ;;  %7852 = vmatpush1.bf16.msra.mxu1 %v10808_v10 }
 0x42e   : > { %7197 = vmatprep.subr.bf16.mxu0 %v10813_v12  ;;  %7853 = vmatprep.subr.bf16.mxu1 %v10816_v13 }
 0x431   : > { %7198 = vmatpush1.bf16.msra.mxu0 %v10811_v15  ;;  %7854 = vmatpush1.bf16.msra.mxu1 %v10814_v16 }
 0x432   : > { %7199 = vmatprep.subr.bf16.mxu0 %v10819_v11  ;;  %7855 = vmatprep.subr.bf16.mxu1 %v10822_v19 }
 0x435   : > { %7200 = vmatpush1.bf16.msra.mxu0 %v10817_v20  ;;  %7856 = vmatpush1.bf16.msra.mxu1 %v10820_v14 }
 0x436   : > { %7201 = vmatprep.subr.bf16.mxu0 %v10825_v22  ;;  %7857 = vmatprep.subr.bf16.mxu1 %v10828_v23 }
 0x439   : > { %7202 = vmatpush1.bf16.msra.mxu0 %v10823_v17  ;;  %7858 = vmatpush1.bf16.msra.mxu1 %v10826_v25 }
 0x43a   : > { %7203 = vmatprep.subr.bf16.mxu0 %v10831_v26  ;;  %7859 = vmatprep.subr.bf16.mxu1 %v10834_v18 }
 0x43d   : > { %7204 = vmatpush1.bf16.msra.mxu0 %v10829_v28  ;;  %7860 = vmatpush1.bf16.msra.mxu1 %v10832_v29 }
 0x43e   : > { %7205 = vmatprep.subr.bf16.mxu0 %v10837_v21  ;;  %7861 = vmatprep.subr.bf16.mxu1 %v10840_v31 }
 0x441   : > { %7206 = vmatpush1.bf16.msra.mxu0 %v10835_v32  ;;  %7862 = vmatpush1.bf16.msra.mxu1 %v10838_v24 }
 0x442   : > { %7207 = vmatprep.subr.bf16.mxu0 %v10843_v33  ;;  %7863 = vmatprep.subr.bf16.mxu1 %v10846_v35 }
 0x445   : > { %7208 = vmatpush1.bf16.msra.mxu0 %v10841_v27  ;;  %7864 = vmatpush1.bf16.msra.mxu1 %v10844_v36 }
 0x446   : > { %7209 = vmatprep.subr.bf16.mxu0 %v10849_v30  ;;  %7865 = vmatprep.subr.bf16.mxu1 %v10852_v38 }
 0x449   : > { %7210 = vmatpush1.bf16.msra.mxu0 %v10847_v39  ;;  %7866 = vmatpush1.bf16.msra.mxu1 %v10850_v34 }
 0x44a   : > { %7211 = vmatprep.subr.bf16.mxu0 %v10855_v41  ;;  %7867 = vmatprep.subr.bf16.mxu1 %v10858_v42 }
 0x44d   : > { %7212 = vmatpush1.bf16.msra.mxu0 %v10853_v37  ;;  %7868 = vmatpush1.bf16.msra.mxu1 %v10856_v44 }
 0x44e   : > { %7213 = vmatprep.subr.bf16.mxu0 %v10861_v45  ;;  %7869 = vmatprep.subr.bf16.mxu1 %v10864_v40 }
 0x451   : > { %7214 = vmatpush1.bf16.msra.mxu0 %v10859_v47  ;;  %7870 = vmatpush1.bf16.msra.mxu1 %v10862_v48 }
 0x454   : > { %7216 = vmatmul.mubr.bf16.vlgmr.msra.gmra.mrb[0].mxu0 %v8078_v43  ;;  %7872 = vmatmul.mubr.bf16.vlgmr.msra.gmra.mrb[0].mxu1 %v8078_v43 }
 0x527   : > { %v7217_v60 = vpop.f32.mrb[0].mxu0  ;;  %v7873_v49 = vpop.f32.mrb[0].mxu1 }
 0x528   : > { %v9112_v61 = vadd.f32 %v7217_v60, %v1319_v56  ;;  %v9114_v62 = vadd.f32 %v7873_v49, %v1327_v57  ;;  %v7219_v63 = vpop.f32.mrb[1].mxu0  ;;  %v7875_v0 = vpop.f32.mrb[1].mxu1 }
 0x529   : > { %v9113_v1 = vadd.f32 %v7219_v63, %v1323_v58  ;;  %v9115_v2 = vadd.f32 %v7875_v0, %v1331_v59  ;;  %v7221_v3 = vpop.f32.mrb[2].mxu0  ;;  %v7877_v4 = vpop.f32.mrb[2].mxu1 }
 0x52a   : > { %v7880_v5 = vmax.f32 %v9112_v61, 0.0  ;;  %v7882_v6 = vmax.f32 %v9114_v62, 0.0  ;;  %v7222_v7 = vpop.f32.mrb[3].mxu0  ;;  %v7878_v8 = vpop.f32.mrb[3].mxu1 }
 0x52b   : > { %v7881_v9 = vmax.f32 %v9113_v1, 0.0  ;;  %v7883_v10 = vmax.f32 %v9115_v2, 0.0 }
 0x52d   : > { %v9110_v12 = vpack.c.bf16 %v7881_v9, %v7880_v5  ;;  %v9111_v13 = vpack.c.bf16 %v7883_v10, %v7882_v6 }
 0x52f   : > { %7900 = vst [vmem:[%s272_s11] sm:$0xff] %v9110_v12  ;;  %7901 = vst [vmem:[%s272_s11 + $0x8] sm:$0xff] %v9111_v13 }
 0x530 PF: > { %s19_s17 = sadd.s32 1, %s10981_s17   ;;  %s12352_s12 = smov %s10965_s13 }
 0x531   : > { %p16_p9 = scmp.ge.s32.totalorder %s19_s17, 6   ;;  %s12353_s13 = smov %s10969_s14 }
 0x532   : > { %s12354_s14 = smov %s11057_s24  ;;  %s12355_s15 = smov %s10977_s16 }
 0x533   : > { %s12356_s16 = smov %s12358_s19  ;;  %18 = sbr.rel (!%p16_p9) target bundleno = 6 (0x6), region = 88 }
 0x53a   :  { %7932 = vsyncpa [#allocation3], 1 }
 0x53b   :  { %7934 = vsyncpa [#allocation3 + $0x1], 1 }
 0x53c   :  { %7935 = vsyncpa [#allocation5], 1 }
 0x53d   :  { %7937 = vsyncpa [#allocation5 + $0x1], 1 }

</bundles_post_ra>
